<compile_context>
chip_gen: v7x
topology: tpu7x:2x2x1
jax: 0.10.0
libtpu: 0.0.40
codegen_flags: <defaults>
</compile_context>

<pallas_src>
import functools

import jax
import jax.numpy as jnp
import numpy as np
from jax import lax
from jax.experimental import pallas as pl
from jax.experimental.pallas import tpu as pltpu


# ---------------------------------------------------------------------------
# Kernel: bidirectional GRU with packed-sequence (length-mask) semantics.
# ---------------------------------------------------------------------------
def bigru_kernel(emb_ref, len_ref,
                 wih_f_ref, wih_b_ref, whh_f_ref, whh_b_ref,
                 gb_f_ref, gb_b_ref, bhn_f_ref, bhn_b_ref,
                 out_ref, hid_ref,
                 xg_f_ref, xg_b_ref, bwd_ref):
    seq_len, tb, h = out_ref.shape              # h is the lane-padded hidden size
    lengths = len_ref[...]                      # (tb, 1) int32

    # ---- hoisted input projections: one big lane-aligned MXU GEMM per direction.
    #      b_ih and the r/z parts of b_hh are already folded into gb_*.
    x_flat = emb_ref[...].reshape(seq_len * tb, h).astype(wih_f_ref.dtype)
    xg_f_ref[...] = (jnp.dot(x_flat, wih_f_ref[...],
                             preferred_element_type=jnp.float32)
                     + gb_f_ref[...]).reshape(seq_len, tb, 3 * h)
    xg_b_ref[...] = (jnp.dot(x_flat, wih_b_ref[...],
                             preferred_element_type=jnp.float32)
                     + gb_b_ref[...]).reshape(seq_len, tb, 3 * h)

    bhn_f = bhn_f_ref[...]                      # (1, h): n-gate part of b_hh (fwd)
    bhn_b = bhn_b_ref[...]                      # (1, h): n-gate part of b_hh (bwd)

    def sigmoid(x):                             # EUP tanh; no VALU divide
        return 0.5 * (jnp.tanh(0.5 * x) + 1.0)

    def cell(xg, hg, h_prev, bhn):
        xr, xz, xn = xg[:, :h], xg[:, h:2 * h], xg[:, 2 * h:]
        hr, hz, hn = hg[:, :h], hg[:, h:2 * h], hg[:, 2 * h:]
        r = sigmoid(xr + hr)
        z = sigmoid(xz + hz)
        n = jnp.tanh(xn + r * (hn + bhn))       # PyTorch GRU: b_hn inside r * (.)
        return (1.0 - z) * n + z * h_prev

    h0 = jnp.zeros((tb, h), jnp.float32)

    # ---- forward + backward recurrences interleaved in one unrolled loop ----
    def body(i, carry):
        h_f, h_b = carry
        t_fwd = i
        t_bwd = seq_len - 1 - i

        # forward direction
        hg_f = jnp.dot(h_f, whh_f_ref[...], preferred_element_type=jnp.float32)
        hf_new = cell(xg_f_ref[t_fwd], hg_f, h_f, bhn_f)
        valid_f = lengths > t_fwd
        out_ref[t_fwd] = jnp.where(valid_f, hf_new, 0.0)   # padded steps -> 0
        h_f = jnp.where(valid_f, hf_new, h_f)              # freeze state past len

        # backward direction (packed semantics: state stays 0 until first valid t)
        hg_b = jnp.dot(h_b, whh_b_ref[...], preferred_element_type=jnp.float32)
        hb_new = cell(xg_b_ref[t_bwd], hg_b, h_b, bhn_b)
        valid_b = lengths > t_bwd
        bwd_ref[t_bwd] = jnp.where(valid_b, hb_new, 0.0)
        h_b = jnp.where(valid_b, hb_new, h_b)
        return h_f, h_b

    h_f, h_b = lax.fori_loop(0, seq_len, body, (h0, h0), unroll=True)

    hid_ref[0] = h_f
    hid_ref[1] = h_b
    out_ref[...] = out_ref[...] + bwd_ref[...]   # sum of the two directions


# ---------------------------------------------------------------------------
# Weight / bias layout prep (transpose + per-gate zero padding to lane width)
# ---------------------------------------------------------------------------
def _pad_gate_weight(w, h, hp):
    """PyTorch GRU weight (3h, h) -> (hp, 3hp): transposed, zero-padded per gate."""
    parts = []
    for g in range(3):
        wg = w[g * h:(g + 1) * h, :].astype(jnp.float32).T       # (h_in, h_out)
        parts.append(jnp.pad(wg, ((0, hp - h), (0, hp - h))))
    return jnp.concatenate(parts, axis=1)                        # (hp, 3*hp)


def _pad_gate_bias(b, h, hp):
    parts = [jnp.pad(b[g * h:(g + 1) * h].astype(jnp.float32), (0, hp - h))
             for g in range(3)]
    return jnp.concatenate(parts).reshape(1, 3 * hp)


# ---------------------------------------------------------------------------
# Wrapper: embedding gather, tiling, VMEM budget, pallas_call
# ---------------------------------------------------------------------------
def encoder_rnn_forward(input_seq, input_lengths, emb_table, params,
                        *, proj_dtype=jnp.float32, single_buffer_weights=True):
    """EncoderRNN.forward with hidden=None.
    input_seq: (L, B) int32, input_lengths: (B,) int32, emb_table: (V, H).
    Returns (outputs (L, B, H), hidden (2, B, H))."""
    seq_len, batch = input_seq.shape
    vocab, h = emb_table.shape
    f32 = jnp.float32
    hp = 128 * pl.cdiv(h, 128)                  # lane-aligned hidden size

    # --- embedding: single fused XLA gather (per-token Pallas grid removed) ---
    ids = jnp.clip(input_seq.astype(jnp.int32), 0, vocab - 1)   # validated ids
    embedded = jnp.take(emb_table.astype(f32), ids, axis=0)     # (L, B, h)
    embedded = jnp.pad(embedded, ((0, 0), (0, 0), (0, hp - h)))

    # --- batch tiling: feed the MXU up to 128 rows per recurrence step --------
    if batch <= 128:
        bp = 8 * pl.cdiv(batch, 8)
        tb = bp
    else:
        tb = 128
        bp = 128 * pl.cdiv(batch, 128)
    # On multi-TensorCore chips (v7x / v4 megacore) a one-step parallel grid
    # leaves a core idle: split the batch tile in half when possible.
    kind = jax.devices()[0].device_kind.lower()
    if any(tag in kind for tag in ("v7", "tpu7", "v4")) and bp // tb < 2 and tb % 16 == 0:
        tb //= 2
    nb = bp // tb

    if bp != batch:
        embedded = jnp.pad(embedded, ((0, 0), (0, bp - batch), (0, 0)))
        lengths_p = jnp.pad(input_lengths.astype(jnp.int32), (0, bp - batch))
    else:
        lengths_p = input_lengths.astype(jnp.int32)
    lengths_p = lengths_p.reshape(bp, 1)

    # --- weights: transpose + per-gate pad once in XLA; fold biases -----------
    wih_f = _pad_gate_weight(params["w_ih_f"], h, hp).astype(proj_dtype)
    wih_b = _pad_gate_weight(params["w_ih_b"], h, hp).astype(proj_dtype)
    whh_f = _pad_gate_weight(params["w_hh_f"], h, hp)            # recurrent: f32
    whh_b = _pad_gate_weight(params["w_hh_b"], h, hp)

    bih_f = _pad_gate_bias(params["b_ih_f"], h, hp)
    bhh_f = _pad_gate_bias(params["b_hh_f"], h, hp)
    bih_b = _pad_gate_bias(params["b_ih_b"], h, hp)
    bhh_b = _pad_gate_bias(params["b_hh_b"], h, hp)
    zero_n = jnp.zeros((1, hp), f32)
    gb_f = bih_f + jnp.concatenate([bhh_f[:, :2 * hp], zero_n], axis=1)
    gb_b = bih_b + jnp.concatenate([bhh_b[:, :2 * hp], zero_n], axis=1)
    bhn_f = bhh_f[:, 2 * hp:]                                    # (1, hp)
    bhn_b = bhh_b[:, 2 * hp:]

    # --- specs: grid-invariant weights single-buffered when supported ---------
    wkw = dict(pipeline_mode=pl.Buffered(1)) if single_buffer_weights else {}
    batch_block = lambda i: (0, i, 0)
    w_spec = pl.BlockSpec((hp, 3 * hp), lambda i: (0, 0), **wkw)
    gb_spec = pl.BlockSpec((1, 3 * hp), lambda i: (0, 0), **wkw)
    bhn_spec = pl.BlockSpec((1, hp), lambda i: (0, 0), **wkw)

    # --- explicit VMEM budget (v5e 16 MiB default scoped; v7x 64 MiB physical) -
    pbytes = jnp.dtype(proj_dtype).itemsize
    wbuf = 1 if single_buffer_weights else 2
    need = (2 * seq_len * tb * hp * 4            # embedded block (double-buffered)
            + 2 * seq_len * tb * hp * 4          # output block
            + 2 * 2 * tb * hp * 4                # hidden block
            + wbuf * 2 * hp * 3 * hp * pbytes    # W_ih fwd/bwd
            + wbuf * 2 * hp * 3 * hp * 4         # W_hh fwd/bwd
            + wbuf * (2 * 3 * hp + 2 * hp) * 4   # biases
            + 2 * seq_len * tb * 3 * hp * 4      # precomputed-gate scratch
            + seq_len * tb * hp * 4)             # backward-output scratch
    vmem_limit = int(min(max(need * 1.4, 32 * 1024 * 1024), 60 * 1024 * 1024))

    outputs, hidden = pl.pallas_call(
        bigru_kernel,
        out_shape=(jax.ShapeDtypeStruct((seq_len, bp, hp), f32),
                   jax.ShapeDtypeStruct((2, bp, hp), f32)),
        grid=(nb,),
        in_specs=[
            pl.BlockSpec((seq_len, tb, hp), batch_block),        # embedded
            pl.BlockSpec((tb, 1), lambda i: (i, 0)),             # lengths
            w_spec, w_spec, w_spec, w_spec,                      # W_ih f/b, W_hh f/b
            gb_spec, gb_spec, bhn_spec, bhn_spec,                # folded biases
        ],
        out_specs=(pl.BlockSpec((seq_len, tb, hp), batch_block),
                   pl.BlockSpec((2, tb, hp), batch_block)),
        scratch_shapes=[
            pltpu.VMEM((seq_len, tb, 3 * hp), f32),              # fwd gates
            pltpu.VMEM((seq_len, tb, 3 * hp), f32),              # bwd gates
            pltpu.VMEM((seq_len, tb, hp), f32),                  # bwd outputs
        ],
        compiler_params=pltpu.CompilerParams(
            dimension_semantics=("parallel",),
            vmem_limit_bytes=vmem_limit),
    )(embedded, lengths_p,
      wih_f, wih_b, whh_f, whh_b,
      gb_f, gb_b, bhn_f, bhn_b)

    return outputs[:, :batch, :h], hidden[:, :batch, :h]


# ---------------------------------------------------------------------------
# Pure-JAX reference (direct transcription of the PyTorch module semantics)
# ---------------------------------------------------------------------------
def ref_encoder_rnn(input_seq, input_lengths, emb_table, params):
    seq_len, batch = input_seq.shape
    h = emb_table.shape[1]
    embedded = jnp.take(emb_table, input_seq, axis=0)            # (L, B, H)
    lengths = input_lengths.astype(jnp.int32)

    def run_direction(w_ih, w_hh, b_ih, b_hh, reverse):
        def cell(h_prev, x_t):
            gi = x_t @ w_ih.T + b_ih
            gh = h_prev @ w_hh.T + b_hh
            xr, xz, xn = jnp.split(gi, 3, axis=-1)
            hr, hz, hn = jnp.split(gh, 3, axis=-1)
            r = 1.0 / (1.0 + jnp.exp(-(xr + hr)))
            z = 1.0 / (1.0 + jnp.exp(-(xz + hz)))
            n = jnp.tanh(xn + r * hn)
            return (1.0 - z) * n + z * h_prev

        h_state = jnp.zeros((batch, h), jnp.float32)
        out = jnp.zeros((seq_len, batch, h), jnp.float32)
        steps = range(seq_len - 1, -1, -1) if reverse else range(seq_len)
        for t in steps:
            valid = (lengths > t)[:, None]
            h_new = cell(h_state, embedded[t])
            out = out.at[t].set(jnp.where(valid, h_new, 0.0))
            h_state = jnp.where(valid, h_new, h_state)
        return out, h_state

    out_f, h_f = run_direction(params["w_ih_f"], params["w_hh_f"],
                               params["b_ih_f"], params["b_hh_f"], reverse=False)
    out_b, h_b = run_direction(params["w_ih_b"], params["w_hh_b"],
                               params["b_ih_b"], params["b_hh_b"], reverse=True)
    return out_f + out_b, jnp.stack([h_f, h_b], axis=0)


# ---------------------------------------------------------------------------
if __name__ == "__main__":
    seq_len, batch, hidden_size, vocab = 8, 2, 32, 50   # tutorial uses hidden_size=500
    key = jax.random.PRNGKey(0)
    ks = jax.random.split(key, 10)

    input_seq = jax.random.randint(ks[0], (seq_len, batch), 0, vocab, dtype=jnp.int32)
    input_lengths = jnp.array([8, 5], dtype=jnp.int32)  # descending (pack_padded convention)
    emb_table = jax.random.normal(ks[1], (vocab, hidden_size), jnp.float32)

    def w(k, shape):
        return 0.1 * jax.random.normal(k, shape, jnp.float32)

    params = {
        "w_ih_f": w(ks[2], (3 * hidden_size, hidden_size)),
        "w_hh_f": w(ks[3], (3 * hidden_size, hidden_size)),
        "b_ih_f": w(ks[4], (3 * hidden_size,)),
        "b_hh_f": w(ks[5], (3 * hidden_size,)),
        "w_ih_b": w(ks[6], (3 * hidden_size, hidden_size)),
        "w_hh_b": w(ks[7], (3 * hidden_size, hidden_size)),
        "b_ih_b": w(ks[8], (3 * hidden_size,)),
        "b_hh_b": w(ks[9], (3 * hidden_size,)),
    }

    def run_forward(proj_dtype):
        # Prefer single-buffered (Buffered(1)) grid-invariant weights; fall back to
        # default double-buffering if this Pallas build rejects pipeline_mode.
        for single_buf in (True, False):
            try:
                fn = jax.jit(functools.partial(encoder_rnn_forward,
                                               proj_dtype=proj_dtype,
                                               single_buffer_weights=single_buf))
                res = fn(input_seq, input_lengths, emb_table, params)
                return jax.block_until_ready(res)
            except Exception:
                if not single_buf:
                    raise
        raise RuntimeError("unreachable")

    # f32 path (exact check against the PyTorch-faithful reference)
    outputs, hidden = run_forward(jnp.float32)
    ref_out, ref_hid = ref_encoder_rnn(input_seq, input_lengths, emb_table, params)

    ok = (outputs.shape == (seq_len, batch, hidden_size)
          and hidden.shape == (2, batch, hidden_size)
          and np.allclose(np.asarray(outputs), np.asarray(ref_out), atol=1e-4, rtol=1e-4)
          and np.allclose(np.asarray(hidden), np.asarray(ref_hid), atol=1e-4, rtol=1e-4))

    # bf16 input-projection path (v6e/v7x recommendation); recurrent path stays f32.
    out_bf, hid_bf = run_forward(jnp.bfloat16)
    ok = (ok
          and np.allclose(np.asarray(out_bf), np.asarray(ref_out), atol=5e-2, rtol=5e-2)
          and np.allclose(np.asarray(hid_bf), np.asarray(ref_hid), atol=5e-2, rtol=5e-2))

    if ok:
        print("KERNEL_OK")
    else:
        print("mismatch: max |out diff| =",
              float(np.max(np.abs(np.asarray(outputs) - np.asarray(ref_out)))),
              " max |hid diff| =",
              float(np.max(np.abs(np.asarray(hidden) - np.asarray(ref_hid)))))
</pallas_src>

<mosaic_0001>
module attributes {stable_mosaic.version = 11 : i64} {
  func.func @bigru_kernel(%arg0: i32, %arg1: memref<8x8x128xf32, #tpu.memory_space<vmem>>, %arg2: memref<8x1xi32, #tpu.memory_space<vmem>>, %arg3: memref<128x384xf32, #tpu.memory_space<vmem>>, %arg4: memref<128x384xf32, #tpu.memory_space<vmem>>, %arg5: memref<128x384xf32, #tpu.memory_space<vmem>>, %arg6: memref<128x384xf32, #tpu.memory_space<vmem>>, %arg7: memref<1x384xf32, #tpu.memory_space<vmem>>, %arg8: memref<1x384xf32, #tpu.memory_space<vmem>>, %arg9: memref<1x128xf32, #tpu.memory_space<vmem>>, %arg10: memref<1x128xf32, #tpu.memory_space<vmem>>, %arg11: memref<8x8x128xf32, #tpu.memory_space<vmem>>, %arg12: memref<2x8x128xf32, #tpu.memory_space<vmem>>, %arg13: memref<8x8x384xf32, #tpu.memory_space<vmem>>, %arg14: memref<8x8x384xf32, #tpu.memory_space<vmem>>, %arg15: memref<8x8x128xf32, #tpu.memory_space<vmem>>) attributes {dimension_semantics = [#tpu.dimension_semantics<parallel>], iteration_bounds = array<i64: 1>, scalar_prefetch = 0 : i64, scratch_operands = 3 : i64, tpu.core_type = #tpu.core_type<tc>, window_params = [{transform_indices = @transform_0, window_bounds = array<i64: 8, 8, 128>}, {transform_indices = @transform_1, window_bounds = array<i64: 8, 1>}, {pipeline_mode = #tpu.pipeline_mode<synchronous>, transform_indices = @transform_2, window_bounds = array<i64: 128, 384>}, {pipeline_mode = #tpu.pipeline_mode<synchronous>, transform_indices = @transform_3, window_bounds = array<i64: 128, 384>}, {pipeline_mode = #tpu.pipeline_mode<synchronous>, transform_indices = @transform_4, window_bounds = array<i64: 128, 384>}, {pipeline_mode = #tpu.pipeline_mode<synchronous>, transform_indices = @transform_5, window_bounds = array<i64: 128, 384>}, {pipeline_mode = #tpu.pipeline_mode<synchronous>, transform_indices = @transform_6, window_bounds = array<i64: 1, 384>}, {pipeline_mode = #tpu.pipeline_mode<synchronous>, transform_indices = @transform_7, window_bounds = array<i64: 1, 384>}, {pipeline_mode = #tpu.pipeline_mode<synchronous>, transform_indices = @transform_8, window_bounds = array<i64: 1, 128>}, {pipeline_mode = #tpu.pipeline_mode<synchronous>, transform_indices = @transform_9, window_bounds = array<i64: 1, 128>}, {transform_indices = @transform_10, window_bounds = array<i64: 8, 8, 128>}, {transform_indices = @transform_11, window_bounds = array<i64: 2, 8, 128>}]} {
    %c0 = arith.constant 0 : index
    %c0_0 = arith.constant 0 : index
    %0 = vector.load %arg2[%c0, %c0_0] : memref<8x1xi32, #tpu.memory_space<vmem>>, vector<8x1xi32>
    %c0_1 = arith.constant 0 : index
    %c0_2 = arith.constant 0 : index
    %c0_3 = arith.constant 0 : index
    %1 = vector.load %arg1[%c0_1, %c0_2, %c0_3] : memref<8x8x128xf32, #tpu.memory_space<vmem>>, vector<8x8x128xf32>
    %2 = vector.shape_cast %1 : vector<8x8x128xf32> to vector<64x128xf32>
    %c0_4 = arith.constant 0 : index
    %c0_5 = arith.constant 0 : index
    %3 = vector.load %arg3[%c0_4, %c0_5] : memref<128x384xf32, #tpu.memory_space<vmem>>, vector<128x384xf32>
    %cst = arith.constant dense<0.000000e+00> : vector<64x384xf32>
    %4 = tpu.matmul %2, %3, %cst {dimension_numbers = #tpu.dot_dimension_numbers<[1], [0], [0], [1], [0, 0, 1, 1], [], []>} : vector<64x128xf32>, vector<128x384xf32>, vector<64x384xf32> -> vector<64x384xf32>
    %c0_6 = arith.constant 0 : index
    %c0_7 = arith.constant 0 : index
    %5 = vector.load %arg7[%c0_6, %c0_7] : memref<1x384xf32, #tpu.memory_space<vmem>>, vector<1x384xf32>
    %6 = vector.broadcast %5 : vector<1x384xf32> to vector<64x384xf32>
    %7 = arith.addf %4, %6 : vector<64x384xf32>
    %8 = vector.shape_cast %7 : vector<64x384xf32> to vector<8x8x384xf32>
    %c0_8 = arith.constant 0 : index
    %c0_9 = arith.constant 0 : index
    %c0_10 = arith.constant 0 : index
    %9 = vector.load %arg13[%c0_8, %c0_9, %c0_10] : memref<8x8x384xf32, #tpu.memory_space<vmem>>, vector<8x8x384xf32>
    tpu.vector_store %arg13[%c0_8, %c0_9, %c0_10], %8 {strides = array<i32>} : memref<8x8x384xf32, #tpu.memory_space<vmem>>, vector<8x8x384xf32>,
    %c0_11 = arith.constant 0 : index
    %c0_12 = arith.constant 0 : index
    %10 = vector.load %arg4[%c0_11, %c0_12] : memref<128x384xf32, #tpu.memory_space<vmem>>, vector<128x384xf32>
    %cst_13 = arith.constant dense<0.000000e+00> : vector<64x384xf32>
    %11 = tpu.matmul %2, %10, %cst_13 {dimension_numbers = #tpu.dot_dimension_numbers<[1], [0], [0], [1], [0, 0, 1, 1], [], []>} : vector<64x128xf32>, vector<128x384xf32>, vector<64x384xf32> -> vector<64x384xf32>
    %c0_14 = arith.constant 0 : index
    %c0_15 = arith.constant 0 : index
    %12 = vector.load %arg8[%c0_14, %c0_15] : memref<1x384xf32, #tpu.memory_space<vmem>>, vector<1x384xf32>
    %13 = vector.broadcast %12 : vector<1x384xf32> to vector<64x384xf32>
    %14 = arith.addf %11, %13 : vector<64x384xf32>
    %15 = vector.shape_cast %14 : vector<64x384xf32> to vector<8x8x384xf32>
    %c0_16 = arith.constant 0 : index
    %c0_17 = arith.constant 0 : index
    %c0_18 = arith.constant 0 : index
    %16 = vector.load %arg14[%c0_16, %c0_17, %c0_18] : memref<8x8x384xf32, #tpu.memory_space<vmem>>, vector<8x8x384xf32>
    tpu.vector_store %arg14[%c0_16, %c0_17, %c0_18], %15 {strides = array<i32>} : memref<8x8x384xf32, #tpu.memory_space<vmem>>, vector<8x8x384xf32>,
    %c0_19 = arith.constant 0 : index
    %c0_20 = arith.constant 0 : index
    %17 = vector.load %arg9[%c0_19, %c0_20] : memref<1x128xf32, #tpu.memory_space<vmem>>, vector<1x128xf32>
    %c0_21 = arith.constant 0 : index
    %c0_22 = arith.constant 0 : index
    %18 = vector.load %arg10[%c0_21, %c0_22] : memref<1x128xf32, #tpu.memory_space<vmem>>, vector<1x128xf32>
    %cst_23 = arith.constant 0.000000e+00 : f32
    %19 = vector.broadcast %cst_23 : f32 to vector<8x128xf32>
    %c0_i32 = arith.constant 0 : i32
    %c7_i32 = arith.constant 7 : i32
    %20 = arith.subi %c7_i32, %c0_i32 : i32
    %c0_24 = arith.constant 0 : index
    %c0_25 = arith.constant 0 : index
    %21 = vector.load %arg5[%c0_24, %c0_25] : memref<128x384xf32, #tpu.memory_space<vmem>>, vector<128x384xf32>
    %cst_26 = arith.constant dense<0.000000e+00> : vector<8x384xf32>
    %22 = tpu.matmul %19, %21, %cst_26 {dimension_numbers = #tpu.dot_dimension_numbers<[1], [0], [0], [1], [0, 0, 1, 1], [], []>} : vector<8x128xf32>, vector<128x384xf32>, vector<8x384xf32> -> vector<8x384xf32>
    %23 = arith.index_cast %c0_i32 : i32 to index
    %c0_27 = arith.constant 0 : index
    %c0_28 = arith.constant 0 : index
    %24 = vector.load %arg13[%23, %c0_27, %c0_28] : memref<8x8x384xf32, #tpu.memory_space<vmem>>, vector<1x8x384xf32>
    %25 = vector.shape_cast %24 : vector<1x8x384xf32> to vector<8x384xf32>
    %26 = vector.extract_strided_slice %25 {offsets = [0, 0], sizes = [8, 128], strides = [1, 1]} : vector<8x384xf32> to vector<8x128xf32>
    %27 = vector.extract_strided_slice %25 {offsets = [0, 128], sizes = [8, 128], strides = [1, 1]} : vector<8x384xf32> to vector<8x128xf32>
    %28 = vector.extract_strided_slice %25 {offsets = [0, 256], sizes = [8, 128], strides = [1, 1]} : vector<8x384xf32> to vector<8x128xf32>
    %29 = vector.extract_strided_slice %22 {offsets = [0, 0], sizes = [8, 128], strides = [1, 1]} : vector<8x384xf32> to vector<8x128xf32>
    %30 = vector.extract_strided_slice %22 {offsets = [0, 128], sizes = [8, 128], strides = [1, 1]} : vector<8x384xf32> to vector<8x128xf32>
    %31 = vector.extract_strided_slice %22 {offsets = [0, 256], sizes = [8, 128], strides = [1, 1]} : vector<8x384xf32> to vector<8x128xf32>
    %32 = arith.addf %26, %29 : vector<8x128xf32>
    %cst_29 = arith.constant 5.000000e-01 : f32
    %33 = vector.broadcast %cst_29 : f32 to vector<8x128xf32>
    %34 = arith.mulf %33, %32 : vector<8x128xf32>
    %35 = math.tanh %34 : vector<8x128xf32>
    %cst_30 = arith.constant 1.000000e+00 : f32
    %36 = vector.broadcast %cst_30 : f32 to vector<8x128xf32>
    %37 = arith.addf %35, %36 : vector<8x128xf32>
    %cst_31 = arith.constant 5.000000e-01 : f32
    %38 = vector.broadcast %cst_31 : f32 to vector<8x128xf32>
    %39 = arith.mulf %38, %37 : vector<8x128xf32>
    %40 = arith.addf %27, %30 : vector<8x128xf32>
    %cst_32 = arith.constant 5.000000e-01 : f32
    %41 = vector.broadcast %cst_32 : f32 to vector<8x128xf32>
    %42 = arith.mulf %41, %40 : vector<8x128xf32>
    %43 = math.tanh %42 : vector<8x128xf32>
    %cst_33 = arith.constant 1.000000e+00 : f32
    %44 = vector.broadcast %cst_33 : f32 to vector<8x128xf32>
    %45 = arith.addf %43, %44 : vector<8x128xf32>
    %cst_34 = arith.constant 5.000000e-01 : f32
    %46 = vector.broadcast %cst_34 : f32 to vector<8x128xf32>
    %47 = arith.mulf %46, %45 : vector<8x128xf32>
    %48 = vector.broadcast %17 : vector<1x128xf32> to vector<8x128xf32>
    %49 = arith.addf %31, %48 : vector<8x128xf32>
    %50 = arith.mulf %39, %49 : vector<8x128xf32>
    %51 = arith.addf %28, %50 : vector<8x128xf32>
    %52 = math.tanh %51 : vector<8x128xf32>
    %cst_35 = arith.constant 1.000000e+00 : f32
    %53 = vector.broadcast %cst_35 : f32 to vector<8x128xf32>
    %54 = arith.subf %53, %47 : vector<8x128xf32>
    %55 = arith.mulf %54, %52 : vector<8x128xf32>
    %56 = arith.mulf %47, %19 : vector<8x128xf32>
    %57 = arith.addf %55, %56 : vector<8x128xf32>
    %58 = vector.broadcast %c0_i32 : i32 to vector<8x1xi32>
    %59 = arith.cmpi sgt, %0, %58 : vector<8x1xi32>
    %cst_36 = arith.constant 0.000000e+00 : f32
    %60 = vector.shape_cast %59 : vector<8x1xi1> to vector<8x1xi1>
    %61 = vector.broadcast %60 : vector<8x1xi1> to vector<8x128xi1>
    %62 = vector.broadcast %cst_36 : f32 to vector<8x128xf32>
    %63 = arith.select %61, %57, %62 : vector<8x128xi1>, vector<8x128xf32>
    %64 = arith.index_cast %c0_i32 : i32 to index
    %c0_37 = arith.constant 0 : index
    %c0_38 = arith.constant 0 : index
    %65 = vector.load %arg11[%64, %c0_37, %c0_38] : memref<8x8x128xf32, #tpu.memory_space<vmem>>, vector<1x8x128xf32>
    %66 = vector.shape_cast %65 : vector<1x8x128xf32> to vector<8x128xf32>
    %67 = vector.shape_cast %63 : vector<8x128xf32> to vector<1x8x128xf32>
    tpu.vector_store %arg11[%64, %c0_37, %c0_38], %67 {strides = array<i32>} : memref<8x8x128xf32, #tpu.memory_space<vmem>>, vector<1x8x128xf32>,
    %68 = vector.shape_cast %59 : vector<8x1xi1> to vector<8x1xi1>
    %69 = vector.broadcast %68 : vector<8x1xi1> to vector<8x128xi1>
    %70 = arith.select %69, %57, %19 : vector<8x128xi1>, vector<8x128xf32>
    %c0_39 = arith.constant 0 : index
    %c0_40 = arith.constant 0 : index
    %71 = vector.load %arg6[%c0_39, %c0_40] : memref<128x384xf32, #tpu.memory_space<vmem>>, vector<128x384xf32>
    %cst_41 = arith.constant dense<0.000000e+00> : vector<8x384xf32>
    %72 = tpu.matmul %19, %71, %cst_41 {dimension_numbers = #tpu.dot_dimension_numbers<[1], [0], [0], [1], [0, 0, 1, 1], [], []>} : vector<8x128xf32>, vector<128x384xf32>, vector<8x384xf32> -> vector<8x384xf32>
    %73 = arith.index_cast %20 : i32 to index
    %c0_42 = arith.constant 0 : index
    %c0_43 = arith.constant 0 : index
    %74 = vector.load %arg14[%73, %c0_42, %c0_43] : memref<8x8x384xf32, #tpu.memory_space<vmem>>, vector<1x8x384xf32>
    %75 = vector.shape_cast %74 : vector<1x8x384xf32> to vector<8x384xf32>
    %76 = vector.extract_strided_slice %75 {offsets = [0, 0], sizes = [8, 128], strides = [1, 1]} : vector<8x384xf32> to vector<8x128xf32>
    %77 = vector.extract_strided_slice %75 {offsets = [0, 128], sizes = [8, 128], strides = [1, 1]} : vector<8x384xf32> to vector<8x128xf32>
    %78 = vector.extract_strided_slice %75 {offsets = [0, 256], sizes = [8, 128], strides = [1, 1]} : vector<8x384xf32> to vector<8x128xf32>
    %79 = vector.extract_strided_slice %72 {offsets = [0, 0], sizes = [8, 128], strides = [1, 1]} : vector<8x384xf32> to vector<8x128xf32>
    %80 = vector.extract_strided_slice %72 {offsets = [0, 128], sizes = [8, 128], strides = [1, 1]} : vector<8x384xf32> to vector<8x128xf32>
    %81 = vector.extract_strided_slice %72 {offsets = [0, 256], sizes = [8, 128], strides = [1, 1]} : vector<8x384xf32> to vector<8x128xf32>
    %82 = arith.addf %76, %79 : vector<8x128xf32>
    %cst_44 = arith.constant 5.000000e-01 : f32
    %83 = vector.broadcast %cst_44 : f32 to vector<8x128xf32>
    %84 = arith.mulf %83, %82 : vector<8x128xf32>
    %85 = math.tanh %84 : vector<8x128xf32>
    %cst_45 = arith.constant 1.000000e+00 : f32
    %86 = vector.broadcast %cst_45 : f32 to vector<8x128xf32>
    %87 = arith.addf %85, %86 : vector<8x128xf32>
    %cst_46 = arith.constant 5.000000e-01 : f32
    %88 = vector.broadcast %cst_46 : f32 to vector<8x128xf32>
    %89 = arith.mulf %88, %87 : vector<8x128xf32>
    %90 = arith.addf %77, %80 : vector<8x128xf32>
    %cst_47 = arith.constant 5.000000e-01 : f32
    %91 = vector.broadcast %cst_47 : f32 to vector<8x128xf32>
    %92 = arith.mulf %91, %90 : vector<8x128xf32>
    %93 = math.tanh %92 : vector<8x128xf32>
    %cst_48 = arith.constant 1.000000e+00 : f32
    %94 = vector.broadcast %cst_48 : f32 to vector<8x128xf32>
    %95 = arith.addf %93, %94 : vector<8x128xf32>
    %cst_49 = arith.constant 5.000000e-01 : f32
    %96 = vector.broadcast %cst_49 : f32 to vector<8x128xf32>
    %97 = arith.mulf %96, %95 : vector<8x128xf32>
    %98 = vector.broadcast %18 : vector<1x128xf32> to vector<8x128xf32>
    %99 = arith.addf %81, %98 : vector<8x128xf32>
    %100 = arith.mulf %89, %99 : vector<8x128xf32>
    %101 = arith.addf %78, %100 : vector<8x128xf32>
    %102 = math.tanh %101 : vector<8x128xf32>
    %cst_50 = arith.constant 1.000000e+00 : f32
    %103 = vector.broadcast %cst_50 : f32 to vector<8x128xf32>
    %104 = arith.subf %103, %97 : vector<8x128xf32>
    %105 = arith.mulf %104, %102 : vector<8x128xf32>
    %106 = arith.mulf %97, %19 : vector<8x128xf32>
    %107 = arith.addf %105, %106 : vector<8x128xf32>
    %108 = vector.broadcast %20 : i32 to vector<8x1xi32>
    %109 = arith.cmpi sgt, %0, %108 : vector<8x1xi32>
    %cst_51 = arith.constant 0.000000e+00 : f32
    %110 = vector.shape_cast %109 : vector<8x1xi1> to vector<8x1xi1>
    %111 = vector.broadcast %110 : vector<8x1xi1> to vector<8x128xi1>
    %112 = vector.broadcast %cst_51 : f32 to vector<8x128xf32>
    %113 = arith.select %111, %107, %112 : vector<8x128xi1>, vector<8x128xf32>
    %114 = arith.index_cast %20 : i32 to index
    %c0_52 = arith.constant 0 : index
    %c0_53 = arith.constant 0 : index
    %115 = vector.load %arg15[%114, %c0_52, %c0_53] : memref<8x8x128xf32, #tpu.memory_space<vmem>>, vector<1x8x128xf32>
    %116 = vector.shape_cast %115 : vector<1x8x128xf32> to vector<8x128xf32>
    %117 = vector.shape_cast %113 : vector<8x128xf32> to vector<1x8x128xf32>
    tpu.vector_store %arg15[%114, %c0_52, %c0_53], %117 {strides = array<i32>} : memref<8x8x128xf32, #tpu.memory_space<vmem>>, vector<1x8x128xf32>,
    %118 = vector.shape_cast %109 : vector<8x1xi1> to vector<8x1xi1>
    %119 = vector.broadcast %118 : vector<8x1xi1> to vector<8x128xi1>
    %120 = arith.select %119, %107, %19 : vector<8x128xi1>, vector<8x128xf32>
    %c1_i32 = arith.constant 1 : i32
    %c7_i32_54 = arith.constant 7 : i32
    %121 = arith.subi %c7_i32_54, %c1_i32 : i32
    %c0_55 = arith.constant 0 : index
    %c0_56 = arith.constant 0 : index
    %122 = vector.load %arg5[%c0_55, %c0_56] : memref<128x384xf32, #tpu.memory_space<vmem>>, vector<128x384xf32>
    %cst_57 = arith.constant dense<0.000000e+00> : vector<8x384xf32>
    %123 = tpu.matmul %70, %122, %cst_57 {dimension_numbers = #tpu.dot_dimension_numbers<[1], [0], [0], [1], [0, 0, 1, 1], [], []>} : vector<8x128xf32>, vector<128x384xf32>, vector<8x384xf32> -> vector<8x384xf32>
    %124 = arith.index_cast %c1_i32 : i32 to index
    %c0_58 = arith.constant 0 : index
    %c0_59 = arith.constant 0 : index
    %125 = vector.load %arg13[%124, %c0_58, %c0_59] : memref<8x8x384xf32, #tpu.memory_space<vmem>>, vector<1x8x384xf32>
    %126 = vector.shape_cast %125 : vector<1x8x384xf32> to vector<8x384xf32>
    %127 = vector.extract_strided_slice %126 {offsets = [0, 0], sizes = [8, 128], strides = [1, 1]} : vector<8x384xf32> to vector<8x128xf32>
    %128 = vector.extract_strided_slice %126 {offsets = [0, 128], sizes = [8, 128], strides = [1, 1]} : vector<8x384xf32> to vector<8x128xf32>
    %129 = vector.extract_strided_slice %126 {offsets = [0, 256], sizes = [8, 128], strides = [1, 1]} : vector<8x384xf32> to vector<8x128xf32>
    %130 = vector.extract_strided_slice %123 {offsets = [0, 0], sizes = [8, 128], strides = [1, 1]} : vector<8x384xf32> to vector<8x128xf32>
    %131 = vector.extract_strided_slice %123 {offsets = [0, 128], sizes = [8, 128], strides = [1, 1]} : vector<8x384xf32> to vector<8x128xf32>
    %132 = vector.extract_strided_slice %123 {offsets = [0, 256], sizes = [8, 128], strides = [1, 1]} : vector<8x384xf32> to vector<8x128xf32>
    %133 = arith.addf %127, %130 : vector<8x128xf32>
    %cst_60 = arith.constant 5.000000e-01 : f32
    %134 = vector.broadcast %cst_60 : f32 to vector<8x128xf32>
    %135 = arith.mulf %134, %133 : vector<8x128xf32>
    %136 = math.tanh %135 : vector<8x128xf32>
    %cst_61 = arith.constant 1.000000e+00 : f32
    %137 = vector.broadcast %cst_61 : f32 to vector<8x128xf32>
    %138 = arith.addf %136, %137 : vector<8x128xf32>
    %cst_62 = arith.constant 5.000000e-01 : f32
    %139 = vector.broadcast %cst_62 : f32 to vector<8x128xf32>
    %140 = arith.mulf %139, %138 : vector<8x128xf32>
    %141 = arith.addf %128, %131 : vector<8x128xf32>
    %cst_63 = arith.constant 5.000000e-01 : f32
    %142 = vector.broadcast %cst_63 : f32 to vector<8x128xf32>
    %143 = arith.mulf %142, %141 : vector<8x128xf32>
    %144 = math.tanh %143 : vector<8x128xf32>
    %cst_64 = arith.constant 1.000000e+00 : f32
    %145 = vector.broadcast %cst_64 : f32 to vector<8x128xf32>
    %146 = arith.addf %144, %145 : vector<8x128xf32>
    %cst_65 = arith.constant 5.000000e-01 : f32
    %147 = vector.broadcast %cst_65 : f32 to vector<8x128xf32>
    %148 = arith.mulf %147, %146 : vector<8x128xf32>
    %149 = vector.broadcast %17 : vector<1x128xf32> to vector<8x128xf32>
    %150 = arith.addf %132, %149 : vector<8x128xf32>
    %151 = arith.mulf %140, %150 : vector<8x128xf32>
    %152 = arith.addf %129, %151 : vector<8x128xf32>
    %153 = math.tanh %152 : vector<8x128xf32>
    %cst_66 = arith.constant 1.000000e+00 : f32
    %154 = vector.broadcast %cst_66 : f32 to vector<8x128xf32>
    %155 = arith.subf %154, %148 : vector<8x128xf32>
    %156 = arith.mulf %155, %153 : vector<8x128xf32>
    %157 = arith.mulf %148, %70 : vector<8x128xf32>
    %158 = arith.addf %156, %157 : vector<8x128xf32>
    %159 = vector.broadcast %c1_i32 : i32 to vector<8x1xi32>
    %160 = arith.cmpi sgt, %0, %159 : vector<8x1xi32>
    %cst_67 = arith.constant 0.000000e+00 : f32
    %161 = vector.shape_cast %160 : vector<8x1xi1> to vector<8x1xi1>
    %162 = vector.broadcast %161 : vector<8x1xi1> to vector<8x128xi1>
    %163 = vector.broadcast %cst_67 : f32 to vector<8x128xf32>
    %164 = arith.select %162, %158, %163 : vector<8x128xi1>, vector<8x128xf32>
    %165 = arith.index_cast %c1_i32 : i32 to index
    %c0_68 = arith.constant 0 : index
    %c0_69 = arith.constant 0 : index
    %166 = vector.load %arg11[%165, %c0_68, %c0_69] : memref<8x8x128xf32, #tpu.memory_space<vmem>>, vector<1x8x128xf32>
    %167 = vector.shape_cast %166 : vector<1x8x128xf32> to vector<8x128xf32>
    %168 = vector.shape_cast %164 : vector<8x128xf32> to vector<1x8x128xf32>
    tpu.vector_store %arg11[%165, %c0_68, %c0_69], %168 {strides = array<i32>} : memref<8x8x128xf32, #tpu.memory_space<vmem>>, vector<1x8x128xf32>,
    %169 = vector.shape_cast %160 : vector<8x1xi1> to vector<8x1xi1>
    %170 = vector.broadcast %169 : vector<8x1xi1> to vector<8x128xi1>
    %171 = arith.select %170, %158, %70 : vector<8x128xi1>, vector<8x128xf32>
    %c0_70 = arith.constant 0 : index
    %c0_71 = arith.constant 0 : index
    %172 = vector.load %arg6[%c0_70, %c0_71] : memref<128x384xf32, #tpu.memory_space<vmem>>, vector<128x384xf32>
    %cst_72 = arith.constant dense<0.000000e+00> : vector<8x384xf32>
    %173 = tpu.matmul %120, %172, %cst_72 {dimension_numbers = #tpu.dot_dimension_numbers<[1], [0], [0], [1], [0, 0, 1, 1], [], []>} : vector<8x128xf32>, vector<128x384xf32>, vector<8x384xf32> -> vector<8x384xf32>
    %174 = arith.index_cast %121 : i32 to index
    %c0_73 = arith.constant 0 : index
    %c0_74 = arith.constant 0 : index
    %175 = vector.load %arg14[%174, %c0_73, %c0_74] : memref<8x8x384xf32, #tpu.memory_space<vmem>>, vector<1x8x384xf32>
    %176 = vector.shape_cast %175 : vector<1x8x384xf32> to vector<8x384xf32>
    %177 = vector.extract_strided_slice %176 {offsets = [0, 0], sizes = [8, 128], strides = [1, 1]} : vector<8x384xf32> to vector<8x128xf32>
    %178 = vector.extract_strided_slice %176 {offsets = [0, 128], sizes = [8, 128], strides = [1, 1]} : vector<8x384xf32> to vector<8x128xf32>
    %179 = vector.extract_strided_slice %176 {offsets = [0, 256], sizes = [8, 128], strides = [1, 1]} : vector<8x384xf32> to vector<8x128xf32>
    %180 = vector.extract_strided_slice %173 {offsets = [0, 0], sizes = [8, 128], strides = [1, 1]} : vector<8x384xf32> to vector<8x128xf32>
    %181 = vector.extract_strided_slice %173 {offsets = [0, 128], sizes = [8, 128], strides = [1, 1]} : vector<8x384xf32> to vector<8x128xf32>
    %182 = vector.extract_strided_slice %173 {offsets = [0, 256], sizes = [8, 128], strides = [1, 1]} : vector<8x384xf32> to vector<8x128xf32>
    %183 = arith.addf %177, %180 : vector<8x128xf32>
    %cst_75 = arith.constant 5.000000e-01 : f32
    %184 = vector.broadcast %cst_75 : f32 to vector<8x128xf32>
    %185 = arith.mulf %184, %183 : vector<8x128xf32>
    %186 = math.tanh %185 : vector<8x128xf32>
    %cst_76 = arith.constant 1.000000e+00 : f32
    %187 = vector.broadcast %cst_76 : f32 to vector<8x128xf32>
    %188 = arith.addf %186, %187 : vector<8x128xf32>
    %cst_77 = arith.constant 5.000000e-01 : f32
    %189 = vector.broadcast %cst_77 : f32 to vector<8x128xf32>
    %190 = arith.mulf %189, %188 : vector<8x128xf32>
    %191 = arith.addf %178, %181 : vector<8x128xf32>
    %cst_78 = arith.constant 5.000000e-01 : f32
    %192 = vector.broadcast %cst_78 : f32 to vector<8x128xf32>
    %193 = arith.mulf %192, %191 : vector<8x128xf32>
    %194 = math.tanh %193 : vector<8x128xf32>
    %cst_79 = arith.constant 1.000000e+00 : f32
    %195 = vector.broadcast %cst_79 : f32 to vector<8x128xf32>
    %196 = arith.addf %194, %195 : vector<8x128xf32>
    %cst_80 = arith.constant 5.000000e-01 : f32
    %197 = vector.broadcast %cst_80 : f32 to vector<8x128xf32>
    %198 = arith.mulf %197, %196 : vector<8x128xf32>
    %199 = vector.broadcast %18 : vector<1x128xf32> to vector<8x128xf32>
    %200 = arith.addf %182, %199 : vector<8x128xf32>
    %201 = arith.mulf %190, %200 : vector<8x128xf32>
    %202 = arith.addf %179, %201 : vector<8x128xf32>
    %203 = math.tanh %202 : vector<8x128xf32>
    %cst_81 = arith.constant 1.000000e+00 : f32
    %204 = vector.broadcast %cst_81 : f32 to vector<8x128xf32>
    %205 = arith.subf %204, %198 : vector<8x128xf32>
    %206 = arith.mulf %205, %203 : vector<8x128xf32>
    %207 = arith.mulf %198, %120 : vector<8x128xf32>
    %208 = arith.addf %206, %207 : vector<8x128xf32>
    %209 = vector.broadcast %121 : i32 to vector<8x1xi32>
    %210 = arith.cmpi sgt, %0, %209 : vector<8x1xi32>
    %cst_82 = arith.constant 0.000000e+00 : f32
    %211 = vector.shape_cast %210 : vector<8x1xi1> to vector<8x1xi1>
    %212 = vector.broadcast %211 : vector<8x1xi1> to vector<8x128xi1>
    %213 = vector.broadcast %cst_82 : f32 to vector<8x128xf32>
    %214 = arith.select %212, %208, %213 : vector<8x128xi1>, vector<8x128xf32>
    %215 = arith.index_cast %121 : i32 to index
    %c0_83 = arith.constant 0 : index
    %c0_84 = arith.constant 0 : index
    %216 = vector.load %arg15[%215, %c0_83, %c0_84] : memref<8x8x128xf32, #tpu.memory_space<vmem>>, vector<1x8x128xf32>
    %217 = vector.shape_cast %216 : vector<1x8x128xf32> to vector<8x128xf32>
    %218 = vector.shape_cast %214 : vector<8x128xf32> to vector<1x8x128xf32>
    tpu.vector_store %arg15[%215, %c0_83, %c0_84], %218 {strides = array<i32>} : memref<8x8x128xf32, #tpu.memory_space<vmem>>, vector<1x8x128xf32>,
    %219 = vector.shape_cast %210 : vector<8x1xi1> to vector<8x1xi1>
    %220 = vector.broadcast %219 : vector<8x1xi1> to vector<8x128xi1>
    %221 = arith.select %220, %208, %120 : vector<8x128xi1>, vector<8x128xf32>
    %c2_i32 = arith.constant 2 : i32
    %c7_i32_85 = arith.constant 7 : i32
    %222 = arith.subi %c7_i32_85, %c2_i32 : i32
    %c0_86 = arith.constant 0 : index
    %c0_87 = arith.constant 0 : index
    %223 = vector.load %arg5[%c0_86, %c0_87] : memref<128x384xf32, #tpu.memory_space<vmem>>, vector<128x384xf32>
    %cst_88 = arith.constant dense<0.000000e+00> : vector<8x384xf32>
    %224 = tpu.matmul %171, %223, %cst_88 {dimension_numbers = #tpu.dot_dimension_numbers<[1], [0], [0], [1], [0, 0, 1, 1], [], []>} : vector<8x128xf32>, vector<128x384xf32>, vector<8x384xf32> -> vector<8x384xf32>
    %225 = arith.index_cast %c2_i32 : i32 to index
    %c0_89 = arith.constant 0 : index
    %c0_90 = arith.constant 0 : index
    %226 = vector.load %arg13[%225, %c0_89, %c0_90] : memref<8x8x384xf32, #tpu.memory_space<vmem>>, vector<1x8x384xf32>
    %227 = vector.shape_cast %226 : vector<1x8x384xf32> to vector<8x384xf32>
    %228 = vector.extract_strided_slice %227 {offsets = [0, 0], sizes = [8, 128], strides = [1, 1]} : vector<8x384xf32> to vector<8x128xf32>
    %229 = vector.extract_strided_slice %227 {offsets = [0, 128], sizes = [8, 128], strides = [1, 1]} : vector<8x384xf32> to vector<8x128xf32>
    %230 = vector.extract_strided_slice %227 {offsets = [0, 256], sizes = [8, 128], strides = [1, 1]} : vector<8x384xf32> to vector<8x128xf32>
    %231 = vector.extract_strided_slice %224 {offsets = [0, 0], sizes = [8, 128], strides = [1, 1]} : vector<8x384xf32> to vector<8x128xf32>
    %232 = vector.extract_strided_slice %224 {offsets = [0, 128], sizes = [8, 128], strides = [1, 1]} : vector<8x384xf32> to vector<8x128xf32>
    %233 = vector.extract_strided_slice %224 {offsets = [0, 256], sizes = [8, 128], strides = [1, 1]} : vector<8x384xf32> to vector<8x128xf32>
    %234 = arith.addf %228, %231 : vector<8x128xf32>
    %cst_91 = arith.constant 5.000000e-01 : f32
    %235 = vector.broadcast %cst_91 : f32 to vector<8x128xf32>
    %236 = arith.mulf %235, %234 : vector<8x128xf32>
    %237 = math.tanh %236 : vector<8x128xf32>
    %cst_92 = arith.constant 1.000000e+00 : f32
    %238 = vector.broadcast %cst_92 : f32 to vector<8x128xf32>
    %239 = arith.addf %237, %238 : vector<8x128xf32>
    %cst_93 = arith.constant 5.000000e-01 : f32
    %240 = vector.broadcast %cst_93 : f32 to vector<8x128xf32>
    %241 = arith.mulf %240, %239 : vector<8x128xf32>
    %242 = arith.addf %229, %232 : vector<8x128xf32>
    %cst_94 = arith.constant 5.000000e-01 : f32
    %243 = vector.broadcast %cst_94 : f32 to vector<8x128xf32>
    %244 = arith.mulf %243, %242 : vector<8x128xf32>
    %245 = math.tanh %244 : vector<8x128xf32>
    %cst_95 = arith.constant 1.000000e+00 : f32
    %246 = vector.broadcast %cst_95 : f32 to vector<8x128xf32>
    %247 = arith.addf %245, %246 : vector<8x128xf32>
    %cst_96 = arith.constant 5.000000e-01 : f32
    %248 = vector.broadcast %cst_96 : f32 to vector<8x128xf32>
    %249 = arith.mulf %248, %247 : vector<8x128xf32>
    %250 = vector.broadcast %17 : vector<1x128xf32> to vector<8x128xf32>
    %251 = arith.addf %233, %250 : vector<8x128xf32>
    %252 = arith.mulf %241, %251 : vector<8x128xf32>
    %253 = arith.addf %230, %252 : vector<8x128xf32>
    %254 = math.tanh %253 : vector<8x128xf32>
    %cst_97 = arith.constant 1.000000e+00 : f32
    %255 = vector.broadcast %cst_97 : f32 to vector<8x128xf32>
    %256 = arith.subf %255, %249 : vector<8x128xf32>
    %257 = arith.mulf %256, %254 : vector<8x128xf32>
    %258 = arith.mulf %249, %171 : vector<8x128xf32>
    %259 = arith.addf %257, %258 : vector<8x128xf32>
    %260 = vector.broadcast %c2_i32 : i32 to vector<8x1xi32>
    %261 = arith.cmpi sgt, %0, %260 : vector<8x1xi32>
    %cst_98 = arith.constant 0.000000e+00 : f32
    %262 = vector.shape_cast %261 : vector<8x1xi1> to vector<8x1xi1>
    %263 = vector.broadcast %262 : vector<8x1xi1> to vector<8x128xi1>
    %264 = vector.broadcast %cst_98 : f32 to vector<8x128xf32>
    %265 = arith.select %263, %259, %264 : vector<8x128xi1>, vector<8x128xf32>
    %266 = arith.index_cast %c2_i32 : i32 to index
    %c0_99 = arith.constant 0 : index
    %c0_100 = arith.constant 0 : index
    %267 = vector.load %arg11[%266, %c0_99, %c0_100] : memref<8x8x128xf32, #tpu.memory_space<vmem>>, vector<1x8x128xf32>
    %268 = vector.shape_cast %267 : vector<1x8x128xf32> to vector<8x128xf32>
    %269 = vector.shape_cast %265 : vector<8x128xf32> to vector<1x8x128xf32>
    tpu.vector_store %arg11[%266, %c0_99, %c0_100], %269 {strides = array<i32>} : memref<8x8x128xf32, #tpu.memory_space<vmem>>, vector<1x8x128xf32>,
    %270 = vector.shape_cast %261 : vector<8x1xi1> to vector<8x1xi1>
    %271 = vector.broadcast %270 : vector<8x1xi1> to vector<8x128xi1>
    %272 = arith.select %271, %259, %171 : vector<8x128xi1>, vector<8x128xf32>
    %c0_101 = arith.constant 0 : index
    %c0_102 = arith.constant 0 : index
    %273 = vector.load %arg6[%c0_101, %c0_102] : memref<128x384xf32, #tpu.memory_space<vmem>>, vector<128x384xf32>
    %cst_103 = arith.constant dense<0.000000e+00> : vector<8x384xf32>
    %274 = tpu.matmul %221, %273, %cst_103 {dimension_numbers = #tpu.dot_dimension_numbers<[1], [0], [0], [1], [0, 0, 1, 1], [], []>} : vector<8x128xf32>, vector<128x384xf32>, vector<8x384xf32> -> vector<8x384xf32>
    %275 = arith.index_cast %222 : i32 to index
    %c0_104 = arith.constant 0 : index
    %c0_105 = arith.constant 0 : index
    %276 = vector.load %arg14[%275, %c0_104, %c0_105] : memref<8x8x384xf32, #tpu.memory_space<vmem>>, vector<1x8x384xf32>
    %277 = vector.shape_cast %276 : vector<1x8x384xf32> to vector<8x384xf32>
    %278 = vector.extract_strided_slice %277 {offsets = [0, 0], sizes = [8, 128], strides = [1, 1]} : vector<8x384xf32> to vector<8x128xf32>
    %279 = vector.extract_strided_slice %277 {offsets = [0, 128], sizes = [8, 128], strides = [1, 1]} : vector<8x384xf32> to vector<8x128xf32>
    %280 = vector.extract_strided_slice %277 {offsets = [0, 256], sizes = [8, 128], strides = [1, 1]} : vector<8x384xf32> to vector<8x128xf32>
    %281 = vector.extract_strided_slice %274 {offsets = [0, 0], sizes = [8, 128], strides = [1, 1]} : vector<8x384xf32> to vector<8x128xf32>
    %282 = vector.extract_strided_slice %274 {offsets = [0, 128], sizes = [8, 128], strides = [1, 1]} : vector<8x384xf32> to vector<8x128xf32>
    %283 = vector.extract_strided_slice %274 {offsets = [0, 256], sizes = [8, 128], strides = [1, 1]} : vector<8x384xf32> to vector<8x128xf32>
    %284 = arith.addf %278, %281 : vector<8x128xf32>
    %cst_106 = arith.constant 5.000000e-01 : f32
    %285 = vector.broadcast %cst_106 : f32 to vector<8x128xf32>
    %286 = arith.mulf %285, %284 : vector<8x128xf32>
    %287 = math.tanh %286 : vector<8x128xf32>
    %cst_107 = arith.constant 1.000000e+00 : f32
    %288 = vector.broadcast %cst_107 : f32 to vector<8x128xf32>
    %289 = arith.addf %287, %288 : vector<8x128xf32>
    %cst_108 = arith.constant 5.000000e-01 : f32
    %290 = vector.broadcast %cst_108 : f32 to vector<8x128xf32>
    %291 = arith.mulf %290, %289 : vector<8x128xf32>
    %292 = arith.addf %279, %282 : vector<8x128xf32>
    %cst_109 = arith.constant 5.000000e-01 : f32
    %293 = vector.broadcast %cst_109 : f32 to vector<8x128xf32>
    %294 = arith.mulf %293, %292 : vector<8x128xf32>
    %295 = math.tanh %294 : vector<8x128xf32>
    %cst_110 = arith.constant 1.000000e+00 : f32
    %296 = vector.broadcast %cst_110 : f32 to vector<8x128xf32>
    %297 = arith.addf %295, %296 : vector<8x128xf32>
    %cst_111 = arith.constant 5.000000e-01 : f32
    %298 = vector.broadcast %cst_111 : f32 to vector<8x128xf32>
    %299 = arith.mulf %298, %297 : vector<8x128xf32>
    %300 = vector.broadcast %18 : vector<1x128xf32> to vector<8x128xf32>
    %301 = arith.addf %283, %300 : vector<8x128xf32>
    %302 = arith.mulf %291, %301 : vector<8x128xf32>
    %303 = arith.addf %280, %302 : vector<8x128xf32>
    %304 = math.tanh %303 : vector<8x128xf32>
    %cst_112 = arith.constant 1.000000e+00 : f32
    %305 = vector.broadcast %cst_112 : f32 to vector<8x128xf32>
    %306 = arith.subf %305, %299 : vector<8x128xf32>
    %307 = arith.mulf %306, %304 : vector<8x128xf32>
    %308 = arith.mulf %299, %221 : vector<8x128xf32>
    %309 = arith.addf %307, %308 : vector<8x128xf32>
    %310 = vector.broadcast %222 : i32 to vector<8x1xi32>
    %311 = arith.cmpi sgt, %0, %310 : vector<8x1xi32>
    %cst_113 = arith.constant 0.000000e+00 : f32
    %312 = vector.shape_cast %311 : vector<8x1xi1> to vector<8x1xi1>
    %313 = vector.broadcast %312 : vector<8x1xi1> to vector<8x128xi1>
    %314 = vector.broadcast %cst_113 : f32 to vector<8x128xf32>
    %315 = arith.select %313, %309, %314 : vector<8x128xi1>, vector<8x128xf32>
    %316 = arith.index_cast %222 : i32 to index
    %c0_114 = arith.constant 0 : index
    %c0_115 = arith.constant 0 : index
    %317 = vector.load %arg15[%316, %c0_114, %c0_115] : memref<8x8x128xf32, #tpu.memory_space<vmem>>, vector<1x8x128xf32>
    %318 = vector.shape_cast %317 : vector<1x8x128xf32> to vector<8x128xf32>
    %319 = vector.shape_cast %315 : vector<8x128xf32> to vector<1x8x128xf32>
    tpu.vector_store %arg15[%316, %c0_114, %c0_115], %319 {strides = array<i32>} : memref<8x8x128xf32, #tpu.memory_space<vmem>>, vector<1x8x128xf32>,
    %320 = vector.shape_cast %311 : vector<8x1xi1> to vector<8x1xi1>
    %321 = vector.broadcast %320 : vector<8x1xi1> to vector<8x128xi1>
    %322 = arith.select %321, %309, %221 : vector<8x128xi1>, vector<8x128xf32>
    %c3_i32 = arith.constant 3 : i32
    %c7_i32_116 = arith.constant 7 : i32
    %323 = arith.subi %c7_i32_116, %c3_i32 : i32
    %c0_117 = arith.constant 0 : index
    %c0_118 = arith.constant 0 : index
    %324 = vector.load %arg5[%c0_117, %c0_118] : memref<128x384xf32, #tpu.memory_space<vmem>>, vector<128x384xf32>
    %cst_119 = arith.constant dense<0.000000e+00> : vector<8x384xf32>
    %325 = tpu.matmul %272, %324, %cst_119 {dimension_numbers = #tpu.dot_dimension_numbers<[1], [0], [0], [1], [0, 0, 1, 1], [], []>} : vector<8x128xf32>, vector<128x384xf32>, vector<8x384xf32> -> vector<8x384xf32>
    %326 = arith.index_cast %c3_i32 : i32 to index
    %c0_120 = arith.constant 0 : index
    %c0_121 = arith.constant 0 : index
    %327 = vector.load %arg13[%326, %c0_120, %c0_121] : memref<8x8x384xf32, #tpu.memory_space<vmem>>, vector<1x8x384xf32>
    %328 = vector.shape_cast %327 : vector<1x8x384xf32> to vector<8x384xf32>
    %329 = vector.extract_strided_slice %328 {offsets = [0, 0], sizes = [8, 128], strides = [1, 1]} : vector<8x384xf32> to vector<8x128xf32>
    %330 = vector.extract_strided_slice %328 {offsets = [0, 128], sizes = [8, 128], strides = [1, 1]} : vector<8x384xf32> to vector<8x128xf32>
    %331 = vector.extract_strided_slice %328 {offsets = [0, 256], sizes = [8, 128], strides = [1, 1]} : vector<8x384xf32> to vector<8x128xf32>
    %332 = vector.extract_strided_slice %325 {offsets = [0, 0], sizes = [8, 128], strides = [1, 1]} : vector<8x384xf32> to vector<8x128xf32>
    %333 = vector.extract_strided_slice %325 {offsets = [0, 128], sizes = [8, 128], strides = [1, 1]} : vector<8x384xf32> to vector<8x128xf32>
    %334 = vector.extract_strided_slice %325 {offsets = [0, 256], sizes = [8, 128], strides = [1, 1]} : vector<8x384xf32> to vector<8x128xf32>
    %335 = arith.addf %329, %332 : vector<8x128xf32>
    %cst_122 = arith.constant 5.000000e-01 : f32
    %336 = vector.broadcast %cst_122 : f32 to vector<8x128xf32>
    %337 = arith.mulf %336, %335 : vector<8x128xf32>
    %338 = math.tanh %337 : vector<8x128xf32>
    %cst_123 = arith.constant 1.000000e+00 : f32
    %339 = vector.broadcast %cst_123 : f32 to vector<8x128xf32>
    %340 = arith.addf %338, %339 : vector<8x128xf32>
    %cst_124 = arith.constant 5.000000e-01 : f32
    %341 = vector.broadcast %cst_124 : f32 to vector<8x128xf32>
    %342 = arith.mulf %341, %340 : vector<8x128xf32>
    %343 = arith.addf %330, %333 : vector<8x128xf32>
    %cst_125 = arith.constant 5.000000e-01 : f32
    %344 = vector.broadcast %cst_125 : f32 to vector<8x128xf32>
    %345 = arith.mulf %344, %343 : vector<8x128xf32>
    %346 = math.tanh %345 : vector<8x128xf32>
    %cst_126 = arith.constant 1.000000e+00 : f32
    %347 = vector.broadcast %cst_126 : f32 to vector<8x128xf32>
    %348 = arith.addf %346, %347 : vector<8x128xf32>
    %cst_127 = arith.constant 5.000000e-01 : f32
    %349 = vector.broadcast %cst_127 : f32 to vector<8x128xf32>
    %350 = arith.mulf %349, %348 : vector<8x128xf32>
    %351 = vector.broadcast %17 : vector<1x128xf32> to vector<8x128xf32>
    %352 = arith.addf %334, %351 : vector<8x128xf32>
    %353 = arith.mulf %342, %352 : vector<8x128xf32>
    %354 = arith.addf %331, %353 : vector<8x128xf32>
    %355 = math.tanh %354 : vector<8x128xf32>
    %cst_128 = arith.constant 1.000000e+00 : f32
    %356 = vector.broadcast %cst_128 : f32 to vector<8x128xf32>
    %357 = arith.subf %356, %350 : vector<8x128xf32>
    %358 = arith.mulf %357, %355 : vector<8x128xf32>
    %359 = arith.mulf %350, %272 : vector<8x128xf32>
    %360 = arith.addf %358, %359 : vector<8x128xf32>
    %361 = vector.broadcast %c3_i32 : i32 to vector<8x1xi32>
    %362 = arith.cmpi sgt, %0, %361 : vector<8x1xi32>
    %cst_129 = arith.constant 0.000000e+00 : f32
    %363 = vector.shape_cast %362 : vector<8x1xi1> to vector<8x1xi1>
    %364 = vector.broadcast %363 : vector<8x1xi1> to vector<8x128xi1>
    %365 = vector.broadcast %cst_129 : f32 to vector<8x128xf32>
    %366 = arith.select %364, %360, %365 : vector<8x128xi1>, vector<8x128xf32>
    %367 = arith.index_cast %c3_i32 : i32 to index
    %c0_130 = arith.constant 0 : index
    %c0_131 = arith.constant 0 : index
    %368 = vector.load %arg11[%367, %c0_130, %c0_131] : memref<8x8x128xf32, #tpu.memory_space<vmem>>, vector<1x8x128xf32>
    %369 = vector.shape_cast %368 : vector<1x8x128xf32> to vector<8x128xf32>
    %370 = vector.shape_cast %366 : vector<8x128xf32> to vector<1x8x128xf32>
    tpu.vector_store %arg11[%367, %c0_130, %c0_131], %370 {strides = array<i32>} : memref<8x8x128xf32, #tpu.memory_space<vmem>>, vector<1x8x128xf32>,
    %371 = vector.shape_cast %362 : vector<8x1xi1> to vector<8x1xi1>
    %372 = vector.broadcast %371 : vector<8x1xi1> to vector<8x128xi1>
    %373 = arith.select %372, %360, %272 : vector<8x128xi1>, vector<8x128xf32>
    %c0_132 = arith.constant 0 : index
    %c0_133 = arith.constant 0 : index
    %374 = vector.load %arg6[%c0_132, %c0_133] : memref<128x384xf32, #tpu.memory_space<vmem>>, vector<128x384xf32>
    %cst_134 = arith.constant dense<0.000000e+00> : vector<8x384xf32>
    %375 = tpu.matmul %322, %374, %cst_134 {dimension_numbers = #tpu.dot_dimension_numbers<[1], [0], [0], [1], [0, 0, 1, 1], [], []>} : vector<8x128xf32>, vector<128x384xf32>, vector<8x384xf32> -> vector<8x384xf32>
    %376 = arith.index_cast %323 : i32 to index
    %c0_135 = arith.constant 0 : index
    %c0_136 = arith.constant 0 : index
    %377 = vector.load %arg14[%376, %c0_135, %c0_136] : memref<8x8x384xf32, #tpu.memory_space<vmem>>, vector<1x8x384xf32>
    %378 = vector.shape_cast %377 : vector<1x8x384xf32> to vector<8x384xf32>
    %379 = vector.extract_strided_slice %378 {offsets = [0, 0], sizes = [8, 128], strides = [1, 1]} : vector<8x384xf32> to vector<8x128xf32>
    %380 = vector.extract_strided_slice %378 {offsets = [0, 128], sizes = [8, 128], strides = [1, 1]} : vector<8x384xf32> to vector<8x128xf32>
    %381 = vector.extract_strided_slice %378 {offsets = [0, 256], sizes = [8, 128], strides = [1, 1]} : vector<8x384xf32> to vector<8x128xf32>
    %382 = vector.extract_strided_slice %375 {offsets = [0, 0], sizes = [8, 128], strides = [1, 1]} : vector<8x384xf32> to vector<8x128xf32>
    %383 = vector.extract_strided_slice %375 {offsets = [0, 128], sizes = [8, 128], strides = [1, 1]} : vector<8x384xf32> to vector<8x128xf32>
    %384 = vector.extract_strided_slice %375 {offsets = [0, 256], sizes = [8, 128], strides = [1, 1]} : vector<8x384xf32> to vector<8x128xf32>
    %385 = arith.addf %379, %382 : vector<8x128xf32>
    %cst_137 = arith.constant 5.000000e-01 : f32
    %386 = vector.broadcast %cst_137 : f32 to vector<8x128xf32>
    %387 = arith.mulf %386, %385 : vector<8x128xf32>
    %388 = math.tanh %387 : vector<8x128xf32>
    %cst_138 = arith.constant 1.000000e+00 : f32
    %389 = vector.broadcast %cst_138 : f32 to vector<8x128xf32>
    %390 = arith.addf %388, %389 : vector<8x128xf32>
    %cst_139 = arith.constant 5.000000e-01 : f32
    %391 = vector.broadcast %cst_139 : f32 to vector<8x128xf32>
    %392 = arith.mulf %391, %390 : vector<8x128xf32>
    %393 = arith.addf %380, %383 : vector<8x128xf32>
    %cst_140 = arith.constant 5.000000e-01 : f32
    %394 = vector.broadcast %cst_140 : f32 to vector<8x128xf32>
    %395 = arith.mulf %394, %393 : vector<8x128xf32>
    %396 = math.tanh %395 : vector<8x128xf32>
    %cst_141 = arith.constant 1.000000e+00 : f32
    %397 = vector.broadcast %cst_141 : f32 to vector<8x128xf32>
    %398 = arith.addf %396, %397 : vector<8x128xf32>
    %cst_142 = arith.constant 5.000000e-01 : f32
    %399 = vector.broadcast %cst_142 : f32 to vector<8x128xf32>
    %400 = arith.mulf %399, %398 : vector<8x128xf32>
    %401 = vector.broadcast %18 : vector<1x128xf32> to vector<8x128xf32>
    %402 = arith.addf %384, %401 : vector<8x128xf32>
    %403 = arith.mulf %392, %402 : vector<8x128xf32>
    %404 = arith.addf %381, %403 : vector<8x128xf32>
    %405 = math.tanh %404 : vector<8x128xf32>
    %cst_143 = arith.constant 1.000000e+00 : f32
    %406 = vector.broadcast %cst_143 : f32 to vector<8x128xf32>
    %407 = arith.subf %406, %400 : vector<8x128xf32>
    %408 = arith.mulf %407, %405 : vector<8x128xf32>
    %409 = arith.mulf %400, %322 : vector<8x128xf32>
    %410 = arith.addf %408, %409 : vector<8x128xf32>
    %411 = vector.broadcast %323 : i32 to vector<8x1xi32>
    %412 = arith.cmpi sgt, %0, %411 : vector<8x1xi32>
    %cst_144 = arith.constant 0.000000e+00 : f32
    %413 = vector.shape_cast %412 : vector<8x1xi1> to vector<8x1xi1>
    %414 = vector.broadcast %413 : vector<8x1xi1> to vector<8x128xi1>
    %415 = vector.broadcast %cst_144 : f32 to vector<8x128xf32>
    %416 = arith.select %414, %410, %415 : vector<8x128xi1>, vector<8x128xf32>
    %417 = arith.index_cast %323 : i32 to index
    %c0_145 = arith.constant 0 : index
    %c0_146 = arith.constant 0 : index
    %418 = vector.load %arg15[%417, %c0_145, %c0_146] : memref<8x8x128xf32, #tpu.memory_space<vmem>>, vector<1x8x128xf32>
    %419 = vector.shape_cast %418 : vector<1x8x128xf32> to vector<8x128xf32>
    %420 = vector.shape_cast %416 : vector<8x128xf32> to vector<1x8x128xf32>
    tpu.vector_store %arg15[%417, %c0_145, %c0_146], %420 {strides = array<i32>} : memref<8x8x128xf32, #tpu.memory_space<vmem>>, vector<1x8x128xf32>,
    %421 = vector.shape_cast %412 : vector<8x1xi1> to vector<8x1xi1>
    %422 = vector.broadcast %421 : vector<8x1xi1> to vector<8x128xi1>
    %423 = arith.select %422, %410, %322 : vector<8x128xi1>, vector<8x128xf32>
    %c4_i32 = arith.constant 4 : i32
    %c7_i32_147 = arith.constant 7 : i32
    %424 = arith.subi %c7_i32_147, %c4_i32 : i32
    %c0_148 = arith.constant 0 : index
    %c0_149 = arith.constant 0 : index
    %425 = vector.load %arg5[%c0_148, %c0_149] : memref<128x384xf32, #tpu.memory_space<vmem>>, vector<128x384xf32>
    %cst_150 = arith.constant dense<0.000000e+00> : vector<8x384xf32>
    %426 = tpu.matmul %373, %425, %cst_150 {dimension_numbers = #tpu.dot_dimension_numbers<[1], [0], [0], [1], [0, 0, 1, 1], [], []>} : vector<8x128xf32>, vector<128x384xf32>, vector<8x384xf32> -> vector<8x384xf32>
    %427 = arith.index_cast %c4_i32 : i32 to index
    %c0_151 = arith.constant 0 : index
    %c0_152 = arith.constant 0 : index
    %428 = vector.load %arg13[%427, %c0_151, %c0_152] : memref<8x8x384xf32, #tpu.memory_space<vmem>>, vector<1x8x384xf32>
    %429 = vector.shape_cast %428 : vector<1x8x384xf32> to vector<8x384xf32>
    %430 = vector.extract_strided_slice %429 {offsets = [0, 0], sizes = [8, 128], strides = [1, 1]} : vector<8x384xf32> to vector<8x128xf32>
    %431 = vector.extract_strided_slice %429 {offsets = [0, 128], sizes = [8, 128], strides = [1, 1]} : vector<8x384xf32> to vector<8x128xf32>
    %432 = vector.extract_strided_slice %429 {offsets = [0, 256], sizes = [8, 128], strides = [1, 1]} : vector<8x384xf32> to vector<8x128xf32>
    %433 = vector.extract_strided_slice %426 {offsets = [0, 0], sizes = [8, 128], strides = [1, 1]} : vector<8x384xf32> to vector<8x128xf32>
    %434 = vector.extract_strided_slice %426 {offsets = [0, 128], sizes = [8, 128], strides = [1, 1]} : vector<8x384xf32> to vector<8x128xf32>
    %435 = vector.extract_strided_slice %426 {offsets = [0, 256], sizes = [8, 128], strides = [1, 1]} : vector<8x384xf32> to vector<8x128xf32>
    %436 = arith.addf %430, %433 : vector<8x128xf32>
    %cst_153 = arith.constant 5.000000e-01 : f32
    %437 = vector.broadcast %cst_153 : f32 to vector<8x128xf32>
    %438 = arith.mulf %437, %436 : vector<8x128xf32>
    %439 = math.tanh %438 : vector<8x128xf32>
    %cst_154 = arith.constant 1.000000e+00 : f32
    %440 = vector.broadcast %cst_154 : f32 to vector<8x128xf32>
    %441 = arith.addf %439, %440 : vector<8x128xf32>
    %cst_155 = arith.constant 5.000000e-01 : f32
    %442 = vector.broadcast %cst_155 : f32 to vector<8x128xf32>
    %443 = arith.mulf %442, %441 : vector<8x128xf32>
    %444 = arith.addf %431, %434 : vector<8x128xf32>
    %cst_156 = arith.constant 5.000000e-01 : f32
    %445 = vector.broadcast %cst_156 : f32 to vector<8x128xf32>
    %446 = arith.mulf %445, %444 : vector<8x128xf32>
    %447 = math.tanh %446 : vector<8x128xf32>
    %cst_157 = arith.constant 1.000000e+00 : f32
    %448 = vector.broadcast %cst_157 : f32 to vector<8x128xf32>
    %449 = arith.addf %447, %448 : vector<8x128xf32>
    %cst_158 = arith.constant 5.000000e-01 : f32
    %450 = vector.broadcast %cst_158 : f32 to vector<8x128xf32>
    %451 = arith.mulf %450, %449 : vector<8x128xf32>
    %452 = vector.broadcast %17 : vector<1x128xf32> to vector<8x128xf32>
    %453 = arith.addf %435, %452 : vector<8x128xf32>
    %454 = arith.mulf %443, %453 : vector<8x128xf32>
    %455 = arith.addf %432, %454 : vector<8x128xf32>
    %456 = math.tanh %455 : vector<8x128xf32>
    %cst_159 = arith.constant 1.000000e+00 : f32
    %457 = vector.broadcast %cst_159 : f32 to vector<8x128xf32>
    %458 = arith.subf %457, %451 : vector<8x128xf32>
    %459 = arith.mulf %458, %456 : vector<8x128xf32>
    %460 = arith.mulf %451, %373 : vector<8x128xf32>
    %461 = arith.addf %459, %460 : vector<8x128xf32>
    %462 = vector.broadcast %c4_i32 : i32 to vector<8x1xi32>
    %463 = arith.cmpi sgt, %0, %462 : vector<8x1xi32>
    %cst_160 = arith.constant 0.000000e+00 : f32
    %464 = vector.shape_cast %463 : vector<8x1xi1> to vector<8x1xi1>
    %465 = vector.broadcast %464 : vector<8x1xi1> to vector<8x128xi1>
    %466 = vector.broadcast %cst_160 : f32 to vector<8x128xf32>
    %467 = arith.select %465, %461, %466 : vector<8x128xi1>, vector<8x128xf32>
    %468 = arith.index_cast %c4_i32 : i32 to index
    %c0_161 = arith.constant 0 : index
    %c0_162 = arith.constant 0 : index
    %469 = vector.load %arg11[%468, %c0_161, %c0_162] : memref<8x8x128xf32, #tpu.memory_space<vmem>>, vector<1x8x128xf32>
    %470 = vector.shape_cast %469 : vector<1x8x128xf32> to vector<8x128xf32>
    %471 = vector.shape_cast %467 : vector<8x128xf32> to vector<1x8x128xf32>
    tpu.vector_store %arg11[%468, %c0_161, %c0_162], %471 {strides = array<i32>} : memref<8x8x128xf32, #tpu.memory_space<vmem>>, vector<1x8x128xf32>,
    %472 = vector.shape_cast %463 : vector<8x1xi1> to vector<8x1xi1>
    %473 = vector.broadcast %472 : vector<8x1xi1> to vector<8x128xi1>
    %474 = arith.select %473, %461, %373 : vector<8x128xi1>, vector<8x128xf32>
    %c0_163 = arith.constant 0 : index
    %c0_164 = arith.constant 0 : index
    %475 = vector.load %arg6[%c0_163, %c0_164] : memref<128x384xf32, #tpu.memory_space<vmem>>, vector<128x384xf32>
    %cst_165 = arith.constant dense<0.000000e+00> : vector<8x384xf32>
    %476 = tpu.matmul %423, %475, %cst_165 {dimension_numbers = #tpu.dot_dimension_numbers<[1], [0], [0], [1], [0, 0, 1, 1], [], []>} : vector<8x128xf32>, vector<128x384xf32>, vector<8x384xf32> -> vector<8x384xf32>
    %477 = arith.index_cast %424 : i32 to index
    %c0_166 = arith.constant 0 : index
    %c0_167 = arith.constant 0 : index
    %478 = vector.load %arg14[%477, %c0_166, %c0_167] : memref<8x8x384xf32, #tpu.memory_space<vmem>>, vector<1x8x384xf32>
    %479 = vector.shape_cast %478 : vector<1x8x384xf32> to vector<8x384xf32>
    %480 = vector.extract_strided_slice %479 {offsets = [0, 0], sizes = [8, 128], strides = [1, 1]} : vector<8x384xf32> to vector<8x128xf32>
    %481 = vector.extract_strided_slice %479 {offsets = [0, 128], sizes = [8, 128], strides = [1, 1]} : vector<8x384xf32> to vector<8x128xf32>
    %482 = vector.extract_strided_slice %479 {offsets = [0, 256], sizes = [8, 128], strides = [1, 1]} : vector<8x384xf32> to vector<8x128xf32>
    %483 = vector.extract_strided_slice %476 {offsets = [0, 0], sizes = [8, 128], strides = [1, 1]} : vector<8x384xf32> to vector<8x128xf32>
    %484 = vector.extract_strided_slice %476 {offsets = [0, 128], sizes = [8, 128], strides = [1, 1]} : vector<8x384xf32> to vector<8x128xf32>
    %485 = vector.extract_strided_slice %476 {offsets = [0, 256], sizes = [8, 128], strides = [1, 1]} : vector<8x384xf32> to vector<8x128xf32>
    %486 = arith.addf %480, %483 : vector<8x128xf32>
    %cst_168 = arith.constant 5.000000e-01 : f32
    %487 = vector.broadcast %cst_168 : f32 to vector<8x128xf32>
    %488 = arith.mulf %487, %486 : vector<8x128xf32>
    %489 = math.tanh %488 : vector<8x128xf32>
    %cst_169 = arith.constant 1.000000e+00 : f32
    %490 = vector.broadcast %cst_169 : f32 to vector<8x128xf32>
    %491 = arith.addf %489, %490 : vector<8x128xf32>
    %cst_170 = arith.constant 5.000000e-01 : f32
    %492 = vector.broadcast %cst_170 : f32 to vector<8x128xf32>
    %493 = arith.mulf %492, %491 : vector<8x128xf32>
    %494 = arith.addf %481, %484 : vector<8x128xf32>
    %cst_171 = arith.constant 5.000000e-01 : f32
    %495 = vector.broadcast %cst_171 : f32 to vector<8x128xf32>
    %496 = arith.mulf %495, %494 : vector<8x128xf32>
    %497 = math.tanh %496 : vector<8x128xf32>
    %cst_172 = arith.constant 1.000000e+00 : f32
    %498 = vector.broadcast %cst_172 : f32 to vector<8x128xf32>
    %499 = arith.addf %497, %498 : vector<8x128xf32>
    %cst_173 = arith.constant 5.000000e-01 : f32
    %500 = vector.broadcast %cst_173 : f32 to vector<8x128xf32>
    %501 = arith.mulf %500, %499 : vector<8x128xf32>
    %502 = vector.broadcast %18 : vector<1x128xf32> to vector<8x128xf32>
    %503 = arith.addf %485, %502 : vector<8x128xf32>
    %504 = arith.mulf %493, %503 : vector<8x128xf32>
    %505 = arith.addf %482, %504 : vector<8x128xf32>
    %506 = math.tanh %505 : vector<8x128xf32>
    %cst_174 = arith.constant 1.000000e+00 : f32
    %507 = vector.broadcast %cst_174 : f32 to vector<8x128xf32>
    %508 = arith.subf %507, %501 : vector<8x128xf32>
    %509 = arith.mulf %508, %506 : vector<8x128xf32>
    %510 = arith.mulf %501, %423 : vector<8x128xf32>
    %511 = arith.addf %509, %510 : vector<8x128xf32>
    %512 = vector.broadcast %424 : i32 to vector<8x1xi32>
    %513 = arith.cmpi sgt, %0, %512 : vector<8x1xi32>
    %cst_175 = arith.constant 0.000000e+00 : f32
    %514 = vector.shape_cast %513 : vector<8x1xi1> to vector<8x1xi1>
    %515 = vector.broadcast %514 : vector<8x1xi1> to vector<8x128xi1>
    %516 = vector.broadcast %cst_175 : f32 to vector<8x128xf32>
    %517 = arith.select %515, %511, %516 : vector<8x128xi1>, vector<8x128xf32>
    %518 = arith.index_cast %424 : i32 to index
    %c0_176 = arith.constant 0 : index
    %c0_177 = arith.constant 0 : index
    %519 = vector.load %arg15[%518, %c0_176, %c0_177] : memref<8x8x128xf32, #tpu.memory_space<vmem>>, vector<1x8x128xf32>
    %520 = vector.shape_cast %519 : vector<1x8x128xf32> to vector<8x128xf32>
    %521 = vector.shape_cast %517 : vector<8x128xf32> to vector<1x8x128xf32>
    tpu.vector_store %arg15[%518, %c0_176, %c0_177], %521 {strides = array<i32>} : memref<8x8x128xf32, #tpu.memory_space<vmem>>, vector<1x8x128xf32>,
    %522 = vector.shape_cast %513 : vector<8x1xi1> to vector<8x1xi1>
    %523 = vector.broadcast %522 : vector<8x1xi1> to vector<8x128xi1>
    %524 = arith.select %523, %511, %423 : vector<8x128xi1>, vector<8x128xf32>
    %c5_i32 = arith.constant 5 : i32
    %c7_i32_178 = arith.constant 7 : i32
    %525 = arith.subi %c7_i32_178, %c5_i32 : i32
    %c0_179 = arith.constant 0 : index
    %c0_180 = arith.constant 0 : index
    %526 = vector.load %arg5[%c0_179, %c0_180] : memref<128x384xf32, #tpu.memory_space<vmem>>, vector<128x384xf32>
    %cst_181 = arith.constant dense<0.000000e+00> : vector<8x384xf32>
    %527 = tpu.matmul %474, %526, %cst_181 {dimension_numbers = #tpu.dot_dimension_numbers<[1], [0], [0], [1], [0, 0, 1, 1], [], []>} : vector<8x128xf32>, vector<128x384xf32>, vector<8x384xf32> -> vector<8x384xf32>
    %528 = arith.index_cast %c5_i32 : i32 to index
    %c0_182 = arith.constant 0 : index
    %c0_183 = arith.constant 0 : index
    %529 = vector.load %arg13[%528, %c0_182, %c0_183] : memref<8x8x384xf32, #tpu.memory_space<vmem>>, vector<1x8x384xf32>
    %530 = vector.shape_cast %529 : vector<1x8x384xf32> to vector<8x384xf32>
    %531 = vector.extract_strided_slice %530 {offsets = [0, 0], sizes = [8, 128], strides = [1, 1]} : vector<8x384xf32> to vector<8x128xf32>
    %532 = vector.extract_strided_slice %530 {offsets = [0, 128], sizes = [8, 128], strides = [1, 1]} : vector<8x384xf32> to vector<8x128xf32>
    %533 = vector.extract_strided_slice %530 {offsets = [0, 256], sizes = [8, 128], strides = [1, 1]} : vector<8x384xf32> to vector<8x128xf32>
    %534 = vector.extract_strided_slice %527 {offsets = [0, 0], sizes = [8, 128], strides = [1, 1]} : vector<8x384xf32> to vector<8x128xf32>
    %535 = vector.extract_strided_slice %527 {offsets = [0, 128], sizes = [8, 128], strides = [1, 1]} : vector<8x384xf32> to vector<8x128xf32>
    %536 = vector.extract_strided_slice %527 {offsets = [0, 256], sizes = [8, 128], strides = [1, 1]} : vector<8x384xf32> to vector<8x128xf32>
    %537 = arith.addf %531, %534 : vector<8x128xf32>
    %cst_184 = arith.constant 5.000000e-01 : f32
    %538 = vector.broadcast %cst_184 : f32 to vector<8x128xf32>
    %539 = arith.mulf %538, %537 : vector<8x128xf32>
    %540 = math.tanh %539 : vector<8x128xf32>
    %cst_185 = arith.constant 1.000000e+00 : f32
    %541 = vector.broadcast %cst_185 : f32 to vector<8x128xf32>
    %542 = arith.addf %540, %541 : vector<8x128xf32>
    %cst_186 = arith.constant 5.000000e-01 : f32
    %543 = vector.broadcast %cst_186 : f32 to vector<8x128xf32>
    %544 = arith.mulf %543, %542 : vector<8x128xf32>
    %545 = arith.addf %532, %535 : vector<8x128xf32>
    %cst_187 = arith.constant 5.000000e-01 : f32
    %546 = vector.broadcast %cst_187 : f32 to vector<8x128xf32>
    %547 = arith.mulf %546, %545 : vector<8x128xf32>
    %548 = math.tanh %547 : vector<8x128xf32>
    %cst_188 = arith.constant 1.000000e+00 : f32
    %549 = vector.broadcast %cst_188 : f32 to vector<8x128xf32>
    %550 = arith.addf %548, %549 : vector<8x128xf32>
    %cst_189 = arith.constant 5.000000e-01 : f32
    %551 = vector.broadcast %cst_189 : f32 to vector<8x128xf32>
    %552 = arith.mulf %551, %550 : vector<8x128xf32>
    %553 = vector.broadcast %17 : vector<1x128xf32> to vector<8x128xf32>
    %554 = arith.addf %536, %553 : vector<8x128xf32>
    %555 = arith.mulf %544, %554 : vector<8x128xf32>
    %556 = arith.addf %533, %555 : vector<8x128xf32>
    %557 = math.tanh %556 : vector<8x128xf32>
    %cst_190 = arith.constant 1.000000e+00 : f32
    %558 = vector.broadcast %cst_190 : f32 to vector<8x128xf32>
    %559 = arith.subf %558, %552 : vector<8x128xf32>
    %560 = arith.mulf %559, %557 : vector<8x128xf32>
    %561 = arith.mulf %552, %474 : vector<8x128xf32>
    %562 = arith.addf %560, %561 : vector<8x128xf32>
    %563 = vector.broadcast %c5_i32 : i32 to vector<8x1xi32>
    %564 = arith.cmpi sgt, %0, %563 : vector<8x1xi32>
    %cst_191 = arith.constant 0.000000e+00 : f32
    %565 = vector.shape_cast %564 : vector<8x1xi1> to vector<8x1xi1>
    %566 = vector.broadcast %565 : vector<8x1xi1> to vector<8x128xi1>
    %567 = vector.broadcast %cst_191 : f32 to vector<8x128xf32>
    %568 = arith.select %566, %562, %567 : vector<8x128xi1>, vector<8x128xf32>
    %569 = arith.index_cast %c5_i32 : i32 to index
    %c0_192 = arith.constant 0 : index
    %c0_193 = arith.constant 0 : index
    %570 = vector.load %arg11[%569, %c0_192, %c0_193] : memref<8x8x128xf32, #tpu.memory_space<vmem>>, vector<1x8x128xf32>
    %571 = vector.shape_cast %570 : vector<1x8x128xf32> to vector<8x128xf32>
    %572 = vector.shape_cast %568 : vector<8x128xf32> to vector<1x8x128xf32>
    tpu.vector_store %arg11[%569, %c0_192, %c0_193], %572 {strides = array<i32>} : memref<8x8x128xf32, #tpu.memory_space<vmem>>, vector<1x8x128xf32>,
    %573 = vector.shape_cast %564 : vector<8x1xi1> to vector<8x1xi1>
    %574 = vector.broadcast %573 : vector<8x1xi1> to vector<8x128xi1>
    %575 = arith.select %574, %562, %474 : vector<8x128xi1>, vector<8x128xf32>
    %c0_194 = arith.constant 0 : index
    %c0_195 = arith.constant 0 : index
    %576 = vector.load %arg6[%c0_194, %c0_195] : memref<128x384xf32, #tpu.memory_space<vmem>>, vector<128x384xf32>
    %cst_196 = arith.constant dense<0.000000e+00> : vector<8x384xf32>
    %577 = tpu.matmul %524, %576, %cst_196 {dimension_numbers = #tpu.dot_dimension_numbers<[1], [0], [0], [1], [0, 0, 1, 1], [], []>} : vector<8x128xf32>, vector<128x384xf32>, vector<8x384xf32> -> vector<8x384xf32>
    %578 = arith.index_cast %525 : i32 to index
    %c0_197 = arith.constant 0 : index
    %c0_198 = arith.constant 0 : index
    %579 = vector.load %arg14[%578, %c0_197, %c0_198] : memref<8x8x384xf32, #tpu.memory_space<vmem>>, vector<1x8x384xf32>
    %580 = vector.shape_cast %579 : vector<1x8x384xf32> to vector<8x384xf32>
    %581 = vector.extract_strided_slice %580 {offsets = [0, 0], sizes = [8, 128], strides = [1, 1]} : vector<8x384xf32> to vector<8x128xf32>
    %582 = vector.extract_strided_slice %580 {offsets = [0, 128], sizes = [8, 128], strides = [1, 1]} : vector<8x384xf32> to vector<8x128xf32>
    %583 = vector.extract_strided_slice %580 {offsets = [0, 256], sizes = [8, 128], strides = [1, 1]} : vector<8x384xf32> to vector<8x128xf32>
    %584 = vector.extract_strided_slice %577 {offsets = [0, 0], sizes = [8, 128], strides = [1, 1]} : vector<8x384xf32> to vector<8x128xf32>
    %585 = vector.extract_strided_slice %577 {offsets = [0, 128], sizes = [8, 128], strides = [1, 1]} : vector<8x384xf32> to vector<8x128xf32>
    %586 = vector.extract_strided_slice %577 {offsets = [0, 256], sizes = [8, 128], strides = [1, 1]} : vector<8x384xf32> to vector<8x128xf32>
    %587 = arith.addf %581, %584 : vector<8x128xf32>
    %cst_199 = arith.constant 5.000000e-01 : f32
    %588 = vector.broadcast %cst_199 : f32 to vector<8x128xf32>
    %589 = arith.mulf %588, %587 : vector<8x128xf32>
    %590 = math.tanh %589 : vector<8x128xf32>
    %cst_200 = arith.constant 1.000000e+00 : f32
    %591 = vector.broadcast %cst_200 : f32 to vector<8x128xf32>
    %592 = arith.addf %590, %591 : vector<8x128xf32>
    %cst_201 = arith.constant 5.000000e-01 : f32
    %593 = vector.broadcast %cst_201 : f32 to vector<8x128xf32>
    %594 = arith.mulf %593, %592 : vector<8x128xf32>
    %595 = arith.addf %582, %585 : vector<8x128xf32>
    %cst_202 = arith.constant 5.000000e-01 : f32
    %596 = vector.broadcast %cst_202 : f32 to vector<8x128xf32>
    %597 = arith.mulf %596, %595 : vector<8x128xf32>
    %598 = math.tanh %597 : vector<8x128xf32>
    %cst_203 = arith.constant 1.000000e+00 : f32
    %599 = vector.broadcast %cst_203 : f32 to vector<8x128xf32>
    %600 = arith.addf %598, %599 : vector<8x128xf32>
    %cst_204 = arith.constant 5.000000e-01 : f32
    %601 = vector.broadcast %cst_204 : f32 to vector<8x128xf32>
    %602 = arith.mulf %601, %600 : vector<8x128xf32>
    %603 = vector.broadcast %18 : vector<1x128xf32> to vector<8x128xf32>
    %604 = arith.addf %586, %603 : vector<8x128xf32>
    %605 = arith.mulf %594, %604 : vector<8x128xf32>
    %606 = arith.addf %583, %605 : vector<8x128xf32>
    %607 = math.tanh %606 : vector<8x128xf32>
    %cst_205 = arith.constant 1.000000e+00 : f32
    %608 = vector.broadcast %cst_205 : f32 to vector<8x128xf32>
    %609 = arith.subf %608, %602 : vector<8x128xf32>
    %610 = arith.mulf %609, %607 : vector<8x128xf32>
    %611 = arith.mulf %602, %524 : vector<8x128xf32>
    %612 = arith.addf %610, %611 : vector<8x128xf32>
    %613 = vector.broadcast %525 : i32 to vector<8x1xi32>
    %614 = arith.cmpi sgt, %0, %613 : vector<8x1xi32>
    %cst_206 = arith.constant 0.000000e+00 : f32
    %615 = vector.shape_cast %614 : vector<8x1xi1> to vector<8x1xi1>
    %616 = vector.broadcast %615 : vector<8x1xi1> to vector<8x128xi1>
    %617 = vector.broadcast %cst_206 : f32 to vector<8x128xf32>
    %618 = arith.select %616, %612, %617 : vector<8x128xi1>, vector<8x128xf32>
    %619 = arith.index_cast %525 : i32 to index
    %c0_207 = arith.constant 0 : index
    %c0_208 = arith.constant 0 : index
    %620 = vector.load %arg15[%619, %c0_207, %c0_208] : memref<8x8x128xf32, #tpu.memory_space<vmem>>, vector<1x8x128xf32>
    %621 = vector.shape_cast %620 : vector<1x8x128xf32> to vector<8x128xf32>
    %622 = vector.shape_cast %618 : vector<8x128xf32> to vector<1x8x128xf32>
    tpu.vector_store %arg15[%619, %c0_207, %c0_208], %622 {strides = array<i32>} : memref<8x8x128xf32, #tpu.memory_space<vmem>>, vector<1x8x128xf32>,
    %623 = vector.shape_cast %614 : vector<8x1xi1> to vector<8x1xi1>
    %624 = vector.broadcast %623 : vector<8x1xi1> to vector<8x128xi1>
    %625 = arith.select %624, %612, %524 : vector<8x128xi1>, vector<8x128xf32>
    %c6_i32 = arith.constant 6 : i32
    %c7_i32_209 = arith.constant 7 : i32
    %626 = arith.subi %c7_i32_209, %c6_i32 : i32
    %c0_210 = arith.constant 0 : index
    %c0_211 = arith.constant 0 : index
    %627 = vector.load %arg5[%c0_210, %c0_211] : memref<128x384xf32, #tpu.memory_space<vmem>>, vector<128x384xf32>
    %cst_212 = arith.constant dense<0.000000e+00> : vector<8x384xf32>
    %628 = tpu.matmul %575, %627, %cst_212 {dimension_numbers = #tpu.dot_dimension_numbers<[1], [0], [0], [1], [0, 0, 1, 1], [], []>} : vector<8x128xf32>, vector<128x384xf32>, vector<8x384xf32> -> vector<8x384xf32>
    %629 = arith.index_cast %c6_i32 : i32 to index
    %c0_213 = arith.constant 0 : index
    %c0_214 = arith.constant 0 : index
    %630 = vector.load %arg13[%629, %c0_213, %c0_214] : memref<8x8x384xf32, #tpu.memory_space<vmem>>, vector<1x8x384xf32>
    %631 = vector.shape_cast %630 : vector<1x8x384xf32> to vector<8x384xf32>
    %632 = vector.extract_strided_slice %631 {offsets = [0, 0], sizes = [8, 128], strides = [1, 1]} : vector<8x384xf32> to vector<8x128xf32>
    %633 = vector.extract_strided_slice %631 {offsets = [0, 128], sizes = [8, 128], strides = [1, 1]} : vector<8x384xf32> to vector<8x128xf32>
    %634 = vector.extract_strided_slice %631 {offsets = [0, 256], sizes = [8, 128], strides = [1, 1]} : vector<8x384xf32> to vector<8x128xf32>
    %635 = vector.extract_strided_slice %628 {offsets = [0, 0], sizes = [8, 128], strides = [1, 1]} : vector<8x384xf32> to vector<8x128xf32>
    %636 = vector.extract_strided_slice %628 {offsets = [0, 128], sizes = [8, 128], strides = [1, 1]} : vector<8x384xf32> to vector<8x128xf32>
    %637 = vector.extract_strided_slice %628 {offsets = [0, 256], sizes = [8, 128], strides = [1, 1]} : vector<8x384xf32> to vector<8x128xf32>
    %638 = arith.addf %632, %635 : vector<8x128xf32>
    %cst_215 = arith.constant 5.000000e-01 : f32
    %639 = vector.broadcast %cst_215 : f32 to vector<8x128xf32>
    %640 = arith.mulf %639, %638 : vector<8x128xf32>
    %641 = math.tanh %640 : vector<8x128xf32>
    %cst_216 = arith.constant 1.000000e+00 : f32
    %642 = vector.broadcast %cst_216 : f32 to vector<8x128xf32>
    %643 = arith.addf %641, %642 : vector<8x128xf32>
    %cst_217 = arith.constant 5.000000e-01 : f32
    %644 = vector.broadcast %cst_217 : f32 to vector<8x128xf32>
    %645 = arith.mulf %644, %643 : vector<8x128xf32>
    %646 = arith.addf %633, %636 : vector<8x128xf32>
    %cst_218 = arith.constant 5.000000e-01 : f32
    %647 = vector.broadcast %cst_218 : f32 to vector<8x128xf32>
    %648 = arith.mulf %647, %646 : vector<8x128xf32>
    %649 = math.tanh %648 : vector<8x128xf32>
    %cst_219 = arith.constant 1.000000e+00 : f32
    %650 = vector.broadcast %cst_219 : f32 to vector<8x128xf32>
    %651 = arith.addf %649, %650 : vector<8x128xf32>
    %cst_220 = arith.constant 5.000000e-01 : f32
    %652 = vector.broadcast %cst_220 : f32 to vector<8x128xf32>
    %653 = arith.mulf %652, %651 : vector<8x128xf32>
    %654 = vector.broadcast %17 : vector<1x128xf32> to vector<8x128xf32>
    %655 = arith.addf %637, %654 : vector<8x128xf32>
    %656 = arith.mulf %645, %655 : vector<8x128xf32>
    %657 = arith.addf %634, %656 : vector<8x128xf32>
    %658 = math.tanh %657 : vector<8x128xf32>
    %cst_221 = arith.constant 1.000000e+00 : f32
    %659 = vector.broadcast %cst_221 : f32 to vector<8x128xf32>
    %660 = arith.subf %659, %653 : vector<8x128xf32>
    %661 = arith.mulf %660, %658 : vector<8x128xf32>
    %662 = arith.mulf %653, %575 : vector<8x128xf32>
    %663 = arith.addf %661, %662 : vector<8x128xf32>
    %664 = vector.broadcast %c6_i32 : i32 to vector<8x1xi32>
    %665 = arith.cmpi sgt, %0, %664 : vector<8x1xi32>
    %cst_222 = arith.constant 0.000000e+00 : f32
    %666 = vector.shape_cast %665 : vector<8x1xi1> to vector<8x1xi1>
    %667 = vector.broadcast %666 : vector<8x1xi1> to vector<8x128xi1>
    %668 = vector.broadcast %cst_222 : f32 to vector<8x128xf32>
    %669 = arith.select %667, %663, %668 : vector<8x128xi1>, vector<8x128xf32>
    %670 = arith.index_cast %c6_i32 : i32 to index
    %c0_223 = arith.constant 0 : index
    %c0_224 = arith.constant 0 : index
    %671 = vector.load %arg11[%670, %c0_223, %c0_224] : memref<8x8x128xf32, #tpu.memory_space<vmem>>, vector<1x8x128xf32>
    %672 = vector.shape_cast %671 : vector<1x8x128xf32> to vector<8x128xf32>
    %673 = vector.shape_cast %669 : vector<8x128xf32> to vector<1x8x128xf32>
    tpu.vector_store %arg11[%670, %c0_223, %c0_224], %673 {strides = array<i32>} : memref<8x8x128xf32, #tpu.memory_space<vmem>>, vector<1x8x128xf32>,
    %674 = vector.shape_cast %665 : vector<8x1xi1> to vector<8x1xi1>
    %675 = vector.broadcast %674 : vector<8x1xi1> to vector<8x128xi1>
    %676 = arith.select %675, %663, %575 : vector<8x128xi1>, vector<8x128xf32>
    %c0_225 = arith.constant 0 : index
    %c0_226 = arith.constant 0 : index
    %677 = vector.load %arg6[%c0_225, %c0_226] : memref<128x384xf32, #tpu.memory_space<vmem>>, vector<128x384xf32>
    %cst_227 = arith.constant dense<0.000000e+00> : vector<8x384xf32>
    %678 = tpu.matmul %625, %677, %cst_227 {dimension_numbers = #tpu.dot_dimension_numbers<[1], [0], [0], [1], [0, 0, 1, 1], [], []>} : vector<8x128xf32>, vector<128x384xf32>, vector<8x384xf32> -> vector<8x384xf32>
    %679 = arith.index_cast %626 : i32 to index
    %c0_228 = arith.constant 0 : index
    %c0_229 = arith.constant 0 : index
    %680 = vector.load %arg14[%679, %c0_228, %c0_229] : memref<8x8x384xf32, #tpu.memory_space<vmem>>, vector<1x8x384xf32>
    %681 = vector.shape_cast %680 : vector<1x8x384xf32> to vector<8x384xf32>
    %682 = vector.extract_strided_slice %681 {offsets = [0, 0], sizes = [8, 128], strides = [1, 1]} : vector<8x384xf32> to vector<8x128xf32>
    %683 = vector.extract_strided_slice %681 {offsets = [0, 128], sizes = [8, 128], strides = [1, 1]} : vector<8x384xf32> to vector<8x128xf32>
    %684 = vector.extract_strided_slice %681 {offsets = [0, 256], sizes = [8, 128], strides = [1, 1]} : vector<8x384xf32> to vector<8x128xf32>
    %685 = vector.extract_strided_slice %678 {offsets = [0, 0], sizes = [8, 128], strides = [1, 1]} : vector<8x384xf32> to vector<8x128xf32>
    %686 = vector.extract_strided_slice %678 {offsets = [0, 128], sizes = [8, 128], strides = [1, 1]} : vector<8x384xf32> to vector<8x128xf32>
    %687 = vector.extract_strided_slice %678 {offsets = [0, 256], sizes = [8, 128], strides = [1, 1]} : vector<8x384xf32> to vector<8x128xf32>
    %688 = arith.addf %682, %685 : vector<8x128xf32>
    %cst_230 = arith.constant 5.000000e-01 : f32
    %689 = vector.broadcast %cst_230 : f32 to vector<8x128xf32>
    %690 = arith.mulf %689, %688 : vector<8x128xf32>
    %691 = math.tanh %690 : vector<8x128xf32>
    %cst_231 = arith.constant 1.000000e+00 : f32
    %692 = vector.broadcast %cst_231 : f32 to vector<8x128xf32>
    %693 = arith.addf %691, %692 : vector<8x128xf32>
    %cst_232 = arith.constant 5.000000e-01 : f32
    %694 = vector.broadcast %cst_232 : f32 to vector<8x128xf32>
    %695 = arith.mulf %694, %693 : vector<8x128xf32>
    %696 = arith.addf %683, %686 : vector<8x128xf32>
    %cst_233 = arith.constant 5.000000e-01 : f32
    %697 = vector.broadcast %cst_233 : f32 to vector<8x128xf32>
    %698 = arith.mulf %697, %696 : vector<8x128xf32>
    %699 = math.tanh %698 : vector<8x128xf32>
    %cst_234 = arith.constant 1.000000e+00 : f32
    %700 = vector.broadcast %cst_234 : f32 to vector<8x128xf32>
    %701 = arith.addf %699, %700 : vector<8x128xf32>
    %cst_235 = arith.constant 5.000000e-01 : f32
    %702 = vector.broadcast %cst_235 : f32 to vector<8x128xf32>
    %703 = arith.mulf %702, %701 : vector<8x128xf32>
    %704 = vector.broadcast %18 : vector<1x128xf32> to vector<8x128xf32>
    %705 = arith.addf %687, %704 : vector<8x128xf32>
    %706 = arith.mulf %695, %705 : vector<8x128xf32>
    %707 = arith.addf %684, %706 : vector<8x128xf32>
    %708 = math.tanh %707 : vector<8x128xf32>
    %cst_236 = arith.constant 1.000000e+00 : f32
    %709 = vector.broadcast %cst_236 : f32 to vector<8x128xf32>
    %710 = arith.subf %709, %703 : vector<8x128xf32>
    %711 = arith.mulf %710, %708 : vector<8x128xf32>
    %712 = arith.mulf %703, %625 : vector<8x128xf32>
    %713 = arith.addf %711, %712 : vector<8x128xf32>
    %714 = vector.broadcast %626 : i32 to vector<8x1xi32>
    %715 = arith.cmpi sgt, %0, %714 : vector<8x1xi32>
    %cst_237 = arith.constant 0.000000e+00 : f32
    %716 = vector.shape_cast %715 : vector<8x1xi1> to vector<8x1xi1>
    %717 = vector.broadcast %716 : vector<8x1xi1> to vector<8x128xi1>
    %718 = vector.broadcast %cst_237 : f32 to vector<8x128xf32>
    %719 = arith.select %717, %713, %718 : vector<8x128xi1>, vector<8x128xf32>
    %720 = arith.index_cast %626 : i32 to index
    %c0_238 = arith.constant 0 : index
    %c0_239 = arith.constant 0 : index
    %721 = vector.load %arg15[%720, %c0_238, %c0_239] : memref<8x8x128xf32, #tpu.memory_space<vmem>>, vector<1x8x128xf32>
    %722 = vector.shape_cast %721 : vector<1x8x128xf32> to vector<8x128xf32>
    %723 = vector.shape_cast %719 : vector<8x128xf32> to vector<1x8x128xf32>
    tpu.vector_store %arg15[%720, %c0_238, %c0_239], %723 {strides = array<i32>} : memref<8x8x128xf32, #tpu.memory_space<vmem>>, vector<1x8x128xf32>,
    %724 = vector.shape_cast %715 : vector<8x1xi1> to vector<8x1xi1>
    %725 = vector.broadcast %724 : vector<8x1xi1> to vector<8x128xi1>
    %726 = arith.select %725, %713, %625 : vector<8x128xi1>, vector<8x128xf32>
    %c7_i32_240 = arith.constant 7 : i32
    %c7_i32_241 = arith.constant 7 : i32
    %727 = arith.subi %c7_i32_241, %c7_i32_240 : i32
    %c0_242 = arith.constant 0 : index
    %c0_243 = arith.constant 0 : index
    %728 = vector.load %arg5[%c0_242, %c0_243] : memref<128x384xf32, #tpu.memory_space<vmem>>, vector<128x384xf32>
    %cst_244 = arith.constant dense<0.000000e+00> : vector<8x384xf32>
    %729 = tpu.matmul %676, %728, %cst_244 {dimension_numbers = #tpu.dot_dimension_numbers<[1], [0], [0], [1], [0, 0, 1, 1], [], []>} : vector<8x128xf32>, vector<128x384xf32>, vector<8x384xf32> -> vector<8x384xf32>
    %730 = arith.index_cast %c7_i32_240 : i32 to index
    %c0_245 = arith.constant 0 : index
    %c0_246 = arith.constant 0 : index
    %731 = vector.load %arg13[%730, %c0_245, %c0_246] : memref<8x8x384xf32, #tpu.memory_space<vmem>>, vector<1x8x384xf32>
    %732 = vector.shape_cast %731 : vector<1x8x384xf32> to vector<8x384xf32>
    %733 = vector.extract_strided_slice %732 {offsets = [0, 0], sizes = [8, 128], strides = [1, 1]} : vector<8x384xf32> to vector<8x128xf32>
    %734 = vector.extract_strided_slice %732 {offsets = [0, 128], sizes = [8, 128], strides = [1, 1]} : vector<8x384xf32> to vector<8x128xf32>
    %735 = vector.extract_strided_slice %732 {offsets = [0, 256], sizes = [8, 128], strides = [1, 1]} : vector<8x384xf32> to vector<8x128xf32>
    %736 = vector.extract_strided_slice %729 {offsets = [0, 0], sizes = [8, 128], strides = [1, 1]} : vector<8x384xf32> to vector<8x128xf32>
    %737 = vector.extract_strided_slice %729 {offsets = [0, 128], sizes = [8, 128], strides = [1, 1]} : vector<8x384xf32> to vector<8x128xf32>
    %738 = vector.extract_strided_slice %729 {offsets = [0, 256], sizes = [8, 128], strides = [1, 1]} : vector<8x384xf32> to vector<8x128xf32>
    %739 = arith.addf %733, %736 : vector<8x128xf32>
    %cst_247 = arith.constant 5.000000e-01 : f32
    %740 = vector.broadcast %cst_247 : f32 to vector<8x128xf32>
    %741 = arith.mulf %740, %739 : vector<8x128xf32>
    %742 = math.tanh %741 : vector<8x128xf32>
    %cst_248 = arith.constant 1.000000e+00 : f32
    %743 = vector.broadcast %cst_248 : f32 to vector<8x128xf32>
    %744 = arith.addf %742, %743 : vector<8x128xf32>
    %cst_249 = arith.constant 5.000000e-01 : f32
    %745 = vector.broadcast %cst_249 : f32 to vector<8x128xf32>
    %746 = arith.mulf %745, %744 : vector<8x128xf32>
    %747 = arith.addf %734, %737 : vector<8x128xf32>
    %cst_250 = arith.constant 5.000000e-01 : f32
    %748 = vector.broadcast %cst_250 : f32 to vector<8x128xf32>
    %749 = arith.mulf %748, %747 : vector<8x128xf32>
    %750 = math.tanh %749 : vector<8x128xf32>
    %cst_251 = arith.constant 1.000000e+00 : f32
    %751 = vector.broadcast %cst_251 : f32 to vector<8x128xf32>
    %752 = arith.addf %750, %751 : vector<8x128xf32>
    %cst_252 = arith.constant 5.000000e-01 : f32
    %753 = vector.broadcast %cst_252 : f32 to vector<8x128xf32>
    %754 = arith.mulf %753, %752 : vector<8x128xf32>
    %755 = vector.broadcast %17 : vector<1x128xf32> to vector<8x128xf32>
    %756 = arith.addf %738, %755 : vector<8x128xf32>
    %757 = arith.mulf %746, %756 : vector<8x128xf32>
    %758 = arith.addf %735, %757 : vector<8x128xf32>
    %759 = math.tanh %758 : vector<8x128xf32>
    %cst_253 = arith.constant 1.000000e+00 : f32
    %760 = vector.broadcast %cst_253 : f32 to vector<8x128xf32>
    %761 = arith.subf %760, %754 : vector<8x128xf32>
    %762 = arith.mulf %761, %759 : vector<8x128xf32>
    %763 = arith.mulf %754, %676 : vector<8x128xf32>
    %764 = arith.addf %762, %763 : vector<8x128xf32>
    %765 = vector.broadcast %c7_i32_240 : i32 to vector<8x1xi32>
    %766 = arith.cmpi sgt, %0, %765 : vector<8x1xi32>
    %cst_254 = arith.constant 0.000000e+00 : f32
    %767 = vector.shape_cast %766 : vector<8x1xi1> to vector<8x1xi1>
    %768 = vector.broadcast %767 : vector<8x1xi1> to vector<8x128xi1>
    %769 = vector.broadcast %cst_254 : f32 to vector<8x128xf32>
    %770 = arith.select %768, %764, %769 : vector<8x128xi1>, vector<8x128xf32>
    %771 = arith.index_cast %c7_i32_240 : i32 to index
    %c0_255 = arith.constant 0 : index
    %c0_256 = arith.constant 0 : index
    %772 = vector.load %arg11[%771, %c0_255, %c0_256] : memref<8x8x128xf32, #tpu.memory_space<vmem>>, vector<1x8x128xf32>
    %773 = vector.shape_cast %772 : vector<1x8x128xf32> to vector<8x128xf32>
    %774 = vector.shape_cast %770 : vector<8x128xf32> to vector<1x8x128xf32>
    tpu.vector_store %arg11[%771, %c0_255, %c0_256], %774 {strides = array<i32>} : memref<8x8x128xf32, #tpu.memory_space<vmem>>, vector<1x8x128xf32>,
    %775 = vector.shape_cast %766 : vector<8x1xi1> to vector<8x1xi1>
    %776 = vector.broadcast %775 : vector<8x1xi1> to vector<8x128xi1>
    %777 = arith.select %776, %764, %676 : vector<8x128xi1>, vector<8x128xf32>
    %c0_257 = arith.constant 0 : index
    %c0_258 = arith.constant 0 : index
    %778 = vector.load %arg6[%c0_257, %c0_258] : memref<128x384xf32, #tpu.memory_space<vmem>>, vector<128x384xf32>
    %cst_259 = arith.constant dense<0.000000e+00> : vector<8x384xf32>
    %779 = tpu.matmul %726, %778, %cst_259 {dimension_numbers = #tpu.dot_dimension_numbers<[1], [0], [0], [1], [0, 0, 1, 1], [], []>} : vector<8x128xf32>, vector<128x384xf32>, vector<8x384xf32> -> vector<8x384xf32>
    %780 = arith.index_cast %727 : i32 to index
    %c0_260 = arith.constant 0 : index
    %c0_261 = arith.constant 0 : index
    %781 = vector.load %arg14[%780, %c0_260, %c0_261] : memref<8x8x384xf32, #tpu.memory_space<vmem>>, vector<1x8x384xf32>
    %782 = vector.shape_cast %781 : vector<1x8x384xf32> to vector<8x384xf32>
    %783 = vector.extract_strided_slice %782 {offsets = [0, 0], sizes = [8, 128], strides = [1, 1]} : vector<8x384xf32> to vector<8x128xf32>
    %784 = vector.extract_strided_slice %782 {offsets = [0, 128], sizes = [8, 128], strides = [1, 1]} : vector<8x384xf32> to vector<8x128xf32>
    %785 = vector.extract_strided_slice %782 {offsets = [0, 256], sizes = [8, 128], strides = [1, 1]} : vector<8x384xf32> to vector<8x128xf32>
    %786 = vector.extract_strided_slice %779 {offsets = [0, 0], sizes = [8, 128], strides = [1, 1]} : vector<8x384xf32> to vector<8x128xf32>
    %787 = vector.extract_strided_slice %779 {offsets = [0, 128], sizes = [8, 128], strides = [1, 1]} : vector<8x384xf32> to vector<8x128xf32>
    %788 = vector.extract_strided_slice %779 {offsets = [0, 256], sizes = [8, 128], strides = [1, 1]} : vector<8x384xf32> to vector<8x128xf32>
    %789 = arith.addf %783, %786 : vector<8x128xf32>
    %cst_262 = arith.constant 5.000000e-01 : f32
    %790 = vector.broadcast %cst_262 : f32 to vector<8x128xf32>
    %791 = arith.mulf %790, %789 : vector<8x128xf32>
    %792 = math.tanh %791 : vector<8x128xf32>
    %cst_263 = arith.constant 1.000000e+00 : f32
    %793 = vector.broadcast %cst_263 : f32 to vector<8x128xf32>
    %794 = arith.addf %792, %793 : vector<8x128xf32>
    %cst_264 = arith.constant 5.000000e-01 : f32
    %795 = vector.broadcast %cst_264 : f32 to vector<8x128xf32>
    %796 = arith.mulf %795, %794 : vector<8x128xf32>
    %797 = arith.addf %784, %787 : vector<8x128xf32>
    %cst_265 = arith.constant 5.000000e-01 : f32
    %798 = vector.broadcast %cst_265 : f32 to vector<8x128xf32>
    %799 = arith.mulf %798, %797 : vector<8x128xf32>
    %800 = math.tanh %799 : vector<8x128xf32>
    %cst_266 = arith.constant 1.000000e+00 : f32
    %801 = vector.broadcast %cst_266 : f32 to vector<8x128xf32>
    %802 = arith.addf %800, %801 : vector<8x128xf32>
    %cst_267 = arith.constant 5.000000e-01 : f32
    %803 = vector.broadcast %cst_267 : f32 to vector<8x128xf32>
    %804 = arith.mulf %803, %802 : vector<8x128xf32>
    %805 = vector.broadcast %18 : vector<1x128xf32> to vector<8x128xf32>
    %806 = arith.addf %788, %805 : vector<8x128xf32>
    %807 = arith.mulf %796, %806 : vector<8x128xf32>
    %808 = arith.addf %785, %807 : vector<8x128xf32>
    %809 = math.tanh %808 : vector<8x128xf32>
    %cst_268 = arith.constant 1.000000e+00 : f32
    %810 = vector.broadcast %cst_268 : f32 to vector<8x128xf32>
    %811 = arith.subf %810, %804 : vector<8x128xf32>
    %812 = arith.mulf %811, %809 : vector<8x128xf32>
    %813 = arith.mulf %804, %726 : vector<8x128xf32>
    %814 = arith.addf %812, %813 : vector<8x128xf32>
    %815 = vector.broadcast %727 : i32 to vector<8x1xi32>
    %816 = arith.cmpi sgt, %0, %815 : vector<8x1xi32>
    %cst_269 = arith.constant 0.000000e+00 : f32
    %817 = vector.shape_cast %816 : vector<8x1xi1> to vector<8x1xi1>
    %818 = vector.broadcast %817 : vector<8x1xi1> to vector<8x128xi1>
    %819 = vector.broadcast %cst_269 : f32 to vector<8x128xf32>
    %820 = arith.select %818, %814, %819 : vector<8x128xi1>, vector<8x128xf32>
    %821 = arith.index_cast %727 : i32 to index
    %c0_270 = arith.constant 0 : index
    %c0_271 = arith.constant 0 : index
    %822 = vector.load %arg15[%821, %c0_270, %c0_271] : memref<8x8x128xf32, #tpu.memory_space<vmem>>, vector<1x8x128xf32>
    %823 = vector.shape_cast %822 : vector<1x8x128xf32> to vector<8x128xf32>
    %824 = vector.shape_cast %820 : vector<8x128xf32> to vector<1x8x128xf32>
    tpu.vector_store %arg15[%821, %c0_270, %c0_271], %824 {strides = array<i32>} : memref<8x8x128xf32, #tpu.memory_space<vmem>>, vector<1x8x128xf32>,
    %825 = vector.shape_cast %816 : vector<8x1xi1> to vector<8x1xi1>
    %826 = vector.broadcast %825 : vector<8x1xi1> to vector<8x128xi1>
    %827 = arith.select %826, %814, %726 : vector<8x128xi1>, vector<8x128xf32>
    %c8_i32 = arith.constant 8 : i32
    %c0_272 = arith.constant 0 : index
    %c0_273 = arith.constant 0 : index
    %c0_274 = arith.constant 0 : index
    %828 = vector.load %arg12[%c0_272, %c0_273, %c0_274] : memref<2x8x128xf32, #tpu.memory_space<vmem>>, vector<1x8x128xf32>
    %829 = vector.shape_cast %828 : vector<1x8x128xf32> to vector<8x128xf32>
    %830 = vector.shape_cast %777 : vector<8x128xf32> to vector<1x8x128xf32>
    tpu.vector_store %arg12[%c0_272, %c0_273, %c0_274], %830 {strides = array<i32>} : memref<2x8x128xf32, #tpu.memory_space<vmem>>, vector<1x8x128xf32>,
    %c1 = arith.constant 1 : index
    %c0_275 = arith.constant 0 : index
    %c0_276 = arith.constant 0 : index
    %831 = vector.load %arg12[%c1, %c0_275, %c0_276] : memref<2x8x128xf32, #tpu.memory_space<vmem>>, vector<1x8x128xf32>
    %832 = vector.shape_cast %831 : vector<1x8x128xf32> to vector<8x128xf32>
    %833 = vector.shape_cast %827 : vector<8x128xf32> to vector<1x8x128xf32>
    tpu.vector_store %arg12[%c1, %c0_275, %c0_276], %833 {strides = array<i32>} : memref<2x8x128xf32, #tpu.memory_space<vmem>>, vector<1x8x128xf32>,
    %c0_277 = arith.constant 0 : index
    %c0_278 = arith.constant 0 : index
    %c0_279 = arith.constant 0 : index
    %834 = vector.load %arg11[%c0_277, %c0_278, %c0_279] : memref<8x8x128xf32, #tpu.memory_space<vmem>>, vector<8x8x128xf32>
    %c0_280 = arith.constant 0 : index
    %c0_281 = arith.constant 0 : index
    %c0_282 = arith.constant 0 : index
    %835 = vector.load %arg15[%c0_280, %c0_281, %c0_282] : memref<8x8x128xf32, #tpu.memory_space<vmem>>, vector<8x8x128xf32>
    %836 = arith.addf %834, %835 : vector<8x8x128xf32>
    %c0_283 = arith.constant 0 : index
    %c0_284 = arith.constant 0 : index
    %c0_285 = arith.constant 0 : index
    %837 = vector.load %arg11[%c0_283, %c0_284, %c0_285] : memref<8x8x128xf32, #tpu.memory_space<vmem>>, vector<8x8x128xf32>
    tpu.vector_store %arg11[%c0_283, %c0_284, %c0_285], %836 {strides = array<i32>} : memref<8x8x128xf32, #tpu.memory_space<vmem>>, vector<8x8x128xf32>,
    return
  }
  func.func @transform_0(%arg0: i32) -> (i32, i32, i32) {
    %c0_i32 = arith.constant 0 : i32
    %c0_i32_0 = arith.constant 0 : i32
    %c0_i32_1 = arith.constant 0 : i32
    return %c0_i32, %arg0, %c0_i32_0 : i32, i32, i32
  }
  func.func @transform_1(%arg0: i32) -> (i32, i32) {
    %c0_i32 = arith.constant 0 : i32
    %c0_i32_0 = arith.constant 0 : i32
    return %arg0, %c0_i32 : i32, i32
  }
  func.func @transform_2(%arg0: i32) -> (i32, i32) {
    %c0_i32 = arith.constant 0 : i32
    %c0_i32_0 = arith.constant 0 : i32
    %c0_i32_1 = arith.constant 0 : i32
    return %c0_i32, %c0_i32_0 : i32, i32
  }
  func.func @transform_3(%arg0: i32) -> (i32, i32) {
    %c0_i32 = arith.constant 0 : i32
    %c0_i32_0 = arith.constant 0 : i32
    %c0_i32_1 = arith.constant 0 : i32
    return %c0_i32, %c0_i32_0 : i32, i32
  }
  func.func @transform_4(%arg0: i32) -> (i32, i32) {
    %c0_i32 = arith.constant 0 : i32
    %c0_i32_0 = arith.constant 0 : i32
    %c0_i32_1 = arith.constant 0 : i32
    return %c0_i32, %c0_i32_0 : i32, i32
  }
  func.func @transform_5(%arg0: i32) -> (i32, i32) {
    %c0_i32 = arith.constant 0 : i32
    %c0_i32_0 = arith.constant 0 : i32
    %c0_i32_1 = arith.constant 0 : i32
    return %c0_i32, %c0_i32_0 : i32, i32
  }
  func.func @transform_6(%arg0: i32) -> (i32, i32) {
    %c0_i32 = arith.constant 0 : i32
    %c0_i32_0 = arith.constant 0 : i32
    %c0_i32_1 = arith.constant 0 : i32
    return %c0_i32, %c0_i32_0 : i32, i32
  }
  func.func @transform_7(%arg0: i32) -> (i32, i32) {
    %c0_i32 = arith.constant 0 : i32
    %c0_i32_0 = arith.constant 0 : i32
    %c0_i32_1 = arith.constant 0 : i32
    return %c0_i32, %c0_i32_0 : i32, i32
  }
  func.func @transform_8(%arg0: i32) -> (i32, i32) {
    %c0_i32 = arith.constant 0 : i32
    %c0_i32_0 = arith.constant 0 : i32
    %c0_i32_1 = arith.constant 0 : i32
    return %c0_i32, %c0_i32_0 : i32, i32
  }
  func.func @transform_9(%arg0: i32) -> (i32, i32) {
    %c0_i32 = arith.constant 0 : i32
    %c0_i32_0 = arith.constant 0 : i32
    %c0_i32_1 = arith.constant 0 : i32
    return %c0_i32, %c0_i32_0 : i32, i32
  }
  func.func @transform_10(%arg0: i32) -> (i32, i32, i32) {
    %c0_i32 = arith.constant 0 : i32
    %c0_i32_0 = arith.constant 0 : i32
    %c0_i32_1 = arith.constant 0 : i32
    return %c0_i32, %arg0, %c0_i32_0 : i32, i32, i32
  }
  func.func @transform_11(%arg0: i32) -> (i32, i32, i32) {
    %c0_i32 = arith.constant 0 : i32
    %c0_i32_0 = arith.constant 0 : i32
    %c0_i32_1 = arith.constant 0 : i32
    return %c0_i32, %arg0, %c0_i32_0 : i32, i32, i32
  }
}

module attributes {stable_mosaic.version = 11 : i64} {
  func.func @bigru_kernel(%arg0: i32, %arg1: memref<8x8x128xf32, #tpu.memory_space<vmem>>, %arg2: memref<8x1xi32, #tpu.memory_space<vmem>>, %arg3: memref<128x384xf32, #tpu.memory_space<vmem>>, %arg4: memref<128x384xf32, #tpu.memory_space<vmem>>, %arg5: memref<128x384xf32, #tpu.memory_space<vmem>>, %arg6: memref<128x384xf32, #tpu.memory_space<vmem>>, %arg7: memref<1x384xf32, #tpu.memory_space<vmem>>, %arg8: memref<1x384xf32, #tpu.memory_space<vmem>>, %arg9: memref<1x128xf32, #tpu.memory_space<vmem>>, %arg10: memref<1x128xf32, #tpu.memory_space<vmem>>, %arg11: memref<8x8x128xf32, #tpu.memory_space<vmem>>, %arg12: memref<2x8x128xf32, #tpu.memory_space<vmem>>, %arg13: memref<8x8x384xf32, #tpu.memory_space<vmem>>, %arg14: memref<8x8x384xf32, #tpu.memory_space<vmem>>, %arg15: memref<8x8x128xf32, #tpu.memory_space<vmem>>) attributes {dimension_semantics = [#tpu.dimension_semantics<parallel>], iteration_bounds = array<i64: 1>, scalar_prefetch = 0 : i64, scratch_operands = 3 : i64, tpu.core_type = #tpu.core_type<tc>, window_params = [{transform_indices = @transform_0, window_bounds = array<i64: 8, 8, 128>}, {transform_indices = @transform_1, window_bounds = array<i64: 8, 1>}, {pipeline_mode = #tpu.pipeline_mode<synchronous>, transform_indices = @transform_2, window_bounds = array<i64: 128, 384>}, {pipeline_mode = #tpu.pipeline_mode<synchronous>, transform_indices = @transform_3, window_bounds = array<i64: 128, 384>}, {pipeline_mode = #tpu.pipeline_mode<synchronous>, transform_indices = @transform_4, window_bounds = array<i64: 128, 384>}, {pipeline_mode = #tpu.pipeline_mode<synchronous>, transform_indices = @transform_5, window_bounds = array<i64: 128, 384>}, {pipeline_mode = #tpu.pipeline_mode<synchronous>, transform_indices = @transform_6, window_bounds = array<i64: 1, 384>}, {pipeline_mode = #tpu.pipeline_mode<synchronous>, transform_indices = @transform_7, window_bounds = array<i64: 1, 384>}, {pipeline_mode = #tpu.pipeline_mode<synchronous>, transform_indices = @transform_8, window_bounds = array<i64: 1, 128>}, {pipeline_mode = #tpu.pipeline_mode<synchronous>, transform_indices = @transform_9, window_bounds = array<i64: 1, 128>}, {transform_indices = @transform_10, window_bounds = array<i64: 8, 8, 128>}, {transform_indices = @transform_11, window_bounds = array<i64: 2, 8, 128>}]} {
    %c0 = arith.constant 0 : index
    %c0_0 = arith.constant 0 : index
    %0 = vector.load %arg2[%c0, %c0_0] : memref<8x1xi32, #tpu.memory_space<vmem>>, vector<8x1xi32>
    %c0_1 = arith.constant 0 : index
    %c0_2 = arith.constant 0 : index
    %c0_3 = arith.constant 0 : index
    %1 = vector.load %arg1[%c0_1, %c0_2, %c0_3] : memref<8x8x128xf32, #tpu.memory_space<vmem>>, vector<8x8x128xf32>
    %2 = vector.shape_cast %1 : vector<8x8x128xf32> to vector<64x128xf32>
    %c0_4 = arith.constant 0 : index
    %c0_5 = arith.constant 0 : index
    %3 = vector.load %arg3[%c0_4, %c0_5] : memref<128x384xf32, #tpu.memory_space<vmem>>, vector<128x384xf32>
    %cst = arith.constant dense<0.000000e+00> : vector<64x384xf32>
    %4 = tpu.matmul %2, %3, %cst {dimension_numbers = #tpu.dot_dimension_numbers<[1], [0], [0], [1], [0, 0, 1, 1], [], []>} : vector<64x128xf32>, vector<128x384xf32>, vector<64x384xf32> -> vector<64x384xf32>
    %c0_6 = arith.constant 0 : index
    %c0_7 = arith.constant 0 : index
    %5 = vector.load %arg7[%c0_6, %c0_7] : memref<1x384xf32, #tpu.memory_space<vmem>>, vector<1x384xf32>
    %6 = vector.broadcast %5 : vector<1x384xf32> to vector<64x384xf32>
    %7 = arith.addf %4, %6 : vector<64x384xf32>
    %8 = vector.shape_cast %7 : vector<64x384xf32> to vector<8x8x384xf32>
    %c0_8 = arith.constant 0 : index
    %c0_9 = arith.constant 0 : index
    %c0_10 = arith.constant 0 : index
    %9 = vector.load %arg13[%c0_8, %c0_9, %c0_10] : memref<8x8x384xf32, #tpu.memory_space<vmem>>, vector<8x8x384xf32>
    tpu.vector_store %arg13[%c0_8, %c0_9, %c0_10], %8 {strides = array<i32>} : memref<8x8x384xf32, #tpu.memory_space<vmem>>, vector<8x8x384xf32>,
    %c0_11 = arith.constant 0 : index
    %c0_12 = arith.constant 0 : index
    %10 = vector.load %arg4[%c0_11, %c0_12] : memref<128x384xf32, #tpu.memory_space<vmem>>, vector<128x384xf32>
    %cst_13 = arith.constant dense<0.000000e+00> : vector<64x384xf32>
    %11 = tpu.matmul %2, %10, %cst_13 {dimension_numbers = #tpu.dot_dimension_numbers<[1], [0], [0], [1], [0, 0, 1, 1], [], []>} : vector<64x128xf32>, vector<128x384xf32>, vector<64x384xf32> -> vector<64x384xf32>
    %c0_14 = arith.constant 0 : index
    %c0_15 = arith.constant 0 : index
    %12 = vector.load %arg8[%c0_14, %c0_15] : memref<1x384xf32, #tpu.memory_space<vmem>>, vector<1x384xf32>
    %13 = vector.broadcast %12 : vector<1x384xf32> to vector<64x384xf32>
    %14 = arith.addf %11, %13 : vector<64x384xf32>
    %15 = vector.shape_cast %14 : vector<64x384xf32> to vector<8x8x384xf32>
    %c0_16 = arith.constant 0 : index
    %c0_17 = arith.constant 0 : index
    %c0_18 = arith.constant 0 : index
    %16 = vector.load %arg14[%c0_16, %c0_17, %c0_18] : memref<8x8x384xf32, #tpu.memory_space<vmem>>, vector<8x8x384xf32>
    tpu.vector_store %arg14[%c0_16, %c0_17, %c0_18], %15 {strides = array<i32>} : memref<8x8x384xf32, #tpu.memory_space<vmem>>, vector<8x8x384xf32>,
    %c0_19 = arith.constant 0 : index
    %c0_20 = arith.constant 0 : index
    %17 = vector.load %arg9[%c0_19, %c0_20] : memref<1x128xf32, #tpu.memory_space<vmem>>, vector<1x128xf32>
    %c0_21 = arith.constant 0 : index
    %c0_22 = arith.constant 0 : index
    %18 = vector.load %arg10[%c0_21, %c0_22] : memref<1x128xf32, #tpu.memory_space<vmem>>, vector<1x128xf32>
    %cst_23 = arith.constant 0.000000e+00 : f32
    %19 = vector.broadcast %cst_23 : f32 to vector<8x128xf32>
    %c0_i32 = arith.constant 0 : i32
    %c7_i32 = arith.constant 7 : i32
    %20 = arith.subi %c7_i32, %c0_i32 : i32
    %c0_24 = arith.constant 0 : index
    %c0_25 = arith.constant 0 : index
    %21 = vector.load %arg5[%c0_24, %c0_25] : memref<128x384xf32, #tpu.memory_space<vmem>>, vector<128x384xf32>
    %cst_26 = arith.constant dense<0.000000e+00> : vector<8x384xf32>
    %22 = tpu.matmul %19, %21, %cst_26 {dimension_numbers = #tpu.dot_dimension_numbers<[1], [0], [0], [1], [0, 0, 1, 1], [], []>} : vector<8x128xf32>, vector<128x384xf32>, vector<8x384xf32> -> vector<8x384xf32>
    %23 = arith.index_cast %c0_i32 : i32 to index
    %c0_27 = arith.constant 0 : index
    %c0_28 = arith.constant 0 : index
    %24 = vector.load %arg13[%23, %c0_27, %c0_28] : memref<8x8x384xf32, #tpu.memory_space<vmem>>, vector<1x8x384xf32>
    %25 = vector.shape_cast %24 : vector<1x8x384xf32> to vector<8x384xf32>
    %26 = vector.extract_strided_slice %25 {offsets = [0, 0], sizes = [8, 128], strides = [1, 1]} : vector<8x384xf32> to vector<8x128xf32>
    %27 = vector.extract_strided_slice %25 {offsets = [0, 128], sizes = [8, 128], strides = [1, 1]} : vector<8x384xf32> to vector<8x128xf32>
    %28 = vector.extract_strided_slice %25 {offsets = [0, 256], sizes = [8, 128], strides = [1, 1]} : vector<8x384xf32> to vector<8x128xf32>
    %29 = vector.extract_strided_slice %22 {offsets = [0, 0], sizes = [8, 128], strides = [1, 1]} : vector<8x384xf32> to vector<8x128xf32>
    %30 = vector.extract_strided_slice %22 {offsets = [0, 128], sizes = [8, 128], strides = [1, 1]} : vector<8x384xf32> to vector<8x128xf32>
    %31 = vector.extract_strided_slice %22 {offsets = [0, 256], sizes = [8, 128], strides = [1, 1]} : vector<8x384xf32> to vector<8x128xf32>
    %32 = arith.addf %26, %29 : vector<8x128xf32>
    %cst_29 = arith.constant 5.000000e-01 : f32
    %33 = vector.broadcast %cst_29 : f32 to vector<8x128xf32>
    %34 = arith.mulf %33, %32 : vector<8x128xf32>
    %35 = math.tanh %34 : vector<8x128xf32>
    %cst_30 = arith.constant 1.000000e+00 : f32
    %36 = vector.broadcast %cst_30 : f32 to vector<8x128xf32>
    %37 = arith.addf %35, %36 : vector<8x128xf32>
    %cst_31 = arith.constant 5.000000e-01 : f32
    %38 = vector.broadcast %cst_31 : f32 to vector<8x128xf32>
    %39 = arith.mulf %38, %37 : vector<8x128xf32>
    %40 = arith.addf %27, %30 : vector<8x128xf32>
    %cst_32 = arith.constant 5.000000e-01 : f32
    %41 = vector.broadcast %cst_32 : f32 to vector<8x128xf32>
    %42 = arith.mulf %41, %40 : vector<8x128xf32>
    %43 = math.tanh %42 : vector<8x128xf32>
    %cst_33 = arith.constant 1.000000e+00 : f32
    %44 = vector.broadcast %cst_33 : f32 to vector<8x128xf32>
    %45 = arith.addf %43, %44 : vector<8x128xf32>
    %cst_34 = arith.constant 5.000000e-01 : f32
    %46 = vector.broadcast %cst_34 : f32 to vector<8x128xf32>
    %47 = arith.mulf %46, %45 : vector<8x128xf32>
    %48 = vector.broadcast %17 : vector<1x128xf32> to vector<8x128xf32>
    %49 = arith.addf %31, %48 : vector<8x128xf32>
    %50 = arith.mulf %39, %49 : vector<8x128xf32>
    %51 = arith.addf %28, %50 : vector<8x128xf32>
    %52 = math.tanh %51 : vector<8x128xf32>
    %cst_35 = arith.constant 1.000000e+00 : f32
    %53 = vector.broadcast %cst_35 : f32 to vector<8x128xf32>
    %54 = arith.subf %53, %47 : vector<8x128xf32>
    %55 = arith.mulf %54, %52 : vector<8x128xf32>
    %56 = arith.mulf %47, %19 : vector<8x128xf32>
    %57 = arith.addf %55, %56 : vector<8x128xf32>
    %58 = vector.broadcast %c0_i32 : i32 to vector<8x1xi32>
    %59 = arith.cmpi sgt, %0, %58 : vector<8x1xi32>
    %cst_36 = arith.constant 0.000000e+00 : f32
    %60 = vector.shape_cast %59 : vector<8x1xi1> to vector<8x1xi1>
    %61 = vector.broadcast %60 : vector<8x1xi1> to vector<8x128xi1>
    %62 = vector.broadcast %cst_36 : f32 to vector<8x128xf32>
    %63 = arith.select %61, %57, %62 : vector<8x128xi1>, vector<8x128xf32>
    %64 = arith.index_cast %c0_i32 : i32 to index
    %c0_37 = arith.constant 0 : index
    %c0_38 = arith.constant 0 : index
    %65 = vector.load %arg11[%64, %c0_37, %c0_38] : memref<8x8x128xf32, #tpu.memory_space<vmem>>, vector<1x8x128xf32>
    %66 = vector.shape_cast %65 : vector<1x8x128xf32> to vector<8x128xf32>
    %67 = vector.shape_cast %63 : vector<8x128xf32> to vector<1x8x128xf32>
    tpu.vector_store %arg11[%64, %c0_37, %c0_38], %67 {strides = array<i32>} : memref<8x8x128xf32, #tpu.memory_space<vmem>>, vector<1x8x128xf32>,
    %68 = vector.shape_cast %59 : vector<8x1xi1> to vector<8x1xi1>
    %69 = vector.broadcast %68 : vector<8x1xi1> to vector<8x128xi1>
    %70 = arith.select %69, %57, %19 : vector<8x128xi1>, vector<8x128xf32>
    %c0_39 = arith.constant 0 : index
    %c0_40 = arith.constant 0 : index
    %71 = vector.load %arg6[%c0_39, %c0_40] : memref<128x384xf32, #tpu.memory_space<vmem>>, vector<128x384xf32>
    %cst_41 = arith.constant dense<0.000000e+00> : vector<8x384xf32>
    %72 = tpu.matmul %19, %71, %cst_41 {dimension_numbers = #tpu.dot_dimension_numbers<[1], [0], [0], [1], [0, 0, 1, 1], [], []>} : vector<8x128xf32>, vector<128x384xf32>, vector<8x384xf32> -> vector<8x384xf32>
    %73 = arith.index_cast %20 : i32 to index
    %c0_42 = arith.constant 0 : index
    %c0_43 = arith.constant 0 : index
    %74 = vector.load %arg14[%73, %c0_42, %c0_43] : memref<8x8x384xf32, #tpu.memory_space<vmem>>, vector<1x8x384xf32>
    %75 = vector.shape_cast %74 : vector<1x8x384xf32> to vector<8x384xf32>
    %76 = vector.extract_strided_slice %75 {offsets = [0, 0], sizes = [8, 128], strides = [1, 1]} : vector<8x384xf32> to vector<8x128xf32>
    %77 = vector.extract_strided_slice %75 {offsets = [0, 128], sizes = [8, 128], strides = [1, 1]} : vector<8x384xf32> to vector<8x128xf32>
    %78 = vector.extract_strided_slice %75 {offsets = [0, 256], sizes = [8, 128], strides = [1, 1]} : vector<8x384xf32> to vector<8x128xf32>
    %79 = vector.extract_strided_slice %72 {offsets = [0, 0], sizes = [8, 128], strides = [1, 1]} : vector<8x384xf32> to vector<8x128xf32>
    %80 = vector.extract_strided_slice %72 {offsets = [0, 128], sizes = [8, 128], strides = [1, 1]} : vector<8x384xf32> to vector<8x128xf32>
    %81 = vector.extract_strided_slice %72 {offsets = [0, 256], sizes = [8, 128], strides = [1, 1]} : vector<8x384xf32> to vector<8x128xf32>
    %82 = arith.addf %76, %79 : vector<8x128xf32>
    %cst_44 = arith.constant 5.000000e-01 : f32
    %83 = vector.broadcast %cst_44 : f32 to vector<8x128xf32>
    %84 = arith.mulf %83, %82 : vector<8x128xf32>
    %85 = math.tanh %84 : vector<8x128xf32>
    %cst_45 = arith.constant 1.000000e+00 : f32
    %86 = vector.broadcast %cst_45 : f32 to vector<8x128xf32>
    %87 = arith.addf %85, %86 : vector<8x128xf32>
    %cst_46 = arith.constant 5.000000e-01 : f32
    %88 = vector.broadcast %cst_46 : f32 to vector<8x128xf32>
    %89 = arith.mulf %88, %87 : vector<8x128xf32>
    %90 = arith.addf %77, %80 : vector<8x128xf32>
    %cst_47 = arith.constant 5.000000e-01 : f32
    %91 = vector.broadcast %cst_47 : f32 to vector<8x128xf32>
    %92 = arith.mulf %91, %90 : vector<8x128xf32>
    %93 = math.tanh %92 : vector<8x128xf32>
    %cst_48 = arith.constant 1.000000e+00 : f32
    %94 = vector.broadcast %cst_48 : f32 to vector<8x128xf32>
    %95 = arith.addf %93, %94 : vector<8x128xf32>
    %cst_49 = arith.constant 5.000000e-01 : f32
    %96 = vector.broadcast %cst_49 : f32 to vector<8x128xf32>
    %97 = arith.mulf %96, %95 : vector<8x128xf32>
    %98 = vector.broadcast %18 : vector<1x128xf32> to vector<8x128xf32>
    %99 = arith.addf %81, %98 : vector<8x128xf32>
    %100 = arith.mulf %89, %99 : vector<8x128xf32>
    %101 = arith.addf %78, %100 : vector<8x128xf32>
    %102 = math.tanh %101 : vector<8x128xf32>
    %cst_50 = arith.constant 1.000000e+00 : f32
    %103 = vector.broadcast %cst_50 : f32 to vector<8x128xf32>
    %104 = arith.subf %103, %97 : vector<8x128xf32>
    %105 = arith.mulf %104, %102 : vector<8x128xf32>
    %106 = arith.mulf %97, %19 : vector<8x128xf32>
    %107 = arith.addf %105, %106 : vector<8x128xf32>
    %108 = vector.broadcast %20 : i32 to vector<8x1xi32>
    %109 = arith.cmpi sgt, %0, %108 : vector<8x1xi32>
    %cst_51 = arith.constant 0.000000e+00 : f32
    %110 = vector.shape_cast %109 : vector<8x1xi1> to vector<8x1xi1>
    %111 = vector.broadcast %110 : vector<8x1xi1> to vector<8x128xi1>
    %112 = vector.broadcast %cst_51 : f32 to vector<8x128xf32>
    %113 = arith.select %111, %107, %112 : vector<8x128xi1>, vector<8x128xf32>
    %114 = arith.index_cast %20 : i32 to index
    %c0_52 = arith.constant 0 : index
    %c0_53 = arith.constant 0 : index
    %115 = vector.load %arg15[%114, %c0_52, %c0_53] : memref<8x8x128xf32, #tpu.memory_space<vmem>>, vector<1x8x128xf32>
    %116 = vector.shape_cast %115 : vector<1x8x128xf32> to vector<8x128xf32>
    %117 = vector.shape_cast %113 : vector<8x128xf32> to vector<1x8x128xf32>
    tpu.vector_store %arg15[%114, %c0_52, %c0_53], %117 {strides = array<i32>} : memref<8x8x128xf32, #tpu.memory_space<vmem>>, vector<1x8x128xf32>,
    %118 = vector.shape_cast %109 : vector<8x1xi1> to vector<8x1xi1>
    %119 = vector.broadcast %118 : vector<8x1xi1> to vector<8x128xi1>
    %120 = arith.select %119, %107, %19 : vector<8x128xi1>, vector<8x128xf32>
    %c1_i32 = arith.constant 1 : i32
    %c7_i32_54 = arith.constant 7 : i32
    %121 = arith.subi %c7_i32_54, %c1_i32 : i32
    %c0_55 = arith.constant 0 : index
    %c0_56 = arith.constant 0 : index
    %122 = vector.load %arg5[%c0_55, %c0_56] : memref<128x384xf32, #tpu.memory_space<vmem>>, vector<128x384xf32>
    %cst_57 = arith.constant dense<0.000000e+00> : vector<8x384xf32>
    %123 = tpu.matmul %70, %122, %cst_57 {dimension_numbers = #tpu.dot_dimension_numbers<[1], [0], [0], [1], [0, 0, 1, 1], [], []>} : vector<8x128xf32>, vector<128x384xf32>, vector<8x384xf32> -> vector<8x384xf32>
    %124 = arith.index_cast %c1_i32 : i32 to index
    %c0_58 = arith.constant 0 : index
    %c0_59 = arith.constant 0 : index
    %125 = vector.load %arg13[%124, %c0_58, %c0_59] : memref<8x8x384xf32, #tpu.memory_space<vmem>>, vector<1x8x384xf32>
    %126 = vector.shape_cast %125 : vector<1x8x384xf32> to vector<8x384xf32>
    %127 = vector.extract_strided_slice %126 {offsets = [0, 0], sizes = [8, 128], strides = [1, 1]} : vector<8x384xf32> to vector<8x128xf32>
    %128 = vector.extract_strided_slice %126 {offsets = [0, 128], sizes = [8, 128], strides = [1, 1]} : vector<8x384xf32> to vector<8x128xf32>
    %129 = vector.extract_strided_slice %126 {offsets = [0, 256], sizes = [8, 128], strides = [1, 1]} : vector<8x384xf32> to vector<8x128xf32>
    %130 = vector.extract_strided_slice %123 {offsets = [0, 0], sizes = [8, 128], strides = [1, 1]} : vector<8x384xf32> to vector<8x128xf32>
    %131 = vector.extract_strided_slice %123 {offsets = [0, 128], sizes = [8, 128], strides = [1, 1]} : vector<8x384xf32> to vector<8x128xf32>
    %132 = vector.extract_strided_slice %123 {offsets = [0, 256], sizes = [8, 128], strides = [1, 1]} : vector<8x384xf32> to vector<8x128xf32>
    %133 = arith.addf %127, %130 : vector<8x128xf32>
    %cst_60 = arith.constant 5.000000e-01 : f32
    %134 = vector.broadcast %cst_60 : f32 to vector<8x128xf32>
    %135 = arith.mulf %134, %133 : vector<8x128xf32>
    %136 = math.tanh %135 : vector<8x128xf32>
    %cst_61 = arith.constant 1.000000e+00 : f32
    %137 = vector.broadcast %cst_61 : f32 to vector<8x128xf32>
    %138 = arith.addf %136, %137 : vector<8x128xf32>
    %cst_62 = arith.constant 5.000000e-01 : f32
    %139 = vector.broadcast %cst_62 : f32 to vector<8x128xf32>
    %140 = arith.mulf %139, %138 : vector<8x128xf32>
    %141 = arith.addf %128, %131 : vector<8x128xf32>
    %cst_63 = arith.constant 5.000000e-01 : f32
    %142 = vector.broadcast %cst_63 : f32 to vector<8x128xf32>
    %143 = arith.mulf %142, %141 : vector<8x128xf32>
    %144 = math.tanh %143 : vector<8x128xf32>
    %cst_64 = arith.constant 1.000000e+00 : f32
    %145 = vector.broadcast %cst_64 : f32 to vector<8x128xf32>
    %146 = arith.addf %144, %145 : vector<8x128xf32>
    %cst_65 = arith.constant 5.000000e-01 : f32
    %147 = vector.broadcast %cst_65 : f32 to vector<8x128xf32>
    %148 = arith.mulf %147, %146 : vector<8x128xf32>
    %149 = vector.broadcast %17 : vector<1x128xf32> to vector<8x128xf32>
    %150 = arith.addf %132, %149 : vector<8x128xf32>
    %151 = arith.mulf %140, %150 : vector<8x128xf32>
    %152 = arith.addf %129, %151 : vector<8x128xf32>
    %153 = math.tanh %152 : vector<8x128xf32>
    %cst_66 = arith.constant 1.000000e+00 : f32
    %154 = vector.broadcast %cst_66 : f32 to vector<8x128xf32>
    %155 = arith.subf %154, %148 : vector<8x128xf32>
    %156 = arith.mulf %155, %153 : vector<8x128xf32>
    %157 = arith.mulf %148, %70 : vector<8x128xf32>
    %158 = arith.addf %156, %157 : vector<8x128xf32>
    %159 = vector.broadcast %c1_i32 : i32 to vector<8x1xi32>
    %160 = arith.cmpi sgt, %0, %159 : vector<8x1xi32>
    %cst_67 = arith.constant 0.000000e+00 : f32
    %161 = vector.shape_cast %160 : vector<8x1xi1> to vector<8x1xi1>
    %162 = vector.broadcast %161 : vector<8x1xi1> to vector<8x128xi1>
    %163 = vector.broadcast %cst_67 : f32 to vector<8x128xf32>
    %164 = arith.select %162, %158, %163 : vector<8x128xi1>, vector<8x128xf32>
    %165 = arith.index_cast %c1_i32 : i32 to index
    %c0_68 = arith.constant 0 : index
    %c0_69 = arith.constant 0 : index
    %166 = vector.load %arg11[%165, %c0_68, %c0_69] : memref<8x8x128xf32, #tpu.memory_space<vmem>>, vector<1x8x128xf32>
    %167 = vector.shape_cast %166 : vector<1x8x128xf32> to vector<8x128xf32>
    %168 = vector.shape_cast %164 : vector<8x128xf32> to vector<1x8x128xf32>
    tpu.vector_store %arg11[%165, %c0_68, %c0_69], %168 {strides = array<i32>} : memref<8x8x128xf32, #tpu.memory_space<vmem>>, vector<1x8x128xf32>,
    %169 = vector.shape_cast %160 : vector<8x1xi1> to vector<8x1xi1>
    %170 = vector.broadcast %169 : vector<8x1xi1> to vector<8x128xi1>
    %171 = arith.select %170, %158, %70 : vector<8x128xi1>, vector<8x128xf32>
    %c0_70 = arith.constant 0 : index
    %c0_71 = arith.constant 0 : index
    %172 = vector.load %arg6[%c0_70, %c0_71] : memref<128x384xf32, #tpu.memory_space<vmem>>, vector<128x384xf32>
    %cst_72 = arith.constant dense<0.000000e+00> : vector<8x384xf32>
    %173 = tpu.matmul %120, %172, %cst_72 {dimension_numbers = #tpu.dot_dimension_numbers<[1], [0], [0], [1], [0, 0, 1, 1], [], []>} : vector<8x128xf32>, vector<128x384xf32>, vector<8x384xf32> -> vector<8x384xf32>
    %174 = arith.index_cast %121 : i32 to index
    %c0_73 = arith.constant 0 : index
    %c0_74 = arith.constant 0 : index
    %175 = vector.load %arg14[%174, %c0_73, %c0_74] : memref<8x8x384xf32, #tpu.memory_space<vmem>>, vector<1x8x384xf32>
    %176 = vector.shape_cast %175 : vector<1x8x384xf32> to vector<8x384xf32>
    %177 = vector.extract_strided_slice %176 {offsets = [0, 0], sizes = [8, 128], strides = [1, 1]} : vector<8x384xf32> to vector<8x128xf32>
    %178 = vector.extract_strided_slice %176 {offsets = [0, 128], sizes = [8, 128], strides = [1, 1]} : vector<8x384xf32> to vector<8x128xf32>
    %179 = vector.extract_strided_slice %176 {offsets = [0, 256], sizes = [8, 128], strides = [1, 1]} : vector<8x384xf32> to vector<8x128xf32>
    %180 = vector.extract_strided_slice %173 {offsets = [0, 0], sizes = [8, 128], strides = [1, 1]} : vector<8x384xf32> to vector<8x128xf32>
    %181 = vector.extract_strided_slice %173 {offsets = [0, 128], sizes = [8, 128], strides = [1, 1]} : vector<8x384xf32> to vector<8x128xf32>
    %182 = vector.extract_strided_slice %173 {offsets = [0, 256], sizes = [8, 128], strides = [1, 1]} : vector<8x384xf32> to vector<8x128xf32>
    %183 = arith.addf %177, %180 : vector<8x128xf32>
    %cst_75 = arith.constant 5.000000e-01 : f32
    %184 = vector.broadcast %cst_75 : f32 to vector<8x128xf32>
    %185 = arith.mulf %184, %183 : vector<8x128xf32>
    %186 = math.tanh %185 : vector<8x128xf32>
    %cst_76 = arith.constant 1.000000e+00 : f32
    %187 = vector.broadcast %cst_76 : f32 to vector<8x128xf32>
    %188 = arith.addf %186, %187 : vector<8x128xf32>
    %cst_77 = arith.constant 5.000000e-01 : f32
    %189 = vector.broadcast %cst_77 : f32 to vector<8x128xf32>
    %190 = arith.mulf %189, %188 : vector<8x128xf32>
    %191 = arith.addf %178, %181 : vector<8x128xf32>
    %cst_78 = arith.constant 5.000000e-01 : f32
    %192 = vector.broadcast %cst_78 : f32 to vector<8x128xf32>
    %193 = arith.mulf %192, %191 : vector<8x128xf32>
    %194 = math.tanh %193 : vector<8x128xf32>
    %cst_79 = arith.constant 1.000000e+00 : f32
    %195 = vector.broadcast %cst_79 : f32 to vector<8x128xf32>
    %196 = arith.addf %194, %195 : vector<8x128xf32>
    %cst_80 = arith.constant 5.000000e-01 : f32
    %197 = vector.broadcast %cst_80 : f32 to vector<8x128xf32>
    %198 = arith.mulf %197, %196 : vector<8x128xf32>
    %199 = vector.broadcast %18 : vector<1x128xf32> to vector<8x128xf32>
    %200 = arith.addf %182, %199 : vector<8x128xf32>
    %201 = arith.mulf %190, %200 : vector<8x128xf32>
    %202 = arith.addf %179, %201 : vector<8x128xf32>
    %203 = math.tanh %202 : vector<8x128xf32>
    %cst_81 = arith.constant 1.000000e+00 : f32
    %204 = vector.broadcast %cst_81 : f32 to vector<8x128xf32>
    %205 = arith.subf %204, %198 : vector<8x128xf32>
    %206 = arith.mulf %205, %203 : vector<8x128xf32>
    %207 = arith.mulf %198, %120 : vector<8x128xf32>
    %208 = arith.addf %206, %207 : vector<8x128xf32>
    %209 = vector.broadcast %121 : i32 to vector<8x1xi32>
    %210 = arith.cmpi sgt, %0, %209 : vector<8x1xi32>
    %cst_82 = arith.constant 0.000000e+00 : f32
    %211 = vector.shape_cast %210 : vector<8x1xi1> to vector<8x1xi1>
    %212 = vector.broadcast %211 : vector<8x1xi1> to vector<8x128xi1>
    %213 = vector.broadcast %cst_82 : f32 to vector<8x128xf32>
    %214 = arith.select %212, %208, %213 : vector<8x128xi1>, vector<8x128xf32>
    %215 = arith.index_cast %121 : i32 to index
    %c0_83 = arith.constant 0 : index
    %c0_84 = arith.constant 0 : index
    %216 = vector.load %arg15[%215, %c0_83, %c0_84] : memref<8x8x128xf32, #tpu.memory_space<vmem>>, vector<1x8x128xf32>
    %217 = vector.shape_cast %216 : vector<1x8x128xf32> to vector<8x128xf32>
    %218 = vector.shape_cast %214 : vector<8x128xf32> to vector<1x8x128xf32>
    tpu.vector_store %arg15[%215, %c0_83, %c0_84], %218 {strides = array<i32>} : memref<8x8x128xf32, #tpu.memory_space<vmem>>, vector<1x8x128xf32>,
    %219 = vector.shape_cast %210 : vector<8x1xi1> to vector<8x1xi1>
    %220 = vector.broadcast %219 : vector<8x1xi1> to vector<8x128xi1>
    %221 = arith.select %220, %208, %120 : vector<8x128xi1>, vector<8x128xf32>
    %c2_i32 = arith.constant 2 : i32
    %c7_i32_85 = arith.constant 7 : i32
    %222 = arith.subi %c7_i32_85, %c2_i32 : i32
    %c0_86 = arith.constant 0 : index
    %c0_87 = arith.constant 0 : index
    %223 = vector.load %arg5[%c0_86, %c0_87] : memref<128x384xf32, #tpu.memory_space<vmem>>, vector<128x384xf32>
    %cst_88 = arith.constant dense<0.000000e+00> : vector<8x384xf32>
    %224 = tpu.matmul %171, %223, %cst_88 {dimension_numbers = #tpu.dot_dimension_numbers<[1], [0], [0], [1], [0, 0, 1, 1], [], []>} : vector<8x128xf32>, vector<128x384xf32>, vector<8x384xf32> -> vector<8x384xf32>
    %225 = arith.index_cast %c2_i32 : i32 to index
    %c0_89 = arith.constant 0 : index
    %c0_90 = arith.constant 0 : index
    %226 = vector.load %arg13[%225, %c0_89, %c0_90] : memref<8x8x384xf32, #tpu.memory_space<vmem>>, vector<1x8x384xf32>
    %227 = vector.shape_cast %226 : vector<1x8x384xf32> to vector<8x384xf32>
    %228 = vector.extract_strided_slice %227 {offsets = [0, 0], sizes = [8, 128], strides = [1, 1]} : vector<8x384xf32> to vector<8x128xf32>
    %229 = vector.extract_strided_slice %227 {offsets = [0, 128], sizes = [8, 128], strides = [1, 1]} : vector<8x384xf32> to vector<8x128xf32>
    %230 = vector.extract_strided_slice %227 {offsets = [0, 256], sizes = [8, 128], strides = [1, 1]} : vector<8x384xf32> to vector<8x128xf32>
    %231 = vector.extract_strided_slice %224 {offsets = [0, 0], sizes = [8, 128], strides = [1, 1]} : vector<8x384xf32> to vector<8x128xf32>
    %232 = vector.extract_strided_slice %224 {offsets = [0, 128], sizes = [8, 128], strides = [1, 1]} : vector<8x384xf32> to vector<8x128xf32>
    %233 = vector.extract_strided_slice %224 {offsets = [0, 256], sizes = [8, 128], strides = [1, 1]} : vector<8x384xf32> to vector<8x128xf32>
    %234 = arith.addf %228, %231 : vector<8x128xf32>
    %cst_91 = arith.constant 5.000000e-01 : f32
    %235 = vector.broadcast %cst_91 : f32 to vector<8x128xf32>
    %236 = arith.mulf %235, %234 : vector<8x128xf32>
    %237 = math.tanh %236 : vector<8x128xf32>
    %cst_92 = arith.constant 1.000000e+00 : f32
    %238 = vector.broadcast %cst_92 : f32 to vector<8x128xf32>
    %239 = arith.addf %237, %238 : vector<8x128xf32>
    %cst_93 = arith.constant 5.000000e-01 : f32
    %240 = vector.broadcast %cst_93 : f32 to vector<8x128xf32>
    %241 = arith.mulf %240, %239 : vector<8x128xf32>
    %242 = arith.addf %229, %232 : vector<8x128xf32>
    %cst_94 = arith.constant 5.000000e-01 : f32
    %243 = vector.broadcast %cst_94 : f32 to vector<8x128xf32>
    %244 = arith.mulf %243, %242 : vector<8x128xf32>
    %245 = math.tanh %244 : vector<8x128xf32>
    %cst_95 = arith.constant 1.000000e+00 : f32
    %246 = vector.broadcast %cst_95 : f32 to vector<8x128xf32>
    %247 = arith.addf %245, %246 : vector<8x128xf32>
    %cst_96 = arith.constant 5.000000e-01 : f32
    %248 = vector.broadcast %cst_96 : f32 to vector<8x128xf32>
    %249 = arith.mulf %248, %247 : vector<8x128xf32>
    %250 = vector.broadcast %17 : vector<1x128xf32> to vector<8x128xf32>
    %251 = arith.addf %233, %250 : vector<8x128xf32>
    %252 = arith.mulf %241, %251 : vector<8x128xf32>
    %253 = arith.addf %230, %252 : vector<8x128xf32>
    %254 = math.tanh %253 : vector<8x128xf32>
    %cst_97 = arith.constant 1.000000e+00 : f32
    %255 = vector.broadcast %cst_97 : f32 to vector<8x128xf32>
    %256 = arith.subf %255, %249 : vector<8x128xf32>
    %257 = arith.mulf %256, %254 : vector<8x128xf32>
    %258 = arith.mulf %249, %171 : vector<8x128xf32>
    %259 = arith.addf %257, %258 : vector<8x128xf32>
    %260 = vector.broadcast %c2_i32 : i32 to vector<8x1xi32>
    %261 = arith.cmpi sgt, %0, %260 : vector<8x1xi32>
    %cst_98 = arith.constant 0.000000e+00 : f32
    %262 = vector.shape_cast %261 : vector<8x1xi1> to vector<8x1xi1>
    %263 = vector.broadcast %262 : vector<8x1xi1> to vector<8x128xi1>
    %264 = vector.broadcast %cst_98 : f32 to vector<8x128xf32>
    %265 = arith.select %263, %259, %264 : vector<8x128xi1>, vector<8x128xf32>
    %266 = arith.index_cast %c2_i32 : i32 to index
    %c0_99 = arith.constant 0 : index
    %c0_100 = arith.constant 0 : index
    %267 = vector.load %arg11[%266, %c0_99, %c0_100] : memref<8x8x128xf32, #tpu.memory_space<vmem>>, vector<1x8x128xf32>
    %268 = vector.shape_cast %267 : vector<1x8x128xf32> to vector<8x128xf32>
    %269 = vector.shape_cast %265 : vector<8x128xf32> to vector<1x8x128xf32>
    tpu.vector_store %arg11[%266, %c0_99, %c0_100], %269 {strides = array<i32>} : memref<8x8x128xf32, #tpu.memory_space<vmem>>, vector<1x8x128xf32>,
    %270 = vector.shape_cast %261 : vector<8x1xi1> to vector<8x1xi1>
    %271 = vector.broadcast %270 : vector<8x1xi1> to vector<8x128xi1>
    %272 = arith.select %271, %259, %171 : vector<8x128xi1>, vector<8x128xf32>
    %c0_101 = arith.constant 0 : index
    %c0_102 = arith.constant 0 : index
    %273 = vector.load %arg6[%c0_101, %c0_102] : memref<128x384xf32, #tpu.memory_space<vmem>>, vector<128x384xf32>
    %cst_103 = arith.constant dense<0.000000e+00> : vector<8x384xf32>
    %274 = tpu.matmul %221, %273, %cst_103 {dimension_numbers = #tpu.dot_dimension_numbers<[1], [0], [0], [1], [0, 0, 1, 1], [], []>} : vector<8x128xf32>, vector<128x384xf32>, vector<8x384xf32> -> vector<8x384xf32>
    %275 = arith.index_cast %222 : i32 to index
    %c0_104 = arith.constant 0 : index
    %c0_105 = arith.constant 0 : index
    %276 = vector.load %arg14[%275, %c0_104, %c0_105] : memref<8x8x384xf32, #tpu.memory_space<vmem>>, vector<1x8x384xf32>
    %277 = vector.shape_cast %276 : vector<1x8x384xf32> to vector<8x384xf32>
    %278 = vector.extract_strided_slice %277 {offsets = [0, 0], sizes = [8, 128], strides = [1, 1]} : vector<8x384xf32> to vector<8x128xf32>
    %279 = vector.extract_strided_slice %277 {offsets = [0, 128], sizes = [8, 128], strides = [1, 1]} : vector<8x384xf32> to vector<8x128xf32>
    %280 = vector.extract_strided_slice %277 {offsets = [0, 256], sizes = [8, 128], strides = [1, 1]} : vector<8x384xf32> to vector<8x128xf32>
    %281 = vector.extract_strided_slice %274 {offsets = [0, 0], sizes = [8, 128], strides = [1, 1]} : vector<8x384xf32> to vector<8x128xf32>
    %282 = vector.extract_strided_slice %274 {offsets = [0, 128], sizes = [8, 128], strides = [1, 1]} : vector<8x384xf32> to vector<8x128xf32>
    %283 = vector.extract_strided_slice %274 {offsets = [0, 256], sizes = [8, 128], strides = [1, 1]} : vector<8x384xf32> to vector<8x128xf32>
    %284 = arith.addf %278, %281 : vector<8x128xf32>
    %cst_106 = arith.constant 5.000000e-01 : f32
    %285 = vector.broadcast %cst_106 : f32 to vector<8x128xf32>
    %286 = arith.mulf %285, %284 : vector<8x128xf32>
    %287 = math.tanh %286 : vector<8x128xf32>
    %cst_107 = arith.constant 1.000000e+00 : f32
    %288 = vector.broadcast %cst_107 : f32 to vector<8x128xf32>
    %289 = arith.addf %287, %288 : vector<8x128xf32>
    %cst_108 = arith.constant 5.000000e-01 : f32
    %290 = vector.broadcast %cst_108 : f32 to vector<8x128xf32>
    %291 = arith.mulf %290, %289 : vector<8x128xf32>
    %292 = arith.addf %279, %282 : vector<8x128xf32>
    %cst_109 = arith.constant 5.000000e-01 : f32
    %293 = vector.broadcast %cst_109 : f32 to vector<8x128xf32>
    %294 = arith.mulf %293, %292 : vector<8x128xf32>
    %295 = math.tanh %294 : vector<8x128xf32>
    %cst_110 = arith.constant 1.000000e+00 : f32
    %296 = vector.broadcast %cst_110 : f32 to vector<8x128xf32>
    %297 = arith.addf %295, %296 : vector<8x128xf32>
    %cst_111 = arith.constant 5.000000e-01 : f32
    %298 = vector.broadcast %cst_111 : f32 to vector<8x128xf32>
    %299 = arith.mulf %298, %297 : vector<8x128xf32>
    %300 = vector.broadcast %18 : vector<1x128xf32> to vector<8x128xf32>
    %301 = arith.addf %283, %300 : vector<8x128xf32>
    %302 = arith.mulf %291, %301 : vector<8x128xf32>
    %303 = arith.addf %280, %302 : vector<8x128xf32>
    %304 = math.tanh %303 : vector<8x128xf32>
    %cst_112 = arith.constant 1.000000e+00 : f32
    %305 = vector.broadcast %cst_112 : f32 to vector<8x128xf32>
    %306 = arith.subf %305, %299 : vector<8x128xf32>
    %307 = arith.mulf %306, %304 : vector<8x128xf32>
    %308 = arith.mulf %299, %221 : vector<8x128xf32>
    %309 = arith.addf %307, %308 : vector<8x128xf32>
    %310 = vector.broadcast %222 : i32 to vector<8x1xi32>
    %311 = arith.cmpi sgt, %0, %310 : vector<8x1xi32>
    %cst_113 = arith.constant 0.000000e+00 : f32
    %312 = vector.shape_cast %311 : vector<8x1xi1> to vector<8x1xi1>
    %313 = vector.broadcast %312 : vector<8x1xi1> to vector<8x128xi1>
    %314 = vector.broadcast %cst_113 : f32 to vector<8x128xf32>
    %315 = arith.select %313, %309, %314 : vector<8x128xi1>, vector<8x128xf32>
    %316 = arith.index_cast %222 : i32 to index
    %c0_114 = arith.constant 0 : index
    %c0_115 = arith.constant 0 : index
    %317 = vector.load %arg15[%316, %c0_114, %c0_115] : memref<8x8x128xf32, #tpu.memory_space<vmem>>, vector<1x8x128xf32>
    %318 = vector.shape_cast %317 : vector<1x8x128xf32> to vector<8x128xf32>
    %319 = vector.shape_cast %315 : vector<8x128xf32> to vector<1x8x128xf32>
    tpu.vector_store %arg15[%316, %c0_114, %c0_115], %319 {strides = array<i32>} : memref<8x8x128xf32, #tpu.memory_space<vmem>>, vector<1x8x128xf32>,
    %320 = vector.shape_cast %311 : vector<8x1xi1> to vector<8x1xi1>
    %321 = vector.broadcast %320 : vector<8x1xi1> to vector<8x128xi1>
    %322 = arith.select %321, %309, %221 : vector<8x128xi1>, vector<8x128xf32>
    %c3_i32 = arith.constant 3 : i32
    %c7_i32_116 = arith.constant 7 : i32
    %323 = arith.subi %c7_i32_116, %c3_i32 : i32
    %c0_117 = arith.constant 0 : index
    %c0_118 = arith.constant 0 : index
    %324 = vector.load %arg5[%c0_117, %c0_118] : memref<128x384xf32, #tpu.memory_space<vmem>>, vector<128x384xf32>
    %cst_119 = arith.constant dense<0.000000e+00> : vector<8x384xf32>
    %325 = tpu.matmul %272, %324, %cst_119 {dimension_numbers = #tpu.dot_dimension_numbers<[1], [0], [0], [1], [0, 0, 1, 1], [], []>} : vector<8x128xf32>, vector<128x384xf32>, vector<8x384xf32> -> vector<8x384xf32>
    %326 = arith.index_cast %c3_i32 : i32 to index
    %c0_120 = arith.constant 0 : index
    %c0_121 = arith.constant 0 : index
    %327 = vector.load %arg13[%326, %c0_120, %c0_121] : memref<8x8x384xf32, #tpu.memory_space<vmem>>, vector<1x8x384xf32>
    %328 = vector.shape_cast %327 : vector<1x8x384xf32> to vector<8x384xf32>
    %329 = vector.extract_strided_slice %328 {offsets = [0, 0], sizes = [8, 128], strides = [1, 1]} : vector<8x384xf32> to vector<8x128xf32>
    %330 = vector.extract_strided_slice %328 {offsets = [0, 128], sizes = [8, 128], strides = [1, 1]} : vector<8x384xf32> to vector<8x128xf32>
    %331 = vector.extract_strided_slice %328 {offsets = [0, 256], sizes = [8, 128], strides = [1, 1]} : vector<8x384xf32> to vector<8x128xf32>
    %332 = vector.extract_strided_slice %325 {offsets = [0, 0], sizes = [8, 128], strides = [1, 1]} : vector<8x384xf32> to vector<8x128xf32>
    %333 = vector.extract_strided_slice %325 {offsets = [0, 128], sizes = [8, 128], strides = [1, 1]} : vector<8x384xf32> to vector<8x128xf32>
    %334 = vector.extract_strided_slice %325 {offsets = [0, 256], sizes = [8, 128], strides = [1, 1]} : vector<8x384xf32> to vector<8x128xf32>
    %335 = arith.addf %329, %332 : vector<8x128xf32>
    %cst_122 = arith.constant 5.000000e-01 : f32
    %336 = vector.broadcast %cst_122 : f32 to vector<8x128xf32>
    %337 = arith.mulf %336, %335 : vector<8x128xf32>
    %338 = math.tanh %337 : vector<8x128xf32>
    %cst_123 = arith.constant 1.000000e+00 : f32
    %339 = vector.broadcast %cst_123 : f32 to vector<8x128xf32>
    %340 = arith.addf %338, %339 : vector<8x128xf32>
    %cst_124 = arith.constant 5.000000e-01 : f32
    %341 = vector.broadcast %cst_124 : f32 to vector<8x128xf32>
    %342 = arith.mulf %341, %340 : vector<8x128xf32>
    %343 = arith.addf %330, %333 : vector<8x128xf32>
    %cst_125 = arith.constant 5.000000e-01 : f32
    %344 = vector.broadcast %cst_125 : f32 to vector<8x128xf32>
    %345 = arith.mulf %344, %343 : vector<8x128xf32>
    %346 = math.tanh %345 : vector<8x128xf32>
    %cst_126 = arith.constant 1.000000e+00 : f32
    %347 = vector.broadcast %cst_126 : f32 to vector<8x128xf32>
    %348 = arith.addf %346, %347 : vector<8x128xf32>
    %cst_127 = arith.constant 5.000000e-01 : f32
    %349 = vector.broadcast %cst_127 : f32 to vector<8x128xf32>
    %350 = arith.mulf %349, %348 : vector<8x128xf32>
    %351 = vector.broadcast %17 : vector<1x128xf32> to vector<8x128xf32>
    %352 = arith.addf %334, %351 : vector<8x128xf32>
    %353 = arith.mulf %342, %352 : vector<8x128xf32>
    %354 = arith.addf %331, %353 : vector<8x128xf32>
    %355 = math.tanh %354 : vector<8x128xf32>
    %cst_128 = arith.constant 1.000000e+00 : f32
    %356 = vector.broadcast %cst_128 : f32 to vector<8x128xf32>
    %357 = arith.subf %356, %350 : vector<8x128xf32>
    %358 = arith.mulf %357, %355 : vector<8x128xf32>
    %359 = arith.mulf %350, %272 : vector<8x128xf32>
    %360 = arith.addf %358, %359 : vector<8x128xf32>
    %361 = vector.broadcast %c3_i32 : i32 to vector<8x1xi32>
    %362 = arith.cmpi sgt, %0, %361 : vector<8x1xi32>
    %cst_129 = arith.constant 0.000000e+00 : f32
    %363 = vector.shape_cast %362 : vector<8x1xi1> to vector<8x1xi1>
    %364 = vector.broadcast %363 : vector<8x1xi1> to vector<8x128xi1>
    %365 = vector.broadcast %cst_129 : f32 to vector<8x128xf32>
    %366 = arith.select %364, %360, %365 : vector<8x128xi1>, vector<8x128xf32>
    %367 = arith.index_cast %c3_i32 : i32 to index
    %c0_130 = arith.constant 0 : index
    %c0_131 = arith.constant 0 : index
    %368 = vector.load %arg11[%367, %c0_130, %c0_131] : memref<8x8x128xf32, #tpu.memory_space<vmem>>, vector<1x8x128xf32>
    %369 = vector.shape_cast %368 : vector<1x8x128xf32> to vector<8x128xf32>
    %370 = vector.shape_cast %366 : vector<8x128xf32> to vector<1x8x128xf32>
    tpu.vector_store %arg11[%367, %c0_130, %c0_131], %370 {strides = array<i32>} : memref<8x8x128xf32, #tpu.memory_space<vmem>>, vector<1x8x128xf32>,
    %371 = vector.shape_cast %362 : vector<8x1xi1> to vector<8x1xi1>
    %372 = vector.broadcast %371 : vector<8x1xi1> to vector<8x128xi1>
    %373 = arith.select %372, %360, %272 : vector<8x128xi1>, vector<8x128xf32>
    %c0_132 = arith.constant 0 : index
    %c0_133 = arith.constant 0 : index
    %374 = vector.load %arg6[%c0_132, %c0_133] : memref<128x384xf32, #tpu.memory_space<vmem>>, vector<128x384xf32>
    %cst_134 = arith.constant dense<0.000000e+00> : vector<8x384xf32>
    %375 = tpu.matmul %322, %374, %cst_134 {dimension_numbers = #tpu.dot_dimension_numbers<[1], [0], [0], [1], [0, 0, 1, 1], [], []>} : vector<8x128xf32>, vector<128x384xf32>, vector<8x384xf32> -> vector<8x384xf32>
    %376 = arith.index_cast %323 : i32 to index
    %c0_135 = arith.constant 0 : index
    %c0_136 = arith.constant 0 : index
    %377 = vector.load %arg14[%376, %c0_135, %c0_136] : memref<8x8x384xf32, #tpu.memory_space<vmem>>, vector<1x8x384xf32>
    %378 = vector.shape_cast %377 : vector<1x8x384xf32> to vector<8x384xf32>
    %379 = vector.extract_strided_slice %378 {offsets = [0, 0], sizes = [8, 128], strides = [1, 1]} : vector<8x384xf32> to vector<8x128xf32>
    %380 = vector.extract_strided_slice %378 {offsets = [0, 128], sizes = [8, 128], strides = [1, 1]} : vector<8x384xf32> to vector<8x128xf32>
    %381 = vector.extract_strided_slice %378 {offsets = [0, 256], sizes = [8, 128], strides = [1, 1]} : vector<8x384xf32> to vector<8x128xf32>
    %382 = vector.extract_strided_slice %375 {offsets = [0, 0], sizes = [8, 128], strides = [1, 1]} : vector<8x384xf32> to vector<8x128xf32>
    %383 = vector.extract_strided_slice %375 {offsets = [0, 128], sizes = [8, 128], strides = [1, 1]} : vector<8x384xf32> to vector<8x128xf32>
    %384 = vector.extract_strided_slice %375 {offsets = [0, 256], sizes = [8, 128], strides = [1, 1]} : vector<8x384xf32> to vector<8x128xf32>
    %385 = arith.addf %379, %382 : vector<8x128xf32>
    %cst_137 = arith.constant 5.000000e-01 : f32
    %386 = vector.broadcast %cst_137 : f32 to vector<8x128xf32>
    %387 = arith.mulf %386, %385 : vector<8x128xf32>
    %388 = math.tanh %387 : vector<8x128xf32>
    %cst_138 = arith.constant 1.000000e+00 : f32
    %389 = vector.broadcast %cst_138 : f32 to vector<8x128xf32>
    %390 = arith.addf %388, %389 : vector<8x128xf32>
    %cst_139 = arith.constant 5.000000e-01 : f32
    %391 = vector.broadcast %cst_139 : f32 to vector<8x128xf32>
    %392 = arith.mulf %391, %390 : vector<8x128xf32>
    %393 = arith.addf %380, %383 : vector<8x128xf32>
    %cst_140 = arith.constant 5.000000e-01 : f32
    %394 = vector.broadcast %cst_140 : f32 to vector<8x128xf32>
    %395 = arith.mulf %394, %393 : vector<8x128xf32>
    %396 = math.tanh %395 : vector<8x128xf32>
    %cst_141 = arith.constant 1.000000e+00 : f32
    %397 = vector.broadcast %cst_141 : f32 to vector<8x128xf32>
    %398 = arith.addf %396, %397 : vector<8x128xf32>
    %cst_142 = arith.constant 5.000000e-01 : f32
    %399 = vector.broadcast %cst_142 : f32 to vector<8x128xf32>
    %400 = arith.mulf %399, %398 : vector<8x128xf32>
    %401 = vector.broadcast %18 : vector<1x128xf32> to vector<8x128xf32>
    %402 = arith.addf %384, %401 : vector<8x128xf32>
    %403 = arith.mulf %392, %402 : vector<8x128xf32>
    %404 = arith.addf %381, %403 : vector<8x128xf32>
    %405 = math.tanh %404 : vector<8x128xf32>
    %cst_143 = arith.constant 1.000000e+00 : f32
    %406 = vector.broadcast %cst_143 : f32 to vector<8x128xf32>
    %407 = arith.subf %406, %400 : vector<8x128xf32>
    %408 = arith.mulf %407, %405 : vector<8x128xf32>
    %409 = arith.mulf %400, %322 : vector<8x128xf32>
    %410 = arith.addf %408, %409 : vector<8x128xf32>
    %411 = vector.broadcast %323 : i32 to vector<8x1xi32>
    %412 = arith.cmpi sgt, %0, %411 : vector<8x1xi32>
    %cst_144 = arith.constant 0.000000e+00 : f32
    %413 = vector.shape_cast %412 : vector<8x1xi1> to vector<8x1xi1>
    %414 = vector.broadcast %413 : vector<8x1xi1> to vector<8x128xi1>
    %415 = vector.broadcast %cst_144 : f32 to vector<8x128xf32>
    %416 = arith.select %414, %410, %415 : vector<8x128xi1>, vector<8x128xf32>
    %417 = arith.index_cast %323 : i32 to index
    %c0_145 = arith.constant 0 : index
    %c0_146 = arith.constant 0 : index
    %418 = vector.load %arg15[%417, %c0_145, %c0_146] : memref<8x8x128xf32, #tpu.memory_space<vmem>>, vector<1x8x128xf32>
    %419 = vector.shape_cast %418 : vector<1x8x128xf32> to vector<8x128xf32>
    %420 = vector.shape_cast %416 : vector<8x128xf32> to vector<1x8x128xf32>
    tpu.vector_store %arg15[%417, %c0_145, %c0_146], %420 {strides = array<i32>} : memref<8x8x128xf32, #tpu.memory_space<vmem>>, vector<1x8x128xf32>,
    %421 = vector.shape_cast %412 : vector<8x1xi1> to vector<8x1xi1>
    %422 = vector.broadcast %421 : vector<8x1xi1> to vector<8x128xi1>
    %423 = arith.select %422, %410, %322 : vector<8x128xi1>, vector<8x128xf32>
    %c4_i32 = arith.constant 4 : i32
    %c7_i32_147 = arith.constant 7 : i32
    %424 = arith.subi %c7_i32_147, %c4_i32 : i32
    %c0_148 = arith.constant 0 : index
    %c0_149 = arith.constant 0 : index
    %425 = vector.load %arg5[%c0_148, %c0_149] : memref<128x384xf32, #tpu.memory_space<vmem>>, vector<128x384xf32>
    %cst_150 = arith.constant dense<0.000000e+00> : vector<8x384xf32>
    %426 = tpu.matmul %373, %425, %cst_150 {dimension_numbers = #tpu.dot_dimension_numbers<[1], [0], [0], [1], [0, 0, 1, 1], [], []>} : vector<8x128xf32>, vector<128x384xf32>, vector<8x384xf32> -> vector<8x384xf32>
    %427 = arith.index_cast %c4_i32 : i32 to index
    %c0_151 = arith.constant 0 : index
    %c0_152 = arith.constant 0 : index
    %428 = vector.load %arg13[%427, %c0_151, %c0_152] : memref<8x8x384xf32, #tpu.memory_space<vmem>>, vector<1x8x384xf32>
    %429 = vector.shape_cast %428 : vector<1x8x384xf32> to vector<8x384xf32>
    %430 = vector.extract_strided_slice %429 {offsets = [0, 0], sizes = [8, 128], strides = [1, 1]} : vector<8x384xf32> to vector<8x128xf32>
    %431 = vector.extract_strided_slice %429 {offsets = [0, 128], sizes = [8, 128], strides = [1, 1]} : vector<8x384xf32> to vector<8x128xf32>
    %432 = vector.extract_strided_slice %429 {offsets = [0, 256], sizes = [8, 128], strides = [1, 1]} : vector<8x384xf32> to vector<8x128xf32>
    %433 = vector.extract_strided_slice %426 {offsets = [0, 0], sizes = [8, 128], strides = [1, 1]} : vector<8x384xf32> to vector<8x128xf32>
    %434 = vector.extract_strided_slice %426 {offsets = [0, 128], sizes = [8, 128], strides = [1, 1]} : vector<8x384xf32> to vector<8x128xf32>
    %435 = vector.extract_strided_slice %426 {offsets = [0, 256], sizes = [8, 128], strides = [1, 1]} : vector<8x384xf32> to vector<8x128xf32>
    %436 = arith.addf %430, %433 : vector<8x128xf32>
    %cst_153 = arith.constant 5.000000e-01 : f32
    %437 = vector.broadcast %cst_153 : f32 to vector<8x128xf32>
    %438 = arith.mulf %437, %436 : vector<8x128xf32>
    %439 = math.tanh %438 : vector<8x128xf32>
    %cst_154 = arith.constant 1.000000e+00 : f32
    %440 = vector.broadcast %cst_154 : f32 to vector<8x128xf32>
    %441 = arith.addf %439, %440 : vector<8x128xf32>
    %cst_155 = arith.constant 5.000000e-01 : f32
    %442 = vector.broadcast %cst_155 : f32 to vector<8x128xf32>
    %443 = arith.mulf %442, %441 : vector<8x128xf32>
    %444 = arith.addf %431, %434 : vector<8x128xf32>
    %cst_156 = arith.constant 5.000000e-01 : f32
    %445 = vector.broadcast %cst_156 : f32 to vector<8x128xf32>
    %446 = arith.mulf %445, %444 : vector<8x128xf32>
    %447 = math.tanh %446 : vector<8x128xf32>
    %cst_157 = arith.constant 1.000000e+00 : f32
    %448 = vector.broadcast %cst_157 : f32 to vector<8x128xf32>
    %449 = arith.addf %447, %448 : vector<8x128xf32>
    %cst_158 = arith.constant 5.000000e-01 : f32
    %450 = vector.broadcast %cst_158 : f32 to vector<8x128xf32>
    %451 = arith.mulf %450, %449 : vector<8x128xf32>
    %452 = vector.broadcast %17 : vector<1x128xf32> to vector<8x128xf32>
    %453 = arith.addf %435, %452 : vector<8x128xf32>
    %454 = arith.mulf %443, %453 : vector<8x128xf32>
    %455 = arith.addf %432, %454 : vector<8x128xf32>
    %456 = math.tanh %455 : vector<8x128xf32>
    %cst_159 = arith.constant 1.000000e+00 : f32
    %457 = vector.broadcast %cst_159 : f32 to vector<8x128xf32>
    %458 = arith.subf %457, %451 : vector<8x128xf32>
    %459 = arith.mulf %458, %456 : vector<8x128xf32>
    %460 = arith.mulf %451, %373 : vector<8x128xf32>
    %461 = arith.addf %459, %460 : vector<8x128xf32>
    %462 = vector.broadcast %c4_i32 : i32 to vector<8x1xi32>
    %463 = arith.cmpi sgt, %0, %462 : vector<8x1xi32>
    %cst_160 = arith.constant 0.000000e+00 : f32
    %464 = vector.shape_cast %463 : vector<8x1xi1> to vector<8x1xi1>
    %465 = vector.broadcast %464 : vector<8x1xi1> to vector<8x128xi1>
    %466 = vector.broadcast %cst_160 : f32 to vector<8x128xf32>
    %467 = arith.select %465, %461, %466 : vector<8x128xi1>, vector<8x128xf32>
    %468 = arith.index_cast %c4_i32 : i32 to index
    %c0_161 = arith.constant 0 : index
    %c0_162 = arith.constant 0 : index
    %469 = vector.load %arg11[%468, %c0_161, %c0_162] : memref<8x8x128xf32, #tpu.memory_space<vmem>>, vector<1x8x128xf32>
    %470 = vector.shape_cast %469 : vector<1x8x128xf32> to vector<8x128xf32>
    %471 = vector.shape_cast %467 : vector<8x128xf32> to vector<1x8x128xf32>
    tpu.vector_store %arg11[%468, %c0_161, %c0_162], %471 {strides = array<i32>} : memref<8x8x128xf32, #tpu.memory_space<vmem>>, vector<1x8x128xf32>,
    %472 = vector.shape_cast %463 : vector<8x1xi1> to vector<8x1xi1>
    %473 = vector.broadcast %472 : vector<8x1xi1> to vector<8x128xi1>
    %474 = arith.select %473, %461, %373 : vector<8x128xi1>, vector<8x128xf32>
    %c0_163 = arith.constant 0 : index
    %c0_164 = arith.constant 0 : index
    %475 = vector.load %arg6[%c0_163, %c0_164] : memref<128x384xf32, #tpu.memory_space<vmem>>, vector<128x384xf32>
    %cst_165 = arith.constant dense<0.000000e+00> : vector<8x384xf32>
    %476 = tpu.matmul %423, %475, %cst_165 {dimension_numbers = #tpu.dot_dimension_numbers<[1], [0], [0], [1], [0, 0, 1, 1], [], []>} : vector<8x128xf32>, vector<128x384xf32>, vector<8x384xf32> -> vector<8x384xf32>
    %477 = arith.index_cast %424 : i32 to index
    %c0_166 = arith.constant 0 : index
    %c0_167 = arith.constant 0 : index
    %478 = vector.load %arg14[%477, %c0_166, %c0_167] : memref<8x8x384xf32, #tpu.memory_space<vmem>>, vector<1x8x384xf32>
    %479 = vector.shape_cast %478 : vector<1x8x384xf32> to vector<8x384xf32>
    %480 = vector.extract_strided_slice %479 {offsets = [0, 0], sizes = [8, 128], strides = [1, 1]} : vector<8x384xf32> to vector<8x128xf32>
    %481 = vector.extract_strided_slice %479 {offsets = [0, 128], sizes = [8, 128], strides = [1, 1]} : vector<8x384xf32> to vector<8x128xf32>
    %482 = vector.extract_strided_slice %479 {offsets = [0, 256], sizes = [8, 128], strides = [1, 1]} : vector<8x384xf32> to vector<8x128xf32>
    %483 = vector.extract_strided_slice %476 {offsets = [0, 0], sizes = [8, 128], strides = [1, 1]} : vector<8x384xf32> to vector<8x128xf32>
    %484 = vector.extract_strided_slice %476 {offsets = [0, 128], sizes = [8, 128], strides = [1, 1]} : vector<8x384xf32> to vector<8x128xf32>
    %485 = vector.extract_strided_slice %476 {offsets = [0, 256], sizes = [8, 128], strides = [1, 1]} : vector<8x384xf32> to vector<8x128xf32>
    %486 = arith.addf %480, %483 : vector<8x128xf32>
    %cst_168 = arith.constant 5.000000e-01 : f32
    %487 = vector.broadcast %cst_168 : f32 to vector<8x128xf32>
    %488 = arith.mulf %487, %486 : vector<8x128xf32>
    %489 = math.tanh %488 : vector<8x128xf32>
    %cst_169 = arith.constant 1.000000e+00 : f32
    %490 = vector.broadcast %cst_169 : f32 to vector<8x128xf32>
    %491 = arith.addf %489, %490 : vector<8x128xf32>
    %cst_170 = arith.constant 5.000000e-01 : f32
    %492 = vector.broadcast %cst_170 : f32 to vector<8x128xf32>
    %493 = arith.mulf %492, %491 : vector<8x128xf32>
    %494 = arith.addf %481, %484 : vector<8x128xf32>
    %cst_171 = arith.constant 5.000000e-01 : f32
    %495 = vector.broadcast %cst_171 : f32 to vector<8x128xf32>
    %496 = arith.mulf %495, %494 : vector<8x128xf32>
    %497 = math.tanh %496 : vector<8x128xf32>
    %cst_172 = arith.constant 1.000000e+00 : f32
    %498 = vector.broadcast %cst_172 : f32 to vector<8x128xf32>
    %499 = arith.addf %497, %498 : vector<8x128xf32>
    %cst_173 = arith.constant 5.000000e-01 : f32
    %500 = vector.broadcast %cst_173 : f32 to vector<8x128xf32>
    %501 = arith.mulf %500, %499 : vector<8x128xf32>
    %502 = vector.broadcast %18 : vector<1x128xf32> to vector<8x128xf32>
    %503 = arith.addf %485, %502 : vector<8x128xf32>
    %504 = arith.mulf %493, %503 : vector<8x128xf32>
    %505 = arith.addf %482, %504 : vector<8x128xf32>
    %506 = math.tanh %505 : vector<8x128xf32>
    %cst_174 = arith.constant 1.000000e+00 : f32
    %507 = vector.broadcast %cst_174 : f32 to vector<8x128xf32>
    %508 = arith.subf %507, %501 : vector<8x128xf32>
    %509 = arith.mulf %508, %506 : vector<8x128xf32>
    %510 = arith.mulf %501, %423 : vector<8x128xf32>
    %511 = arith.addf %509, %510 : vector<8x128xf32>
    %512 = vector.broadcast %424 : i32 to vector<8x1xi32>
    %513 = arith.cmpi sgt, %0, %512 : vector<8x1xi32>
    %cst_175 = arith.constant 0.000000e+00 : f32
    %514 = vector.shape_cast %513 : vector<8x1xi1> to vector<8x1xi1>
    %515 = vector.broadcast %514 : vector<8x1xi1> to vector<8x128xi1>
    %516 = vector.broadcast %cst_175 : f32 to vector<8x128xf32>
    %517 = arith.select %515, %511, %516 : vector<8x128xi1>, vector<8x128xf32>
    %518 = arith.index_cast %424 : i32 to index
    %c0_176 = arith.constant 0 : index
    %c0_177 = arith.constant 0 : index
    %519 = vector.load %arg15[%518, %c0_176, %c0_177] : memref<8x8x128xf32, #tpu.memory_space<vmem>>, vector<1x8x128xf32>
    %520 = vector.shape_cast %519 : vector<1x8x128xf32> to vector<8x128xf32>
    %521 = vector.shape_cast %517 : vector<8x128xf32> to vector<1x8x128xf32>
    tpu.vector_store %arg15[%518, %c0_176, %c0_177], %521 {strides = array<i32>} : memref<8x8x128xf32, #tpu.memory_space<vmem>>, vector<1x8x128xf32>,
    %522 = vector.shape_cast %513 : vector<8x1xi1> to vector<8x1xi1>
    %523 = vector.broadcast %522 : vector<8x1xi1> to vector<8x128xi1>
    %524 = arith.select %523, %511, %423 : vector<8x128xi1>, vector<8x128xf32>
    %c5_i32 = arith.constant 5 : i32
    %c7_i32_178 = arith.constant 7 : i32
    %525 = arith.subi %c7_i32_178, %c5_i32 : i32
    %c0_179 = arith.constant 0 : index
    %c0_180 = arith.constant 0 : index
    %526 = vector.load %arg5[%c0_179, %c0_180] : memref<128x384xf32, #tpu.memory_space<vmem>>, vector<128x384xf32>
    %cst_181 = arith.constant dense<0.000000e+00> : vector<8x384xf32>
    %527 = tpu.matmul %474, %526, %cst_181 {dimension_numbers = #tpu.dot_dimension_numbers<[1], [0], [0], [1], [0, 0, 1, 1], [], []>} : vector<8x128xf32>, vector<128x384xf32>, vector<8x384xf32> -> vector<8x384xf32>
    %528 = arith.index_cast %c5_i32 : i32 to index
    %c0_182 = arith.constant 0 : index
    %c0_183 = arith.constant 0 : index
    %529 = vector.load %arg13[%528, %c0_182, %c0_183] : memref<8x8x384xf32, #tpu.memory_space<vmem>>, vector<1x8x384xf32>
    %530 = vector.shape_cast %529 : vector<1x8x384xf32> to vector<8x384xf32>
    %531 = vector.extract_strided_slice %530 {offsets = [0, 0], sizes = [8, 128], strides = [1, 1]} : vector<8x384xf32> to vector<8x128xf32>
    %532 = vector.extract_strided_slice %530 {offsets = [0, 128], sizes = [8, 128], strides = [1, 1]} : vector<8x384xf32> to vector<8x128xf32>
    %533 = vector.extract_strided_slice %530 {offsets = [0, 256], sizes = [8, 128], strides = [1, 1]} : vector<8x384xf32> to vector<8x128xf32>
    %534 = vector.extract_strided_slice %527 {offsets = [0, 0], sizes = [8, 128], strides = [1, 1]} : vector<8x384xf32> to vector<8x128xf32>
    %535 = vector.extract_strided_slice %527 {offsets = [0, 128], sizes = [8, 128], strides = [1, 1]} : vector<8x384xf32> to vector<8x128xf32>
    %536 = vector.extract_strided_slice %527 {offsets = [0, 256], sizes = [8, 128], strides = [1, 1]} : vector<8x384xf32> to vector<8x128xf32>
    %537 = arith.addf %531, %534 : vector<8x128xf32>
    %cst_184 = arith.constant 5.000000e-01 : f32
    %538 = vector.broadcast %cst_184 : f32 to vector<8x128xf32>
    %539 = arith.mulf %538, %537 : vector<8x128xf32>
    %540 = math.tanh %539 : vector<8x128xf32>
    %cst_185 = arith.constant 1.000000e+00 : f32
    %541 = vector.broadcast %cst_185 : f32 to vector<8x128xf32>
    %542 = arith.addf %540, %541 : vector<8x128xf32>
    %cst_186 = arith.constant 5.000000e-01 : f32
    %543 = vector.broadcast %cst_186 : f32 to vector<8x128xf32>
    %544 = arith.mulf %543, %542 : vector<8x128xf32>
    %545 = arith.addf %532, %535 : vector<8x128xf32>
    %cst_187 = arith.constant 5.000000e-01 : f32
    %546 = vector.broadcast %cst_187 : f32 to vector<8x128xf32>
    %547 = arith.mulf %546, %545 : vector<8x128xf32>
    %548 = math.tanh %547 : vector<8x128xf32>
    %cst_188 = arith.constant 1.000000e+00 : f32
    %549 = vector.broadcast %cst_188 : f32 to vector<8x128xf32>
    %550 = arith.addf %548, %549 : vector<8x128xf32>
    %cst_189 = arith.constant 5.000000e-01 : f32
    %551 = vector.broadcast %cst_189 : f32 to vector<8x128xf32>
    %552 = arith.mulf %551, %550 : vector<8x128xf32>
    %553 = vector.broadcast %17 : vector<1x128xf32> to vector<8x128xf32>
    %554 = arith.addf %536, %553 : vector<8x128xf32>
    %555 = arith.mulf %544, %554 : vector<8x128xf32>
    %556 = arith.addf %533, %555 : vector<8x128xf32>
    %557 = math.tanh %556 : vector<8x128xf32>
    %cst_190 = arith.constant 1.000000e+00 : f32
    %558 = vector.broadcast %cst_190 : f32 to vector<8x128xf32>
    %559 = arith.subf %558, %552 : vector<8x128xf32>
    %560 = arith.mulf %559, %557 : vector<8x128xf32>
    %561 = arith.mulf %552, %474 : vector<8x128xf32>
    %562 = arith.addf %560, %561 : vector<8x128xf32>
    %563 = vector.broadcast %c5_i32 : i32 to vector<8x1xi32>
    %564 = arith.cmpi sgt, %0, %563 : vector<8x1xi32>
    %cst_191 = arith.constant 0.000000e+00 : f32
    %565 = vector.shape_cast %564 : vector<8x1xi1> to vector<8x1xi1>
    %566 = vector.broadcast %565 : vector<8x1xi1> to vector<8x128xi1>
    %567 = vector.broadcast %cst_191 : f32 to vector<8x128xf32>
    %568 = arith.select %566, %562, %567 : vector<8x128xi1>, vector<8x128xf32>
    %569 = arith.index_cast %c5_i32 : i32 to index
    %c0_192 = arith.constant 0 : index
    %c0_193 = arith.constant 0 : index
    %570 = vector.load %arg11[%569, %c0_192, %c0_193] : memref<8x8x128xf32, #tpu.memory_space<vmem>>, vector<1x8x128xf32>
    %571 = vector.shape_cast %570 : vector<1x8x128xf32> to vector<8x128xf32>
    %572 = vector.shape_cast %568 : vector<8x128xf32> to vector<1x8x128xf32>
    tpu.vector_store %arg11[%569, %c0_192, %c0_193], %572 {strides = array<i32>} : memref<8x8x128xf32, #tpu.memory_space<vmem>>, vector<1x8x128xf32>,
    %573 = vector.shape_cast %564 : vector<8x1xi1> to vector<8x1xi1>
    %574 = vector.broadcast %573 : vector<8x1xi1> to vector<8x128xi1>
    %575 = arith.select %574, %562, %474 : vector<8x128xi1>, vector<8x128xf32>
    %c0_194 = arith.constant 0 : index
    %c0_195 = arith.constant 0 : index
    %576 = vector.load %arg6[%c0_194, %c0_195] : memref<128x384xf32, #tpu.memory_space<vmem>>, vector<128x384xf32>
    %cst_196 = arith.constant dense<0.000000e+00> : vector<8x384xf32>
    %577 = tpu.matmul %524, %576, %cst_196 {dimension_numbers = #tpu.dot_dimension_numbers<[1], [0], [0], [1], [0, 0, 1, 1], [], []>} : vector<8x128xf32>, vector<128x384xf32>, vector<8x384xf32> -> vector<8x384xf32>
    %578 = arith.index_cast %525 : i32 to index
    %c0_197 = arith.constant 0 : index
    %c0_198 = arith.constant 0 : index
    %579 = vector.load %arg14[%578, %c0_197, %c0_198] : memref<8x8x384xf32, #tpu.memory_space<vmem>>, vector<1x8x384xf32>
    %580 = vector.shape_cast %579 : vector<1x8x384xf32> to vector<8x384xf32>
    %581 = vector.extract_strided_slice %580 {offsets = [0, 0], sizes = [8, 128], strides = [1, 1]} : vector<8x384xf32> to vector<8x128xf32>
    %582 = vector.extract_strided_slice %580 {offsets = [0, 128], sizes = [8, 128], strides = [1, 1]} : vector<8x384xf32> to vector<8x128xf32>
    %583 = vector.extract_strided_slice %580 {offsets = [0, 256], sizes = [8, 128], strides = [1, 1]} : vector<8x384xf32> to vector<8x128xf32>
    %584 = vector.extract_strided_slice %577 {offsets = [0, 0], sizes = [8, 128], strides = [1, 1]} : vector<8x384xf32> to vector<8x128xf32>
    %585 = vector.extract_strided_slice %577 {offsets = [0, 128], sizes = [8, 128], strides = [1, 1]} : vector<8x384xf32> to vector<8x128xf32>
    %586 = vector.extract_strided_slice %577 {offsets = [0, 256], sizes = [8, 128], strides = [1, 1]} : vector<8x384xf32> to vector<8x128xf32>
    %587 = arith.addf %581, %584 : vector<8x128xf32>
    %cst_199 = arith.constant 5.000000e-01 : f32
    %588 = vector.broadcast %cst_199 : f32 to vector<8x128xf32>
    %589 = arith.mulf %588, %587 : vector<8x128xf32>
    %590 = math.tanh %589 : vector<8x128xf32>
    %cst_200 = arith.constant 1.000000e+00 : f32
    %591 = vector.broadcast %cst_200 : f32 to vector<8x128xf32>
    %592 = arith.addf %590, %591 : vector<8x128xf32>
    %cst_201 = arith.constant 5.000000e-01 : f32
    %593 = vector.broadcast %cst_201 : f32 to vector<8x128xf32>
    %594 = arith.mulf %593, %592 : vector<8x128xf32>
    %595 = arith.addf %582, %585 : vector<8x128xf32>
    %cst_202 = arith.constant 5.000000e-01 : f32
    %596 = vector.broadcast %cst_202 : f32 to vector<8x128xf32>
    %597 = arith.mulf %596, %595 : vector<8x128xf32>
    %598 = math.tanh %597 : vector<8x128xf32>
    %cst_203 = arith.constant 1.000000e+00 : f32
    %599 = vector.broadcast %cst_203 : f32 to vector<8x128xf32>
    %600 = arith.addf %598, %599 : vector<8x128xf32>
    %cst_204 = arith.constant 5.000000e-01 : f32
    %601 = vector.broadcast %cst_204 : f32 to vector<8x128xf32>
    %602 = arith.mulf %601, %600 : vector<8x128xf32>
    %603 = vector.broadcast %18 : vector<1x128xf32> to vector<8x128xf32>
    %604 = arith.addf %586, %603 : vector<8x128xf32>
    %605 = arith.mulf %594, %604 : vector<8x128xf32>
    %606 = arith.addf %583, %605 : vector<8x128xf32>
    %607 = math.tanh %606 : vector<8x128xf32>
    %cst_205 = arith.constant 1.000000e+00 : f32
    %608 = vector.broadcast %cst_205 : f32 to vector<8x128xf32>
    %609 = arith.subf %608, %602 : vector<8x128xf32>
    %610 = arith.mulf %609, %607 : vector<8x128xf32>
    %611 = arith.mulf %602, %524 : vector<8x128xf32>
    %612 = arith.addf %610, %611 : vector<8x128xf32>
    %613 = vector.broadcast %525 : i32 to vector<8x1xi32>
    %614 = arith.cmpi sgt, %0, %613 : vector<8x1xi32>
    %cst_206 = arith.constant 0.000000e+00 : f32
    %615 = vector.shape_cast %614 : vector<8x1xi1> to vector<8x1xi1>
    %616 = vector.broadcast %615 : vector<8x1xi1> to vector<8x128xi1>
    %617 = vector.broadcast %cst_206 : f32 to vector<8x128xf32>
    %618 = arith.select %616, %612, %617 : vector<8x128xi1>, vector<8x128xf32>
    %619 = arith.index_cast %525 : i32 to index
    %c0_207 = arith.constant 0 : index
    %c0_208 = arith.constant 0 : index
    %620 = vector.load %arg15[%619, %c0_207, %c0_208] : memref<8x8x128xf32, #tpu.memory_space<vmem>>, vector<1x8x128xf32>
    %621 = vector.shape_cast %620 : vector<1x8x128xf32> to vector<8x128xf32>
    %622 = vector.shape_cast %618 : vector<8x128xf32> to vector<1x8x128xf32>
    tpu.vector_store %arg15[%619, %c0_207, %c0_208], %622 {strides = array<i32>} : memref<8x8x128xf32, #tpu.memory_space<vmem>>, vector<1x8x128xf32>,
    %623 = vector.shape_cast %614 : vector<8x1xi1> to vector<8x1xi1>
    %624 = vector.broadcast %623 : vector<8x1xi1> to vector<8x128xi1>
    %625 = arith.select %624, %612, %524 : vector<8x128xi1>, vector<8x128xf32>
    %c6_i32 = arith.constant 6 : i32
    %c7_i32_209 = arith.constant 7 : i32
    %626 = arith.subi %c7_i32_209, %c6_i32 : i32
    %c0_210 = arith.constant 0 : index
    %c0_211 = arith.constant 0 : index
    %627 = vector.load %arg5[%c0_210, %c0_211] : memref<128x384xf32, #tpu.memory_space<vmem>>, vector<128x384xf32>
    %cst_212 = arith.constant dense<0.000000e+00> : vector<8x384xf32>
    %628 = tpu.matmul %575, %627, %cst_212 {dimension_numbers = #tpu.dot_dimension_numbers<[1], [0], [0], [1], [0, 0, 1, 1], [], []>} : vector<8x128xf32>, vector<128x384xf32>, vector<8x384xf32> -> vector<8x384xf32>
    %629 = arith.index_cast %c6_i32 : i32 to index
    %c0_213 = arith.constant 0 : index
    %c0_214 = arith.constant 0 : index
    %630 = vector.load %arg13[%629, %c0_213, %c0_214] : memref<8x8x384xf32, #tpu.memory_space<vmem>>, vector<1x8x384xf32>
    %631 = vector.shape_cast %630 : vector<1x8x384xf32> to vector<8x384xf32>
    %632 = vector.extract_strided_slice %631 {offsets = [0, 0], sizes = [8, 128], strides = [1, 1]} : vector<8x384xf32> to vector<8x128xf32>
    %633 = vector.extract_strided_slice %631 {offsets = [0, 128], sizes = [8, 128], strides = [1, 1]} : vector<8x384xf32> to vector<8x128xf32>
    %634 = vector.extract_strided_slice %631 {offsets = [0, 256], sizes = [8, 128], strides = [1, 1]} : vector<8x384xf32> to vector<8x128xf32>
    %635 = vector.extract_strided_slice %628 {offsets = [0, 0], sizes = [8, 128], strides = [1, 1]} : vector<8x384xf32> to vector<8x128xf32>
    %636 = vector.extract_strided_slice %628 {offsets = [0, 128], sizes = [8, 128], strides = [1, 1]} : vector<8x384xf32> to vector<8x128xf32>
    %637 = vector.extract_strided_slice %628 {offsets = [0, 256], sizes = [8, 128], strides = [1, 1]} : vector<8x384xf32> to vector<8x128xf32>
    %638 = arith.addf %632, %635 : vector<8x128xf32>
    %cst_215 = arith.constant 5.000000e-01 : f32
    %639 = vector.broadcast %cst_215 : f32 to vector<8x128xf32>
    %640 = arith.mulf %639, %638 : vector<8x128xf32>
    %641 = math.tanh %640 : vector<8x128xf32>
    %cst_216 = arith.constant 1.000000e+00 : f32
    %642 = vector.broadcast %cst_216 : f32 to vector<8x128xf32>
    %643 = arith.addf %641, %642 : vector<8x128xf32>
    %cst_217 = arith.constant 5.000000e-01 : f32
    %644 = vector.broadcast %cst_217 : f32 to vector<8x128xf32>
    %645 = arith.mulf %644, %643 : vector<8x128xf32>
    %646 = arith.addf %633, %636 : vector<8x128xf32>
    %cst_218 = arith.constant 5.000000e-01 : f32
    %647 = vector.broadcast %cst_218 : f32 to vector<8x128xf32>
    %648 = arith.mulf %647, %646 : vector<8x128xf32>
    %649 = math.tanh %648 : vector<8x128xf32>
    %cst_219 = arith.constant 1.000000e+00 : f32
    %650 = vector.broadcast %cst_219 : f32 to vector<8x128xf32>
    %651 = arith.addf %649, %650 : vector<8x128xf32>
    %cst_220 = arith.constant 5.000000e-01 : f32
    %652 = vector.broadcast %cst_220 : f32 to vector<8x128xf32>
    %653 = arith.mulf %652, %651 : vector<8x128xf32>
    %654 = vector.broadcast %17 : vector<1x128xf32> to vector<8x128xf32>
    %655 = arith.addf %637, %654 : vector<8x128xf32>
    %656 = arith.mulf %645, %655 : vector<8x128xf32>
    %657 = arith.addf %634, %656 : vector<8x128xf32>
    %658 = math.tanh %657 : vector<8x128xf32>
    %cst_221 = arith.constant 1.000000e+00 : f32
    %659 = vector.broadcast %cst_221 : f32 to vector<8x128xf32>
    %660 = arith.subf %659, %653 : vector<8x128xf32>
    %661 = arith.mulf %660, %658 : vector<8x128xf32>
    %662 = arith.mulf %653, %575 : vector<8x128xf32>
    %663 = arith.addf %661, %662 : vector<8x128xf32>
    %664 = vector.broadcast %c6_i32 : i32 to vector<8x1xi32>
    %665 = arith.cmpi sgt, %0, %664 : vector<8x1xi32>
    %cst_222 = arith.constant 0.000000e+00 : f32
    %666 = vector.shape_cast %665 : vector<8x1xi1> to vector<8x1xi1>
    %667 = vector.broadcast %666 : vector<8x1xi1> to vector<8x128xi1>
    %668 = vector.broadcast %cst_222 : f32 to vector<8x128xf32>
    %669 = arith.select %667, %663, %668 : vector<8x128xi1>, vector<8x128xf32>
    %670 = arith.index_cast %c6_i32 : i32 to index
    %c0_223 = arith.constant 0 : index
    %c0_224 = arith.constant 0 : index
    %671 = vector.load %arg11[%670, %c0_223, %c0_224] : memref<8x8x128xf32, #tpu.memory_space<vmem>>, vector<1x8x128xf32>
    %672 = vector.shape_cast %671 : vector<1x8x128xf32> to vector<8x128xf32>
    %673 = vector.shape_cast %669 : vector<8x128xf32> to vector<1x8x128xf32>
    tpu.vector_store %arg11[%670, %c0_223, %c0_224], %673 {strides = array<i32>} : memref<8x8x128xf32, #tpu.memory_space<vmem>>, vector<1x8x128xf32>,
    %674 = vector.shape_cast %665 : vector<8x1xi1> to vector<8x1xi1>
    %675 = vector.broadcast %674 : vector<8x1xi1> to vector<8x128xi1>
    %676 = arith.select %675, %663, %575 : vector<8x128xi1>, vector<8x128xf32>
    %c0_225 = arith.constant 0 : index
    %c0_226 = arith.constant 0 : index
    %677 = vector.load %arg6[%c0_225, %c0_226] : memref<128x384xf32, #tpu.memory_space<vmem>>, vector<128x384xf32>
    %cst_227 = arith.constant dense<0.000000e+00> : vector<8x384xf32>
    %678 = tpu.matmul %625, %677, %cst_227 {dimension_numbers = #tpu.dot_dimension_numbers<[1], [0], [0], [1], [0, 0, 1, 1], [], []>} : vector<8x128xf32>, vector<128x384xf32>, vector<8x384xf32> -> vector<8x384xf32>
    %679 = arith.index_cast %626 : i32 to index
    %c0_228 = arith.constant 0 : index
    %c0_229 = arith.constant 0 : index
    %680 = vector.load %arg14[%679, %c0_228, %c0_229] : memref<8x8x384xf32, #tpu.memory_space<vmem>>, vector<1x8x384xf32>
    %681 = vector.shape_cast %680 : vector<1x8x384xf32> to vector<8x384xf32>
    %682 = vector.extract_strided_slice %681 {offsets = [0, 0], sizes = [8, 128], strides = [1, 1]} : vector<8x384xf32> to vector<8x128xf32>
    %683 = vector.extract_strided_slice %681 {offsets = [0, 128], sizes = [8, 128], strides = [1, 1]} : vector<8x384xf32> to vector<8x128xf32>
    %684 = vector.extract_strided_slice %681 {offsets = [0, 256], sizes = [8, 128], strides = [1, 1]} : vector<8x384xf32> to vector<8x128xf32>
    %685 = vector.extract_strided_slice %678 {offsets = [0, 0], sizes = [8, 128], strides = [1, 1]} : vector<8x384xf32> to vector<8x128xf32>
    %686 = vector.extract_strided_slice %678 {offsets = [0, 128], sizes = [8, 128], strides = [1, 1]} : vector<8x384xf32> to vector<8x128xf32>
    %687 = vector.extract_strided_slice %678 {offsets = [0, 256], sizes = [8, 128], strides = [1, 1]} : vector<8x384xf32> to vector<8x128xf32>
    %688 = arith.addf %682, %685 : vector<8x128xf32>
    %cst_230 = arith.constant 5.000000e-01 : f32
    %689 = vector.broadcast %cst_230 : f32 to vector<8x128xf32>
    %690 = arith.mulf %689, %688 : vector<8x128xf32>
    %691 = math.tanh %690 : vector<8x128xf32>
    %cst_231 = arith.constant 1.000000e+00 : f32
    %692 = vector.broadcast %cst_231 : f32 to vector<8x128xf32>
    %693 = arith.addf %691, %692 : vector<8x128xf32>
    %cst_232 = arith.constant 5.000000e-01 : f32
    %694 = vector.broadcast %cst_232 : f32 to vector<8x128xf32>
    %695 = arith.mulf %694, %693 : vector<8x128xf32>
    %696 = arith.addf %683, %686 : vector<8x128xf32>
    %cst_233 = arith.constant 5.000000e-01 : f32
    %697 = vector.broadcast %cst_233 : f32 to vector<8x128xf32>
    %698 = arith.mulf %697, %696 : vector<8x128xf32>
    %699 = math.tanh %698 : vector<8x128xf32>
    %cst_234 = arith.constant 1.000000e+00 : f32
    %700 = vector.broadcast %cst_234 : f32 to vector<8x128xf32>
    %701 = arith.addf %699, %700 : vector<8x128xf32>
    %cst_235 = arith.constant 5.000000e-01 : f32
    %702 = vector.broadcast %cst_235 : f32 to vector<8x128xf32>
    %703 = arith.mulf %702, %701 : vector<8x128xf32>
    %704 = vector.broadcast %18 : vector<1x128xf32> to vector<8x128xf32>
    %705 = arith.addf %687, %704 : vector<8x128xf32>
    %706 = arith.mulf %695, %705 : vector<8x128xf32>
    %707 = arith.addf %684, %706 : vector<8x128xf32>
    %708 = math.tanh %707 : vector<8x128xf32>
    %cst_236 = arith.constant 1.000000e+00 : f32
    %709 = vector.broadcast %cst_236 : f32 to vector<8x128xf32>
    %710 = arith.subf %709, %703 : vector<8x128xf32>
    %711 = arith.mulf %710, %708 : vector<8x128xf32>
    %712 = arith.mulf %703, %625 : vector<8x128xf32>
    %713 = arith.addf %711, %712 : vector<8x128xf32>
    %714 = vector.broadcast %626 : i32 to vector<8x1xi32>
    %715 = arith.cmpi sgt, %0, %714 : vector<8x1xi32>
    %cst_237 = arith.constant 0.000000e+00 : f32
    %716 = vector.shape_cast %715 : vector<8x1xi1> to vector<8x1xi1>
    %717 = vector.broadcast %716 : vector<8x1xi1> to vector<8x128xi1>
    %718 = vector.broadcast %cst_237 : f32 to vector<8x128xf32>
    %719 = arith.select %717, %713, %718 : vector<8x128xi1>, vector<8x128xf32>
    %720 = arith.index_cast %626 : i32 to index
    %c0_238 = arith.constant 0 : index
    %c0_239 = arith.constant 0 : index
    %721 = vector.load %arg15[%720, %c0_238, %c0_239] : memref<8x8x128xf32, #tpu.memory_space<vmem>>, vector<1x8x128xf32>
    %722 = vector.shape_cast %721 : vector<1x8x128xf32> to vector<8x128xf32>
    %723 = vector.shape_cast %719 : vector<8x128xf32> to vector<1x8x128xf32>
    tpu.vector_store %arg15[%720, %c0_238, %c0_239], %723 {strides = array<i32>} : memref<8x8x128xf32, #tpu.memory_space<vmem>>, vector<1x8x128xf32>,
    %724 = vector.shape_cast %715 : vector<8x1xi1> to vector<8x1xi1>
    %725 = vector.broadcast %724 : vector<8x1xi1> to vector<8x128xi1>
    %726 = arith.select %725, %713, %625 : vector<8x128xi1>, vector<8x128xf32>
    %c7_i32_240 = arith.constant 7 : i32
    %c7_i32_241 = arith.constant 7 : i32
    %727 = arith.subi %c7_i32_241, %c7_i32_240 : i32
    %c0_242 = arith.constant 0 : index
    %c0_243 = arith.constant 0 : index
    %728 = vector.load %arg5[%c0_242, %c0_243] : memref<128x384xf32, #tpu.memory_space<vmem>>, vector<128x384xf32>
    %cst_244 = arith.constant dense<0.000000e+00> : vector<8x384xf32>
    %729 = tpu.matmul %676, %728, %cst_244 {dimension_numbers = #tpu.dot_dimension_numbers<[1], [0], [0], [1], [0, 0, 1, 1], [], []>} : vector<8x128xf32>, vector<128x384xf32>, vector<8x384xf32> -> vector<8x384xf32>
    %730 = arith.index_cast %c7_i32_240 : i32 to index
    %c0_245 = arith.constant 0 : index
    %c0_246 = arith.constant 0 : index
    %731 = vector.load %arg13[%730, %c0_245, %c0_246] : memref<8x8x384xf32, #tpu.memory_space<vmem>>, vector<1x8x384xf32>
    %732 = vector.shape_cast %731 : vector<1x8x384xf32> to vector<8x384xf32>
    %733 = vector.extract_strided_slice %732 {offsets = [0, 0], sizes = [8, 128], strides = [1, 1]} : vector<8x384xf32> to vector<8x128xf32>
    %734 = vector.extract_strided_slice %732 {offsets = [0, 128], sizes = [8, 128], strides = [1, 1]} : vector<8x384xf32> to vector<8x128xf32>
    %735 = vector.extract_strided_slice %732 {offsets = [0, 256], sizes = [8, 128], strides = [1, 1]} : vector<8x384xf32> to vector<8x128xf32>
    %736 = vector.extract_strided_slice %729 {offsets = [0, 0], sizes = [8, 128], strides = [1, 1]} : vector<8x384xf32> to vector<8x128xf32>
    %737 = vector.extract_strided_slice %729 {offsets = [0, 128], sizes = [8, 128], strides = [1, 1]} : vector<8x384xf32> to vector<8x128xf32>
    %738 = vector.extract_strided_slice %729 {offsets = [0, 256], sizes = [8, 128], strides = [1, 1]} : vector<8x384xf32> to vector<8x128xf32>
    %739 = arith.addf %733, %736 : vector<8x128xf32>
    %cst_247 = arith.constant 5.000000e-01 : f32
    %740 = vector.broadcast %cst_247 : f32 to vector<8x128xf32>
    %741 = arith.mulf %740, %739 : vector<8x128xf32>
    %742 = math.tanh %741 : vector<8x128xf32>
    %cst_248 = arith.constant 1.000000e+00 : f32
    %743 = vector.broadcast %cst_248 : f32 to vector<8x128xf32>
    %744 = arith.addf %742, %743 : vector<8x128xf32>
    %cst_249 = arith.constant 5.000000e-01 : f32
    %745 = vector.broadcast %cst_249 : f32 to vector<8x128xf32>
    %746 = arith.mulf %745, %744 : vector<8x128xf32>
    %747 = arith.addf %734, %737 : vector<8x128xf32>
    %cst_250 = arith.constant 5.000000e-01 : f32
    %748 = vector.broadcast %cst_250 : f32 to vector<8x128xf32>
    %749 = arith.mulf %748, %747 : vector<8x128xf32>
    %750 = math.tanh %749 : vector<8x128xf32>
    %cst_251 = arith.constant 1.000000e+00 : f32
    %751 = vector.broadcast %cst_251 : f32 to vector<8x128xf32>
    %752 = arith.addf %750, %751 : vector<8x128xf32>
    %cst_252 = arith.constant 5.000000e-01 : f32
    %753 = vector.broadcast %cst_252 : f32 to vector<8x128xf32>
    %754 = arith.mulf %753, %752 : vector<8x128xf32>
    %755 = vector.broadcast %17 : vector<1x128xf32> to vector<8x128xf32>
    %756 = arith.addf %738, %755 : vector<8x128xf32>
    %757 = arith.mulf %746, %756 : vector<8x128xf32>
    %758 = arith.addf %735, %757 : vector<8x128xf32>
    %759 = math.tanh %758 : vector<8x128xf32>
    %cst_253 = arith.constant 1.000000e+00 : f32
    %760 = vector.broadcast %cst_253 : f32 to vector<8x128xf32>
    %761 = arith.subf %760, %754 : vector<8x128xf32>
    %762 = arith.mulf %761, %759 : vector<8x128xf32>
    %763 = arith.mulf %754, %676 : vector<8x128xf32>
    %764 = arith.addf %762, %763 : vector<8x128xf32>
    %765 = vector.broadcast %c7_i32_240 : i32 to vector<8x1xi32>
    %766 = arith.cmpi sgt, %0, %765 : vector<8x1xi32>
    %cst_254 = arith.constant 0.000000e+00 : f32
    %767 = vector.shape_cast %766 : vector<8x1xi1> to vector<8x1xi1>
    %768 = vector.broadcast %767 : vector<8x1xi1> to vector<8x128xi1>
    %769 = vector.broadcast %cst_254 : f32 to vector<8x128xf32>
    %770 = arith.select %768, %764, %769 : vector<8x128xi1>, vector<8x128xf32>
    %771 = arith.index_cast %c7_i32_240 : i32 to index
    %c0_255 = arith.constant 0 : index
    %c0_256 = arith.constant 0 : index
    %772 = vector.load %arg11[%771, %c0_255, %c0_256] : memref<8x8x128xf32, #tpu.memory_space<vmem>>, vector<1x8x128xf32>
    %773 = vector.shape_cast %772 : vector<1x8x128xf32> to vector<8x128xf32>
    %774 = vector.shape_cast %770 : vector<8x128xf32> to vector<1x8x128xf32>
    tpu.vector_store %arg11[%771, %c0_255, %c0_256], %774 {strides = array<i32>} : memref<8x8x128xf32, #tpu.memory_space<vmem>>, vector<1x8x128xf32>,
    %775 = vector.shape_cast %766 : vector<8x1xi1> to vector<8x1xi1>
    %776 = vector.broadcast %775 : vector<8x1xi1> to vector<8x128xi1>
    %777 = arith.select %776, %764, %676 : vector<8x128xi1>, vector<8x128xf32>
    %c0_257 = arith.constant 0 : index
    %c0_258 = arith.constant 0 : index
    %778 = vector.load %arg6[%c0_257, %c0_258] : memref<128x384xf32, #tpu.memory_space<vmem>>, vector<128x384xf32>
    %cst_259 = arith.constant dense<0.000000e+00> : vector<8x384xf32>
    %779 = tpu.matmul %726, %778, %cst_259 {dimension_numbers = #tpu.dot_dimension_numbers<[1], [0], [0], [1], [0, 0, 1, 1], [], []>} : vector<8x128xf32>, vector<128x384xf32>, vector<8x384xf32> -> vector<8x384xf32>
    %780 = arith.index_cast %727 : i32 to index
    %c0_260 = arith.constant 0 : index
    %c0_261 = arith.constant 0 : index
    %781 = vector.load %arg14[%780, %c0_260, %c0_261] : memref<8x8x384xf32, #tpu.memory_space<vmem>>, vector<1x8x384xf32>
    %782 = vector.shape_cast %781 : vector<1x8x384xf32> to vector<8x384xf32>
    %783 = vector.extract_strided_slice %782 {offsets = [0, 0], sizes = [8, 128], strides = [1, 1]} : vector<8x384xf32> to vector<8x128xf32>
    %784 = vector.extract_strided_slice %782 {offsets = [0, 128], sizes = [8, 128], strides = [1, 1]} : vector<8x384xf32> to vector<8x128xf32>
    %785 = vector.extract_strided_slice %782 {offsets = [0, 256], sizes = [8, 128], strides = [1, 1]} : vector<8x384xf32> to vector<8x128xf32>
    %786 = vector.extract_strided_slice %779 {offsets = [0, 0], sizes = [8, 128], strides = [1, 1]} : vector<8x384xf32> to vector<8x128xf32>
    %787 = vector.extract_strided_slice %779 {offsets = [0, 128], sizes = [8, 128], strides = [1, 1]} : vector<8x384xf32> to vector<8x128xf32>
    %788 = vector.extract_strided_slice %779 {offsets = [0, 256], sizes = [8, 128], strides = [1, 1]} : vector<8x384xf32> to vector<8x128xf32>
    %789 = arith.addf %783, %786 : vector<8x128xf32>
    %cst_262 = arith.constant 5.000000e-01 : f32
    %790 = vector.broadcast %cst_262 : f32 to vector<8x128xf32>
    %791 = arith.mulf %790, %789 : vector<8x128xf32>
    %792 = math.tanh %791 : vector<8x128xf32>
    %cst_263 = arith.constant 1.000000e+00 : f32
    %793 = vector.broadcast %cst_263 : f32 to vector<8x128xf32>
    %794 = arith.addf %792, %793 : vector<8x128xf32>
    %cst_264 = arith.constant 5.000000e-01 : f32
    %795 = vector.broadcast %cst_264 : f32 to vector<8x128xf32>
    %796 = arith.mulf %795, %794 : vector<8x128xf32>
    %797 = arith.addf %784, %787 : vector<8x128xf32>
    %cst_265 = arith.constant 5.000000e-01 : f32
    %798 = vector.broadcast %cst_265 : f32 to vector<8x128xf32>
    %799 = arith.mulf %798, %797 : vector<8x128xf32>
    %800 = math.tanh %799 : vector<8x128xf32>
    %cst_266 = arith.constant 1.000000e+00 : f32
    %801 = vector.broadcast %cst_266 : f32 to vector<8x128xf32>
    %802 = arith.addf %800, %801 : vector<8x128xf32>
    %cst_267 = arith.constant 5.000000e-01 : f32
    %803 = vector.broadcast %cst_267 : f32 to vector<8x128xf32>
    %804 = arith.mulf %803, %802 : vector<8x128xf32>
    %805 = vector.broadcast %18 : vector<1x128xf32> to vector<8x128xf32>
    %806 = arith.addf %788, %805 : vector<8x128xf32>
    %807 = arith.mulf %796, %806 : vector<8x128xf32>
    %808 = arith.addf %785, %807 : vector<8x128xf32>
    %809 = math.tanh %808 : vector<8x128xf32>
    %cst_268 = arith.constant 1.000000e+00 : f32
    %810 = vector.broadcast %cst_268 : f32 to vector<8x128xf32>
    %811 = arith.subf %810, %804 : vector<8x128xf32>
    %812 = arith.mulf %811, %809 : vector<8x128xf32>
    %813 = arith.mulf %804, %726 : vector<8x128xf32>
    %814 = arith.addf %812, %813 : vector<8x128xf32>
    %815 = vector.broadcast %727 : i32 to vector<8x1xi32>
    %816 = arith.cmpi sgt, %0, %815 : vector<8x1xi32>
    %cst_269 = arith.constant 0.000000e+00 : f32
    %817 = vector.shape_cast %816 : vector<8x1xi1> to vector<8x1xi1>
    %818 = vector.broadcast %817 : vector<8x1xi1> to vector<8x128xi1>
    %819 = vector.broadcast %cst_269 : f32 to vector<8x128xf32>
    %820 = arith.select %818, %814, %819 : vector<8x128xi1>, vector<8x128xf32>
    %821 = arith.index_cast %727 : i32 to index
    %c0_270 = arith.constant 0 : index
    %c0_271 = arith.constant 0 : index
    %822 = vector.load %arg15[%821, %c0_270, %c0_271] : memref<8x8x128xf32, #tpu.memory_space<vmem>>, vector<1x8x128xf32>
    %823 = vector.shape_cast %822 : vector<1x8x128xf32> to vector<8x128xf32>
    %824 = vector.shape_cast %820 : vector<8x128xf32> to vector<1x8x128xf32>
    tpu.vector_store %arg15[%821, %c0_270, %c0_271], %824 {strides = array<i32>} : memref<8x8x128xf32, #tpu.memory_space<vmem>>, vector<1x8x128xf32>,
    %825 = vector.shape_cast %816 : vector<8x1xi1> to vector<8x1xi1>
    %826 = vector.broadcast %825 : vector<8x1xi1> to vector<8x128xi1>
    %827 = arith.select %826, %814, %726 : vector<8x128xi1>, vector<8x128xf32>
    %c8_i32 = arith.constant 8 : i32
    %c0_272 = arith.constant 0 : index
    %c0_273 = arith.constant 0 : index
    %c0_274 = arith.constant 0 : index
    %828 = vector.load %arg12[%c0_272, %c0_273, %c0_274] : memref<2x8x128xf32, #tpu.memory_space<vmem>>, vector<1x8x128xf32>
    %829 = vector.shape_cast %828 : vector<1x8x128xf32> to vector<8x128xf32>
    %830 = vector.shape_cast %777 : vector<8x128xf32> to vector<1x8x128xf32>
    tpu.vector_store %arg12[%c0_272, %c0_273, %c0_274], %830 {strides = array<i32>} : memref<2x8x128xf32, #tpu.memory_space<vmem>>, vector<1x8x128xf32>,
    %c1 = arith.constant 1 : index
    %c0_275 = arith.constant 0 : index
    %c0_276 = arith.constant 0 : index
    %831 = vector.load %arg12[%c1, %c0_275, %c0_276] : memref<2x8x128xf32, #tpu.memory_space<vmem>>, vector<1x8x128xf32>
    %832 = vector.shape_cast %831 : vector<1x8x128xf32> to vector<8x128xf32>
    %833 = vector.shape_cast %827 : vector<8x128xf32> to vector<1x8x128xf32>
    tpu.vector_store %arg12[%c1, %c0_275, %c0_276], %833 {strides = array<i32>} : memref<2x8x128xf32, #tpu.memory_space<vmem>>, vector<1x8x128xf32>,
    %c0_277 = arith.constant 0 : index
    %c0_278 = arith.constant 0 : index
    %c0_279 = arith.constant 0 : index
    %834 = vector.load %arg11[%c0_277, %c0_278, %c0_279] : memref<8x8x128xf32, #tpu.memory_space<vmem>>, vector<8x8x128xf32>
    %c0_280 = arith.constant 0 : index
    %c0_281 = arith.constant 0 : index
    %c0_282 = arith.constant 0 : index
    %835 = vector.load %arg15[%c0_280, %c0_281, %c0_282] : memref<8x8x128xf32, #tpu.memory_space<vmem>>, vector<8x8x128xf32>
    %836 = arith.addf %834, %835 : vector<8x8x128xf32>
    %c0_283 = arith.constant 0 : index
    %c0_284 = arith.constant 0 : index
    %c0_285 = arith.constant 0 : index
    %837 = vector.load %arg11[%c0_283, %c0_284, %c0_285] : memref<8x8x128xf32, #tpu.memory_space<vmem>>, vector<8x8x128xf32>
    tpu.vector_store %arg11[%c0_283, %c0_284, %c0_285], %836 {strides = array<i32>} : memref<8x8x128xf32, #tpu.memory_space<vmem>>, vector<8x8x128xf32>,
    return
  }
  func.func @transform_0(%arg0: i32) -> (i32, i32, i32) {
    %c0_i32 = arith.constant 0 : i32
    %c0_i32_0 = arith.constant 0 : i32
    %c0_i32_1 = arith.constant 0 : i32
    return %c0_i32, %arg0, %c0_i32_0 : i32, i32, i32
  }
  func.func @transform_1(%arg0: i32) -> (i32, i32) {
    %c0_i32 = arith.constant 0 : i32
    %c0_i32_0 = arith.constant 0 : i32
    return %arg0, %c0_i32 : i32, i32
  }
  func.func @transform_2(%arg0: i32) -> (i32, i32) {
    %c0_i32 = arith.constant 0 : i32
    %c0_i32_0 = arith.constant 0 : i32
    %c0_i32_1 = arith.constant 0 : i32
    return %c0_i32, %c0_i32_0 : i32, i32
  }
  func.func @transform_3(%arg0: i32) -> (i32, i32) {
    %c0_i32 = arith.constant 0 : i32
    %c0_i32_0 = arith.constant 0 : i32
    %c0_i32_1 = arith.constant 0 : i32
    return %c0_i32, %c0_i32_0 : i32, i32
  }
  func.func @transform_4(%arg0: i32) -> (i32, i32) {
    %c0_i32 = arith.constant 0 : i32
    %c0_i32_0 = arith.constant 0 : i32
    %c0_i32_1 = arith.constant 0 : i32
    return %c0_i32, %c0_i32_0 : i32, i32
  }
  func.func @transform_5(%arg0: i32) -> (i32, i32) {
    %c0_i32 = arith.constant 0 : i32
    %c0_i32_0 = arith.constant 0 : i32
    %c0_i32_1 = arith.constant 0 : i32
    return %c0_i32, %c0_i32_0 : i32, i32
  }
  func.func @transform_6(%arg0: i32) -> (i32, i32) {
    %c0_i32 = arith.constant 0 : i32
    %c0_i32_0 = arith.constant 0 : i32
    %c0_i32_1 = arith.constant 0 : i32
    return %c0_i32, %c0_i32_0 : i32, i32
  }
  func.func @transform_7(%arg0: i32) -> (i32, i32) {
    %c0_i32 = arith.constant 0 : i32
    %c0_i32_0 = arith.constant 0 : i32
    %c0_i32_1 = arith.constant 0 : i32
    return %c0_i32, %c0_i32_0 : i32, i32
  }
  func.func @transform_8(%arg0: i32) -> (i32, i32) {
    %c0_i32 = arith.constant 0 : i32
    %c0_i32_0 = arith.constant 0 : i32
    %c0_i32_1 = arith.constant 0 : i32
    return %c0_i32, %c0_i32_0 : i32, i32
  }
  func.func @transform_9(%arg0: i32) -> (i32, i32) {
    %c0_i32 = arith.constant 0 : i32
    %c0_i32_0 = arith.constant 0 : i32
    %c0_i32_1 = arith.constant 0 : i32
    return %c0_i32, %c0_i32_0 : i32, i32
  }
  func.func @transform_10(%arg0: i32) -> (i32, i32, i32) {
    %c0_i32 = arith.constant 0 : i32
    %c0_i32_0 = arith.constant 0 : i32
    %c0_i32_1 = arith.constant 0 : i32
    return %c0_i32, %arg0, %c0_i32_0 : i32, i32, i32
  }
  func.func @transform_11(%arg0: i32) -> (i32, i32, i32) {
    %c0_i32 = arith.constant 0 : i32
    %c0_i32_0 = arith.constant 0 : i32
    %c0_i32_1 = arith.constant 0 : i32
    return %c0_i32, %arg0, %c0_i32_0 : i32, i32, i32
  }
}

</mosaic_0001>

<bundles_post_ra>
// kernel: encoder_rnn_forward.1
= control target key start
LH: loop header
LB: loop body
LE: loop exit
PB: predicated region body
PF: predicated region fallthrough
CT: control target
= control target key end

     0   :  { %v9367_v3 = vmov 0.0   ;;  %v6376_v34 = vmov 0   ;;  %vm6378_vm2 = vmmov 0   ;;  %s9355_s2 = inlined_call_operand.vmem [shape: f32[128,384], index: 2, kind: input, shape index: {}]   ;;  %s9356_s0 = inlined_call_operand.vmem [shape: f32[8,8,128], index: 0, kind: input, shape index: {}]   ;;  %s9357_s3 = inlined_call_operand.vmem [shape: f32[128,384], index: 3, kind: input, shape index: {}]   ;;  %s9358_s4 = inlined_call_operand.vmem [shape: f32[128,384], index: 4, kind: input, shape index: {}]   ;;  %s9359_s1 = inlined_call_operand.vmem [shape: s32[8,1], index: 1, kind: input, shape index: {}]   ;;  %s9360_s5 = inlined_call_operand.vmem [shape: f32[128,384], index: 5, kind: input, shape index: {}]   ;;  %s9361_s6 = inlined_call_operand.vmem [shape: f32[1,384], index: 6, kind: input, shape index: {}]   ;;  %s9362_s7 = inlined_call_operand.vmem [shape: f32[1,384], index: 7, kind: input, shape index: {}]   ;;  %s9363_s8 = inlined_call_operand.vmem [shape: f32[1,128], index: 8, kind: input, shape index: {}]   ;;  %s9364_s10 = inlined_call_operand.vmem [shape: f32[8,8,128], index: 10, kind: output, shape index: {0}]   ;;  %s9365_s9 = inlined_call_operand.vmem [shape: f32[1,128], index: 9, kind: input, shape index: {}]   ;;  %s9366_s11 = inlined_call_operand.vmem [shape: f32[2,8,128], index: 11, kind: output, shape index: {1}]  }
   0x1   :  { %v47_v0 = vld [vmem:[%s9355_s2 + $0x8] sm:$0xff]  ;;  %v50_v1 = vld [vmem:[%s9355_s2 + $0x20] sm:$0xff]  ;;  %175 = vmatprep.mubr.f32.mxu0 %v9367_v3  ;;  %v49_v5 = vld [vmem:[%s9355_s2 + $0x18] sm:$0xff]  ;;  %6273 = vset.pattern.permute.xlu0 %v6376_v34 }
   0x2   :  { %v46_v2 = vld [vmem:[%s9355_s2] sm:$0xff]  ;;  %v5181_v4 = vpack.c.bf16 %v50_v1, %v47_v0  ;;  %v53_v6 = vld [vmem:[%s9355_s2 + $0x38] sm:$0xff]  ;;  %v56_v7 = vld [vmem:[%s9355_s2 + $0x50] sm:$0xff]  ;;  %6274 = vset.pattern.permute.xlu1 %v6376_v34 }
   0x3   :  { %v5183_v8 = vpack.c.bf16 %v49_v5, %v46_v2  ;;  %v5185_v9 = vpack.c.bf16 %v56_v7, %v53_v6  ;;  %v52_v10 = vld [vmem:[%s9355_s2 + $0x30] sm:$0xff]  ;;  %v55_v11 = vld [vmem:[%s9355_s2 + $0x48] sm:$0xff]  ;;  %v62_v13 = vld [vmem:[%s9355_s2 + $0x80] sm:$0xff] }
   0x4   :  { %v59_v12 = vld [vmem:[%s9355_s2 + $0x68] sm:$0xff]  ;;  %5182 = vmatprep.subr.bf16.mxu0 %v5181_v4  ;;  %v5187_v14 = vpack.c.bf16 %v55_v11, %v52_v10  ;;  %v58_v16 = vld [vmem:[%s9355_s2 + $0x60] sm:$0xff]  ;;  %v61_v17 = vld [vmem:[%s9355_s2 + $0x78] sm:$0xff] }
   0x5   :  { %5184 = vmatpush1.bf16.msra.mxu0 %v5183_v8  ;;  %v5189_v15 = vpack.c.bf16 %v62_v13, %v59_v12  ;;  %v65_v18 = vld [vmem:[%s9355_s2 + $0x98] sm:$0xff]  ;;  %v68_v19 = vld [vmem:[%s9355_s2 + $0xb0] sm:$0xff]  ;;  %v51_v21 = vld [vmem:[%s9355_s2 + $0x28] sm:$0xff]  ;;  %v5191_v23 = vpack.c.bf16 %v61_v17, %v58_v16 }
   0x6   :  { %5186 = vmatprep.subr.bf16.mxu0 %v5185_v9  ;;  %v48_v20 = vld [vmem:[%s9355_s2 + $0x10] sm:$0xff]  ;;  %v54_v24 = vld [vmem:[%s9355_s2 + $0x40] sm:$0xff]  ;;  %v57_v25 = vld [vmem:[%s9355_s2 + $0x58] sm:$0xff]  ;;  %v5193_v26 = vpack.c.bf16 %v68_v19, %v65_v18 }
   0x7   :  { %v5213_v22 = vpack.c.bf16 %v51_v21, %v48_v20  ;;  %v64_v27 = vld [vmem:[%s9355_s2 + $0x90] sm:$0xff]  ;;  %v67_v28 = vld [vmem:[%s9355_s2 + $0xa8] sm:$0xff]  ;;  %v5217_v30 = vpack.c.bf16 %v57_v25, %v54_v24  ;;  %v74_v31 = vld [vmem:[%s9355_s2 + $0xe0] sm:$0xff] }
   0x8   :  { %v71_v29 = vld [vmem:[%s9355_s2 + $0xc8] sm:$0xff]  ;;  %v60_v32 = vld [vmem:[%s9355_s2 + $0x70] sm:$0xff]  ;;  %v5195_v36 = vpack.c.bf16 %v67_v28, %v64_v27  ;;  %v66_v37 = vld [vmem:[%s9355_s2 + $0xa0] sm:$0xff] }
   0x9   :  { %5188 = vmatpush1.bf16.msra.mxu0 %v5187_v14  ;;  %5214 = vmatprep.subr.bf16.mxu1 %v5213_v22  ;;  %v63_v33 = vld [vmem:[%s9355_s2 + $0x88] sm:$0xff]  ;;  %v69_v38 = vld [vmem:[%s9355_s2 + $0xb8] sm:$0xff]  ;;  %v5197_v39 = vpack.c.bf16 %v74_v31, %v71_v29  ;;  %v70_v40 = vld [vmem:[%s9355_s2 + $0xc0] sm:$0xff] }
   0xa   :  { %5190 = vmatprep.subr.bf16.mxu0 %v5189_v15  ;;  %5216 = vmatpush3.bf16.msra.mxu1 %v5213_v22  ;;  %v5221_v35 = vpack.c.bf16 %v63_v33, %v60_v32  ;;  %v73_v41 = vld [vmem:[%s9355_s2 + $0xd8] sm:$0xff]  ;;  %v6529_v42 = vld [vmem:[%s9356_s0] sm:$0xff]  ;;  %v80_v44 = vld [vmem:[%s9355_s2 + $0x110] sm:$0xff]  ;;  %v5225_v45 = vpack.c.bf16 %v69_v38, %v66_v37 }
   0xb   :  { %5218 = vmatprep.subr.bf16.mxu1 %v5217_v30  ;;  %v77_v43 = vld [vmem:[%s9355_s2 + $0xf8] sm:$0xff]  ;;  %4565 = vmatprep.mubr.f32.mxu1 %v6529_v42  ;;  %v5199_v46 = vpack.c.bf16 %v73_v41, %v70_v40  ;;  %v72_v47 = vld [vmem:[%s9355_s2 + $0xd0] sm:$0xff]  ;;  %v75_v48 = vld [vmem:[%s9355_s2 + $0xe8] sm:$0xff] }
   0xc   :  { %v5201_v49 = vpack.c.bf16 %v80_v44, %v77_v43  ;;  %v76_v50 = vld [vmem:[%s9355_s2 + $0xf0] sm:$0xff]  ;;  %v79_v51 = vld [vmem:[%s9355_s2 + $0x108] sm:$0xff]  ;;  %v86_v53 = vld [vmem:[%s9355_s2 + $0x140] sm:$0xff]  ;;  %v5229_v54 = vpack.c.bf16 %v75_v48, %v72_v47 }
   0xd   :  { %5192 = vmatpush1.bf16.msra.mxu0 %v5191_v23  ;;  %v83_v52 = vld [vmem:[%s9355_s2 + $0x128] sm:$0xff]  ;;  %v5203_v55 = vpack.c.bf16 %v79_v51, %v76_v50  ;;  %v78_v56 = vld [vmem:[%s9355_s2 + $0x100] sm:$0xff]  ;;  %v81_v57 = vld [vmem:[%s9355_s2 + $0x118] sm:$0xff] }
   0xe   :  { %5194 = vmatprep.subr.bf16.mxu0 %v5193_v26  ;;  %5220 = vmatpush3.bf16.msra.mxu1 %v5217_v30  ;;  %v5205_v58 = vpack.c.bf16 %v86_v53, %v83_v52  ;;  %v82_v59 = vld [vmem:[%s9355_s2 + $0x120] sm:$0xff]  ;;  %v85_v60 = vld [vmem:[%s9355_s2 + $0x138] sm:$0xff]  ;;  %v92_v62 = vld [vmem:[%s9355_s2 + $0x170] sm:$0xff]  ;;  %v5233_v63 = vpack.c.bf16 %v81_v57, %v78_v56 }
   0xf   :  { %5222 = vmatprep.subr.bf16.mxu1 %v5221_v35  ;;  %v89_v61 = vld [vmem:[%s9355_s2 + $0x158] sm:$0xff]  ;;  %v5207_v0 = vpack.c.bf16 %v85_v60, %v82_v59  ;;  %v84_v1 = vld [vmem:[%s9355_s2 + $0x130] sm:$0xff]  ;;  %v87_v2 = vld [vmem:[%s9355_s2 + $0x148] sm:$0xff] }
  0x10   :  { %v5209_v4 = vpack.c.bf16 %v92_v62, %v89_v61  ;;  %v88_v5 = vld [vmem:[%s9355_s2 + $0x150] sm:$0xff]  ;;  %v91_v6 = vld [vmem:[%s9355_s2 + $0x168] sm:$0xff]  ;;  %v357_v8 = vld [vmem:[%s9357_s3 + $0x20] sm:$0xff]  ;;  %v5237_v9 = vpack.c.bf16 %v87_v2, %v84_v1 }
  0x11   :  { %5196 = vmatpush1.bf16.msra.mxu0 %v5195_v36  ;;  %v354_v7 = vld [vmem:[%s9357_s3 + $0x8] sm:$0xff]  ;;  %v5211_v10 = vpack.c.bf16 %v91_v6, %v88_v5  ;;  %v90_v11 = vld [vmem:[%s9355_s2 + $0x160] sm:$0xff]  ;;  %v93_v12 = vld [vmem:[%s9355_s2 + $0x178] sm:$0xff] }
  0x12   :  { %5198 = vmatprep.subr.bf16.mxu0 %v5197_v39  ;;  %5224 = vmatpush3.bf16.msra.mxu1 %v5221_v35  ;;  %v5245_v13 = vpack.c.bf16 %v357_v8, %v354_v7  ;;  %v353_v14 = vld [vmem:[%s9357_s3] sm:$0xff]  ;;  %v356_v15 = vld [vmem:[%s9357_s3 + $0x18] sm:$0xff]  ;;  %v363_v17 = vld [vmem:[%s9357_s3 + $0x50] sm:$0xff]  ;;  %v5241_v18 = vpack.c.bf16 %v93_v12, %v90_v11 }
  0x13   :  { %5226 = vmatprep.subr.bf16.mxu1 %v5225_v45  ;;  %v360_v16 = vld [vmem:[%s9357_s3 + $0x38] sm:$0xff]  ;;  %v5247_v19 = vpack.c.bf16 %v356_v15, %v353_v14  ;;  %v355_v20 = vld [vmem:[%s9357_s3 + $0x10] sm:$0xff]  ;;  %v358_v21 = vld [vmem:[%s9357_s3 + $0x28] sm:$0xff] }
  0x14   :  { %v5249_v22 = vpack.c.bf16 %v363_v17, %v360_v16  ;;  %v359_v23 = vld [vmem:[%s9357_s3 + $0x30] sm:$0xff]  ;;  %v362_v24 = vld [vmem:[%s9357_s3 + $0x48] sm:$0xff]  ;;  %v369_v26 = vld [vmem:[%s9357_s3 + $0x80] sm:$0xff]  ;;  %v5277_v27 = vpack.c.bf16 %v358_v21, %v355_v20 }
  0x15   :  { %5200 = vmatpush1.bf16.msra.mxu0 %v5199_v46  ;;  %v366_v25 = vld [vmem:[%s9357_s3 + $0x68] sm:$0xff]  ;;  %v5251_v29 = vpack.c.bf16 %v362_v24, %v359_v23  ;;  %v361_v30 = vld [vmem:[%s9357_s3 + $0x40] sm:$0xff]  ;;  %v364_v31 = vld [vmem:[%s9357_s3 + $0x58] sm:$0xff] }
  0x16   :  { %5202 = vmatprep.subr.bf16.mxu0 %v5201_v49  ;;  %5228 = vmatpush3.bf16.msra.mxu1 %v5225_v45  ;;  %v6633_v28 = vld [vmem:[%s9356_s0 + $0x8] sm:$0xff]  ;;  %v5253_v32 = vpack.c.bf16 %v369_v26, %v366_v25  ;;  %v365_v33 = vld [vmem:[%s9357_s3 + $0x60] sm:$0xff]  ;;  %v368_v35 = vld [vmem:[%s9357_s3 + $0x78] sm:$0xff]  ;;  %v5281_v38 = vpack.c.bf16 %v364_v31, %v361_v30 }
  0x17   :  { %5230 = vmatprep.subr.bf16.mxu1 %v5229_v54  ;;  %v372_v36 = vld [vmem:[%s9357_s3 + $0x98] sm:$0xff]  ;;  %v375_v37 = vld [vmem:[%s9357_s3 + $0xb0] sm:$0xff]  ;;  %v5255_v40 = vpack.c.bf16 %v368_v35, %v365_v33  ;;  %v370_v43 = vld [vmem:[%s9357_s3 + $0x88] sm:$0xff] }
  0x18   :  { %v6658_v39 = vld [vmem:[%s9356_s0 + $0x10] sm:$0xff]  ;;  %v5257_v44 = vpack.c.bf16 %v375_v37, %v372_v36  ;;  %v374_v46 = vld [vmem:[%s9357_s3 + $0xa8] sm:$0xff]  ;;  %v381_v48 = vld [vmem:[%s9357_s3 + $0xe0] sm:$0xff] }
  0x19   :  { %5204 = vmatpush1.bf16.msra.mxu0 %v5203_v55  ;;  %v367_v41 = vld [vmem:[%s9357_s3 + $0x70] sm:$0xff]  ;;  %v378_v47 = vld [vmem:[%s9357_s3 + $0xc8] sm:$0xff]  ;;  %v6685_v50 = vld [vmem:[%s9356_s0 + $0x18] sm:$0xff] }
  0x1a   :  { %5206 = vmatprep.subr.bf16.mxu0 %v5205_v58  ;;  %5232 = vmatpush3.bf16.msra.mxu1 %v5229_v54  ;;  %v371_v45 = vld [vmem:[%s9357_s3 + $0x90] sm:$0xff]  ;;  %v5285_v49 = vpack.c.bf16 %v370_v43, %v367_v41  ;;  %v373_v52 = vld [vmem:[%s9357_s3 + $0xa0] sm:$0xff]  ;;  %v376_v53 = vld [vmem:[%s9357_s3 + $0xb8] sm:$0xff]  ;;  %v5261_v55 = vpack.c.bf16 %v381_v48, %v378_v47 }
  0x1b   :  { %5234 = vmatprep.subr.bf16.mxu1 %v5233_v63  ;;  %v5259_v51 = vpack.c.bf16 %v374_v46, %v371_v45  ;;  %v6696_v54 = vld [vmem:[%s9356_s0 + $0x20] sm:$0xff]  ;;  %v380_v57 = vld [vmem:[%s9357_s3 + $0xd8] sm:$0xff]  ;;  %v387_v59 = vld [vmem:[%s9357_s3 + $0x110] sm:$0xff]  ;;  %v5289_v60 = vpack.c.bf16 %v376_v53, %v373_v52 }
  0x1c   :  { %v377_v56 = vld [vmem:[%s9357_s3 + $0xc0] sm:$0xff]  ;;  %v384_v58 = vld [vmem:[%s9357_s3 + $0xf8] sm:$0xff]  ;;  %v6717_v62 = vld [vmem:[%s9356_s0 + $0x28] sm:$0xff] }
  0x1d   :  { %5208 = vmatpush1.bf16.msra.mxu0 %v5207_v0  ;;  %v5263_v61 = vpack.c.bf16 %v380_v57, %v377_v56  ;;  %v382_v0 = vld [vmem:[%s9357_s3 + $0xe8] sm:$0xff]  ;;  %v5265_v1 = vpack.c.bf16 %v387_v59, %v384_v58  ;;  %v383_v2 = vld [vmem:[%s9357_s3 + $0xf0] sm:$0xff]  ;;  %v393_v7 = vld [vmem:[%s9357_s3 + $0x140] sm:$0xff]  ;;  %v9369_v59 = vmov 0.0|0.0  }
  0x1e   :  { %5210 = vmatprep.subr.bf16.mxu0 %v5209_v4  ;;  %5236 = vmatpush3.bf16.msra.mxu1 %v5233_v63  ;;  %v379_v63 = vld [vmem:[%s9357_s3 + $0xd0] sm:$0xff]  ;;  %v386_v4 = vld [vmem:[%s9357_s3 + $0x108] sm:$0xff]  ;;  %v385_v11 = vld [vmem:[%s9357_s3 + $0x100] sm:$0xff] }
  0x1f   :  { %5238 = vmatprep.subr.bf16.mxu1 %v5237_v9  ;;  %v6734_v5 = vld [vmem:[%s9356_s0 + $0x30] sm:$0xff]  ;;  %v390_v6 = vld [vmem:[%s9357_s3 + $0x128] sm:$0xff]  ;;  %v5293_v8 = vpack.c.bf16 %v382_v0, %v379_v63  ;;  %v388_v12 = vld [vmem:[%s9357_s3 + $0x118] sm:$0xff] }
  0x20   :  { %v389_v14 = vld [vmem:[%s9357_s3 + $0x120] sm:$0xff]  ;;  %v392_v15 = vld [vmem:[%s9357_s3 + $0x138] sm:$0xff]  ;;  %v399_v17 = vld [vmem:[%s9357_s3 + $0x170] sm:$0xff] }
  0x21   :  { %5212 = vmatpush1.bf16.msra.mxu0 %v5211_v10  ;;  %v6749_v10 = vld [vmem:[%s9356_s0 + $0x38] sm:$0xff]  ;;  %v391_v20 = vld [vmem:[%s9357_s3 + $0x130] sm:$0xff]  ;;  %v394_v21 = vld [vmem:[%s9357_s3 + $0x148] sm:$0xff] }
  0x22   :  { %5246 = vmatprep.subr.bf16.mxu0 %v5245_v13  ;;  %5240 = vmatpush3.bf16.msra.mxu1 %v5237_v9  ;;  %v5267_v9 = vpack.c.bf16 %v386_v4, %v383_v2  ;;  %v5269_v13 = vpack.c.bf16 %v393_v7, %v390_v6  ;;  %v396_v16 = vld [vmem:[%s9357_s3 + $0x158] sm:$0xff]  ;;  %v395_v23 = vld [vmem:[%s9357_s3 + $0x150] sm:$0xff]  ;;  %v398_v24 = vld [vmem:[%s9357_s3 + $0x168] sm:$0xff] }
  0x23   :  { %5242 = vmatprep.subr.bf16.mxu1 %v5241_v18  ;;  %v663_v25 = vld [vmem:[%s9358_s4 + $0x8] sm:$0xff]  ;;  %v666_v26 = vld [vmem:[%s9358_s4 + $0x20] sm:$0xff]  ;;  %v400_v31 = vld [vmem:[%s9357_s3 + $0x178] sm:$0xff] }
  0x24   :  { %176 = vmatmul.mubr.f32.vlgmr.msra.gmra.mrb[0].mxu0 %v6529_v42  ;;  %v397_v30 = vld [vmem:[%s9357_s3 + $0x160] sm:$0xff]  ;;  %v665_v35 = vld [vmem:[%s9358_s4 + $0x18] sm:$0xff]  ;;  %v672_v37 = vld [vmem:[%s9358_s4 + $0x50] sm:$0xff] }
  0x25   :  { %5248 = vmatpush1.bf16.msra.mxu0 %v5247_v19  ;;  %181 = vmatprep.mubr.f32.mxu0 %v9367_v3  ;;  %v5271_v19 = vpack.c.bf16 %v392_v15, %v389_v14  ;;  %v662_v33 = vld [vmem:[%s9358_s4] sm:$0xff]  ;;  %v669_v36 = vld [vmem:[%s9358_s4 + $0x38] sm:$0xff]  ;;  %v668_v43 = vld [vmem:[%s9358_s4 + $0x30] sm:$0xff] }
  0x26   :  { %5250 = vmatprep.subr.bf16.mxu0 %v5249_v22  ;;  %5244 = vmatpush3.bf16.msra.mxu1 %v5241_v18  ;;  %v5297_v18 = vpack.c.bf16 %v388_v12, %v385_v11  ;;  %v5273_v22 = vpack.c.bf16 %v399_v17, %v396_v16  ;;  %v6818_v41 = vpack.c.bf16 %v672_v37, %v669_v36  ;;  %v675_v45 = vld [vmem:[%s9358_s4 + $0x68] sm:$0xff]  ;;  %v678_v46 = vld [vmem:[%s9358_s4 + $0x80] sm:$0xff]  ;;  %v664_v48 = vld [vmem:[%s9358_s4 + $0x10] sm:$0xff] }
  0x27   :  { %5278 = vmatprep.subr.bf16.mxu1 %v5277_v27  ;;  %v6835_v47 = vld [vmem:[%s9359_s1] sm:$0xff]  ;;  %v681_v56 = vld [vmem:[%s9358_s4 + $0x98] sm:$0xff]  ;;  %v684_v57 = vld [vmem:[%s9358_s4 + $0xb0] sm:$0xff] }
  0x28   :  { %182 = vmatmul.mubr.f32.gmra.mrb[2].mxu0 %v6633_v28  ;;  %vm878_vm0 = vcmp.gt.s32.totalorder %v6835_v47, 0  ;;  %v674_v53 = vld [vmem:[%s9358_s4 + $0x60] sm:$0xff]  ;;  %v6880_v0 = vpack.c.bf16 %v684_v57, %v681_v56  ;;  %v683_v2 = vld [vmem:[%s9358_s4 + $0xa8] sm:$0xff]  ;;  %v689_v12 = vld [vmem:[%s9358_s4 + $0xd8] sm:$0xff]  ;;  %vm1103_vm1 = vcmp.gt.s32.totalorder %v6835_v47, 7  ;;  %vm1765_vm3 = vcmp.gt.s32.totalorder %v6835_v47, 2 }
  0x29   :  { %5252 = vmatpush1.bf16.msra.mxu0 %v5251_v29  ;;  %187 = vmatprep.mubr.f32.mxu0 %v9367_v3  ;;  %v5275_v29 = vpack.c.bf16 %v398_v24, %v395_v23  ;;  %v879_v52 = vsel %vm878_vm0, 1, %v6376_v34  ;;  %v687_v4 = vld [vmem:[%s9358_s4 + $0xc8] sm:$0xff]  ;;  %v690_v6 = vld [vmem:[%s9358_s4 + $0xe0] sm:$0xff]  ;;  %v696_v14 = vld [vmem:[%s9358_s4 + $0x110] sm:$0xff]  ;;  %vm2207_vm4 = vcmp.gt.s32.totalorder %v6835_v47, 3  ;;  %vm1323_vm5 = vcmp.gt.s32.totalorder %v6835_v47, 1 }
  0x2a   :  { %5254 = vmatprep.subr.bf16.mxu0 %v5253_v32  ;;  %4566 = vmatmul.mubr.f32.vlgmr.msra.gmra.mrb[0].mxu1 %v6633_v28  ;;  %v6799_v32 = vpack.c.bf16 %v666_v26, %v663_v25  ;;  %v6912_v11 = vpack.c.bf16 %v690_v6, %v687_v4  ;;  %v682_v16 = vld [vmem:[%s9358_s4 + $0xa0] sm:$0xff]  ;;  %v685_v17 = vld [vmem:[%s9358_s4 + $0xb8] sm:$0xff]  ;;  %v688_v24 = vld [vmem:[%s9358_s4 + $0xd0] sm:$0xff]  ;;  %vm1544_vm6 = vcmp.gt.s32.totalorder %v6835_v47, 6  ;;  %vm1986_vm7 = vcmp.gt.s32.totalorder %v6835_v47, 5 }
  0x2b   :  { %5280 = vmatpush3.bf16.msra.mxu1 %v5277_v27  ;;  %4568 = vmatprep.mubr.f32.mxu1 %v6658_v39  ;;  %v5301_v27 = vpack.c.bf16 %v394_v21, %v391_v20  ;;  %v695_v20 = vld [vmem:[%s9358_s4 + $0x108] sm:$0xff]  ;;  %v6960_v23 = vpack.c.bf16 %v685_v17, %v682_v16  ;;  %v694_v36 = vld [vmem:[%s9358_s4 + $0x100] sm:$0xff]  ;;  %v697_v37 = vld [vmem:[%s9358_s4 + $0x118] sm:$0xff]  ;;  %vm2428_vm8 = vcmp.gt.s32.totalorder %v6835_v47, 4 }
  0x2c   :  { %188 = vmatmul.mubr.f32.gmra.mrb[4].mxu0 %v6658_v39  ;;  %5282 = vmatprep.subr.bf16.mxu1 %v5281_v38  ;;  %v699_v21 = vld [vmem:[%s9358_s4 + $0x128] sm:$0xff]  ;;  %v886_v56 = vld [vmem:[%s9360_s5] sm:$0xff]  ;;  %v889_v57 = vld [vmem:[%s9360_s5 + $0x18] sm:$0xff] }
  0x2d   :  { %5256 = vmatpush1.bf16.msra.mxu0 %v5255_v40  ;;  %193 = vmatprep.mubr.f32.mxu0 %v9367_v3  ;;  %v6815_v40 = vpack.c.bf16 %v665_v35, %v662_v33  ;;  %v691_v25 = vld [vmem:[%s9358_s4 + $0xe8] sm:$0xff]  ;;  %v1104_v35 = vsel %vm1103_vm1, 1, %v6376_v34  ;;  %v706_v4 = vld [vmem:[%s9358_s4 + $0x160] sm:$0xff]  ;;  %v709_v6 = vld [vmem:[%s9358_s4 + $0x178] sm:$0xff] }
  0x2e   :  { %5258 = vmatprep.subr.bf16.mxu0 %v5257_v44  ;;  %4569 = vmatmul.mubr.f32.gmra.mrb[2].mxu1 %v6685_v50  ;;  %v671_v44 = vld [vmem:[%s9358_s4 + $0x48] sm:$0xff]  ;;  %v6993_v33 = vpack.c.bf16 %v691_v25, %v688_v24  ;;  %v888_v16 = vld [vmem:[%s9360_s5 + $0x10] sm:$0xff]  ;;  %v905_v24 = vld [vmem:[%s9360_s5 + $0x98] sm:$0xff] }
  0x2f   :  { %5284 = vmatpush3.bf16.msra.mxu1 %v5281_v38  ;;  %4571 = vmatprep.mubr.f32.mxu1 %v6696_v54  ;;  %v5305_v38 = vpack.c.bf16 %v400_v31, %v397_v30  ;;  %v705_v30 = vld [vmem:[%s9358_s4 + $0x158] sm:$0xff]  ;;  %v708_v31 = vld [vmem:[%s9358_s4 + $0x170] sm:$0xff]  ;;  %v891_v17 = vld [vmem:[%s9360_s5 + $0x28] sm:$0xff] }
  0x30   :  { %194 = vmatmul.mubr.f32.gmra.mrb[6].mxu0 %v6685_v50  ;;  %5286 = vmatprep.subr.bf16.mxu1 %v5285_v49  ;;  %v908_v25 = vld [vmem:[%s9360_s5 + $0xb0] sm:$0xff] }
  0x31   :  { %5260 = vmatpush1.bf16.msra.mxu0 %v5259_v51  ;;  %199 = vmatprep.mubr.f32.mxu0 %v9367_v3  ;;  %v6847_v51 = vpack.c.bf16 %v671_v44, %v668_v43  ;;  %v704_v43 = vld [vmem:[%s9358_s4 + $0x150] sm:$0xff]  ;;  %v707_v44 = vld [vmem:[%s9358_s4 + $0x168] sm:$0xff] }
  0x32   :  { %5262 = vmatprep.subr.bf16.mxu0 %v5261_v55  ;;  %4572 = vmatmul.mubr.f32.gmra.mrb[4].mxu1 %v6717_v62  ;;  %v677_v55 = vld [vmem:[%s9358_s4 + $0x78] sm:$0xff] }
  0x33   :  { %5288 = vmatpush3.bf16.msra.mxu1 %v5285_v49  ;;  %4574 = vmatprep.mubr.f32.mxu1 %v6734_v5  ;;  %v667_v49 = vld [vmem:[%s9358_s4 + $0x28] sm:$0xff]  ;;  %v6877_v63 = vpack.c.bf16 %v677_v55, %v674_v53  ;;  %v7041_v55 = vpack.c.bf16 %v707_v44, %v704_v43  ;;  %v914_v44 = vld [vmem:[%s9360_s5 + $0xe0] sm:$0xff] }
  0x34   :  { %200 = vmatmul.mubr.f32.gmra.mrb[8].mxu0 %v6696_v54  ;;  %5290 = vmatprep.subr.bf16.mxu1 %v5289_v60  ;;  %v6865_v58 = vpack.c.bf16 %v667_v49, %v664_v48  ;;  %v7027_v48 = vpack.c.bf16 %v697_v37, %v694_v36  ;;  %v1766_v49 = vsel %vm1765_vm3, 1, %v6376_v34  ;;  %v703_v53 = vld [vmem:[%s9358_s4 + $0x148] sm:$0xff]  ;;  %v904_v36 = vld [vmem:[%s9360_s5 + $0x90] sm:$0xff] }
  0x35   :  { %5264 = vmatpush1.bf16.msra.mxu0 %v5263_v61  ;;  %205 = vmatprep.mubr.f32.mxu0 %v9367_v3  ;;  %v673_v61 = vld [vmem:[%s9358_s4 + $0x58] sm:$0xff]  ;;  %v907_v37 = vld [vmem:[%s9360_s5 + $0xa8] sm:$0xff] }
  0x36   :  { %5266 = vmatprep.subr.bf16.mxu0 %v5265_v1  ;;  %4575 = vmatmul.mubr.f32.gmra.mrb[6].mxu1 %v6749_v10  ;;  %v680_v1 = vld [vmem:[%s9358_s4 + $0x90] sm:$0xff]  ;;  %v911_v43 = vld [vmem:[%s9360_s5 + $0xc8] sm:$0xff] }
  0x37   :  { %5292 = vmatpush3.bf16.msra.mxu1 %v5289_v60  ;;  %4609 = vmatprep.mubr.f32.mxu1 %v6529_v42  ;;  %v670_v60 = vld [vmem:[%s9358_s4 + $0x40] sm:$0xff] }
  0x38   :  { %206 = vmatmul.mubr.f32.gmra.mrb[10].mxu0 %v6717_v62  ;;  %5294 = vmatprep.subr.bf16.mxu1 %v5293_v8  ;;  %v6896_v7 = vpack.c.bf16 %v673_v61, %v670_v60  ;;  %v893_v60 = vld [vmem:[%s9360_s5 + $0x38] sm:$0xff]  ;;  %v896_v61 = vld [vmem:[%s9360_s5 + $0x50] sm:$0xff] }
  0x39   :  { %5268 = vmatpush1.bf16.msra.mxu0 %v5267_v9  ;;  %211 = vmatprep.mubr.f32.mxu0 %v9367_v3  ;;  %v6909_v9 = vpack.c.bf16 %v683_v2, %v680_v1  ;;  %v2208_v2 = vsel %vm2207_vm4, 1, %v6376_v34 }
  0x3a   :  { %5270 = vmatprep.subr.bf16.mxu0 %v5269_v13  ;;  %881 = vperm.xlu0 %6273, %v879_v52   ;;  %v693_v13 = vld [vmem:[%s9358_s4 + $0xf8] sm:$0xff]  ;;  %v700_v52 = vld [vmem:[%s9358_s4 + $0x130] sm:$0xff] }
  0x3b   :  { %5296 = vmatpush3.bf16.msra.mxu1 %v5293_v8  ;;  %v679_v8 = vld [vmem:[%s9358_s4 + $0x88] sm:$0xff]  ;;  %v7059_v1 = vpack.c.bf16 %v703_v53, %v700_v52  ;;  %v7161_v52 = vpack.c.bf16 %v907_v37, %v904_v36  ;;  %v7164_v53 = vpack.c.bf16 %v914_v44, %v911_v43  ;;  %v925_v36 = vld [vmem:[%s9360_s5 + $0x138] sm:$0xff]  ;;  %v932_v43 = vld [vmem:[%s9360_s5 + $0x170] sm:$0xff] }
  0x3c   :  { %212 = vmatmul.mubr.f32.gmra.mrb[12].mxu0 %v6734_v5  ;;  %5298 = vmatprep.subr.bf16.mxu1 %v5297_v18  ;;  %v929_v37 = vld [vmem:[%s9360_s5 + $0x158] sm:$0xff] }
  0x3d   :  { %5272 = vmatpush1.bf16.msra.mxu0 %v5271_v19  ;;  %217 = vmatprep.mubr.f32.mxu0 %v9367_v3  ;;  %v6944_v19 = vpack.c.bf16 %v696_v14, %v693_v13  ;;  %v902_v13 = vld [vmem:[%s9360_s5 + $0x80] sm:$0xff]  ;;  %v7090_v14 = vpack.c.bf16 %v709_v6, %v706_v4  ;;  %v909_v6 = vld [vmem:[%s9360_s5 + $0xb8] sm:$0xff] }
  0x3e   :  { %5274 = vmatprep.subr.bf16.mxu0 %v5273_v22  ;;  %v702_v22 = vld [vmem:[%s9358_s4 + $0x140] sm:$0xff]  ;;  %1106 = vperm.xlu0 %6273, %v1104_v35   ;;  %v7133_v35 = vpack.c.bf16 %v908_v25, %v905_v24  ;;  %v915_v24 = vld [vmem:[%s9360_s5 + $0xe8] sm:$0xff] }
  0x3f   :  { %5300 = vmatpush3.bf16.msra.mxu1 %v5297_v18  ;;  %v906_v4 = vld [vmem:[%s9360_s5 + $0xa0] sm:$0xff] }
  0x40   :  { %218 = vmatmul.mubr.f32.gmra.mrb[14].mxu0 %v6749_v10  ;;  %5302 = vmatprep.subr.bf16.mxu1 %v5301_v27 }
  0x41   :  { %5276 = vmatpush1.bf16.msra.mxu0 %v5275_v29  ;;  %482 = vmatprep.mubr.f32.mxu0 %v9367_v3  ;;  %v701_v29 = vld [vmem:[%s9358_s4 + $0x138] sm:$0xff] }
  0x42   :  { %5310 = vmatprep.subr.bf16.mxu0 %v6799_v32  ;;  %1768 = vperm.xlu0 %6273, %v1766_v49   ;;  %v903_v49 = vld [vmem:[%s9360_s5 + $0x88] sm:$0xff] }
  0x43   :  { %5304 = vmatpush3.bf16.msra.mxu1 %v5301_v27  ;;  %v698_v27 = vld [vmem:[%s9358_s4 + $0x120] sm:$0xff] }
  0x44   :  { %483 = vmatmul.mubr.f32.vlgmr.msra.gmra.mrb[16].mxu0 %v6529_v42  ;;  %5306 = vmatprep.subr.bf16.mxu1 %v5305_v38  ;;  %v6851_v42 = vpack.c.bf16 %v678_v46, %v675_v45  ;;  %v887_v45 = vld [vmem:[%s9360_s5 + $0x8] sm:$0xff]  ;;  %v890_v46 = vld [vmem:[%s9360_s5 + $0x20] sm:$0xff] }
  0x45   :  { %5312 = vmatpush1.bf16.msra.mxu0 %v6815_v40  ;;  %488 = vmatprep.mubr.f32.mxu0 %v9367_v3 }
  0x46   :  { %5314 = vmatprep.subr.bf16.mxu0 %v6818_v41  ;;  %2210 = vperm.xlu0 %6273, %v2208_v2  }
  0x47   :  { %5308 = vmatpush3.bf16.msra.mxu1 %v5305_v38  ;;  %v7009_v38 = vpack.c.bf16 %v701_v29, %v698_v27  ;;  %v7120_v27 = vpack.c.bf16 %v891_v17, %v888_v16  ;;  %v894_v29 = vld [vmem:[%s9360_s5 + $0x40] sm:$0xff]  ;;  %v923_v16 = vld [vmem:[%s9360_s5 + $0x128] sm:$0xff] }
  0x48   :  { %489 = vmatmul.mubr.f32.gmra.mrb[18].mxu0 %v6633_v28  ;;  %5341 = vmatprep.subr.bf16.mxu1 %v9369_v59  ;;  %v926_v17 = vld [vmem:[%s9360_s5 + $0x140] sm:$0xff] }
  0x49   :  { %5316 = vmatpush1.bf16.msra.mxu0 %v6847_v51  ;;  %494 = vmatprep.mubr.f32.mxu0 %v9367_v3 }
  0x4a   :  { %5318 = vmatprep.subr.bf16.mxu0 %v6851_v42  ;;  %4610 = vmatmul.mubr.f32.vlgmr.msra.gmra.mrb[8].mxu1 %v6633_v28  ;;  %v676_v28 = vld [vmem:[%s9358_s4 + $0x70] sm:$0xff] }
  0x4b   :  { %5343 = vmatpush3.bf16.msra.mxu1 %v6865_v58  ;;  %4612 = vmatprep.mubr.f32.mxu1 %v6658_v39  ;;  %v6928_v15 = vpack.c.bf16 %v679_v8, %v676_v28  ;;  %v7072_v28 = vpack.c.bf16 %v889_v57, %v886_v56  ;;  %v7075_v8 = vpack.c.bf16 %v896_v61, %v893_v60  ;;  %v910_v56 = vld [vmem:[%s9360_s5 + $0xc0] sm:$0xff]  ;;  %v913_v57 = vld [vmem:[%s9360_s5 + $0xd8] sm:$0xff]  ;;  %v920_v61 = vld [vmem:[%s9360_s5 + $0x110] sm:$0xff] }
  0x4c   :  { %495 = vmatmul.mubr.f32.gmra.mrb[20].mxu0 %v6658_v39  ;;  %5344 = vmatprep.subr.bf16.mxu1 %v9369_v59  ;;  %v686_v39 = vld [vmem:[%s9358_s4 + $0xc0] sm:$0xff]  ;;  %v917_v60 = vld [vmem:[%s9360_s5 + $0xf8] sm:$0xff] }
  0x4d   :  { %5320 = vmatpush1.bf16.msra.mxu0 %v6877_v63  ;;  %500 = vmatprep.mubr.f32.mxu0 %v9367_v3  ;;  %v6941_v18 = vpack.c.bf16 %v689_v12, %v686_v39  ;;  %v895_v39 = vld [vmem:[%s9360_s5 + $0x48] sm:$0xff] }
  0x4e   :  { %5322 = vmatprep.subr.bf16.mxu0 %v6880_v0  ;;  %4613 = vmatmul.mubr.f32.gmra.mrb[10].mxu1 %v6685_v50  ;;  %v899_v12 = vld [vmem:[%s9360_s5 + $0x68] sm:$0xff] }
  0x4f   :  { %5346 = vmatpush3.bf16.msra.mxu1 %v6896_v7  ;;  %4615 = vmatprep.mubr.f32.mxu1 %v6696_v54 }
  0x50   :  { %501 = vmatmul.mubr.f32.gmra.mrb[22].mxu0 %v6685_v50  ;;  %5347 = vmatprep.subr.bf16.mxu1 %v9369_v59  ;;  %v692_v50 = vld [vmem:[%s9358_s4 + $0xf0] sm:$0xff] }
  0x51   :  { %5324 = vmatpush1.bf16.msra.mxu0 %v6909_v9  ;;  %506 = vmatprep.mubr.f32.mxu0 %v9367_v3  ;;  %v6974_v26 = vpack.c.bf16 %v695_v20, %v692_v50  ;;  %v7105_v20 = vpack.c.bf16 %v902_v13, %v899_v12  ;;  %v916_v12 = vld [vmem:[%s9360_s5 + $0xf0] sm:$0xff]  ;;  %v919_v13 = vld [vmem:[%s9360_s5 + $0x108] sm:$0xff] }
  0x52   :  { %5326 = vmatprep.subr.bf16.mxu0 %v6912_v11  ;;  %4616 = vmatmul.mubr.f32.gmra.mrb[12].mxu1 %v6717_v62  ;;  %v7217_v25 = vpack.c.bf16 %v919_v13, %v916_v12  ;;  %v927_v12 = vld [vmem:[%s9360_s5 + $0x148] sm:$0xff] }
  0x53   :  { %5349 = vmatpush3.bf16.msra.mxu1 %v6928_v15  ;;  %4618 = vmatprep.mubr.f32.mxu1 %v6734_v5 }
  0x54   :  { %507 = vmatmul.mubr.f32.gmra.mrb[24].mxu0 %v6696_v54  ;;  %5350 = vmatprep.subr.bf16.mxu1 %v9369_v59  ;;  %v6977_v54 = vpack.c.bf16 %v702_v22, %v699_v21  ;;  %v898_v21 = vld [vmem:[%s9360_s5 + $0x60] sm:$0xff]  ;;  %v901_v22 = vld [vmem:[%s9360_s5 + $0x78] sm:$0xff] }
  0x55   :  { %5328 = vmatpush1.bf16.msra.mxu0 %v6941_v18  ;;  %512 = vmatprep.mubr.f32.mxu0 %v9367_v3 }
  0x56   :  { %5330 = vmatprep.subr.bf16.mxu0 %v6944_v19  ;;  %4619 = vmatmul.mubr.f32.gmra.mrb[14].mxu1 %v6749_v10 }
  0x57   :  { %5352 = vmatpush3.bf16.msra.mxu1 %v6960_v23  ;;  %4653 = vmatprep.mubr.msk.f32.mxu1 %vm6378_vm2, %v9367_v3 }
  0x58   :  { %513 = vmatmul.mubr.f32.gmra.mrb[26].mxu0 %v6717_v62  ;;  %5353 = vmatprep.subr.bf16.mxu1 %v9369_v59  ;;  %v7012_v62 = vpack.c.bf16 %v708_v31, %v705_v30  ;;  %v897_v30 = vld [vmem:[%s9360_s5 + $0x58] sm:$0xff]  ;;  %v7130_v31 = vpack.c.bf16 %v901_v22, %v898_v21  ;;  %v7207_v21 = vpack.c.bf16 %v909_v6, %v906_v4  ;;  %v912_v22 = vld [vmem:[%s9360_s5 + $0xd0] sm:$0xff] }
  0x59   :  { %5332 = vmatpush1.bf16.msra.mxu0 %v6974_v26  ;;  %518 = vmatprep.mubr.f32.mxu0 %v9367_v3  ;;  %v7235_v44 = vpack.c.bf16 %v915_v24, %v912_v22  ;;  %v924_v6 = vld [vmem:[%s9360_s5 + $0x130] sm:$0xff]  ;;  %v933_v22 = vld [vmem:[%s9360_s5 + $0x178] sm:$0xff] }
  0x5a   :  { %5334 = vmatprep.subr.bf16.mxu0 %v6977_v54 }
  0x5b   :  { %5355 = vmatpush3.bf16.msra.mxu1 %v6993_v33 }
  0x5c   :  { %519 = vmatmul.mubr.f32.gmra.mrb[28].mxu0 %v6734_v5  ;;  %5356 = vmatprep.subr.bf16.mxu1 %v9369_v59  ;;  %v7044_v5 = vpack.c.bf16 %v890_v46, %v887_v45  ;;  %v7149_v45 = vpack.c.bf16 %v897_v30, %v894_v29  ;;  %v900_v46 = vld [vmem:[%s9360_s5 + $0x70] sm:$0xff]  ;;  %v7220_v29 = vpack.c.bf16 %v926_v17, %v923_v16  ;;  %v922_v30 = vld [vmem:[%s9360_s5 + $0x120] sm:$0xff] }
  0x5d   :  { %5336 = vmatpush1.bf16.msra.mxu0 %v7009_v38  ;;  %524 = vmatprep.mubr.f32.mxu0 %v9367_v3  ;;  %v7179_v2 = vpack.c.bf16 %v903_v49, %v900_v46  ;;  %v918_v46 = vld [vmem:[%s9360_s5 + $0x100] sm:$0xff]  ;;  %v921_v49 = vld [vmem:[%s9360_s5 + $0x118] sm:$0xff]  ;;  %v7271_v16 = vpack.c.bf16 %v927_v12, %v924_v6 }
  0x5e   :  { %5338 = vmatprep.subr.bf16.mxu0 %v7012_v62  ;;  %v7257_v4 = vpack.c.bf16 %v921_v49, %v918_v46  ;;  %v930_v17 = vld [vmem:[%s9360_s5 + $0x160] sm:$0xff] }
  0x5f   :  { %5358 = vmatpush3.bf16.msra.mxu1 %v7027_v48  ;;  %v7283_v24 = vpack.c.bf16 %v933_v22, %v930_v17 }
  0x60   :  { %525 = vmatmul.mubr.f32.gmra.mrb[30].mxu0 %v6749_v10  ;;  %5359 = vmatprep.subr.bf16.mxu1 %v9369_v59  ;;  %v892_v10 = vld [vmem:[%s9360_s5 + $0x30] sm:$0xff] }
  0x61   :  { %5340 = vmatpush1.bf16.msra.mxu0 %v7041_v55  ;;  %774 = vmatprep.mubr.f32.mxu0 %v9367_v3  ;;  %v7101_v50 = vpack.c.bf16 %v895_v39, %v892_v10  ;;  %v7189_v10 = vpack.c.bf16 %v913_v57, %v910_v56  ;;  %v7192_v39 = vpack.c.bf16 %v920_v61, %v917_v60  ;;  %v928_v60 = vld [vmem:[%s9360_s5 + $0x150] sm:$0xff]  ;;  %v931_v61 = vld [vmem:[%s9360_s5 + $0x168] sm:$0xff] }
  0x62   :  { %5366 = vmatprep.subr.bf16.mxu0 %v7044_v5  ;;  %v7245_v56 = vpack.c.bf16 %v925_v36, %v922_v30  ;;  %v7248_v57 = vpack.c.bf16 %v932_v43, %v929_v37  ;;  %v7267_v13 = vpack.c.bf16 %v931_v61, %v928_v60 }
  0x63   :  { %5361 = vmatpush3.bf16.msra.mxu1 %v7059_v1 }
  0x64   :  { %775 = vmatmul.mubr.f32.vlgmr.msra.gmra.mrb[0].mxu0 %v9367_v3  ;;  %5362 = vmatprep.subr.bf16.mxu1 %v9369_v59 }
  0x65   :  { %5368 = vmatpush1.bf16.msra.mxu0 %v7072_v28  ;;  %998 = vmatprep.mubr.f32.mxu0 %v9367_v3 }
  0x66   :  { %5370 = vmatprep.subr.bf16.mxu0 %v7075_v8 }
  0x67   :  { %5364 = vmatpush3.bf16.msra.mxu1 %v7090_v14 }
  0x68   :  { %5397 = vmatprep.subr.bf16.mxu1 %v9369_v59 }
  0x69   :  { %5372 = vmatpush1.bf16.msra.mxu0 %v7101_v50 }
  0x6a   :  { %5374 = vmatprep.subr.bf16.mxu0 %v7105_v20  ;;  %4654 = vmatmul.mubr.f32.vlgmr.msra.gmra.mrb[16].mxu1 %v9367_v3 }
  0x6b   :  { %5399 = vmatpush3.bf16.msra.mxu1 %v7120_v27  ;;  %4688 = vmatprep.mubr.msk.f32.mxu1 %vm6378_vm2, %v9367_v3 }
  0x6c   :  { %5400 = vmatprep.subr.bf16.mxu1 %v9369_v59 }
  0x6d   :  { %5376 = vmatpush1.bf16.msra.mxu0 %v7130_v31 }
  0x6e   :  { %5378 = vmatprep.subr.bf16.mxu0 %v7133_v35 }
  0x6f   :  { %5402 = vmatpush3.bf16.msra.mxu1 %v7149_v45 }
  0x70   :  { %5403 = vmatprep.subr.bf16.mxu1 %v9369_v59 }
  0x71   :  { %5380 = vmatpush1.bf16.msra.mxu0 %v7161_v52 }
  0x72   :  { %5382 = vmatprep.subr.bf16.mxu0 %v7164_v53 }
  0x73   :  { %5405 = vmatpush3.bf16.msra.mxu1 %v7179_v2 }
  0x74   :  { %5406 = vmatprep.subr.bf16.mxu1 %v9369_v59 }
  0x75   :  { %5384 = vmatpush1.bf16.msra.mxu0 %v7189_v10 }
  0x76   :  { %5386 = vmatprep.subr.bf16.mxu0 %v7192_v39 }
  0x77   :  { %5408 = vmatpush3.bf16.msra.mxu1 %v7207_v21 }
  0x78   :  { %5409 = vmatprep.subr.bf16.mxu1 %v9369_v59 }
  0x79   :  { %5388 = vmatpush1.bf16.msra.mxu0 %v7217_v25 }
  0x7a   :  { %5390 = vmatprep.subr.bf16.mxu0 %v7220_v29 }
  0x7b   :  { %5411 = vmatpush3.bf16.msra.mxu1 %v7235_v44 }
  0x7c   :  { %5412 = vmatprep.subr.bf16.mxu1 %v9369_v59 }
  0x7d   :  { %5392 = vmatpush1.bf16.msra.mxu0 %v7245_v56 }
  0x7e   :  { %5394 = vmatprep.subr.bf16.mxu0 %v7248_v57 }
  0x7f   :  { %5414 = vmatpush3.bf16.msra.mxu1 %v7257_v4 }
  0x80   :  { %5415 = vmatprep.subr.bf16.mxu1 %v9369_v59 }
  0x81   :  { %5396 = vmatpush1.bf16.msra.mxu0 %v7267_v13 }
  0x82   :  { %5422 = vmatprep.subr.bf16.mxu0 %v6799_v32  ;;  %v96_v32 = vlaneseq }
  0x83   :  { %5417 = vmatpush3.bf16.msra.mxu1 %v7271_v16 }
  0x84   :  { %999 = vmatmul.mubr.f32.vlgmr.msra.gmra.mrb[30].mxu0 %v9367_v3  ;;  %5418 = vmatprep.subr.bf16.mxu1 %v9369_v59 }
  0x85   :  { %5424 = vmatpush1.bf16.msra.mxu0 %v6815_v40  ;;  %1224 = vmatprep.mubr.f32.mxu0 %v9367_v3  ;;  %v7325_v40 = vshrl.u32 %v96_v32, 7 }
  0x86   :  { %5426 = vmatprep.subr.bf16.mxu0 %v6818_v41 }
  0x87   :  { %5420 = vmatpush3.bf16.msra.mxu1 %v7283_v24  ;;  %v106_v41 = vsub.s32 2, %v7325_v40 }
  0x88   :  { %5453 = vmatprep.subr.bf16.mxu1 %v9369_v59 }
  0x89   :  { %5428 = vmatpush1.bf16.msra.mxu0 %v6847_v51  ;;  %v94_v51 = vld [vmem:[%s9361_s6] sm:$0x7] }
  0x8a   :  { %4689 = vmatmul.mubr.f32.vlgmr.msra.gmra.mrb[18].mxu1 %v9367_v3  ;;  %5430 = vmatprep.subr.bf16.mxu0 %v6851_v42  ;;  %v7331_v42 = vrot.slane %v94_v51, %v106_v41 }
  0x8b   :  { %5455 = vmatpush3.bf16.msra.mxu1 %v6865_v58  ;;  %4723 = vmatprep.mubr.msk.f32.mxu1 %vm6378_vm2, %v9367_v3 }
  0x8c   :  { %5456 = vmatprep.subr.bf16.mxu1 %v9369_v59 }
  0x8d   :  { %5432 = vmatpush1.bf16.msra.mxu0 %v6877_v63 }
  0x8e   :  { %5434 = vmatprep.subr.bf16.mxu0 %v6880_v0 }
  0x8f   :  { %5458 = vmatpush3.bf16.msra.mxu1 %v6896_v7  ;;  %v1324_v7 = vsel %vm1323_vm5, 1, %v6376_v34 }
  0x90   :  { %5459 = vmatprep.subr.bf16.mxu1 %v9369_v59  ;;  %1326 = vperm.xlu1 %6274, %v1324_v7   ;;  %v102_v7 = vsub.s32 1, %v7325_v40 }
  0x91   :  { %5436 = vmatpush1.bf16.msra.mxu0 %v6909_v9 }
  0x92   :  { %5438 = vmatprep.subr.bf16.mxu0 %v6912_v11  ;;  %v1545_v11 = vsel %vm1544_vm6, 1, %v6376_v34 }
  0x93   :  { %5461 = vmatpush3.bf16.msra.mxu1 %v6928_v15 }
  0x94   :  { %5462 = vmatprep.subr.bf16.mxu1 %v9369_v59  ;;  %1547 = vperm.xlu1 %6274, %v1545_v11  }
  0x95   :  { %5440 = vmatpush1.bf16.msra.mxu0 %v6941_v18 }
  0x96   :  { %5442 = vmatprep.subr.bf16.mxu0 %v6944_v19 }
  0x97   :  { %5464 = vmatpush3.bf16.msra.mxu1 %v6960_v23 }
  0x98   :  { %5465 = vmatprep.subr.bf16.mxu1 %v9369_v59 }
  0x99   :  { %5444 = vmatpush1.bf16.msra.mxu0 %v6974_v26  ;;  %v1987_v26 = vsel %vm1986_vm7, 1, %v6376_v34 }
  0x9a   :  { %5446 = vmatprep.subr.bf16.mxu0 %v6977_v54  ;;  %1989 = vperm.xlu1 %6274, %v1987_v26  }
  0x9b   :  { %5467 = vmatpush3.bf16.msra.mxu1 %v6993_v33 }
  0x9c   :  { %5468 = vmatprep.subr.bf16.mxu1 %v9369_v59 }
  0x9d   :  { %5448 = vmatpush1.bf16.msra.mxu0 %v7009_v38 }
  0x9e   :  { %5450 = vmatprep.subr.bf16.mxu0 %v7012_v62 }
  0x9f   :  { %5470 = vmatpush3.bf16.msra.mxu1 %v7027_v48  ;;  %v2429_v48 = vsel %vm2428_vm8, 1, %v6376_v34 }
  0xa0   :  { %5471 = vmatprep.subr.bf16.mxu1 %v9369_v59  ;;  %2431 = vperm.xlu1 %6274, %v2429_v48  }
  0xa1   :  { %5452 = vmatpush1.bf16.msra.mxu0 %v7041_v55 }
  0xa2   :  { %5478 = vmatprep.subr.bf16.mxu0 %v7044_v5 }
  0xa3   :  { %5473 = vmatpush3.bf16.msra.mxu1 %v7059_v1 }
  0xa4   :  { %5474 = vmatprep.subr.bf16.mxu1 %v9369_v59 }
  0xa7   :  { %5476 = vmatpush3.bf16.msra.mxu1 %v7090_v14  ;;  %v401_v14 = vld [vmem:[%s9362_s7] sm:$0x7] }
  0xa8   :  { %5509 = vmatprep.subr.bf16.mxu1 %v9369_v59  ;;  %v7367_v47 = vrot.slane %v401_v14, %v106_v41 }
  0xb9   :  { %v7413_v59 = vpop.permute.xlu0 %881 }
  0xba   :  { %9414 = vst [vmem:[#allocation16_spill] sm:$0xff] %v7413_v59  ;;  %vm883_vm9 = vcmp.eq.s32.totalorder %v7413_v59, 1 }
  0xfd   :  { %v4567_v58 = vpop.f32.mrb[0].mxu1 }
  0xfe   :  { %v7334_v63 = vadd.f32 %v4567_v58, %v7331_v42  ;;  %v7336_v0 = vpop.f32.mrb[1].mxu1  ;;  %v98_v58 = vsub.s32 0, %v7325_v40  ;;  %v7403_v40 = vld [vmem:[%s9363_s8] ss:$0 sm:$0xff] }
 0x101   :  { %v4570_v9 = vpop.f32.mrb[2].mxu1 }
 0x102   :  { %v7343_v15 = vadd.f32 %v4570_v9, %v7331_v42  ;;  %v300_v18 = vpop.f32.mrb[3].mxu1  ;;  %v7394_v9 = vrot.slane %v94_v51, %v98_v58 }
 0x103   :  { %v7347_v19 = vadd.f32 %v300_v18, %v7331_v42  ;;  %v7396_v18 = vrot.slane %v94_v51, %v102_v7 }
 0x104   :  { %9403 = vst [vmem:[#allocation5_spill] sm:$0xff] %v7343_v15 }
 0x105   :  { %v4573_v23 = vpop.f32.mrb[4].mxu1 }
 0x106   :  { %v7351_v54 = vadd.f32 %v4573_v23, %v7331_v42  ;;  %v310_v33 = vpop.f32.mrb[5].mxu1 }
 0x107   :  { %v7355_v38 = vadd.f32 %v310_v33, %v7331_v42 }
 0x108   :  { %9404 = vst [vmem:[#allocation6_spill] sm:$0xff] %v7351_v54  ;;  %v1799_v54 = vld [vmem:[%s9360_s5 + $0xc0] sm:$0xff] }
 0x109   :  { %9405 = vst [vmem:[#allocation7_spill] sm:$0xff] %v7355_v38  ;;  %v4576_v62 = vpop.f32.mrb[6].mxu1 }
 0x10a   :  { %v7359_v55 = vadd.f32 %v4576_v62, %v7331_v42  ;;  %v320_v5 = vpop.f32.mrb[7].mxu1 }
 0x10b   :  { %v7362_v1 = vadd.f32 %v320_v5, %v7331_v42 }
 0x10c   :  { %9406 = vst [vmem:[#allocation8_spill] sm:$0xff] %v7359_v55 }
 0x10d   :  { %9407 = vst [vmem:[#allocation9_spill] sm:$0xff] %v7362_v1 }
 0x11d   :  { %v4611_v30 = vpop.f32.mrb[8].mxu1 }
 0x11e   :  { %v7370_v36 = vadd.f32 %v4611_v30, %v7367_v47  ;;  %v597_v37 = vpop.f32.mrb[9].mxu1 }
 0x11f   :  { %v7373_v34 = vadd.f32 %v597_v37, %v7367_v47 }
 0x120   :  { %9408 = vst [vmem:[#allocation10_spill] sm:$0xff] %v7370_v36 }
 0x121   :  { %9409 = vst [vmem:[#allocation11_spill] sm:$0xff] %v7373_v34  ;;  %v4614_v43 = vpop.f32.mrb[10].mxu1 }
 0x122   :  { %v7376_v46 = vadd.f32 %v4614_v43, %v7367_v47  ;;  %v607_v49 = vpop.f32.mrb[11].mxu1 }
 0x123   :  { %v7379_v60 = vadd.f32 %v607_v49, %v7367_v47 }
 0x124   :  { %9410 = vst [vmem:[#allocation12_spill] sm:$0xff] %v7376_v46 }
 0x125   :  { %9411 = vst [vmem:[#allocation13_spill] sm:$0xff] %v7379_v60  ;;  %v4617_v61 = vpop.f32.mrb[12].mxu1 }
 0x126   :  { %v7382_v6 = vadd.f32 %v4617_v61, %v7367_v47  ;;  %v617_v12 = vpop.f32.mrb[13].mxu1  ;;  %v291_v61 = vadd.f32 %v7336_v0, %v7331_v42 }
 0x127   :  { %v7385_v17 = vadd.f32 %v617_v12, %v7367_v47 }
 0x128   :  { %9412 = vst [vmem:[#allocation14_spill] sm:$0xff] %v7382_v6 }
 0x129   :  { %9413 = vst [vmem:[#allocation15_spill] sm:$0xff] %v7385_v17  ;;  %v7387_v22 = vpop.f32.mrb[14].mxu1  ;;  %v1805_v17 = vld [vmem:[%s9360_s5 + $0xf0] sm:$0xff] }
 0x12a   :  { %v627_v32 = vpop.f32.mrb[15].mxu1 }
 0x12b   :  { %v7390_v41 = vadd.f32 %v627_v32, %v7367_v47 }
 0x137   :  { %v776_v11 = vpop.f32.mrb[0].mxu0 }
 0x138   :  { %v6205_v23 = vadd.f32 %v776_v11, %v7394_v9  ;;  %v778_v26 = vpop.f32.mrb[1].mxu0 }
 0x139   :  { %v6206_v62 = vadd.f32 %v778_v26, %v7396_v18 }
 0x13a   :  { %v855_v33 = vmul.f32 0.5, %v6205_v23 }
 0x13b   :  { %v860_v30 = vmul.f32 0.5, %v6206_v62 }
 0x13c   :  { %6275 = vtanh.f32 %v855_v33  ;;  %v7408_v33 = vrot.slane %v401_v14, %v98_v58 }
 0x13d   :  { %v847_v48 = vpop.f32.mrb[16].mxu1  ;;  %6277 = vtanh.f32 %v860_v30 }
 0x13e   :  { %v4655_v5 = vpop.f32.mrb[17].mxu1  ;;  %v870_v51 = vadd.f32 %v7403_v40, %v847_v48 }
 0x13f   :  { %v7410_v5 = vrot.slane %v401_v14, %v102_v7 }
 0x146   :  { %v6276_v37 = vpop.eup %6275 }
 0x147   :  { %v857_v43 = vadd.f32 1.0, %v6276_v37  ;;  %v6278_v32 = vpop.eup %6277 }
 0x148   :  { %v862_v23 = vadd.f32 1.0, %v6278_v32 }
 0x149   :  { %v858_v49 = vmul.f32 0.5, %v857_v43 }
 0x14a   :  { %v863_v26 = vmul.f32 0.5, %v862_v23  ;;  %v1564_v23 = vld [vmem:[%s9358_s4 + $0x50] sm:$0xff] }
 0x14b   :  { %v871_v12 = vmul.f32 %v870_v51, %v858_v49 }
 0x14c   :  { %v874_v30 = vsub.f32 1.0, %v863_v26  ;;  %v876_v43 = vmul.f32 0.0, %v863_v26 }
 0x14d   :  { %v872_v11 = vadd.f32 %v871_v12, %v291_v61  ;;  %v9415_v61 = vmov 0.0|0.0   ;;  %v9416_v12 = vmov 0.0  }
 0x14f   :  { %6279 = vtanh.f32 %v872_v11 }
 0x157   :  { %v1000_v62 = vpop.f32.mrb[30].mxu0 }
 0x158   :  { %v6235_v37 = vadd.f32 %v1000_v62, %v7408_v33  ;;  %v1002_v3 = vpop.f32.mrb[31].mxu0  ;;  %v1560_v62 = vld [vmem:[%s9358_s4 + $0x30] sm:$0xff] }
 0x159   :  { %v6280_v48 = vpop.eup %6279  ;;  %v6236_v51 = vadd.f32 %v1002_v3, %v7410_v5 }
 0x15a   :  { %v875_v42 = vmul.f32 %v6280_v48, %v874_v30  ;;  %v1080_v0 = vmul.f32 0.5, %v6235_v37  ;;  %v1563_v30 = vld [vmem:[%s9358_s4 + $0x48] sm:$0xff]  ;;  %v1562_v37 = vld [vmem:[%s9358_s4 + $0x40] sm:$0xff] }
 0x15b   :  { %v1085_v3 = vmul.f32 0.5, %v6236_v51  ;;  %v7530_v48 = vpack.c.bf16 %v1563_v30, %v1560_v62  ;;  %v1570_v51 = vld [vmem:[%s9358_s4 + $0x80] sm:$0xff]  ;;  %v1588_v62 = vld [vmem:[%s9358_s4 + $0x110] sm:$0xff] }
 0x15c   :  { %v877_v49 = vadd.f32 %v876_v43, %v875_v42  ;;  %6281 = vtanh.f32 %v1080_v0  ;;  %v1565_v43 = vld [vmem:[%s9358_s4 + $0x58] sm:$0xff]  ;;  %v1567_v0 = vld [vmem:[%s9358_s4 + $0x68] sm:$0xff] }
 0x15d   :  { %v1071_v58 = vpop.f32.mrb[18].mxu1  ;;  %6283 = vtanh.f32 %v1085_v3  ;;  %v7536_v42 = vpack.c.bf16 %v1565_v43, %v1562_v37  ;;  %v1568_v3 = vld [vmem:[%s9358_s4 + $0x70] sm:$0xff]  ;;  %v1587_v43 = vld [vmem:[%s9358_s4 + $0x108] sm:$0xff] }
 0x15e   :  { %v7419_v14 = vsel %vm883_vm9, %v877_v49, 0.0  ;;  %4201 = vmatmul.mubr.msk.f32.vlgmr.msra.gmra.mrb[2].mxu0 %vm883_vm9, %v877_v49  ;;  %4724 = vmatmul.mubr.msk.f32.vlgmr.msra.gmra.mrb[20].mxu1 %vm883_vm9, %v877_v49  ;;  %v4690_v7 = vpop.f32.mrb[19].mxu1  ;;  %v7546_v49 = vpack.c.bf16 %v1570_v51, %v1567_v0  ;;  %v1584_v37 = vld [vmem:[%s9358_s4 + $0xf0] sm:$0xff]  ;;  %v1586_v0 = vld [vmem:[%s9358_s4 + $0x100] sm:$0xff] }
 0x15f   :  { %885 = vst [vmem:[%s9364_s10] sm:$0xff] %v7419_v14  ;;  %5480 = vmatpush1.bf16.msra.mxu0 %v7072_v28  ;;  %5511 = vmatpush3.bf16.msra.mxu1 %v7120_v27  ;;  %v7443_v28 = vld [vmem:[%s9365_s9] ss:$0 sm:$0xff]  ;;  %v1569_v7 = vld [vmem:[%s9358_s4 + $0x78] sm:$0xff]  ;;  %v7642_v51 = vpack.c.bf16 %v1587_v43, %v1584_v37 }
 0x160   :  { %5482 = vmatprep.subr.bf16.mxu0 %v7075_v8  ;;  %5512 = vmatprep.subr.bf16.mxu1 %v9415_v61  ;;  %v1095_v32 = vadd.f32 %v7443_v28, %v1071_v58  ;;  %v1566_v58 = vld [vmem:[%s9358_s4 + $0x60] sm:$0xff]  ;;  %v1601_v37 = vld [vmem:[%s9358_s4 + $0x178] sm:$0xff] }
 0x161   :  { %1445 = vmatprep.mubr.f32.mxu0 %v9416_v12  ;;  %4758 = vmatprep.mubr.msk.f32.mxu1 %vm6378_vm2, %v9416_v12 }
 0x163   :  { %5484 = vmatpush1.bf16.msra.mxu0 %v7101_v50  ;;  %5514 = vmatpush3.bf16.msra.mxu1 %v7149_v45 }
 0x164   :  { %5486 = vmatprep.subr.bf16.mxu0 %v7105_v20  ;;  %5515 = vmatprep.subr.bf16.mxu1 %v9415_v61  ;;  %v633_v20 = vadd.f32 %v7387_v22, %v7367_v47  ;;  %v1561_v22 = vld [vmem:[%s9358_s4 + $0x38] sm:$0xff] }
 0x165   :  { %v7518_v26 = vpack.c.bf16 %v1564_v23, %v1561_v22  ;;  %v1585_v23 = vld [vmem:[%s9358_s4 + $0xf8] sm:$0xff] }
 0x166   :  { %v6282_v8 = vpop.eup %6281  ;;  %v7630_v30 = vpack.c.bf16 %v1588_v62, %v1585_v23  ;;  %v1598_v23 = vld [vmem:[%s9358_s4 + $0x160] sm:$0xff] }
 0x167   :  { %v1082_v27 = vadd.f32 1.0, %v6282_v8  ;;  %5488 = vmatpush1.bf16.msra.mxu0 %v7130_v31  ;;  %5517 = vmatpush3.bf16.msra.mxu1 %v7179_v2  ;;  %v6284_v31 = vpop.eup %6283  ;;  %v7558_v8 = vpack.c.bf16 %v1569_v7, %v1566_v58  ;;  %v1589_v58 = vld [vmem:[%s9358_s4 + $0x118] sm:$0xff]  ;;  %v7704_v43 = vpack.c.bf16 %v1601_v37, %v1598_v23 }
 0x168   :  { %5490 = vmatprep.subr.bf16.mxu0 %v7133_v35  ;;  %5518 = vmatprep.subr.bf16.mxu1 %v9415_v61  ;;  %v1087_v35 = vadd.f32 1.0, %v6284_v31  ;;  %v1572_v31 = vld [vmem:[%s9358_s4 + $0x90] sm:$0xff]  ;;  %v7648_v7 = vpack.c.bf16 %v1589_v58, %v1586_v0  ;;  %v1776_v0 = vld [vmem:[%s9360_s5 + $0x8] sm:$0xff]  ;;  %v1779_v58 = vld [vmem:[%s9360_s5 + $0x20] sm:$0xff] }
 0x169   :  { %v1083_v50 = vmul.f32 0.5, %v1082_v27  ;;  %v1571_v27 = vld [vmem:[%s9358_s4 + $0x88] sm:$0xff] }
 0x16b   :  { %v1096_v45 = vmul.f32 %v1095_v32, %v1083_v50  ;;  %5492 = vmatpush1.bf16.msra.mxu0 %v7161_v52  ;;  %5520 = vmatpush3.bf16.msra.mxu1 %v7207_v21  ;;  %v1088_v52 = vmul.f32 0.5, %v1087_v35  ;;  %v7470_v21 = vpop.permute.xlu0 %1106  ;;  %v7564_v32 = vpack.c.bf16 %v1571_v27, %v1568_v3  ;;  %v1573_v50 = vld [vmem:[%s9358_s4 + $0x98] sm:$0xff]  ;;  %v1574_v35 = vld [vmem:[%s9358_s4 + $0xa0] sm:$0xff]  ;;  %v1591_v3 = vld [vmem:[%s9358_s4 + $0x128] sm:$0xff] }
 0x16c   :  { %5494 = vmatprep.subr.bf16.mxu0 %v7164_v53  ;;  %5521 = vmatprep.subr.bf16.mxu1 %v9415_v61  ;;  %9417 = vst [vmem:[#allocation17_spill] sm:$0xff] %v7470_v21  ;;  %vm1108_vm10 = vcmp.eq.s32.totalorder %v7470_v21, 1  ;;  %v1594_v27 = vld [vmem:[%s9358_s4 + $0x140] sm:$0xff] }
 0x16d   :  { %v1097_v11 = vadd.f32 %v1096_v45, %v633_v20  ;;  %v1099_v53 = vsub.f32 1.0, %v1088_v52  ;;  %v1576_v20 = vld [vmem:[%s9358_s4 + $0xb0] sm:$0xff]  ;;  %v8466_v21 = vld [vmem:[%s9365_s9] ss:$0 sm:$0xff] }
 0x16e   :  { %v7574_v45 = vpack.c.bf16 %v1576_v20, %v1573_v50  ;;  %v7658_v50 = vpack.c.bf16 %v1594_v27, %v1591_v3  ;;  %v1590_v20 = vld [vmem:[%s9358_s4 + $0x120] sm:$0xff]  ;;  %v7714_v3 = vpack.c.bf16 %v1779_v58, %v1776_v0 }
 0x16f   :  { %6285 = vtanh.f32 %v1097_v11  ;;  %5496 = vmatpush1.bf16.msra.mxu0 %v7189_v10  ;;  %5523 = vmatpush3.bf16.msra.mxu1 %v7235_v44  ;;  %v1101_v10 = vmul.f32 0.0, %v1088_v52  ;;  %v1558_v44 = vld [vmem:[%s9358_s4 + $0x20] sm:$0xff]  ;;  %v1575_v11 = vld [vmem:[%s9358_s4 + $0xa8] sm:$0xff] }
 0x170   :  { %5498 = vmatprep.subr.bf16.mxu0 %v7192_v39  ;;  %5524 = vmatprep.subr.bf16.mxu1 %v9415_v61  ;;  %v7586_v52 = vpack.c.bf16 %v1575_v11, %v1572_v31  ;;  %v1593_v31 = vld [vmem:[%s9358_s4 + $0x138] sm:$0xff]  ;;  %v1592_v11 = vld [vmem:[%s9358_s4 + $0x130] sm:$0xff] }
 0x173   :  { %5500 = vmatpush1.bf16.msra.mxu0 %v7217_v25  ;;  %5526 = vmatpush3.bf16.msra.mxu1 %v7257_v4  ;;  %v1557_v4 = vld [vmem:[%s9358_s4 + $0x18] sm:$0xff] }
 0x174   :  { %5502 = vmatprep.subr.bf16.mxu0 %v7220_v29  ;;  %5527 = vmatprep.subr.bf16.mxu1 %v9415_v61  ;;  %v1555_v29 = vld [vmem:[%s9358_s4 + $0x8] sm:$0xff] }
 0x177   :  { %5504 = vmatpush1.bf16.msra.mxu0 %v7245_v56  ;;  %5529 = vmatpush3.bf16.msra.mxu1 %v7271_v16  ;;  %v7491_v56 = vpack.c.bf16 %v1558_v44, %v1555_v29  ;;  %v1578_v44 = vld [vmem:[%s9358_s4 + $0xc0] sm:$0xff] }
 0x178   :  { %5506 = vmatprep.subr.bf16.mxu0 %v7248_v57  ;;  %5530 = vmatprep.subr.bf16.mxu1 %v9415_v61  ;;  %v1554_v57 = vld [vmem:[%s9358_s4] sm:$0xff] }
 0x179   :  { %v6286_v2 = vpop.eup %6285  ;;  %v7502_v16 = vpack.c.bf16 %v1557_v4, %v1554_v57  ;;  %v1581_v57 = vld [vmem:[%s9358_s4 + $0xd8] sm:$0xff]  ;;  %v1580_v4 = vld [vmem:[%s9358_s4 + $0xd0] sm:$0xff] }
 0x17a   :  { %v1100_v39 = vmul.f32 %v6286_v2, %v1099_v53  ;;  %v1577_v53 = vld [vmem:[%s9358_s4 + $0xb8] sm:$0xff] }
 0x17b   :  { %5508 = vmatpush1.bf16.msra.mxu0 %v7267_v13  ;;  %5532 = vmatpush3.bf16.msra.mxu1 %v7283_v24  ;;  %v1556_v13 = vld [vmem:[%s9358_s4 + $0x10] sm:$0xff]  ;;  %v1559_v24 = vld [vmem:[%s9358_s4 + $0x28] sm:$0xff]  ;;  %v7592_v2 = vpack.c.bf16 %v1577_v53, %v1574_v35  ;;  %v7670_v35 = vpack.c.bf16 %v1593_v31, %v1590_v20 }
 0x17c   :  { %v7472_v25 = vadd.f32 %v1101_v10, %v1100_v39  ;;  %5565 = vmatprep.subr.bf16.mxu1 %v9415_v61  ;;  %5534 = vmatprep.subr.bf16.mxu0 %v7491_v56  ;;  %v7508_v47 = vpack.c.bf16 %v1559_v24, %v1556_v13  ;;  %v1579_v10 = vld [vmem:[%s9358_s4 + $0xc8] sm:$0xff]  ;;  %v1582_v39 = vld [vmem:[%s9358_s4 + $0xe0] sm:$0xff]  ;;  %v7614_v13 = vpack.c.bf16 %v1581_v57, %v1578_v44  ;;  %v1600_v44 = vld [vmem:[%s9358_s4 + $0x170] sm:$0xff] }
 0x17d   :  { %v7602_v29 = vpack.c.bf16 %v1582_v39, %v1579_v10  ;;  %v1583_v24 = vld [vmem:[%s9358_s4 + $0xe8] sm:$0xff]  ;;  %v1597_v39 = vld [vmem:[%s9358_s4 + $0x158] sm:$0xff] }
 0x17e   :  { %4204 = vmatmul.mubr.msk.f32.vlgmr.msra.gmra.mrb[28].mxu0 %vm1108_vm10, %v7472_v25  ;;  %4759 = vmatmul.mubr.msk.f32.vlgmr.msra.gmra.mrb[22].mxu1 %vm1108_vm10, %v7472_v25  ;;  %v7620_v22 = vpack.c.bf16 %v1583_v24, %v1580_v4  ;;  %v1595_v53 = vld [vmem:[%s9358_s4 + $0x148] sm:$0xff]  ;;  %v7686_v57 = vpack.c.bf16 %v1600_v44, %v1597_v39  ;;  %v1596_v4 = vld [vmem:[%s9358_s4 + $0x150] sm:$0xff] }
 0x17f   :  { %1666 = vmatprep.mubr.f32.mxu0 %v9416_v12  ;;  %4793 = vmatprep.mubr.msk.f32.mxu1 %vm6378_vm2, %v9416_v12  ;;  %v7676_v10 = vpack.c.bf16 %v1595_v53, %v1592_v11  ;;  %v1599_v24 = vld [vmem:[%s9358_s4 + $0x168] sm:$0xff] }
 0x180   :  { %5536 = vmatpush1.bf16.msra.mxu0 %v7502_v16  ;;  %5567 = vmatpush3.bf16.msra.mxu1 %v7508_v47  ;;  %v7698_v62 = vpack.c.bf16 %v1599_v24, %v1596_v4 }
 0x181   :  { %5568 = vmatprep.subr.bf16.mxu1 %v9415_v61  ;;  %5538 = vmatprep.subr.bf16.mxu0 %v7518_v26 }
 0x184   :  { %5540 = vmatpush1.bf16.msra.mxu0 %v7530_v48  ;;  %5570 = vmatpush3.bf16.msra.mxu1 %v7536_v42 }
 0x185   :  { %5571 = vmatprep.subr.bf16.mxu1 %v9415_v61  ;;  %5542 = vmatprep.subr.bf16.mxu0 %v7546_v49 }
 0x188   :  { %5544 = vmatpush1.bf16.msra.mxu0 %v7558_v8  ;;  %5573 = vmatpush3.bf16.msra.mxu1 %v7564_v32 }
 0x189   :  { %5574 = vmatprep.subr.bf16.mxu1 %v9415_v61  ;;  %5546 = vmatprep.subr.bf16.mxu0 %v7574_v45 }
 0x18c   :  { %5548 = vmatpush1.bf16.msra.mxu0 %v7586_v52  ;;  %5576 = vmatpush3.bf16.msra.mxu1 %v7592_v2 }
 0x18d   :  { %5577 = vmatprep.subr.bf16.mxu1 %v9415_v61  ;;  %5550 = vmatprep.subr.bf16.mxu0 %v7602_v29 }
 0x190   :  { %5552 = vmatpush1.bf16.msra.mxu0 %v7614_v13  ;;  %5579 = vmatpush3.bf16.msra.mxu1 %v7620_v22 }
 0x191   :  { %5580 = vmatprep.subr.bf16.mxu1 %v9415_v61  ;;  %5554 = vmatprep.subr.bf16.mxu0 %v7630_v30 }
 0x194   :  { %5556 = vmatpush1.bf16.msra.mxu0 %v7642_v51  ;;  %5582 = vmatpush3.bf16.msra.mxu1 %v7648_v7 }
 0x195   :  { %5583 = vmatprep.subr.bf16.mxu1 %v9415_v61  ;;  %5558 = vmatprep.subr.bf16.mxu0 %v7658_v50 }
 0x198   :  { %5560 = vmatpush1.bf16.msra.mxu0 %v7670_v35  ;;  %5585 = vmatpush3.bf16.msra.mxu1 %v7676_v10 }
 0x199   :  { %5586 = vmatprep.subr.bf16.mxu1 %v9415_v61  ;;  %5562 = vmatprep.subr.bf16.mxu0 %v7686_v57 }
 0x19c   :  { %5564 = vmatpush1.bf16.msra.mxu0 %v7698_v62  ;;  %5588 = vmatpush3.bf16.msra.mxu1 %v7704_v43 }
 0x19d   :  { %5621 = vmatprep.subr.bf16.mxu1 %v9415_v61  ;;  %5590 = vmatprep.subr.bf16.mxu0 %v7714_v3 }
 0x231   :  { %v1226_v27 = vpop.f32.mrb[2].mxu0  ;;  %v1297_v20 = vpop.f32.mrb[20].mxu1 }
 0x232   :  { %v6207_v31 = vadd.f32 %v1226_v27, %v7394_v9  ;;  %v1228_v11 = vpop.f32.mrb[3].mxu0  ;;  %v4725_v53 = vpop.f32.mrb[21].mxu1  ;;  %v1315_v0 = vadd.f32 %v7403_v40, %v1297_v20 }
 0x233   :  { %v6208_v44 = vadd.f32 %v1228_v11, %v7396_v18 }
 0x234   :  { %v1306_v39 = vmul.f32 0.5, %v6207_v31 }
 0x235   :  { %v1311_v4 = vmul.f32 0.5, %v6208_v44 }
 0x236   :  { %6287 = vtanh.f32 %v1306_v39 }
 0x237   :  { %6289 = vtanh.f32 %v1311_v4  ;;  %v1775_v4 = vld [vmem:[%s9360_s5] sm:$0xff] }
 0x240   :  { %v6288_v24 = vpop.eup %6287 }
 0x241   :  { %v1308_v23 = vadd.f32 1.0, %v6288_v24  ;;  %v6290_v59 = vpop.eup %6289 }
 0x242   :  { %v1313_v55 = vadd.f32 1.0, %v6290_v59  ;;  %v1777_v59 = vld [vmem:[%s9360_s5 + $0x10] sm:$0xff] }
 0x243   :  { %v1309_v37 = vmul.f32 0.5, %v1308_v23 }
 0x244   :  { %v1314_v27 = vmul.f32 0.5, %v1313_v55  ;;  %v1780_v55 = vld [vmem:[%s9360_s5 + $0x28] sm:$0xff] }
 0x245   :  { %v1316_v58 = vmul.f32 %v1315_v0, %v1309_v37  ;;  %v1782_v37 = vld [vmem:[%s9360_s5 + $0x38] sm:$0xff]  ;;  %v1785_v0 = vld [vmem:[%s9360_s5 + $0x50] sm:$0xff] }
 0x246   :  { %v1319_v31 = vsub.f32 1.0, %v1314_v27 }
 0x247   :  { %v1317_v34 = vadd.f32 %v1316_v58, %v7334_v63  ;;  %v1778_v63 = vld [vmem:[%s9360_s5 + $0x18] sm:$0xff] }
 0x248   :  { %v7748_v1 = vpack.c.bf16 %v1778_v63, %v1775_v4  ;;  %v1786_v4 = vld [vmem:[%s9360_s5 + $0x58] sm:$0xff] }
 0x249   :  { %6291 = vtanh.f32 %v1317_v34  ;;  %v7738_v34 = vpop.permute.xlu1 %1326 }
 0x24a   :  { %9418 = vst [vmem:[#allocation18_spill] sm:$0xff] %v7738_v34  ;;  %vm1328_vm11 = vcmp.eq.s32.totalorder %v7738_v34, 1 }
 0x251   :  { %v1447_v36 = vpop.f32.mrb[28].mxu0  ;;  %v7722_v53 = vpop.f32.mrb[22].mxu1 }
 0x252   :  { %v6233_v11 = vadd.f32 %v1447_v36, %v7408_v33  ;;  %v1449_v39 = vpop.f32.mrb[29].mxu0  ;;  %v4760_v44 = vpop.f32.mrb[23].mxu1  ;;  %v1321_v36 = vmul.f32 %v1314_v27, %v7419_v14  ;;  %v7750_v27 = vpack.c.bf16 %v1780_v55, %v1777_v59  ;;  %v1788_v55 = vld [vmem:[%s9360_s5 + $0x68] sm:$0xff]  ;;  %v1536_v38 = vadd.f32 %v7443_v28, %v7722_v53  ;;  %v1806_v53 = vld [vmem:[%s9360_s5 + $0xf8] sm:$0xff] }
 0x253   :  { %v6292_v20 = vpop.eup %6291  ;;  %v6234_v58 = vadd.f32 %v1449_v39, %v7410_v5  ;;  %v1783_v39 = vld [vmem:[%s9360_s5 + $0x40] sm:$0xff] }
 0x254   :  { %v1320_v24 = vmul.f32 %v6292_v20, %v1319_v31  ;;  %v1527_v23 = vmul.f32 0.5, %v6233_v11  ;;  %v1781_v31 = vld [vmem:[%s9360_s5 + $0x30] sm:$0xff]  ;;  %v7755_v11 = vpack.c.bf16 %v1785_v0, %v1782_v37  ;;  %v1784_v20 = vld [vmem:[%s9360_s5 + $0x48] sm:$0xff]  ;;  %v1787_v37 = vld [vmem:[%s9360_s5 + $0x60] sm:$0xff] }
 0x256   :  { %v1322_v44 = vadd.f32 %v1321_v36, %v1320_v24  ;;  %6293 = vtanh.f32 %v1527_v23  ;;  %v1791_v36 = vld [vmem:[%s9360_s5 + $0x80] sm:$0xff]  ;;  %v1532_v24 = vmul.f32 0.5, %v6234_v58  ;;  %v7788_v23 = vpack.c.bf16 %v1786_v4, %v1783_v39  ;;  %v1790_v58 = vld [vmem:[%s9360_s5 + $0x78] sm:$0xff]  ;;  %v1797_v39 = vld [vmem:[%s9360_s5 + $0xb0] sm:$0xff] }
 0x257   :  { %v7795_v0 = vpack.c.bf16 %v1791_v36, %v1788_v55  ;;  %v7817_v4 = vpack.c.bf16 %v1790_v58, %v1787_v37  ;;  %v1793_v55 = vld [vmem:[%s9360_s5 + $0x90] sm:$0xff]  ;;  %v1795_v37 = vld [vmem:[%s9360_s5 + $0xa0] sm:$0xff]  ;;  %v1798_v58 = vld [vmem:[%s9360_s5 + $0xb8] sm:$0xff] }
 0x258   :  { %v1329_v63 = vsel %vm1328_vm11, %v1322_v44, 0.0  ;;  %v7771_v59 = vsel %vm1328_vm11, %v1322_v44, %v7419_v14  ;;  %v7786_v14 = vpack.c.bf16 %v1784_v20, %v1781_v31  ;;  %v1789_v44 = vld [vmem:[%s9360_s5 + $0x70] sm:$0xff]  ;;  %v1792_v31 = vld [vmem:[%s9360_s5 + $0x88] sm:$0xff]  ;;  %v1794_v20 = vld [vmem:[%s9360_s5 + $0x98] sm:$0xff]  ;;  %6295 = vtanh.f32 %v1532_v24 }
 0x259   :  { %4203 = vst [vmem:[%s9364_s10 + $0x8] sm:$0xff] %v1329_v63  ;;  %1667 = vmatmul.mubr.f32.vlgmr.msra.gmra.mrb[4].mxu0 %v7771_v59  ;;  %4794 = vmatmul.mubr.f32.vlgmr.msra.gmra.mrb[24].mxu1 %v7771_v59  ;;  %v7819_v63 = vpack.c.bf16 %v1792_v31, %v1789_v44  ;;  %v7826_v36 = vpack.c.bf16 %v1797_v39, %v1794_v20  ;;  %v1796_v24 = vld [vmem:[%s9360_s5 + $0xa8] sm:$0xff]  ;;  %v1803_v20 = vld [vmem:[%s9360_s5 + $0xe0] sm:$0xff] }
 0x25a   :  { %5592 = vmatpush1.bf16.msra.mxu0 %v7748_v1  ;;  %5623 = vmatpush3.bf16.msra.mxu1 %v7750_v27  ;;  %v1800_v31 = vld [vmem:[%s9360_s5 + $0xc8] sm:$0xff]  ;;  %v7845_v34 = vpack.c.bf16 %v1796_v24, %v1793_v55  ;;  %v7847_v60 = vpack.c.bf16 %v1798_v58, %v1795_v37  ;;  %v1802_v55 = vld [vmem:[%s9360_s5 + $0xd8] sm:$0xff]  ;;  %v1801_v24 = vld [vmem:[%s9360_s5 + $0xd0] sm:$0xff] }
 0x25b   :  { %5594 = vmatprep.subr.bf16.mxu0 %v7755_v11  ;;  %5624 = vmatprep.subr.bf16.mxu1 %v9415_v61  ;;  %v1804_v37 = vld [vmem:[%s9360_s5 + $0xe8] sm:$0xff]  ;;  %v1809_v58 = vld [vmem:[%s9360_s5 + $0x110] sm:$0xff] }
 0x25c   :  { %1887 = vmatprep.mubr.f32.mxu0 %v9416_v12  ;;  %4828 = vmatprep.mubr.msk.f32.mxu1 %vm6378_vm2, %v9416_v12 }
 0x25e   :  { %5596 = vmatpush1.bf16.msra.mxu0 %v7786_v14  ;;  %5626 = vmatpush3.bf16.msra.mxu1 %v7788_v23 }
 0x25f   :  { %5598 = vmatprep.subr.bf16.mxu0 %v7795_v0  ;;  %5627 = vmatprep.subr.bf16.mxu1 %v9415_v61 }
 0x260   :  { %v6294_v44 = vpop.eup %6293 }
 0x261   :  { %v1529_v39 = vadd.f32 1.0, %v6294_v44  ;;  %v7856_v44 = vpack.c.bf16 %v1803_v20, %v1800_v31  ;;  %v7875_v20 = vpack.c.bf16 %v1802_v55, %v1799_v54  ;;  %v1808_v54 = vld [vmem:[%s9360_s5 + $0x108] sm:$0xff]  ;;  %v1810_v55 = vld [vmem:[%s9360_s5 + $0x118] sm:$0xff] }
 0x262   :  { %5600 = vmatpush1.bf16.msra.mxu0 %v7817_v4  ;;  %5629 = vmatpush3.bf16.msra.mxu1 %v7819_v63  ;;  %v6296_v15 = vpop.eup %6295 }
 0x263   :  { %v1530_v46 = vmul.f32 0.5, %v1529_v39  ;;  %5602 = vmatprep.subr.bf16.mxu0 %v7826_v36  ;;  %5630 = vmatprep.subr.bf16.mxu1 %v9415_v61  ;;  %9419 = vst [vmem:[#allocation19_spill] sm:$0xff] %v7856_v44  ;;  %v7877_v39 = vpack.c.bf16 %v1804_v37, %v1801_v24  ;;  %v1815_v24 = vld [vmem:[%s9360_s5 + $0x140] sm:$0xff]  ;;  %v1534_v37 = vadd.f32 1.0, %v6296_v15  ;;  %v1814_v15 = vld [vmem:[%s9360_s5 + $0x138] sm:$0xff] }
 0x265   :  { %v1537_v31 = vmul.f32 %v1536_v38, %v1530_v46  ;;  %9420 = vst [vmem:[#allocation20_spill] sm:$0xff] %v7877_v39  ;;  %v7885_v38 = vpack.c.bf16 %v1809_v58, %v1806_v53  ;;  %v1807_v46 = vld [vmem:[%s9360_s5 + $0x100] sm:$0xff]  ;;  %v7904_v53 = vpack.c.bf16 %v1808_v54, %v1805_v17  ;;  %v1816_v17 = vld [vmem:[%s9360_s5 + $0x148] sm:$0xff]  ;;  %v1818_v54 = vld [vmem:[%s9360_s5 + $0x158] sm:$0xff] }
 0x266   :  { %5604 = vmatpush1.bf16.msra.mxu0 %v7845_v34  ;;  %5632 = vmatpush3.bf16.msra.mxu1 %v7847_v60  ;;  %v7906_v58 = vpack.c.bf16 %v1810_v55, %v1807_v46  ;;  %v1821_v46 = vld [vmem:[%s9360_s5 + $0x170] sm:$0xff]  ;;  %v1535_v55 = vmul.f32 0.5, %v1534_v37  ;;  %v1820_v37 = vld [vmem:[%s9360_s5 + $0x168] sm:$0xff] }
 0x267   :  { %v1538_v6 = vadd.f32 %v1537_v31, %v7390_v41  ;;  %5606 = vmatprep.subr.bf16.mxu0 %v7856_v44  ;;  %5633 = vmatprep.subr.bf16.mxu1 %v9415_v61  ;;  %9421 = vst [vmem:[#allocation21_spill] sm:$0xff] %v7885_v38  ;;  %v1812_v41 = vld [vmem:[%s9360_s5 + $0x128] sm:$0xff]  ;;  %9422 = vst [vmem:[#allocation22_spill] sm:$0xff] %v7904_v53  ;;  %v1811_v31 = vld [vmem:[%s9360_s5 + $0x120] sm:$0xff] }
 0x268   :  { %9423 = vst [vmem:[#allocation23_spill] sm:$0xff] %v7906_v58  ;;  %v7913_v44 = vpack.c.bf16 %v1815_v24, %v1812_v41  ;;  %v7932_v41 = vpack.c.bf16 %v1814_v15, %v1811_v31  ;;  %v1819_v31 = vld [vmem:[%s9360_s5 + $0x160] sm:$0xff]  ;;  %v1822_v15 = vld [vmem:[%s9360_s5 + $0x178] sm:$0xff] }
 0x269   :  { %6297 = vtanh.f32 %v1538_v6  ;;  %v1813_v6 = vld [vmem:[%s9360_s5 + $0x130] sm:$0xff] }
 0x26a   :  { %5608 = vmatpush1.bf16.msra.mxu0 %v7875_v20  ;;  %5635 = vmatpush3.bf16.msra.mxu1 %v7877_v39  ;;  %9424 = vst [vmem:[#allocation24_spill] sm:$0xff] %v7913_v44  ;;  %9425 = vst [vmem:[#allocation25_spill] sm:$0xff] %v7932_v41  ;;  %v7934_v24 = vpack.c.bf16 %v1816_v17, %v1813_v6  ;;  %v7941_v39 = vpack.c.bf16 %v1821_v46, %v1818_v54  ;;  %v1540_v6 = vsub.f32 1.0, %v1535_v55 }
 0x26b   :  { %5610 = vmatprep.subr.bf16.mxu0 %v7885_v38  ;;  %5636 = vmatprep.subr.bf16.mxu1 %v9415_v61  ;;  %v1817_v38 = vld [vmem:[%s9360_s5 + $0x150] sm:$0xff]  ;;  %v7956_v54 = vpack.c.bf16 %v1822_v15, %v1819_v31 }
 0x26c   :  { %v7954_v17 = vpack.c.bf16 %v1820_v37, %v1817_v38 }
 0x26e   :  { %5612 = vmatpush1.bf16.msra.mxu0 %v7904_v53  ;;  %5638 = vmatpush3.bf16.msra.mxu1 %v7906_v58 }
 0x26f   :  { %5614 = vmatprep.subr.bf16.mxu0 %v7913_v44  ;;  %5639 = vmatprep.subr.bf16.mxu1 %v9415_v61  ;;  %v7963_v44 = vsel %vm1108_vm10, %v7472_v25, 0.0 }
 0x270   :  { %9426 = vst [vmem:[#allocation26_spill] sm:$0xff] %v7963_v44  ;;  %v1542_v53 = vmul.f32 %v1535_v55, %v7963_v44  ;;  %v8025_v55 = vpop.permute.xlu0 %1768 }
 0x271   :  { %9429 = vst [vmem:[#allocation29_spill] sm:$0xff] %v8025_v55  ;;  %vm1770_vm13 = vcmp.eq.s32.totalorder %v8025_v55, 1 }
 0x272   :  { %5616 = vmatpush1.bf16.msra.mxu0 %v7932_v41  ;;  %5641 = vmatpush3.bf16.msra.mxu1 %v7934_v24  ;;  %v7966_v41 = vpop.permute.xlu1 %1547 }
 0x273   :  { %v6298_v46 = vpop.eup %6297  ;;  %5618 = vmatprep.subr.bf16.mxu0 %v7941_v39  ;;  %5642 = vmatprep.subr.bf16.mxu1 %v9415_v61  ;;  %9427 = vst [vmem:[#allocation27_spill] sm:$0xff] %v7966_v41  ;;  %vm1549_vm12 = vcmp.eq.s32.totalorder %v7966_v41, 1 }
 0x274   :  { %v1541_v58 = vmul.f32 %v6298_v46, %v1540_v6  ;;  %v9431_v46 = vld [vmem:[#allocation19_spill] sm:$0xff] }
 0x276   :  { %5620 = vmatpush1.bf16.msra.mxu0 %v7954_v17  ;;  %5644 = vmatpush3.bf16.msra.mxu1 %v7956_v54  ;;  %v7970_v38 = vadd.f32 %v1542_v53, %v1541_v58 }
 0x277   :  { %5646 = vmatprep.subr.bf16.mxu0 %v7491_v56  ;;  %5677 = vmatprep.subr.bf16.mxu1 %v9415_v61 }
 0x278   :  { %9428 = vst [vmem:[#allocation28_spill] sm:$0xff] %v7970_v38  ;;  %v7979_v25 = vsel %vm1549_vm12, %v7970_v38, %v7963_v44  ;;  %v2683_v38 = vld [vmem:[%s9360_s5 + $0xf0] sm:$0xff] }
 0x279   :  { %1888 = vmatmul.mubr.f32.vlgmr.msra.gmra.mrb[26].mxu0 %v7979_v25  ;;  %4829 = vmatmul.mubr.f32.vlgmr.msra.gmra.mrb[26].mxu1 %v7979_v25 }
 0x27a   :  { %5648 = vmatpush1.bf16.msra.mxu0 %v7502_v16  ;;  %5679 = vmatpush3.bf16.msra.mxu1 %v7508_v47 }
 0x27b   :  { %5650 = vmatprep.subr.bf16.mxu0 %v7518_v26  ;;  %5680 = vmatprep.subr.bf16.mxu1 %v9415_v61 }
 0x27c   :  { %2108 = vmatprep.mubr.f32.mxu0 %v9416_v12  ;;  %4863 = vmatprep.mubr.msk.f32.mxu1 %vm6378_vm2, %v9416_v12 }
 0x27e   :  { %5652 = vmatpush1.bf16.msra.mxu0 %v7530_v48  ;;  %5682 = vmatpush3.bf16.msra.mxu1 %v7536_v42 }
 0x27f   :  { %5654 = vmatprep.subr.bf16.mxu0 %v7546_v49  ;;  %5683 = vmatprep.subr.bf16.mxu1 %v9415_v61 }
 0x282   :  { %5656 = vmatpush1.bf16.msra.mxu0 %v7558_v8  ;;  %5685 = vmatpush3.bf16.msra.mxu1 %v7564_v32 }
 0x283   :  { %5658 = vmatprep.subr.bf16.mxu0 %v7574_v45  ;;  %5686 = vmatprep.subr.bf16.mxu1 %v9415_v61 }
 0x286   :  { %5660 = vmatpush1.bf16.msra.mxu0 %v7586_v52  ;;  %5688 = vmatpush3.bf16.msra.mxu1 %v7592_v2 }
 0x287   :  { %5662 = vmatprep.subr.bf16.mxu0 %v7602_v29  ;;  %5689 = vmatprep.subr.bf16.mxu1 %v9415_v61 }
 0x28a   :  { %5664 = vmatpush1.bf16.msra.mxu0 %v7614_v13  ;;  %5691 = vmatpush3.bf16.msra.mxu1 %v7620_v22 }
 0x28b   :  { %5666 = vmatprep.subr.bf16.mxu0 %v7630_v30  ;;  %5692 = vmatprep.subr.bf16.mxu1 %v9415_v61 }
 0x28e   :  { %5668 = vmatpush1.bf16.msra.mxu0 %v7642_v51  ;;  %5694 = vmatpush3.bf16.msra.mxu1 %v7648_v7 }
 0x28f   :  { %5670 = vmatprep.subr.bf16.mxu0 %v7658_v50  ;;  %5695 = vmatprep.subr.bf16.mxu1 %v9415_v61 }
 0x292   :  { %5672 = vmatpush1.bf16.msra.mxu0 %v7670_v35  ;;  %5697 = vmatpush3.bf16.msra.mxu1 %v7676_v10 }
 0x293   :  { %5674 = vmatprep.subr.bf16.mxu0 %v7686_v57  ;;  %5698 = vmatprep.subr.bf16.mxu1 %v9415_v61 }
 0x296   :  { %5676 = vmatpush1.bf16.msra.mxu0 %v7698_v62  ;;  %5700 = vmatpush3.bf16.msra.mxu1 %v7704_v43 }
 0x297   :  { %5702 = vmatprep.subr.bf16.mxu0 %v7714_v3  ;;  %5733 = vmatprep.subr.bf16.mxu1 %v9415_v61 }
 0x32c   :  { %v1668_v56 = vpop.f32.mrb[4].mxu0  ;;  %v1739_v16 = vpop.f32.mrb[24].mxu1 }
 0x32d   :  { %v6209_v47 = vadd.f32 %v1668_v56, %v7394_v9  ;;  %v1670_v26 = vpop.f32.mrb[5].mxu0  ;;  %v4795_v48 = vpop.f32.mrb[25].mxu1  ;;  %v1757_v2 = vadd.f32 %v7403_v40, %v1739_v16  ;;  %v9436_v56 = vld [vmem:[#allocation24_spill] sm:$0xff] }
 0x32e   :  { %v6210_v49 = vadd.f32 %v1670_v26, %v7396_v18 }
 0x32f   :  { %v1748_v42 = vmul.f32 0.5, %v6209_v47  ;;  %v9437_v47 = vld [vmem:[#allocation25_spill] sm:$0xff] }
 0x330   :  { %v1753_v8 = vmul.f32 0.5, %v6210_v49 }
 0x331   :  { %6299 = vtanh.f32 %v1748_v42  ;;  %v8074_v42 = vpop.permute.xlu1 %1989 }
 0x332   :  { %6301 = vtanh.f32 %v1753_v8  ;;  %vm1991_vm14 = vcmp.eq.s32.totalorder %v8074_v42, 1  ;;  %v2441_v8 = vld [vmem:[%s9358_s4 + $0x18] sm:$0xff] }
 0x33b   :  { %v6300_v32 = vpop.eup %6299 }
 0x33c   :  { %v1750_v45 = vadd.f32 1.0, %v6300_v32  ;;  %v6302_v13 = vpop.eup %6301  ;;  %v2440_v32 = vld [vmem:[%s9358_s4 + $0x10] sm:$0xff] }
 0x33d   :  { %v1755_v30 = vadd.f32 1.0, %v6302_v13  ;;  %v2448_v13 = vld [vmem:[%s9358_s4 + $0x50] sm:$0xff] }
 0x33e   :  { %v1751_v52 = vmul.f32 0.5, %v1750_v45 }
 0x33f   :  { %v1756_v51 = vmul.f32 0.5, %v1755_v30  ;;  %v2444_v30 = vld [vmem:[%s9358_s4 + $0x30] sm:$0xff] }
 0x340   :  { %v1758_v29 = vmul.f32 %v1757_v2, %v1751_v52  ;;  %v2443_v52 = vld [vmem:[%s9358_s4 + $0x28] sm:$0xff] }
 0x341   :  { %v1761_v35 = vsub.f32 1.0, %v1756_v51  ;;  %v1763_v53 = vmul.f32 %v1756_v51, %v7771_v59  ;;  %v8116_v2 = vpack.c.bf16 %v2443_v52, %v2440_v32  ;;  %v2447_v51 = vld [vmem:[%s9358_s4 + $0x48] sm:$0xff] }
 0x342   :  { %v1759_v22 = vadd.f32 %v1758_v29, %v7347_v19  ;;  %v2445_v29 = vld [vmem:[%s9358_s4 + $0x38] sm:$0xff]  ;;  %v2475_v52 = vld [vmem:[%s9358_s4 + $0x128] sm:$0xff] }
 0x344   :  { %6303 = vtanh.f32 %v1759_v22  ;;  %v8126_v22 = vpack.c.bf16 %v2448_v13, %v2445_v29  ;;  %v2478_v29 = vld [vmem:[%s9358_s4 + $0x140] sm:$0xff] }
 0x345   :  { %v8266_v13 = vpack.c.bf16 %v2478_v29, %v2475_v52  ;;  %v8331_v29 = vld [vmem:[%s9363_s8] ss:$0 sm:$0xff] }
 0x34c   :  { %v1889_v7 = vpop.f32.mrb[26].mxu0  ;;  %v1960_v50 = vpop.f32.mrb[26].mxu1 }
 0x34d   :  { %v6231_v10 = vadd.f32 %v1889_v7, %v7408_v33  ;;  %v1891_v57 = vpop.f32.mrb[27].mxu0  ;;  %v4830_v62 = vpop.f32.mrb[27].mxu1  ;;  %v2446_v7 = vld [vmem:[%s9358_s4 + $0x40] sm:$0xff] }
 0x34e   :  { %v6304_v43 = vpop.eup %6303  ;;  %v6232_v40 = vadd.f32 %v1891_v57, %v7410_v5  ;;  %v2451_v57 = vld [vmem:[%s9358_s4 + $0x68] sm:$0xff]  ;;  %v2454_v62 = vld [vmem:[%s9358_s4 + $0x80] sm:$0xff] }
 0x34f   :  { %v1762_v3 = vmul.f32 %v6304_v43, %v1761_v35  ;;  %v1969_v58 = vmul.f32 0.5, %v6231_v10  ;;  %v2449_v35 = vld [vmem:[%s9358_s4 + $0x58] sm:$0xff]  ;;  %v8154_v43 = vpack.c.bf16 %v2454_v62, %v2451_v57  ;;  %v2479_v57 = vld [vmem:[%s9358_s4 + $0x148] sm:$0xff] }
 0x350   :  { %v1974_v15 = vmul.f32 0.5, %v6232_v40  ;;  %v8144_v10 = vpack.c.bf16 %v2449_v35, %v2446_v7  ;;  %v2476_v7 = vld [vmem:[%s9358_s4 + $0x130] sm:$0xff] }
 0x351   :  { %6305 = vtanh.f32 %v1969_v58  ;;  %v1764_v19 = vadd.f32 %v1763_v53, %v1762_v3  ;;  %v2450_v3 = vld [vmem:[%s9358_s4 + $0x60] sm:$0xff]  ;;  %v2453_v53 = vld [vmem:[%s9358_s4 + $0x78] sm:$0xff]  ;;  %v2452_v58 = vld [vmem:[%s9358_s4 + $0x70] sm:$0xff]  ;;  %v8284_v62 = vpack.c.bf16 %v2479_v57, %v2476_v7 }
 0x352   :  { %6307 = vtanh.f32 %v1974_v15  ;;  %v8166_v40 = vpack.c.bf16 %v2453_v53, %v2450_v3  ;;  %v2457_v15 = vld [vmem:[%s9358_s4 + $0x98] sm:$0xff]  ;;  %v2484_v53 = vld [vmem:[%s9358_s4 + $0x170] sm:$0xff]  ;;  %v9440_v57 = vld [vmem:[#allocation5_spill] sm:$0xff] }
 0x353   :  { %v1771_v37 = vsel %vm1770_vm13, %v1764_v19, 0.0  ;;  %v8033_v31 = vsel %vm1770_vm13, %v1764_v19, %v7771_v59  ;;  %v1978_v59 = vadd.f32 %v7443_v28, %v1960_v50  ;;  %v9432_v28 = vld [vmem:[#allocation20_spill] sm:$0xff]  ;;  %v8138_v50 = vpack.c.bf16 %v2447_v51, %v2444_v30  ;;  %v2455_v19 = vld [vmem:[%s9358_s4 + $0x88] sm:$0xff]  ;;  %v2474_v30 = vld [vmem:[%s9358_s4 + $0x120] sm:$0xff] }
 0x354   :  { %4206 = vst [vmem:[%s9364_s10 + $0x10] sm:$0xff] %v1771_v37  ;;  %2109 = vmatmul.mubr.f32.vlgmr.msra.gmra.mrb[6].mxu0 %v8033_v31  ;;  %4864 = vmatmul.mubr.f32.vlgmr.msra.gmra.mrb[28].mxu1 %v8033_v31  ;;  %v8172_v37 = vpack.c.bf16 %v2455_v19, %v2452_v58  ;;  %v2477_v51 = vld [vmem:[%s9358_s4 + $0x138] sm:$0xff]  ;;  %v2480_v19 = vld [vmem:[%s9358_s4 + $0x150] sm:$0xff] }
 0x355   :  { %5704 = vmatpush1.bf16.msra.mxu0 %v7748_v1  ;;  %5735 = vmatpush3.bf16.msra.mxu1 %v7750_v27  ;;  %v8278_v35 = vpack.c.bf16 %v2477_v51, %v2474_v30  ;;  %v2481_v3 = vld [vmem:[%s9358_s4 + $0x158] sm:$0xff] }
 0x356   :  { %5706 = vmatprep.subr.bf16.mxu0 %v7755_v11  ;;  %5736 = vmatprep.subr.bf16.mxu1 %v9415_v61  ;;  %v8294_v58 = vpack.c.bf16 %v2484_v53, %v2481_v3 }
 0x357   :  { %2329 = vmatprep.mubr.f32.mxu0 %v9416_v12  ;;  %4898 = vmatprep.mubr.msk.f32.mxu1 %vm6378_vm2, %v9416_v12 }
 0x359   :  { %5708 = vmatpush1.bf16.msra.mxu0 %v7786_v14  ;;  %5738 = vmatpush3.bf16.msra.mxu1 %v7788_v23 }
 0x35a   :  { %5710 = vmatprep.subr.bf16.mxu0 %v7795_v0  ;;  %5739 = vmatprep.subr.bf16.mxu1 %v9415_v61  ;;  %v9430_v0 = vld [vmem:[#allocation14_spill] sm:$0xff] }
 0x35b   :  { %v6306_v1 = vpop.eup %6305  ;;  %9438 = vst [vmem:[#allocation14_spill] sm:$0xff] %v8074_v42  ;;  %v9443_v42 = vld [vmem:[#allocation15_spill] sm:$0xff] }
 0x35c   :  { %v1971_v27 = vadd.f32 1.0, %v6306_v1  ;;  %v6308_v23 = vpop.eup %6307  ;;  %v2460_v1 = vld [vmem:[%s9358_s4 + $0xb0] sm:$0xff] }
 0x35d   :  { %5712 = vmatpush1.bf16.msra.mxu0 %v7817_v4  ;;  %5741 = vmatpush3.bf16.msra.mxu1 %v7819_v63  ;;  %v1976_v4 = vadd.f32 1.0, %v6308_v23  ;;  %v9433_v63 = vld [vmem:[#allocation21_spill] sm:$0xff] }
 0x35e   :  { %v1972_v11 = vmul.f32 0.5, %v1971_v27  ;;  %5714 = vmatprep.subr.bf16.mxu0 %v7826_v36  ;;  %5742 = vmatprep.subr.bf16.mxu1 %v9415_v61  ;;  %v9434_v36 = vld [vmem:[#allocation22_spill] sm:$0xff]  ;;  %v8182_v27 = vpack.c.bf16 %v2460_v1, %v2457_v15  ;;  %v2482_v1 = vld [vmem:[%s9358_s4 + $0x160] sm:$0xff] }
 0x35f   :  { %v2483_v15 = vld [vmem:[%s9358_s4 + $0x168] sm:$0xff] }
 0x360   :  { %v1979_v14 = vmul.f32 %v1978_v59, %v1972_v11  ;;  %v2456_v11 = vld [vmem:[%s9358_s4 + $0x90] sm:$0xff]  ;;  %v2459_v59 = vld [vmem:[%s9358_s4 + $0xa8] sm:$0xff] }
 0x361   :  { %5716 = vmatpush1.bf16.msra.mxu0 %v7845_v34  ;;  %5744 = vmatpush3.bf16.msra.mxu1 %v7847_v60  ;;  %v1977_v34 = vmul.f32 0.5, %v1976_v4  ;;  %v9435_v60 = vld [vmem:[#allocation23_spill] sm:$0xff]  ;;  %v8194_v23 = vpack.c.bf16 %v2459_v59, %v2456_v11  ;;  %v2466_v4 = vld [vmem:[%s9358_s4 + $0xe0] sm:$0xff]  ;;  %v8306_v11 = vpack.c.bf16 %v2483_v15, %v2480_v19  ;;  %v2485_v59 = vld [vmem:[%s9358_s4 + $0x178] sm:$0xff] }
 0x362   :  { %v1980_v6 = vadd.f32 %v1979_v14, %v9430_v0  ;;  %5718 = vmatprep.subr.bf16.mxu0 %v9431_v46  ;;  %5745 = vmatprep.subr.bf16.mxu1 %v9415_v61  ;;  %v2458_v14 = vld [vmem:[%s9358_s4 + $0xa0] sm:$0xff]  ;;  %v2461_v0 = vld [vmem:[%s9358_s4 + $0xb8] sm:$0xff]  ;;  %v2463_v46 = vld [vmem:[%s9358_s4 + $0xc8] sm:$0xff] }
 0x363   :  { %v1982_v16 = vsub.f32 1.0, %v1977_v34  ;;  %v1984_v48 = vmul.f32 %v1977_v34, %v7979_v25  ;;  %v2465_v34 = vld [vmem:[%s9358_s4 + $0xd8] sm:$0xff] }
 0x364   :  { %6309 = vtanh.f32 %v1980_v6  ;;  %v8200_v6 = vpack.c.bf16 %v2461_v0, %v2458_v14  ;;  %v8312_v14 = vpack.c.bf16 %v2485_v59, %v2482_v1  ;;  %v2654_v0 = vld [vmem:[%s9360_s5 + $0x8] sm:$0xff] }
 0x365   :  { %5720 = vmatpush1.bf16.msra.mxu0 %v7875_v20  ;;  %5747 = vmatpush3.bf16.msra.mxu1 %v9432_v28  ;;  %v8210_v28 = vpack.c.bf16 %v2466_v4, %v2463_v46  ;;  %v2657_v46 = vld [vmem:[%s9360_s5 + $0x20] sm:$0xff] }
 0x366   :  { %5722 = vmatprep.subr.bf16.mxu0 %v9433_v63  ;;  %5748 = vmatprep.subr.bf16.mxu1 %v9415_v61  ;;  %v2462_v63 = vld [vmem:[%s9358_s4 + $0xc0] sm:$0xff]  ;;  %v8322_v4 = vpack.c.bf16 %v2657_v46, %v2654_v0 }
 0x369   :  { %5724 = vmatpush1.bf16.msra.mxu0 %v9434_v36  ;;  %5750 = vmatpush3.bf16.msra.mxu1 %v9435_v60  ;;  %v2464_v36 = vld [vmem:[%s9358_s4 + $0xd0] sm:$0xff]  ;;  %v8222_v60 = vpack.c.bf16 %v2465_v34, %v2462_v63 }
 0x36a   :  { %5726 = vmatprep.subr.bf16.mxu0 %v9436_v56  ;;  %5751 = vmatprep.subr.bf16.mxu1 %v9415_v61  ;;  %v2467_v56 = vld [vmem:[%s9358_s4 + $0xe8] sm:$0xff] }
 0x36d   :  { %5728 = vmatpush1.bf16.msra.mxu0 %v9437_v47  ;;  %5753 = vmatpush3.bf16.msra.mxu1 %v7934_v24  ;;  %v2439_v24 = vld [vmem:[%s9358_s4 + $0x8] sm:$0xff]  ;;  %v2469_v47 = vld [vmem:[%s9358_s4 + $0xf8] sm:$0xff] }
 0x36e   :  { %v6310_v20 = vpop.eup %6309  ;;  %5730 = vmatprep.subr.bf16.mxu0 %v7941_v39  ;;  %5754 = vmatprep.subr.bf16.mxu1 %v9415_v61 }
 0x36f   :  { %v1983_v26 = vmul.f32 %v6310_v20, %v1982_v16  ;;  %v8228_v16 = vpack.c.bf16 %v2467_v56, %v2464_v36  ;;  %v2472_v20 = vld [vmem:[%s9358_s4 + $0x110] sm:$0xff] }
 0x371   :  { %5732 = vmatpush1.bf16.msra.mxu0 %v7954_v17  ;;  %5756 = vmatpush3.bf16.msra.mxu1 %v7956_v54  ;;  %v8078_v49 = vadd.f32 %v1984_v48, %v1983_v26  ;;  %v2442_v17 = vld [vmem:[%s9358_s4 + $0x20] sm:$0xff]  ;;  %v8238_v26 = vpack.c.bf16 %v2472_v20, %v2469_v47  ;;  %v2468_v48 = vld [vmem:[%s9358_s4 + $0xf0] sm:$0xff] }
 0x372   :  { %5789 = vmatprep.subr.bf16.mxu1 %v9415_v61  ;;  %v8099_v54 = vpack.c.bf16 %v2442_v17, %v2439_v24  ;;  %v2471_v24 = vld [vmem:[%s9358_s4 + $0x108] sm:$0xff]  ;;  %v2470_v17 = vld [vmem:[%s9358_s4 + $0x100] sm:$0xff] }
 0x373   :  { %9439 = vst [vmem:[#allocation19_spill] sm:$0xff] %v8078_v49  ;;  %v8086_v39 = vsel %vm1991_vm14, %v8078_v49, %v7979_v25  ;;  %v2438_v25 = vld [vmem:[%s9358_s4] sm:$0xff] }
 0x374   :  { %2330 = vmatmul.mubr.f32.vlgmr.msra.gmra.mrb[24].mxu0 %v8086_v39  ;;  %4899 = vmatmul.mubr.f32.vlgmr.msra.gmra.mrb[30].mxu1 %v8086_v39  ;;  %v8110_v45 = vpack.c.bf16 %v2441_v8, %v2438_v25  ;;  %v8250_v25 = vpack.c.bf16 %v2471_v24, %v2468_v48  ;;  %v2473_v8 = vld [vmem:[%s9358_s4 + $0x118] sm:$0xff] }
 0x375   :  { %2550 = vmatprep.mubr.f32.mxu0 %v9416_v12  ;;  %4933 = vmatprep.mubr.msk.f32.mxu1 %vm6378_vm2, %v9416_v12  ;;  %v8256_v32 = vpack.c.bf16 %v2473_v8, %v2470_v17 }
 0x376   :  { %5758 = vmatprep.subr.bf16.mxu0 %v8099_v54  ;;  %5791 = vmatpush3.bf16.msra.mxu1 %v8116_v2 }
 0x377   :  { %5760 = vmatpush1.bf16.msra.mxu0 %v8110_v45  ;;  %5792 = vmatprep.subr.bf16.mxu1 %v9415_v61 }
 0x378   :  { %5762 = vmatprep.subr.bf16.mxu0 %v8126_v22 }
 0x37a   :  { %5794 = vmatpush3.bf16.msra.mxu1 %v8144_v10 }
 0x37b   :  { %5764 = vmatpush1.bf16.msra.mxu0 %v8138_v50  ;;  %5795 = vmatprep.subr.bf16.mxu1 %v9415_v61 }
 0x37c   :  { %5766 = vmatprep.subr.bf16.mxu0 %v8154_v43 }
 0x37e   :  { %5797 = vmatpush3.bf16.msra.mxu1 %v8172_v37 }
 0x37f   :  { %5768 = vmatpush1.bf16.msra.mxu0 %v8166_v40  ;;  %5798 = vmatprep.subr.bf16.mxu1 %v9415_v61 }
 0x380   :  { %5770 = vmatprep.subr.bf16.mxu0 %v8182_v27 }
 0x382   :  { %5800 = vmatpush3.bf16.msra.mxu1 %v8200_v6 }
 0x383   :  { %5772 = vmatpush1.bf16.msra.mxu0 %v8194_v23  ;;  %5801 = vmatprep.subr.bf16.mxu1 %v9415_v61 }
 0x384   :  { %5774 = vmatprep.subr.bf16.mxu0 %v8210_v28 }
 0x386   :  { %5803 = vmatpush3.bf16.msra.mxu1 %v8228_v16 }
 0x387   :  { %5776 = vmatpush1.bf16.msra.mxu0 %v8222_v60  ;;  %5804 = vmatprep.subr.bf16.mxu1 %v9415_v61 }
 0x388   :  { %5778 = vmatprep.subr.bf16.mxu0 %v8238_v26 }
 0x38a   :  { %5806 = vmatpush3.bf16.msra.mxu1 %v8256_v32 }
 0x38b   :  { %5780 = vmatpush1.bf16.msra.mxu0 %v8250_v25  ;;  %5807 = vmatprep.subr.bf16.mxu1 %v9415_v61 }
 0x38c   :  { %5782 = vmatprep.subr.bf16.mxu0 %v8266_v13 }
 0x38e   :  { %5809 = vmatpush3.bf16.msra.mxu1 %v8284_v62 }
 0x38f   :  { %5784 = vmatpush1.bf16.msra.mxu0 %v8278_v35  ;;  %5810 = vmatprep.subr.bf16.mxu1 %v9415_v61 }
 0x390   :  { %5786 = vmatprep.subr.bf16.mxu0 %v8294_v58 }
 0x392   :  { %5812 = vmatpush3.bf16.msra.mxu1 %v8312_v14 }
 0x393   :  { %5788 = vmatpush1.bf16.msra.mxu0 %v8306_v11  ;;  %5845 = vmatprep.subr.bf16.mxu1 %v9415_v61 }
 0x394   :  { %5814 = vmatprep.subr.bf16.mxu0 %v8322_v4 }
 0x427   :  { %v2110_v63 = vpop.f32.mrb[6].mxu0  ;;  %v2181_v34 = vpop.f32.mrb[28].mxu1 }
 0x428   :  { %v6211_v36 = vadd.f32 %v2110_v63, %v7394_v9  ;;  %v2112_v56 = vpop.f32.mrb[7].mxu0  ;;  %v4865_v47 = vpop.f32.mrb[29].mxu1  ;;  %v2199_v30 = vadd.f32 %v8331_v29, %v2181_v34 }
 0x429   :  { %v6212_v48 = vadd.f32 %v2112_v56, %v7396_v18  ;;  %v2656_v56 = vld [vmem:[%s9360_s5 + $0x18] sm:$0xff]  ;;  %v2655_v47 = vld [vmem:[%s9360_s5 + $0x10] sm:$0xff] }
 0x42a   :  { %v2190_v20 = vmul.f32 0.5, %v6211_v36  ;;  %v2653_v36 = vld [vmem:[%s9360_s5] sm:$0xff] }
 0x42b   :  { %v2195_v24 = vmul.f32 0.5, %v6212_v48  ;;  %v8350_v48 = vpop.permute.xlu0 %2210 }
 0x42c   :  { %6311 = vtanh.f32 %v2190_v20  ;;  %v2658_v20 = vld [vmem:[%s9360_s5 + $0x28] sm:$0xff]  ;;  %9441 = vst [vmem:[#allocation20_spill] sm:$0xff] %v8350_v48  ;;  %vm2212_vm15 = vcmp.eq.s32.totalorder %v8350_v48, 1 }
 0x42d   :  { %6313 = vtanh.f32 %v2195_v24 }
 0x436   :  { %v6312_v17 = vpop.eup %6311 }
 0x437   :  { %v2192_v8 = vadd.f32 1.0, %v6312_v17  ;;  %v6314_v7 = vpop.eup %6313 }
 0x438   :  { %v2197_v53 = vadd.f32 1.0, %v6314_v7 }
 0x439   :  { %v2193_v52 = vmul.f32 0.5, %v2192_v8 }
 0x43a   :  { %v2198_v19 = vmul.f32 0.5, %v2197_v53  ;;  %v2659_v53 = vld [vmem:[%s9360_s5 + $0x30] sm:$0xff] }
 0x43b   :  { %v2200_v51 = vmul.f32 %v2199_v30, %v2193_v52  ;;  %v2660_v52 = vld [vmem:[%s9360_s5 + $0x38] sm:$0xff]  ;;  %v2663_v30 = vld [vmem:[%s9360_s5 + $0x50] sm:$0xff] }
 0x43c   :  { %v2203_v59 = vsub.f32 1.0, %v2198_v19  ;;  %v2205_v17 = vmul.f32 %v2198_v19, %v8033_v31  ;;  %v8370_v19 = vpack.c.bf16 %v2663_v30, %v2660_v52  ;;  %v2672_v52 = vld [vmem:[%s9360_s5 + $0x98] sm:$0xff]  ;;  %v2675_v30 = vld [vmem:[%s9360_s5 + $0xb0] sm:$0xff] }
 0x43d   :  { %v2201_v3 = vadd.f32 %v2200_v51, %v9440_v57  ;;  %v8362_v57 = vpack.c.bf16 %v2656_v56, %v2653_v36  ;;  %v2669_v36 = vld [vmem:[%s9360_s5 + $0x80] sm:$0xff] }
 0x43f   :  { %6315 = vtanh.f32 %v2201_v3  ;;  %v8364_v3 = vpack.c.bf16 %v2658_v20, %v2655_v47  ;;  %v2665_v47 = vld [vmem:[%s9360_s5 + $0x60] sm:$0xff] }
 0x447   :  { %v2331_v15 = vpop.f32.mrb[24].mxu0  ;;  %v8335_v1 = vpop.f32.mrb[30].mxu1 }
 0x448   :  { %v6229_v0 = vadd.f32 %v2331_v15, %v7408_v33  ;;  %v2333_v46 = vpop.f32.mrb[25].mxu0  ;;  %v4900_v63 = vpop.f32.mrb[31].mxu1  ;;  %v2662_v15 = vld [vmem:[%s9360_s5 + $0x48] sm:$0xff] }
 0x449   :  { %v6316_v34 = vpop.eup %6315  ;;  %v6230_v51 = vadd.f32 %v2333_v46, %v7410_v5  ;;  %v2666_v63 = vld [vmem:[%s9360_s5 + $0x68] sm:$0xff]  ;;  %v8397_v56 = vpack.c.bf16 %v2662_v15, %v2659_v53  ;;  %v2671_v15 = vld [vmem:[%s9360_s5 + $0x90] sm:$0xff] }
 0x44a   :  { %v2204_v24 = vmul.f32 %v6316_v34, %v2203_v59  ;;  %v2411_v8 = vmul.f32 0.5, %v6229_v0  ;;  %v2661_v59 = vld [vmem:[%s9360_s5 + $0x40] sm:$0xff]  ;;  %v2664_v0 = vld [vmem:[%s9360_s5 + $0x58] sm:$0xff]  ;;  %v8406_v20 = vpack.c.bf16 %v2669_v36, %v2666_v63 }
 0x44b   :  { %v2416_v34 = vmul.f32 0.5, %v6230_v51  ;;  %v2673_v63 = vld [vmem:[%s9360_s5 + $0xa0] sm:$0xff]  ;;  %v2676_v36 = vld [vmem:[%s9360_s5 + $0xb8] sm:$0xff] }
 0x44c   :  { %6317 = vtanh.f32 %v2411_v8  ;;  %v8360_v7 = vadd.f32 %v2205_v17, %v2204_v24  ;;  %v2668_v24 = vld [vmem:[%s9360_s5 + $0x78] sm:$0xff]  ;;  %v2667_v17 = vld [vmem:[%s9360_s5 + $0x70] sm:$0xff]  ;;  %v2670_v8 = vld [vmem:[%s9360_s5 + $0x88] sm:$0xff] }
 0x44d   :  { %6319 = vtanh.f32 %v2416_v34  ;;  %v8428_v51 = vpack.c.bf16 %v2668_v24, %v2665_v47  ;;  %v8430_v53 = vpack.c.bf16 %v2670_v8, %v2667_v17  ;;  %v2678_v47 = vld [vmem:[%s9360_s5 + $0xc8] sm:$0xff]  ;;  %v2681_v24 = vld [vmem:[%s9360_s5 + $0xe0] sm:$0xff] }
 0x44e   :  { %9442 = vst [vmem:[#allocation21_spill] sm:$0xff] %v8360_v7  ;;  %v8385_v46 = vsel %vm2212_vm15, %v8360_v7, %v8033_v31  ;;  %v8399_v31 = vpack.c.bf16 %v2664_v0, %v2661_v59  ;;  %v8437_v59 = vpack.c.bf16 %v2675_v30, %v2672_v52  ;;  %v2674_v0 = vld [vmem:[%s9360_s5 + $0xa8] sm:$0xff]  ;;  %v8458_v52 = vpack.c.bf16 %v2676_v36, %v2673_v63  ;;  %v2677_v30 = vld [vmem:[%s9360_s5 + $0xc0] sm:$0xff]  ;;  %v2679_v63 = vld [vmem:[%s9360_s5 + $0xd0] sm:$0xff] }
 0x44f   :  { %2551 = vmatmul.mubr.f32.vlgmr.msra.gmra.mrb[8].mxu0 %v8385_v46  ;;  %4934 = vmatmul.mubr.f32.vlgmr.msra.gmra.mrb[32].mxu1 %v8385_v46  ;;  %v8456_v8 = vpack.c.bf16 %v2674_v0, %v2671_v15  ;;  %v8472_v15 = vpack.c.bf16 %v2681_v24, %v2678_v47  ;;  %v2680_v0 = vld [vmem:[%s9360_s5 + $0xd8] sm:$0xff]  ;;  %v2682_v36 = vld [vmem:[%s9360_s5 + $0xe8] sm:$0xff]  ;;  %v2687_v47 = vld [vmem:[%s9360_s5 + $0x110] sm:$0xff] }
 0x450   :  { %5816 = vmatpush1.bf16.msra.mxu0 %v8362_v57  ;;  %5847 = vmatpush3.bf16.msra.mxu1 %v8364_v3  ;;  %v8493_v41 = vpack.c.bf16 %v2682_v36, %v2679_v63  ;;  %v2693_v63 = vld [vmem:[%s9360_s5 + $0x140] sm:$0xff]  ;;  %v2695_v7 = vld [vmem:[%s9360_s5 + $0x150] sm:$0xff] }
 0x451   :  { %5818 = vmatprep.subr.bf16.mxu0 %v8370_v19  ;;  %5848 = vmatprep.subr.bf16.mxu1 %v9415_v61 }
 0x452   :  { %2765 = vmatprep.mubr.f32.mxu0 %v9416_v12  ;;  %4968 = vmatprep.mubr.msk.f32.mxu1 %vm6378_vm2, %v9416_v12 }
 0x454   :  { %5820 = vmatpush1.bf16.msra.mxu0 %v8397_v56  ;;  %5850 = vmatpush3.bf16.msra.mxu1 %v8399_v31 }
 0x455   :  { %5822 = vmatprep.subr.bf16.mxu0 %v8406_v20  ;;  %5851 = vmatprep.subr.bf16.mxu1 %v9415_v61 }
 0x456   :  { %v6318_v34 = vpop.eup %6317 }
 0x457   :  { %v2413_v17 = vadd.f32 1.0, %v6318_v34  ;;  %v2420_v34 = vadd.f32 %v8466_v21, %v8335_v1  ;;  %v2684_v1 = vld [vmem:[%s9360_s5 + $0xf8] sm:$0xff]  ;;  %v6320_v55 = vpop.eup %6319 }
 0x458   :  { %5824 = vmatpush1.bf16.msra.mxu0 %v8428_v51  ;;  %5853 = vmatpush3.bf16.msra.mxu1 %v8430_v53  ;;  %v2418_v36 = vadd.f32 1.0, %v6320_v55  ;;  %v2692_v55 = vld [vmem:[%s9360_s5 + $0x138] sm:$0xff] }
 0x459   :  { %v2414_v44 = vmul.f32 0.5, %v2413_v17  ;;  %5826 = vmatprep.subr.bf16.mxu0 %v8437_v59  ;;  %5854 = vmatprep.subr.bf16.mxu1 %v9415_v61  ;;  %v8491_v17 = vpack.c.bf16 %v2680_v0, %v2677_v30  ;;  %v2686_v30 = vld [vmem:[%s9360_s5 + $0x108] sm:$0xff]  ;;  %v2688_v0 = vld [vmem:[%s9360_s5 + $0x118] sm:$0xff] }
 0x45b   :  { %v2421_v24 = vmul.f32 %v2420_v34, %v2414_v44  ;;  %v8501_v44 = vpack.c.bf16 %v2687_v47, %v2684_v1  ;;  %v2685_v34 = vld [vmem:[%s9360_s5 + $0x100] sm:$0xff]  ;;  %v8520_v1 = vpack.c.bf16 %v2686_v30, %v2683_v38  ;;  %v2691_v38 = vld [vmem:[%s9360_s5 + $0x130] sm:$0xff]  ;;  %v2696_v30 = vld [vmem:[%s9360_s5 + $0x158] sm:$0xff] }
 0x45c   :  { %5828 = vmatpush1.bf16.msra.mxu0 %v8456_v8  ;;  %5856 = vmatpush3.bf16.msra.mxu1 %v8458_v52  ;;  %v8522_v47 = vpack.c.bf16 %v2688_v0, %v2685_v34  ;;  %v2699_v34 = vld [vmem:[%s9360_s5 + $0x170] sm:$0xff]  ;;  %v2419_v0 = vmul.f32 0.5, %v2418_v36  ;;  %v2698_v36 = vld [vmem:[%s9360_s5 + $0x168] sm:$0xff] }
 0x45d   :  { %v2422_v49 = vadd.f32 %v2421_v24, %v9443_v42  ;;  %5830 = vmatprep.subr.bf16.mxu0 %v8472_v15  ;;  %5857 = vmatprep.subr.bf16.mxu1 %v9415_v61  ;;  %9444 = vst [vmem:[#allocation22_spill] sm:$0xff] %v8501_v44  ;;  %v2690_v42 = vld [vmem:[%s9360_s5 + $0x128] sm:$0xff]  ;;  %9445 = vst [vmem:[#allocation23_spill] sm:$0xff] %v8520_v1  ;;  %v2689_v24 = vld [vmem:[%s9360_s5 + $0x120] sm:$0xff] }
 0x45e   :  { %9446 = vst [vmem:[#allocation24_spill] sm:$0xff] %v8522_v47  ;;  %v8529_v48 = vpack.c.bf16 %v2693_v63, %v2690_v42  ;;  %v8548_v42 = vpack.c.bf16 %v2692_v55, %v2689_v24  ;;  %v2697_v24 = vld [vmem:[%s9360_s5 + $0x160] sm:$0xff]  ;;  %v2700_v55 = vld [vmem:[%s9360_s5 + $0x178] sm:$0xff] }
 0x45f   :  { %6321 = vtanh.f32 %v2422_v49  ;;  %v2694_v49 = vld [vmem:[%s9360_s5 + $0x148] sm:$0xff] }
 0x460   :  { %5832 = vmatpush1.bf16.msra.mxu0 %v8491_v17  ;;  %5859 = vmatpush3.bf16.msra.mxu1 %v8493_v41  ;;  %9447 = vst [vmem:[#allocation25_spill] sm:$0xff] %v8529_v48  ;;  %9448 = vst [vmem:[#allocation5_spill] sm:$0xff] %v8548_v42  ;;  %v8550_v63 = vpack.c.bf16 %v2694_v49, %v2691_v38  ;;  %v2424_v38 = vsub.f32 1.0, %v2419_v0  ;;  %v8570_v49 = vpack.c.bf16 %v2698_v36, %v2695_v7 }
 0x461   :  { %5834 = vmatprep.subr.bf16.mxu0 %v8501_v44  ;;  %5860 = vmatprep.subr.bf16.mxu1 %v9415_v61  ;;  %v8557_v44 = vpack.c.bf16 %v2699_v34, %v2696_v30  ;;  %v8572_v30 = vpack.c.bf16 %v2700_v55, %v2697_v24 }
 0x464   :  { %5836 = vmatpush1.bf16.msra.mxu0 %v8520_v1  ;;  %5862 = vmatpush3.bf16.msra.mxu1 %v8522_v47  ;;  %v2426_v1 = vmul.f32 %v2419_v0, %v8086_v39 }
 0x465   :  { %5838 = vmatprep.subr.bf16.mxu0 %v8529_v48  ;;  %5863 = vmatprep.subr.bf16.mxu1 %v9415_v61  ;;  %v8576_v48 = vpop.permute.xlu1 %2431 }
 0x466   :  { %vm2433_vm0 = vcmp.eq.s32.totalorder %v8576_v48, 1 }
 0x468   :  { %5840 = vmatpush1.bf16.msra.mxu0 %v8548_v42  ;;  %5865 = vmatpush3.bf16.msra.mxu1 %v8550_v63 }
 0x469   :  { %v6322_v34 = vpop.eup %6321  ;;  %5842 = vmatprep.subr.bf16.mxu0 %v8557_v44  ;;  %5866 = vmatprep.subr.bf16.mxu1 %v9415_v61 }
 0x46a   :  { %v2425_v47 = vmul.f32 %v6322_v34, %v2424_v38 }
 0x46c   :  { %5844 = vmatpush1.bf16.msra.mxu0 %v8570_v49  ;;  %5868 = vmatpush3.bf16.msra.mxu1 %v8572_v30  ;;  %v8581_v42 = vadd.f32 %v2426_v1, %v2425_v47 }
 0x46d   :  { %5870 = vmatprep.subr.bf16.mxu0 %v8099_v54  ;;  %5901 = vmatprep.subr.bf16.mxu1 %v9415_v61 }
 0x46e   :  { %v8590_v7 = vsel %vm2433_vm0, %v8581_v42, %v8086_v39  ;;  %v2434_v24 = vsel %vm2433_vm0, %v8581_v42, 0.0  ;;  %v9454_v42 = vld [vmem:[#allocation25_spill] sm:$0xff] }
 0x46f   :  { %2766 = vmatmul.mubr.f32.vlgmr.msra.gmra.mrb[22].mxu0 %v8590_v7  ;;  %4969 = vmatmul.mubr.f32.vlgmr.msra.gmra.mrb[34].mxu1 %v8590_v7 }
 0x470   :  { %5872 = vmatpush1.bf16.msra.mxu0 %v8110_v45  ;;  %5903 = vmatpush3.bf16.msra.mxu1 %v8116_v2 }
 0x471   :  { %5874 = vmatprep.subr.bf16.mxu0 %v8126_v22  ;;  %5904 = vmatprep.subr.bf16.mxu1 %v9415_v61 }
 0x472   :  { %2980 = vmatprep.mubr.f32.mxu0 %v9416_v12  ;;  %5003 = vmatprep.mubr.msk.f32.mxu1 %vm6378_vm2, %v9416_v12 }
 0x474   :  { %5876 = vmatpush1.bf16.msra.mxu0 %v8138_v50  ;;  %5906 = vmatpush3.bf16.msra.mxu1 %v8144_v10 }
 0x475   :  { %5878 = vmatprep.subr.bf16.mxu0 %v8154_v43  ;;  %5907 = vmatprep.subr.bf16.mxu1 %v9415_v61 }
 0x478   :  { %5880 = vmatpush1.bf16.msra.mxu0 %v8166_v40  ;;  %5909 = vmatpush3.bf16.msra.mxu1 %v8172_v37 }
 0x479   :  { %5882 = vmatprep.subr.bf16.mxu0 %v8182_v27  ;;  %5910 = vmatprep.subr.bf16.mxu1 %v9415_v61 }
 0x47c   :  { %5884 = vmatpush1.bf16.msra.mxu0 %v8194_v23  ;;  %5912 = vmatpush3.bf16.msra.mxu1 %v8200_v6 }
 0x47d   :  { %5886 = vmatprep.subr.bf16.mxu0 %v8210_v28  ;;  %5913 = vmatprep.subr.bf16.mxu1 %v9415_v61 }
 0x480   :  { %5888 = vmatpush1.bf16.msra.mxu0 %v8222_v60  ;;  %5915 = vmatpush3.bf16.msra.mxu1 %v8228_v16  ;;  %v9449_v60 = vld [vmem:[#allocation7_spill] sm:$0xff] }
 0x481   :  { %5890 = vmatprep.subr.bf16.mxu0 %v8238_v26  ;;  %5916 = vmatprep.subr.bf16.mxu1 %v9415_v61 }
 0x484   :  { %5892 = vmatpush1.bf16.msra.mxu0 %v8250_v25  ;;  %5918 = vmatpush3.bf16.msra.mxu1 %v8256_v32 }
 0x485   :  { %5894 = vmatprep.subr.bf16.mxu0 %v8266_v13  ;;  %5919 = vmatprep.subr.bf16.mxu1 %v9415_v61 }
 0x488   :  { %5896 = vmatpush1.bf16.msra.mxu0 %v8278_v35  ;;  %5921 = vmatpush3.bf16.msra.mxu1 %v8284_v62 }
 0x489   :  { %5898 = vmatprep.subr.bf16.mxu0 %v8294_v58  ;;  %5922 = vmatprep.subr.bf16.mxu1 %v9415_v61 }
 0x48c   :  { %5900 = vmatpush1.bf16.msra.mxu0 %v8306_v11  ;;  %5924 = vmatpush3.bf16.msra.mxu1 %v8312_v14 }
 0x48d   :  { %5926 = vmatprep.subr.bf16.mxu0 %v8322_v4  ;;  %5957 = vmatprep.subr.bf16.mxu1 %v9415_v61 }
 0x522   :  { %v2552_v39 = vpop.f32.mrb[8].mxu0  ;;  %v2623_v54 = vpop.f32.mrb[32].mxu1 }
 0x523   :  { %v6213_v45 = vadd.f32 %v2552_v39, %v7394_v9  ;;  %v2554_v2 = vpop.f32.mrb[9].mxu0  ;;  %v4935_v22 = vpop.f32.mrb[33].mxu1  ;;  %v2641_v23 = vadd.f32 %v8331_v29, %v2623_v54  ;;  %v9455_v54 = vld [vmem:[#allocation5_spill] sm:$0xff] }
 0x524   :  { %v6214_v10 = vadd.f32 %v2554_v2, %v7396_v18  ;;  %v9456_v22 = vld [vmem:[#allocation21_spill] sm:$0xff] }
 0x525   :  { %v2632_v50 = vmul.f32 0.5, %v6213_v45 }
 0x526   :  { %v2637_v43 = vmul.f32 0.5, %v6214_v10  ;;  %v2213_v10 = vsel %vm2212_vm15, %v9456_v22, 0.0  ;;  %v3331_v22 = vld [vmem:[%s9358_s4 + $0x108] sm:$0xff] }
 0x527   :  { %6323 = vtanh.f32 %v2632_v50  ;;  %v3330_v50 = vld [vmem:[%s9358_s4 + $0x100] sm:$0xff] }
 0x528   :  { %6325 = vtanh.f32 %v2637_v43 }
 0x531   :  { %v6324_v40 = vpop.eup %6323 }
 0x532   :  { %v2634_v37 = vadd.f32 1.0, %v6324_v40  ;;  %v6326_v28 = vpop.eup %6325  ;;  %v3298_v40 = vld [vmem:[%s9358_s4] sm:$0xff] }
 0x533   :  { %v2639_v26 = vadd.f32 1.0, %v6326_v28 }
 0x534   :  { %v2635_v27 = vmul.f32 0.5, %v2634_v37  ;;  %v3301_v37 = vld [vmem:[%s9358_s4 + $0x18] sm:$0xff] }
 0x535   :  { %v2640_v25 = vmul.f32 0.5, %v2639_v26 }
 0x536   :  { %v2642_v6 = vmul.f32 %v2641_v23, %v2635_v27  ;;  %v3300_v27 = vld [vmem:[%s9358_s4 + $0x10] sm:$0xff]  ;;  %v8723_v23 = vpack.c.bf16 %v3301_v37, %v3298_v40  ;;  %v3334_v37 = vld [vmem:[%s9358_s4 + $0x120] sm:$0xff] }
 0x537   :  { %v2645_v35 = vsub.f32 1.0, %v2640_v25  ;;  %v2647_v1 = vmul.f32 %v2640_v25, %v8385_v46  ;;  %v3304_v25 = vld [vmem:[%s9358_s4 + $0x30] sm:$0xff] }
 0x538   :  { %v2643_v16 = vadd.f32 %v2642_v6, %v9449_v60  ;;  %v3303_v6 = vld [vmem:[%s9358_s4 + $0x28] sm:$0xff]  ;;  %v3305_v60 = vld [vmem:[%s9358_s4 + $0x38] sm:$0xff] }
 0x539   :  { %v8729_v28 = vpack.c.bf16 %v3303_v6, %v3300_v27  ;;  %v3337_v27 = vld [vmem:[%s9358_s4 + $0x138] sm:$0xff]  ;;  %v3336_v6 = vld [vmem:[%s9358_s4 + $0x130] sm:$0xff] }
 0x53a   :  { %6327 = vtanh.f32 %v2643_v16  ;;  %v3308_v16 = vld [vmem:[%s9358_s4 + $0x50] sm:$0xff] }
 0x53b   :  { %v8739_v26 = vpack.c.bf16 %v3308_v16, %v3305_v60  ;;  %v8891_v60 = vpack.c.bf16 %v3337_v27, %v3334_v37  ;;  %v3339_v16 = vld [vmem:[%s9358_s4 + $0x148] sm:$0xff] }
 0x542   :  { %v2767_v32 = vpop.f32.mrb[22].mxu0  ;;  %v2838_v13 = vpop.f32.mrb[34].mxu1 }
 0x543   :  { %v6227_v62 = vadd.f32 %v2767_v32, %v7408_v33  ;;  %v2769_v58 = vpop.f32.mrb[23].mxu0  ;;  %v4970_v11 = vpop.f32.mrb[35].mxu1  ;;  %v3307_v32 = vld [vmem:[%s9358_s4 + $0x48] sm:$0xff] }
 0x544   :  { %v6328_v14 = vpop.eup %6327  ;;  %v6228_v0 = vadd.f32 %v2769_v58, %v7410_v5  ;;  %v3311_v11 = vld [vmem:[%s9358_s4 + $0x68] sm:$0xff] }
 0x545   :  { %v2646_v4 = vmul.f32 %v6328_v14, %v2645_v35  ;;  %v2847_v47 = vmul.f32 0.5, %v6227_v62  ;;  %v8751_v35 = vpack.c.bf16 %v3307_v32, %v3304_v25  ;;  %v3309_v62 = vld [vmem:[%s9358_s4 + $0x58] sm:$0xff]  ;;  %v3314_v14 = vld [vmem:[%s9358_s4 + $0x80] sm:$0xff]  ;;  %v8897_v25 = vpack.c.bf16 %v3339_v16, %v3336_v6 }
 0x546   :  { %v2852_v34 = vmul.f32 0.5, %v6228_v0  ;;  %v3312_v0 = vld [vmem:[%s9358_s4 + $0x70] sm:$0xff]  ;;  %v3341_v32 = vld [vmem:[%s9358_s4 + $0x158] sm:$0xff] }
 0x547   :  { %6329 = vtanh.f32 %v2847_v47  ;;  %v2648_v36 = vadd.f32 %v2647_v1, %v2646_v4  ;;  %v8767_v4 = vpack.c.bf16 %v3314_v14, %v3311_v11  ;;  %v3310_v1 = vld [vmem:[%s9358_s4 + $0x60] sm:$0xff]  ;;  %v3313_v47 = vld [vmem:[%s9358_s4 + $0x78] sm:$0xff]  ;;  %v3340_v11 = vld [vmem:[%s9358_s4 + $0x150] sm:$0xff] }
 0x548   :  { %6331 = vtanh.f32 %v2852_v34  ;;  %v3317_v34 = vld [vmem:[%s9358_s4 + $0x98] sm:$0xff]  ;;  %v3343_v14 = vld [vmem:[%s9358_s4 + $0x168] sm:$0xff] }
 0x549   :  { %v2649_v55 = vsel %vm2433_vm0, %v2648_v36, 0.0  ;;  %v8644_v38 = vsel %vm2433_vm0, %v2648_v36, %v8385_v46  ;;  %v8779_v36 = vpack.c.bf16 %v3313_v47, %v3310_v1  ;;  %v3342_v1 = vld [vmem:[%s9358_s4 + $0x160] sm:$0xff]  ;;  %v8919_v47 = vpack.c.bf16 %v3343_v14, %v3340_v11 }
 0x54a   :  { %2981 = vmatmul.mubr.f32.vlgmr.msra.gmra.mrb[10].mxu0 %v8644_v38  ;;  %v4179_v39 = vadd.f32 %v2649_v55, %v2434_v24  ;;  %5004 = vmatmul.mubr.f32.vlgmr.msra.gmra.mrb[36].mxu1 %v8644_v38  ;;  %v3315_v24 = vld [vmem:[%s9358_s4 + $0x88] sm:$0xff]  ;;  %v3513_v14 = vld [vmem:[%s9360_s5] sm:$0xff] }
 0x54b   :  { %5928 = vmatpush1.bf16.msra.mxu0 %v8362_v57  ;;  %5959 = vmatpush3.bf16.msra.mxu1 %v8364_v3  ;;  %v8785_v55 = vpack.c.bf16 %v3315_v24, %v3312_v0  ;;  %v3345_v0 = vld [vmem:[%s9358_s4 + $0x178] sm:$0xff] }
 0x54c   :  { %4187 = vst [vmem:[%s9364_s10 + $0x20] sm:$0xff] %v4179_v39  ;;  %5930 = vmatprep.subr.bf16.mxu0 %v8370_v19  ;;  %5960 = vmatprep.subr.bf16.mxu1 %v9415_v61  ;;  %v2856_v19 = vadd.f32 %v8466_v21, %v2838_v13  ;;  %v3306_v13 = vld [vmem:[%s9358_s4 + $0x40] sm:$0xff]  ;;  %v3320_v39 = vld [vmem:[%s9358_s4 + $0xb0] sm:$0xff]  ;;  %v8925_v24 = vpack.c.bf16 %v3345_v0, %v3342_v1  ;;  %v3516_v1 = vld [vmem:[%s9360_s5 + $0x18] sm:$0xff] }
 0x54d   :  { %3195 = vmatprep.mubr.f32.mxu0 %v9416_v12  ;;  %5038 = vmatprep.mubr.msk.f32.mxu1 %vm6378_vm2, %v9416_v12  ;;  %v8757_v58 = vpack.c.bf16 %v3309_v62, %v3306_v13  ;;  %v3344_v13 = vld [vmem:[%s9358_s4 + $0x170] sm:$0xff] }
 0x54e   :  { %v8907_v62 = vpack.c.bf16 %v3344_v13, %v3341_v32  ;;  %v3515_v0 = vld [vmem:[%s9360_s5 + $0x10] sm:$0xff] }
 0x54f   :  { %5932 = vmatpush1.bf16.msra.mxu0 %v8397_v56  ;;  %5962 = vmatpush3.bf16.msra.mxu1 %v8399_v31  ;;  %v9450_v31 = vld [vmem:[#allocation12_spill] sm:$0xff] }
 0x550   :  { %5934 = vmatprep.subr.bf16.mxu0 %v8406_v20  ;;  %5963 = vmatprep.subr.bf16.mxu1 %v9415_v61 }
 0x551   :  { %v6330_v48 = vpop.eup %6329 }
 0x552   :  { %v2849_v57 = vadd.f32 1.0, %v6330_v48  ;;  %v6332_v56 = vpop.eup %6331  ;;  %v8795_v48 = vpack.c.bf16 %v3320_v39, %v3317_v34  ;;  %v3514_v34 = vld [vmem:[%s9360_s5 + $0x8] sm:$0xff]  ;;  %v3517_v39 = vld [vmem:[%s9360_s5 + $0x20] sm:$0xff] }
 0x553   :  { %5936 = vmatpush1.bf16.msra.mxu0 %v8428_v51  ;;  %5965 = vmatpush3.bf16.msra.mxu1 %v8430_v53  ;;  %v2854_v51 = vadd.f32 1.0, %v6332_v56  ;;  %v9451_v53 = vld [vmem:[#allocation22_spill] sm:$0xff]  ;;  %v3321_v56 = vld [vmem:[%s9358_s4 + $0xb8] sm:$0xff] }
 0x554   :  { %v2850_v3 = vmul.f32 0.5, %v2849_v57  ;;  %5938 = vmatprep.subr.bf16.mxu0 %v8437_v59  ;;  %5966 = vmatprep.subr.bf16.mxu1 %v9415_v61  ;;  %v3316_v57 = vld [vmem:[%s9358_s4 + $0x90] sm:$0xff] }
 0x555   :  { %v2855_v59 = vmul.f32 0.5, %v2854_v51  ;;  %v3326_v51 = vld [vmem:[%s9358_s4 + $0xe0] sm:$0xff] }
 0x556   :  { %v2857_v46 = vmul.f32 %v2856_v19, %v2850_v3  ;;  %v3319_v3 = vld [vmem:[%s9358_s4 + $0xa8] sm:$0xff]  ;;  %v3318_v19 = vld [vmem:[%s9358_s4 + $0xa0] sm:$0xff] }
 0x557   :  { %5940 = vmatpush1.bf16.msra.mxu0 %v8456_v8  ;;  %5968 = vmatpush3.bf16.msra.mxu1 %v8458_v52  ;;  %v9452_v8 = vld [vmem:[#allocation23_spill] sm:$0xff]  ;;  %v9453_v52 = vld [vmem:[#allocation24_spill] sm:$0xff]  ;;  %v2862_v45 = vmul.f32 %v2855_v59, %v8590_v7 }
 0x558   :  { %v2858_v20 = vadd.f32 %v2857_v46, %v9450_v31  ;;  %5942 = vmatprep.subr.bf16.mxu0 %v8472_v15  ;;  %5969 = vmatprep.subr.bf16.mxu1 %v9415_v61  ;;  %v2860_v15 = vsub.f32 1.0, %v2855_v59  ;;  %v8807_v46 = vpack.c.bf16 %v3319_v3, %v3316_v57  ;;  %v8813_v31 = vpack.c.bf16 %v3321_v56, %v3318_v19  ;;  %v3322_v59 = vld [vmem:[%s9358_s4 + $0xc0] sm:$0xff] }
 0x559   :  { %v8935_v57 = vpack.c.bf16 %v3517_v39, %v3514_v34  ;;  %v3518_v34 = vld [vmem:[%s9360_s5 + $0x28] sm:$0xff] }
 0x55a   :  { %6333 = vtanh.f32 %v2858_v20  ;;  %v3323_v20 = vld [vmem:[%s9358_s4 + $0xc8] sm:$0xff] }
 0x55b   :  { %5944 = vmatpush1.bf16.msra.mxu0 %v8491_v17  ;;  %5971 = vmatpush3.bf16.msra.mxu1 %v8493_v41 }
 0x55c   :  { %5946 = vmatprep.subr.bf16.mxu0 %v9451_v53  ;;  %5972 = vmatprep.subr.bf16.mxu1 %v9415_v61  ;;  %v8823_v53 = vpack.c.bf16 %v3326_v51, %v3323_v20 }
 0x55f   :  { %5948 = vmatpush1.bf16.msra.mxu0 %v9452_v8  ;;  %5974 = vmatpush3.bf16.msra.mxu1 %v9453_v52  ;;  %v3325_v8 = vld [vmem:[%s9358_s4 + $0xd8] sm:$0xff]  ;;  %v3324_v52 = vld [vmem:[%s9358_s4 + $0xd0] sm:$0xff] }
 0x560   :  { %5950 = vmatprep.subr.bf16.mxu0 %v9454_v42  ;;  %5975 = vmatprep.subr.bf16.mxu1 %v9415_v61  ;;  %v8835_v42 = vpack.c.bf16 %v3325_v8, %v3322_v59 }
 0x563   :  { %5952 = vmatpush1.bf16.msra.mxu0 %v9455_v54  ;;  %5977 = vmatpush3.bf16.msra.mxu1 %v8550_v63 }
 0x564   :  { %v6334_v17 = vpop.eup %6333  ;;  %5954 = vmatprep.subr.bf16.mxu0 %v8557_v44  ;;  %5978 = vmatprep.subr.bf16.mxu1 %v9415_v61 }
 0x565   :  { %v2861_v41 = vmul.f32 %v6334_v17, %v2860_v15  ;;  %v3327_v15 = vld [vmem:[%s9358_s4 + $0xe8] sm:$0xff]  ;;  %v3329_v17 = vld [vmem:[%s9358_s4 + $0xf8] sm:$0xff] }
 0x566   :  { %v8841_v54 = vpack.c.bf16 %v3327_v15, %v3324_v52 }
 0x567   :  { %5956 = vmatpush1.bf16.msra.mxu0 %v8570_v49  ;;  %5980 = vmatpush3.bf16.msra.mxu1 %v8572_v30  ;;  %v2863_v2 = vadd.f32 %v2862_v45, %v2861_v41  ;;  %v3299_v30 = vld [vmem:[%s9358_s4 + $0x8] sm:$0xff]  ;;  %v3332_v41 = vld [vmem:[%s9358_s4 + $0x110] sm:$0xff] }
 0x568   :  { %6013 = vmatprep.subr.bf16.mxu1 %v9415_v61  ;;  %v8851_v45 = vpack.c.bf16 %v3332_v41, %v3329_v17 }
 0x569   :  { %v2864_v63 = vsel %vm2212_vm15, %v2863_v2, 0.0  ;;  %v8696_v44 = vsel %vm2212_vm15, %v2863_v2, %v8590_v7  ;;  %v3302_v7 = vld [vmem:[%s9358_s4 + $0x20] sm:$0xff]  ;;  %v3328_v2 = vld [vmem:[%s9358_s4 + $0xf0] sm:$0xff] }
 0x56a   :  { %3196 = vmatmul.mubr.f32.vlgmr.msra.gmra.mrb[20].mxu0 %v8696_v44  ;;  %v4178_v49 = vadd.f32 %v2864_v63, %v2213_v10  ;;  %5039 = vmatmul.mubr.f32.vlgmr.msra.gmra.mrb[38].mxu1 %v8696_v44  ;;  %v8712_v43 = vpack.c.bf16 %v3302_v7, %v3299_v30  ;;  %v8863_v10 = vpack.c.bf16 %v3331_v22, %v3328_v2  ;;  %v3333_v63 = vld [vmem:[%s9358_s4 + $0x118] sm:$0xff]  ;;  %v3335_v30 = vld [vmem:[%s9358_s4 + $0x128] sm:$0xff]  ;;  %v3338_v7 = vld [vmem:[%s9358_s4 + $0x140] sm:$0xff] }
 0x56b   :  { %3410 = vmatprep.mubr.f32.mxu0 %v9416_v12  ;;  %5073 = vmatprep.mubr.msk.f32.mxu1 %vm6378_vm2, %v9416_v12  ;;  %v8879_v40 = vpack.c.bf16 %v3338_v7, %v3335_v30 }
 0x56c   :  { %4186 = vst [vmem:[%s9364_s10 + $0x18] sm:$0xff] %v4178_v49  ;;  %5982 = vmatprep.subr.bf16.mxu0 %v8712_v43  ;;  %6015 = vmatpush3.bf16.msra.mxu1 %v8729_v28  ;;  %v8869_v49 = vpack.c.bf16 %v3333_v63, %v3330_v50  ;;  %v9458_v63 = vld [vmem:[#allocation6_spill] sm:$0xff] }
 0x56d   :  { %5984 = vmatpush1.bf16.msra.mxu0 %v8723_v23  ;;  %6016 = vmatprep.subr.bf16.mxu1 %v9415_v61 }
 0x56e   :  { %5986 = vmatprep.subr.bf16.mxu0 %v8739_v26 }
 0x570   :  { %6018 = vmatpush3.bf16.msra.mxu1 %v8757_v58 }
 0x571   :  { %5988 = vmatpush1.bf16.msra.mxu0 %v8751_v35  ;;  %6019 = vmatprep.subr.bf16.mxu1 %v9415_v61 }
 0x572   :  { %5990 = vmatprep.subr.bf16.mxu0 %v8767_v4 }
 0x574   :  { %6021 = vmatpush3.bf16.msra.mxu1 %v8785_v55 }
 0x575   :  { %5992 = vmatpush1.bf16.msra.mxu0 %v8779_v36  ;;  %6022 = vmatprep.subr.bf16.mxu1 %v9415_v61 }
 0x576   :  { %5994 = vmatprep.subr.bf16.mxu0 %v8795_v48 }
 0x578   :  { %6024 = vmatpush3.bf16.msra.mxu1 %v8813_v31 }
 0x579   :  { %5996 = vmatpush1.bf16.msra.mxu0 %v8807_v46  ;;  %6025 = vmatprep.subr.bf16.mxu1 %v9415_v61 }
 0x57a   :  { %5998 = vmatprep.subr.bf16.mxu0 %v8823_v53 }
 0x57c   :  { %6027 = vmatpush3.bf16.msra.mxu1 %v8841_v54 }
 0x57d   :  { %6000 = vmatpush1.bf16.msra.mxu0 %v8835_v42  ;;  %6028 = vmatprep.subr.bf16.mxu1 %v9415_v61 }
 0x57e   :  { %6002 = vmatprep.subr.bf16.mxu0 %v8851_v45 }
 0x580   :  { %6030 = vmatpush3.bf16.msra.mxu1 %v8869_v49 }
 0x581   :  { %6004 = vmatpush1.bf16.msra.mxu0 %v8863_v10  ;;  %6031 = vmatprep.subr.bf16.mxu1 %v9415_v61 }
 0x582   :  { %6006 = vmatprep.subr.bf16.mxu0 %v8879_v40 }
 0x584   :  { %6033 = vmatpush3.bf16.msra.mxu1 %v8897_v25 }
 0x585   :  { %6008 = vmatpush1.bf16.msra.mxu0 %v8891_v60  ;;  %6034 = vmatprep.subr.bf16.mxu1 %v9415_v61 }
 0x586   :  { %6010 = vmatprep.subr.bf16.mxu0 %v8907_v62 }
 0x588   :  { %6036 = vmatpush3.bf16.msra.mxu1 %v8925_v24 }
 0x589   :  { %6012 = vmatpush1.bf16.msra.mxu0 %v8919_v47  ;;  %6069 = vmatprep.subr.bf16.mxu1 %v9415_v61 }
 0x58a   :  { %6038 = vmatprep.subr.bf16.mxu0 %v8935_v57 }
 0x61d   :  { %v2982_v3 = vpop.f32.mrb[10].mxu0  ;;  %v3053_v19 = vpop.f32.mrb[36].mxu1 }
 0x61e   :  { %v6215_v56 = vadd.f32 %v2982_v3, %v7394_v9  ;;  %v2984_v20 = vpop.f32.mrb[11].mxu0  ;;  %v5005_v51 = vpop.f32.mrb[37].mxu1  ;;  %v3071_v2 = vadd.f32 %v8331_v29, %v3053_v19 }
 0x61f   :  { %v6216_v8 = vadd.f32 %v2984_v20, %v7396_v18  ;;  %v3523_v20 = vld [vmem:[%s9360_s5 + $0x50] sm:$0xff] }
 0x620   :  { %v3062_v59 = vmul.f32 0.5, %v6215_v56  ;;  %v3520_v56 = vld [vmem:[%s9360_s5 + $0x38] sm:$0xff] }
 0x621   :  { %v3067_v52 = vmul.f32 0.5, %v6216_v8  ;;  %v8966_v8 = vpack.c.bf16 %v3516_v1, %v3513_v14  ;;  %v3525_v14 = vld [vmem:[%s9360_s5 + $0x60] sm:$0xff]  ;;  %v3528_v1 = vld [vmem:[%s9360_s5 + $0x78] sm:$0xff] }
 0x622   :  { %6335 = vtanh.f32 %v3062_v59 }
 0x623   :  { %6337 = vtanh.f32 %v3067_v52  ;;  %v8968_v52 = vpack.c.bf16 %v3518_v34, %v3515_v0  ;;  %v3527_v0 = vld [vmem:[%s9360_s5 + $0x70] sm:$0xff]  ;;  %v3530_v34 = vld [vmem:[%s9360_s5 + $0x88] sm:$0xff] }
 0x62c   :  { %v6336_v15 = vpop.eup %6335 }
 0x62d   :  { %v3064_v17 = vadd.f32 1.0, %v6336_v15  ;;  %v6338_v50 = vpop.eup %6337  ;;  %v3519_v15 = vld [vmem:[%s9360_s5 + $0x30] sm:$0xff] }
 0x62e   :  { %v3069_v7 = vadd.f32 1.0, %v6338_v50  ;;  %v9459_v50 = vld [vmem:[#allocation19_spill] sm:$0xff] }
 0x62f   :  { %v3065_v41 = vmul.f32 0.5, %v3064_v17  ;;  %v8973_v17 = vpack.c.bf16 %v3523_v20, %v3520_v56  ;;  %v9040_v56 = vpack.c.bf16 %v3530_v34, %v3527_v0  ;;  %v3531_v20 = vld [vmem:[%s9360_s5 + $0x90] sm:$0xff]  ;;  %v3542_v0 = vld [vmem:[%s9360_s5 + $0xe8] sm:$0xff] }
 0x630   :  { %v3070_v37 = vmul.f32 0.5, %v3069_v7 }
 0x631   :  { %v3072_v22 = vmul.f32 %v3071_v2, %v3065_v41  ;;  %v3522_v41 = vld [vmem:[%s9360_s5 + $0x48] sm:$0xff]  ;;  %v3521_v2 = vld [vmem:[%s9360_s5 + $0x40] sm:$0xff] }
 0x632   :  { %v3075_v16 = vsub.f32 1.0, %v3070_v37  ;;  %v3077_v3 = vmul.f32 %v3070_v37, %v8644_v38 }
 0x633   :  { %v3073_v30 = vadd.f32 %v3072_v22, %v9458_v63  ;;  %v3524_v22 = vld [vmem:[%s9360_s5 + $0x58] sm:$0xff] }
 0x635   :  { %6339 = vtanh.f32 %v3073_v30  ;;  %v1992_v30 = vsel %vm1991_vm14, %v9459_v50, 0.0  ;;  %v3541_v50 = vld [vmem:[%s9360_s5 + $0xe0] sm:$0xff] }
 0x63d   :  { %v3197_v27 = vpop.f32.mrb[20].mxu0  ;;  %v8943_v6 = vpop.f32.mrb[38].mxu1 }
 0x63e   :  { %v6225_v32 = vadd.f32 %v3197_v27, %v7408_v33  ;;  %v3199_v13 = vpop.f32.mrb[21].mxu0  ;;  %v5040_v11 = vpop.f32.mrb[39].mxu1  ;;  %v3526_v27 = vld [vmem:[%s9360_s5 + $0x68] sm:$0xff] }
 0x63f   :  { %v6340_v29 = vpop.eup %6339  ;;  %v6226_v51 = vadd.f32 %v3199_v13, %v7410_v5  ;;  %v9006_v11 = vpack.c.bf16 %v3524_v22, %v3521_v2  ;;  %v3538_v22 = vld [vmem:[%s9360_s5 + $0xc8] sm:$0xff] }
 0x640   :  { %v3076_v39 = vmul.f32 %v6340_v29, %v3075_v16  ;;  %v3277_v19 = vmul.f32 0.5, %v6225_v32  ;;  %v3529_v16 = vld [vmem:[%s9360_s5 + $0x80] sm:$0xff] }
 0x641   :  { %v3282_v32 = vmul.f32 0.5, %v6226_v51  ;;  %v9016_v29 = vpack.c.bf16 %v3529_v16, %v3526_v27  ;;  %v3537_v27 = vld [vmem:[%s9360_s5 + $0xc0] sm:$0xff] }
 0x642   :  { %6341 = vtanh.f32 %v3277_v19  ;;  %v3078_v59 = vadd.f32 %v3077_v3, %v3076_v39  ;;  %v3532_v39 = vld [vmem:[%s9360_s5 + $0x98] sm:$0xff]  ;;  %v3535_v3 = vld [vmem:[%s9360_s5 + $0xb0] sm:$0xff]  ;;  %v9038_v19 = vpack.c.bf16 %v3528_v1, %v3525_v14 }
 0x643   :  { %6343 = vtanh.f32 %v3282_v32  ;;  %v9047_v51 = vpack.c.bf16 %v3535_v3, %v3532_v39  ;;  %v3286_v32 = vadd.f32 %v8466_v21, %v8943_v6  ;;  %v3540_v14 = vld [vmem:[%s9360_s5 + $0xd8] sm:$0xff]  ;;  %v3539_v1 = vld [vmem:[%s9360_s5 + $0xd0] sm:$0xff] }
 0x644   :  { %v3079_v7 = vsel %vm1991_vm14, %v3078_v59, 0.0  ;;  %v8992_v37 = vsel %vm1991_vm14, %v3078_v59, %v8644_v38  ;;  %v9004_v38 = vpack.c.bf16 %v3522_v41, %v3519_v15  ;;  %v3534_v59 = vld [vmem:[%s9360_s5 + $0xa8] sm:$0xff]  ;;  %v3533_v15 = vld [vmem:[%s9360_s5 + $0xa0] sm:$0xff]  ;;  %v3536_v41 = vld [vmem:[%s9360_s5 + $0xb8] sm:$0xff]  ;;  %v9096_v39 = vpack.c.bf16 %v3540_v14, %v3537_v27 }
 0x645   :  { %3411 = vmatmul.mubr.f32.vlgmr.msra.gmra.mrb[12].mxu0 %v8992_v37  ;;  %v4180_v13 = vadd.f32 %v3079_v7, %v1992_v30  ;;  %5074 = vmatmul.mubr.f32.vlgmr.msra.gmra.mrb[40].mxu1 %v8992_v37  ;;  %v9066_v30 = vpack.c.bf16 %v3534_v59, %v3531_v20  ;;  %v9068_v7 = vpack.c.bf16 %v3536_v41, %v3533_v15  ;;  %v3544_v21 = vld [vmem:[%s9360_s5 + $0xf8] sm:$0xff]  ;;  %v3547_v6 = vld [vmem:[%s9360_s5 + $0x110] sm:$0xff]  ;;  %v9461_v15 = vld [vmem:[#allocation13_spill] sm:$0xff] }
 0x646   :  { %6040 = vmatpush1.bf16.msra.mxu0 %v8966_v8  ;;  %6071 = vmatpush3.bf16.msra.mxu1 %v8968_v52  ;;  %v9098_v3 = vpack.c.bf16 %v3542_v0, %v3539_v1  ;;  %v3543_v20 = vld [vmem:[%s9360_s5 + $0xf0] sm:$0xff]  ;;  %v3550_v27 = vld [vmem:[%s9360_s5 + $0x128] sm:$0xff]  ;;  %v3549_v0 = vld [vmem:[%s9360_s5 + $0x120] sm:$0xff] }
 0x647   :  { %4188 = vst [vmem:[%s9364_s10 + $0x28] sm:$0xff] %v4180_v13  ;;  %6042 = vmatprep.subr.bf16.mxu0 %v8973_v17  ;;  %6072 = vmatprep.subr.bf16.mxu1 %v9415_v61  ;;  %v9077_v13 = vpack.c.bf16 %v3541_v50, %v3538_v22  ;;  %v3546_v22 = vld [vmem:[%s9360_s5 + $0x108] sm:$0xff]  ;;  %v3545_v50 = vld [vmem:[%s9360_s5 + $0x100] sm:$0xff] }
 0x648   :  { %3625 = vmatprep.mubr.f32.mxu0 %v9416_v12  ;;  %5108 = vmatprep.mubr.msk.f32.mxu1 %vm6378_vm2, %v9416_v12  ;;  %v9125_v14 = vpack.c.bf16 %v3546_v22, %v3543_v20  ;;  %v3554_v20 = vld [vmem:[%s9360_s5 + $0x148] sm:$0xff] }
 0x64a   :  { %6044 = vmatpush1.bf16.msra.mxu0 %v9004_v38  ;;  %6074 = vmatpush3.bf16.msra.mxu1 %v9006_v11 }
 0x64b   :  { %6046 = vmatprep.subr.bf16.mxu0 %v9016_v29  ;;  %6075 = vmatprep.subr.bf16.mxu1 %v9415_v61 }
 0x64c   :  { %v6342_v2 = vpop.eup %6341 }
 0x64d   :  { %v3279_v63 = vadd.f32 1.0, %v6342_v2  ;;  %v6344_v59 = vpop.eup %6343  ;;  %v9106_v2 = vpack.c.bf16 %v3547_v6, %v3544_v21  ;;  %v3552_v6 = vld [vmem:[%s9360_s5 + $0x138] sm:$0xff] }
 0x64e   :  { %6048 = vmatpush1.bf16.msra.mxu0 %v9038_v19  ;;  %6077 = vmatpush3.bf16.msra.mxu1 %v9040_v56  ;;  %v9153_v22 = vpack.c.bf16 %v3552_v6, %v3549_v0  ;;  %v3560_v0 = vld [vmem:[%s9360_s5 + $0x178] sm:$0xff] }
 0x64f   :  { %v3280_v16 = vmul.f32 0.5, %v3279_v63  ;;  %6050 = vmatprep.subr.bf16.mxu0 %v9047_v51  ;;  %6078 = vmatprep.subr.bf16.mxu1 %v9415_v61  ;;  %v3548_v63 = vld [vmem:[%s9360_s5 + $0x118] sm:$0xff] }
 0x650   :  { %v9127_v1 = vpack.c.bf16 %v3548_v63, %v3545_v50  ;;  %v3555_v63 = vld [vmem:[%s9360_s5 + $0x150] sm:$0xff] }
 0x651   :  { %v3287_v34 = vmul.f32 %v3286_v32, %v3280_v16  ;;  %v3553_v16 = vld [vmem:[%s9360_s5 + $0x140] sm:$0xff]  ;;  %v3284_v32 = vadd.f32 1.0, %v6344_v59  ;;  %v3556_v59 = vld [vmem:[%s9360_s5 + $0x158] sm:$0xff] }
 0x652   :  { %6052 = vmatpush1.bf16.msra.mxu0 %v9066_v30  ;;  %6080 = vmatpush3.bf16.msra.mxu1 %v9068_v7  ;;  %9462 = vst [vmem:[#allocation15_spill] sm:$0xff] %v9127_v1  ;;  %v9134_v21 = vpack.c.bf16 %v3553_v16, %v3550_v27  ;;  %v3558_v16 = vld [vmem:[%s9360_s5 + $0x168] sm:$0xff] }
 0x653   :  { %v3288_v41 = vadd.f32 %v3287_v34, %v9461_v15  ;;  %6054 = vmatprep.subr.bf16.mxu0 %v9077_v13  ;;  %6081 = vmatprep.subr.bf16.mxu1 %v9415_v61  ;;  %v3551_v34 = vld [vmem:[%s9360_s5 + $0x130] sm:$0xff] }
 0x654   :  { %9463 = vst [vmem:[#allocation7_spill] sm:$0xff] %v9134_v21  ;;  %v3559_v15 = vld [vmem:[%s9360_s5 + $0x170] sm:$0xff]  ;;  %v9155_v50 = vpack.c.bf16 %v3554_v20, %v3551_v34  ;;  %v9175_v34 = vpack.c.bf16 %v3558_v16, %v3555_v63  ;;  %v9466_v63 = vld [vmem:[#allocation28_spill] sm:$0xff] }
 0x655   :  { %6345 = vtanh.f32 %v3288_v41  ;;  %v3285_v41 = vmul.f32 0.5, %v3284_v32  ;;  %v9162_v27 = vpack.c.bf16 %v3559_v15, %v3556_v59  ;;  %v3557_v32 = vld [vmem:[%s9360_s5 + $0x160] sm:$0xff] }
 0x656   :  { %6056 = vmatpush1.bf16.msra.mxu0 %v9096_v39  ;;  %6083 = vmatpush3.bf16.msra.mxu1 %v9098_v3  ;;  %v9177_v20 = vpack.c.bf16 %v3560_v0, %v3557_v32 }
 0x657   :  { %6058 = vmatprep.subr.bf16.mxu0 %v9106_v2  ;;  %6084 = vmatprep.subr.bf16.mxu1 %v9415_v61  ;;  %v3290_v6 = vsub.f32 1.0, %v3285_v41 }
 0x65a   :  { %6060 = vmatpush1.bf16.msra.mxu0 %v9125_v14  ;;  %6086 = vmatpush3.bf16.msra.mxu1 %v9127_v1 }
 0x65b   :  { %6062 = vmatprep.subr.bf16.mxu0 %v9134_v21  ;;  %6087 = vmatprep.subr.bf16.mxu1 %v9415_v61  ;;  %v3292_v21 = vmul.f32 %v3285_v41, %v8696_v44  ;;  %v4161_v41 = vld [vmem:[%s9364_s10 + $0x10] sm:$0xff] }
 0x65e   :  { %6064 = vmatpush1.bf16.msra.mxu0 %v9153_v22  ;;  %6089 = vmatpush3.bf16.msra.mxu1 %v9155_v50 }
 0x65f   :  { %v6346_v59 = vpop.eup %6345  ;;  %6066 = vmatprep.subr.bf16.mxu0 %v9162_v27  ;;  %6090 = vmatprep.subr.bf16.mxu1 %v9415_v61 }
 0x660   :  { %v3291_v15 = vmul.f32 %v6346_v59, %v3290_v6 }
 0x662   :  { %6068 = vmatpush1.bf16.msra.mxu0 %v9175_v34  ;;  %6092 = vmatpush3.bf16.msra.mxu1 %v9177_v20  ;;  %v3293_v1 = vadd.f32 %v3292_v21, %v3291_v15 }
 0x663   :  { %6094 = vmatprep.subr.bf16.mxu0 %v8712_v43  ;;  %6125 = vmatprep.subr.bf16.mxu1 %v9415_v61 }
 0x664   :  { %v3294_v16 = vsel %vm1770_vm13, %v3293_v1, 0.0  ;;  %v9191_v32 = vsel %vm1770_vm13, %v3293_v1, %v8696_v44 }
 0x665   :  { %3626 = vmatmul.mubr.f32.vlgmr.msra.gmra.mrb[18].mxu0 %v9191_v32  ;;  %v4177_v0 = vadd.f32 %v4161_v41, %v3294_v16  ;;  %5109 = vmatmul.mubr.f32.vlgmr.msra.gmra.mrb[42].mxu1 %v9191_v32  ;;  %v1550_v41 = vsel %vm1549_vm12, %v9466_v63, 0.0 }
 0x666   :  { %6096 = vmatpush1.bf16.msra.mxu0 %v8723_v23  ;;  %6127 = vmatpush3.bf16.msra.mxu1 %v8729_v28 }
 0x667   :  { %4185 = vst [vmem:[%s9364_s10 + $0x10] sm:$0xff] %v4177_v0  ;;  %6098 = vmatprep.subr.bf16.mxu0 %v8739_v26  ;;  %6128 = vmatprep.subr.bf16.mxu1 %v9415_v61 }
 0x668   :  { %3840 = vmatprep.mubr.f32.mxu0 %v9416_v12  ;;  %5143 = vmatprep.mubr.msk.f32.mxu1 %vm6378_vm2, %v9416_v12 }
 0x66a   :  { %6100 = vmatpush1.bf16.msra.mxu0 %v8751_v35  ;;  %6130 = vmatpush3.bf16.msra.mxu1 %v8757_v58 }
 0x66b   :  { %6102 = vmatprep.subr.bf16.mxu0 %v8767_v4  ;;  %6131 = vmatprep.subr.bf16.mxu1 %v9415_v61 }
 0x66e   :  { %6104 = vmatpush1.bf16.msra.mxu0 %v8779_v36  ;;  %6133 = vmatpush3.bf16.msra.mxu1 %v8785_v55 }
 0x66f   :  { %6106 = vmatprep.subr.bf16.mxu0 %v8795_v48  ;;  %6134 = vmatprep.subr.bf16.mxu1 %v9415_v61 }
 0x672   :  { %6108 = vmatpush1.bf16.msra.mxu0 %v8807_v46  ;;  %6136 = vmatpush3.bf16.msra.mxu1 %v8813_v31  ;;  %v9241_v46 = vld [vmem:[%s9363_s8] ss:$0 sm:$0xff] }
 0x673   :  { %6110 = vmatprep.subr.bf16.mxu0 %v8823_v53  ;;  %6137 = vmatprep.subr.bf16.mxu1 %v9415_v61 }
 0x676   :  { %6112 = vmatpush1.bf16.msra.mxu0 %v8835_v42  ;;  %6139 = vmatpush3.bf16.msra.mxu1 %v8841_v54  ;;  %v9465_v54 = vld [vmem:[#allocation9_spill] sm:$0xff] }
 0x677   :  { %6114 = vmatprep.subr.bf16.mxu0 %v8851_v45  ;;  %6140 = vmatprep.subr.bf16.mxu1 %v9415_v61 }
 0x67a   :  { %6116 = vmatpush1.bf16.msra.mxu0 %v8863_v10  ;;  %6142 = vmatpush3.bf16.msra.mxu1 %v8869_v49 }
 0x67b   :  { %6118 = vmatprep.subr.bf16.mxu0 %v8879_v40  ;;  %6143 = vmatprep.subr.bf16.mxu1 %v9415_v61 }
 0x67e   :  { %6120 = vmatpush1.bf16.msra.mxu0 %v8891_v60  ;;  %6145 = vmatpush3.bf16.msra.mxu1 %v8897_v25 }
 0x67f   :  { %6122 = vmatprep.subr.bf16.mxu0 %v8907_v62  ;;  %6146 = vmatprep.subr.bf16.mxu1 %v9415_v61 }
 0x682   :  { %6124 = vmatpush1.bf16.msra.mxu0 %v8919_v47  ;;  %6148 = vmatpush3.bf16.msra.mxu1 %v8925_v24 }
 0x683   :  { %6150 = vmatprep.subr.bf16.mxu0 %v8935_v57  ;;  %6181 = vmatprep.subr.bf16.mxu1 %v9415_v61 }
 0x718   :  { %v3412_v44 = vpop.f32.mrb[12].mxu0  ;;  %v3483_v43 = vpop.f32.mrb[40].mxu1 }
 0x719   :  { %v6217_v23 = vadd.f32 %v3412_v44, %v7394_v9  ;;  %v3414_v28 = vpop.f32.mrb[13].mxu0  ;;  %v5075_v26 = vpop.f32.mrb[41].mxu1  ;;  %v3501_v31 = vadd.f32 %v9241_v46, %v3483_v43 }
 0x71a   :  { %v6218_v58 = vadd.f32 %v3414_v28, %v7396_v18 }
 0x71b   :  { %v3492_v35 = vmul.f32 0.5, %v6217_v23 }
 0x71c   :  { %v3497_v4 = vmul.f32 0.5, %v6218_v58 }
 0x71d   :  { %6347 = vtanh.f32 %v3492_v35 }
 0x71e   :  { %6349 = vtanh.f32 %v3497_v4 }
 0x727   :  { %v6348_v36 = vpop.eup %6347 }
 0x728   :  { %v3494_v55 = vadd.f32 1.0, %v6348_v36  ;;  %v6350_v42 = vpop.eup %6349 }
 0x729   :  { %v3499_v10 = vadd.f32 1.0, %v6350_v42 }
 0x72a   :  { %v3495_v48 = vmul.f32 0.5, %v3494_v55 }
 0x72b   :  { %v3500_v49 = vmul.f32 0.5, %v3499_v10 }
 0x72c   :  { %v3502_v53 = vmul.f32 %v3501_v31, %v3495_v48 }
 0x72d   :  { %v3505_v25 = vsub.f32 1.0, %v3500_v49  ;;  %v3507_v21 = vmul.f32 %v3500_v49, %v8992_v37 }
 0x72e   :  { %v3503_v45 = vadd.f32 %v3502_v53, %v9465_v54 }
 0x730   :  { %6351 = vtanh.f32 %v3503_v45  ;;  %v9472_v45 = vld [vmem:[#allocation8_spill] sm:$0xff] }
 0x738   :  { %v3627_v40 = vpop.f32.mrb[18].mxu0  ;;  %v3698_v60 = vpop.f32.mrb[42].mxu1 }
 0x739   :  { %v6223_v62 = vadd.f32 %v3627_v40, %v7408_v33  ;;  %v3629_v47 = vpop.f32.mrb[19].mxu0  ;;  %v5110_v24 = vpop.f32.mrb[43].mxu1 }
 0x73a   :  { %v6352_v57 = vpop.eup %6351  ;;  %v6224_v59 = vadd.f32 %v3629_v47, %v7410_v5 }
 0x73b   :  { %v3506_v1 = vmul.f32 %v6352_v57, %v3505_v25  ;;  %v3707_v6 = vmul.f32 0.5, %v6223_v62 }
 0x73c   :  { %v3712_v43 = vmul.f32 0.5, %v6224_v59 }
 0x73d   :  { %6353 = vtanh.f32 %v3707_v6  ;;  %v3508_v15 = vadd.f32 %v3507_v21, %v3506_v1 }
 0x73e   :  { %6355 = vtanh.f32 %v3712_v43 }
 0x73f   :  { %v3509_v0 = vsel %vm1549_vm12, %v3508_v15, 0.0  ;;  %v9256_v44 = vsel %vm1549_vm12, %v3508_v15, %v8992_v37 }
 0x740   :  { %3841 = vmatmul.mubr.f32.vlgmr.msra.gmra.mrb[14].mxu0 %v9256_v44  ;;  %v4181_v23 = vadd.f32 %v3509_v0, %v1550_v41  ;;  %5144 = vmatmul.mubr.f32.vlgmr.msra.gmra.mrb[44].mxu1 %v9256_v44 }
 0x741   :  { %6152 = vmatpush1.bf16.msra.mxu0 %v8966_v8  ;;  %6183 = vmatpush3.bf16.msra.mxu1 %v8968_v52 }
 0x742   :  { %4189 = vst [vmem:[%s9364_s10 + $0x30] sm:$0xff] %v4181_v23  ;;  %6154 = vmatprep.subr.bf16.mxu0 %v8973_v17  ;;  %6184 = vmatprep.subr.bf16.mxu1 %v9415_v61 }
 0x743   :  { %4055 = vmatprep.mubr.f32.mxu0 %v9416_v12  ;;  %5178 = vmatprep.mubr.msk.f32.mxu1 %vm6378_vm2, %v9416_v12  ;;  %v9279_v12 = vld [vmem:[%s9365_s9] ss:$0 sm:$0xff] }
 0x744   :  { %v3716_v37 = vadd.f32 %v9279_v12, %v3698_v60 }
 0x745   :  { %6156 = vmatpush1.bf16.msra.mxu0 %v9004_v38  ;;  %6186 = vmatpush3.bf16.msra.mxu1 %v9006_v11 }
 0x746   :  { %6158 = vmatprep.subr.bf16.mxu0 %v9016_v29  ;;  %6187 = vmatprep.subr.bf16.mxu1 %v9415_v61  ;;  %v9468_v29 = vld [vmem:[#allocation10_spill] sm:$0xff] }
 0x747   :  { %v6354_v8 = vpop.eup %6353 }
 0x748   :  { %v3709_v52 = vadd.f32 1.0, %v6354_v8  ;;  %v6356_v11 = vpop.eup %6355 }
 0x749   :  { %6160 = vmatpush1.bf16.msra.mxu0 %v9038_v19  ;;  %6189 = vmatpush3.bf16.msra.mxu1 %v9040_v56  ;;  %v3714_v56 = vadd.f32 1.0, %v6356_v11 }
 0x74a   :  { %v3710_v17 = vmul.f32 0.5, %v3709_v52  ;;  %6162 = vmatprep.subr.bf16.mxu0 %v9047_v51  ;;  %6190 = vmatprep.subr.bf16.mxu1 %v9415_v61 }
 0x74b   :  { %v3715_v51 = vmul.f32 0.5, %v3714_v56 }
 0x74c   :  { %v3717_v38 = vmul.f32 %v3716_v37, %v3710_v17 }
 0x74d   :  { %6164 = vmatpush1.bf16.msra.mxu0 %v9066_v30  ;;  %6192 = vmatpush3.bf16.msra.mxu1 %v9068_v7  ;;  %v9469_v30 = vld [vmem:[#allocation15_spill] sm:$0xff] }
 0x74e   :  { %v3718_v19 = vadd.f32 %v3717_v38, %v9468_v29  ;;  %6166 = vmatprep.subr.bf16.mxu0 %v9077_v13  ;;  %6193 = vmatprep.subr.bf16.mxu1 %v9415_v61  ;;  %v9470_v7 = vld [vmem:[#allocation7_spill] sm:$0xff]  ;;  %v3720_v13 = vsub.f32 1.0, %v3715_v51 }
 0x750   :  { %6357 = vtanh.f32 %v3718_v19 }
 0x751   :  { %6168 = vmatpush1.bf16.msra.mxu0 %v9096_v39  ;;  %6195 = vmatpush3.bf16.msra.mxu1 %v9098_v3 }
 0x752   :  { %6170 = vmatprep.subr.bf16.mxu0 %v9106_v2  ;;  %6196 = vmatprep.subr.bf16.mxu1 %v9415_v61  ;;  %v3722_v2 = vmul.f32 %v3715_v51, %v9191_v32 }
 0x755   :  { %6172 = vmatpush1.bf16.msra.mxu0 %v9125_v14  ;;  %6198 = vmatpush3.bf16.msra.mxu1 %v9469_v30 }
 0x756   :  { %6174 = vmatprep.subr.bf16.mxu0 %v9470_v7  ;;  %6199 = vmatprep.subr.bf16.mxu1 %v9415_v61 }
 0x759   :  { %6176 = vmatpush1.bf16.msra.mxu0 %v9153_v22  ;;  %6201 = vmatpush3.bf16.msra.mxu1 %v9155_v50 }
 0x75a   :  { %v6358_v39 = vpop.eup %6357  ;;  %6178 = vmatprep.subr.bf16.mxu0 %v9162_v27  ;;  %6202 = vmatprep.subr.bf16.mxu1 %v9415_v61  ;;  %v4160_v61 = vld [vmem:[%s9364_s10 + $0x8] sm:$0xff] }
 0x75b   :  { %v3721_v3 = vmul.f32 %v6358_v39, %v3720_v13  ;;  %v4159_v13 = vld [vmem:[%s9364_s10] sm:$0xff] }
 0x75d   :  { %6180 = vmatpush1.bf16.msra.mxu0 %v9175_v34  ;;  %6204 = vmatpush3.bf16.msra.mxu1 %v9177_v20  ;;  %v3723_v14 = vadd.f32 %v3722_v2, %v3721_v3 }
 0x75f   :  { %v3724_v26 = vsel %vm1328_vm11, %v3723_v14, 0.0  ;;  %v9309_v22 = vsel %vm1328_vm11, %v3723_v14, %v9191_v32 }
 0x760   :  { %4056 = vmatmul.mubr.f32.vlgmr.msra.gmra.mrb[16].mxu0 %v9309_v22  ;;  %v4176_v50 = vadd.f32 %v4160_v61, %v3724_v26  ;;  %5179 = vmatmul.mubr.f32.vlgmr.msra.gmra.mrb[46].mxu1 %v9309_v22 }
 0x762   :  { %4184 = vst [vmem:[%s9364_s10 + $0x8] sm:$0xff] %v4176_v50 }
 0x813   :  { %v3842_v27 = vpop.f32.mrb[14].mxu0  ;;  %v3913_v34 = vpop.f32.mrb[44].mxu1 }
 0x814   :  { %v6219_v20 = vadd.f32 %v3842_v27, %v7394_v9  ;;  %v3844_v35 = vpop.f32.mrb[15].mxu0  ;;  %v5145_v32 = vpop.f32.mrb[45].mxu1  ;;  %v3931_v53 = vadd.f32 %v9241_v46, %v3913_v34 }
 0x815   :  { %v6220_v4 = vadd.f32 %v3844_v35, %v7396_v18 }
 0x816   :  { %v3922_v58 = vmul.f32 0.5, %v6219_v20 }
 0x817   :  { %v3927_v36 = vmul.f32 0.5, %v6220_v4 }
 0x818   :  { %6359 = vtanh.f32 %v3922_v58 }
 0x819   :  { %6361 = vtanh.f32 %v3927_v36 }
 0x822   :  { %v6360_v55 = vpop.eup %6359 }
 0x823   :  { %v3924_v48 = vadd.f32 1.0, %v6360_v55  ;;  %v6362_v54 = vpop.eup %6361 }
 0x824   :  { %v3929_v49 = vadd.f32 1.0, %v6362_v54 }
 0x825   :  { %v3925_v31 = vmul.f32 0.5, %v3924_v48 }
 0x826   :  { %v3930_v9 = vmul.f32 0.5, %v3929_v49 }
 0x827   :  { %v3932_v42 = vmul.f32 %v3931_v53, %v3925_v31 }
 0x828   :  { %v3935_v25 = vsub.f32 1.0, %v3930_v9  ;;  %v3937_v1 = vmul.f32 %v3930_v9, %v9256_v44 }
 0x829   :  { %v3933_v10 = vadd.f32 %v3932_v42, %v9472_v45 }
 0x82b   :  { %6363 = vtanh.f32 %v3933_v10 }
 0x833   :  { %v4057_v40 = vpop.f32.mrb[16].mxu0  ;;  %v4128_v60 = vpop.f32.mrb[46].mxu1 }
 0x834   :  { %v6221_v18 = vadd.f32 %v4057_v40, %v7408_v33  ;;  %v4059_v62 = vpop.f32.mrb[17].mxu0  ;;  %v5180_v47 = vpop.f32.mrb[47].mxu1  ;;  %v9474_v33 = vld [vmem:[#allocation26_spill] sm:$0xff]  ;;  %v4145_v23 = vadd.f32 %v9279_v12, %v4128_v60 }
 0x835   :  { %v6364_v24 = vpop.eup %6363  ;;  %v6222_v46 = vadd.f32 %v4059_v62, %v7410_v5 }
 0x836   :  { %v3936_v57 = vmul.f32 %v6364_v24, %v3935_v25  ;;  %v4136_v21 = vmul.f32 0.5, %v6221_v18 }
 0x837   :  { %v4141_v41 = vmul.f32 0.5, %v6222_v46 }
 0x838   :  { %v3938_v6 = vadd.f32 %v3937_v1, %v3936_v57  ;;  %6365 = vtanh.f32 %v4136_v21 }
 0x839   :  { %6367 = vtanh.f32 %v4141_v41 }
 0x83a   :  { %v3939_v15 = vsel %vm1108_vm10, %v3938_v6, 0.0  ;;  %v3942_v63 = vsel %vm1108_vm10, %v3938_v6, %v9256_v44  ;;  %v9475_v44 = vld [vmem:[#allocation11_spill] sm:$0xff] }
 0x83b   :  { %4156 = vst [vmem:[%s9366_s11] sm:$0xff] %v3942_v63  ;;  %v4182_v16 = vadd.f32 %v3939_v15, %v9474_v33 }
 0x83d   :  { %4190 = vst [vmem:[%s9364_s10 + $0x38] sm:$0xff] %v4182_v16 }
 0x842   :  { %v6366_v5 = vpop.eup %6365 }
 0x843   :  { %v4138_v0 = vadd.f32 1.0, %v6366_v5  ;;  %v6368_v52 = vpop.eup %6367 }
 0x844   :  { %v4143_v37 = vadd.f32 1.0, %v6368_v52 }
 0x845   :  { %v4139_v43 = vmul.f32 0.5, %v4138_v0 }
 0x846   :  { %v4144_v38 = vmul.f32 0.5, %v4143_v37 }
 0x847   :  { %v4146_v8 = vmul.f32 %v4145_v23, %v4139_v43 }
 0x848   :  { %v4149_v11 = vsub.f32 1.0, %v4144_v38  ;;  %v4151_v56 = vmul.f32 %v4144_v38, %v9309_v22 }
 0x849   :  { %v4147_v17 = vadd.f32 %v4146_v8, %v9475_v44 }
 0x84b   :  { %6369 = vtanh.f32 %v4147_v17 }
 0x855   :  { %v6370_v29 = vpop.eup %6369 }
 0x856   :  { %v4150_v19 = vmul.f32 %v6370_v29, %v4149_v11 }
 0x858   :  { %v4152_v51 = vadd.f32 %v4151_v56, %v4150_v19 }
 0x85a   :  { %v4153_v7 = vsel %vm883_vm9, %v4152_v51, 0.0  ;;  %v4155_v12 = vsel %vm883_vm9, %v4152_v51, %v9309_v22 }
 0x85b   :  { %4212 = vst [vmem:[%s9366_s11 + $0x8] sm:$0xff] %v4155_v12  ;;  %v4175_v39 = vadd.f32 %v4159_v13, %v4153_v7 }
 0x85d   :  { %4183 = vst [vmem:[%s9364_s10] sm:$0xff] %v4175_v39 }

// kernel: encoder_rnn_forward.1
= control target key start
LH: loop header
LB: loop body
LE: loop exit
PB: predicated region body
PF: predicated region fallthrough
CT: control target
= control target key end

     0   :  { %v9367_v3 = vmov 0.0   ;;  %v6376_v34 = vmov 0   ;;  %vm6378_vm2 = vmmov 0   ;;  %s9355_s2 = inlined_call_operand.vmem [shape: f32[128,384], index: 2, kind: input, shape index: {}]   ;;  %s9356_s0 = inlined_call_operand.vmem [shape: f32[8,8,128], index: 0, kind: input, shape index: {}]   ;;  %s9357_s3 = inlined_call_operand.vmem [shape: f32[128,384], index: 3, kind: input, shape index: {}]   ;;  %s9358_s4 = inlined_call_operand.vmem [shape: f32[128,384], index: 4, kind: input, shape index: {}]   ;;  %s9359_s1 = inlined_call_operand.vmem [shape: s32[8,1], index: 1, kind: input, shape index: {}]   ;;  %s9360_s5 = inlined_call_operand.vmem [shape: f32[128,384], index: 5, kind: input, shape index: {}]   ;;  %s9361_s6 = inlined_call_operand.vmem [shape: f32[1,384], index: 6, kind: input, shape index: {}]   ;;  %s9362_s7 = inlined_call_operand.vmem [shape: f32[1,384], index: 7, kind: input, shape index: {}]   ;;  %s9363_s8 = inlined_call_operand.vmem [shape: f32[1,128], index: 8, kind: input, shape index: {}]   ;;  %s9364_s10 = inlined_call_operand.vmem [shape: f32[8,8,128], index: 10, kind: output, shape index: {0}]   ;;  %s9365_s9 = inlined_call_operand.vmem [shape: f32[1,128], index: 9, kind: input, shape index: {}]   ;;  %s9366_s11 = inlined_call_operand.vmem [shape: f32[2,8,128], index: 11, kind: output, shape index: {1}]  }
   0x1   :  { %v47_v0 = vld [vmem:[%s9355_s2 + $0x8] sm:$0xff]  ;;  %v50_v1 = vld [vmem:[%s9355_s2 + $0x20] sm:$0xff]  ;;  %175 = vmatprep.mubr.f32.mxu0 %v9367_v3  ;;  %v49_v5 = vld [vmem:[%s9355_s2 + $0x18] sm:$0xff]  ;;  %6273 = vset.pattern.permute.xlu0 %v6376_v34 }
   0x2   :  { %v46_v2 = vld [vmem:[%s9355_s2] sm:$0xff]  ;;  %v5181_v4 = vpack.c.bf16 %v50_v1, %v47_v0  ;;  %v53_v6 = vld [vmem:[%s9355_s2 + $0x38] sm:$0xff]  ;;  %v56_v7 = vld [vmem:[%s9355_s2 + $0x50] sm:$0xff]  ;;  %6274 = vset.pattern.permute.xlu1 %v6376_v34 }
   0x3   :  { %v5183_v8 = vpack.c.bf16 %v49_v5, %v46_v2  ;;  %v5185_v9 = vpack.c.bf16 %v56_v7, %v53_v6  ;;  %v52_v10 = vld [vmem:[%s9355_s2 + $0x30] sm:$0xff]  ;;  %v55_v11 = vld [vmem:[%s9355_s2 + $0x48] sm:$0xff]  ;;  %v62_v13 = vld [vmem:[%s9355_s2 + $0x80] sm:$0xff] }
   0x4   :  { %v59_v12 = vld [vmem:[%s9355_s2 + $0x68] sm:$0xff]  ;;  %5182 = vmatprep.subr.bf16.mxu0 %v5181_v4  ;;  %v5187_v14 = vpack.c.bf16 %v55_v11, %v52_v10  ;;  %v58_v16 = vld [vmem:[%s9355_s2 + $0x60] sm:$0xff]  ;;  %v61_v17 = vld [vmem:[%s9355_s2 + $0x78] sm:$0xff] }
   0x5   :  { %5184 = vmatpush1.bf16.msra.mxu0 %v5183_v8  ;;  %v5189_v15 = vpack.c.bf16 %v62_v13, %v59_v12  ;;  %v65_v18 = vld [vmem:[%s9355_s2 + $0x98] sm:$0xff]  ;;  %v68_v19 = vld [vmem:[%s9355_s2 + $0xb0] sm:$0xff]  ;;  %v51_v21 = vld [vmem:[%s9355_s2 + $0x28] sm:$0xff]  ;;  %v5191_v23 = vpack.c.bf16 %v61_v17, %v58_v16 }
   0x6   :  { %5186 = vmatprep.subr.bf16.mxu0 %v5185_v9  ;;  %v48_v20 = vld [vmem:[%s9355_s2 + $0x10] sm:$0xff]  ;;  %v54_v24 = vld [vmem:[%s9355_s2 + $0x40] sm:$0xff]  ;;  %v57_v25 = vld [vmem:[%s9355_s2 + $0x58] sm:$0xff]  ;;  %v5193_v26 = vpack.c.bf16 %v68_v19, %v65_v18 }
   0x7   :  { %v5213_v22 = vpack.c.bf16 %v51_v21, %v48_v20  ;;  %v64_v27 = vld [vmem:[%s9355_s2 + $0x90] sm:$0xff]  ;;  %v67_v28 = vld [vmem:[%s9355_s2 + $0xa8] sm:$0xff]  ;;  %v5217_v30 = vpack.c.bf16 %v57_v25, %v54_v24  ;;  %v74_v31 = vld [vmem:[%s9355_s2 + $0xe0] sm:$0xff] }
   0x8   :  { %v71_v29 = vld [vmem:[%s9355_s2 + $0xc8] sm:$0xff]  ;;  %v60_v32 = vld [vmem:[%s9355_s2 + $0x70] sm:$0xff]  ;;  %v5195_v36 = vpack.c.bf16 %v67_v28, %v64_v27  ;;  %v66_v37 = vld [vmem:[%s9355_s2 + $0xa0] sm:$0xff] }
   0x9   :  { %5188 = vmatpush1.bf16.msra.mxu0 %v5187_v14  ;;  %5214 = vmatprep.subr.bf16.mxu1 %v5213_v22  ;;  %v63_v33 = vld [vmem:[%s9355_s2 + $0x88] sm:$0xff]  ;;  %v69_v38 = vld [vmem:[%s9355_s2 + $0xb8] sm:$0xff]  ;;  %v5197_v39 = vpack.c.bf16 %v74_v31, %v71_v29  ;;  %v70_v40 = vld [vmem:[%s9355_s2 + $0xc0] sm:$0xff] }
   0xa   :  { %5190 = vmatprep.subr.bf16.mxu0 %v5189_v15  ;;  %5216 = vmatpush3.bf16.msra.mxu1 %v5213_v22  ;;  %v5221_v35 = vpack.c.bf16 %v63_v33, %v60_v32  ;;  %v73_v41 = vld [vmem:[%s9355_s2 + $0xd8] sm:$0xff]  ;;  %v6529_v42 = vld [vmem:[%s9356_s0] sm:$0xff]  ;;  %v80_v44 = vld [vmem:[%s9355_s2 + $0x110] sm:$0xff]  ;;  %v5225_v45 = vpack.c.bf16 %v69_v38, %v66_v37 }
   0xb   :  { %5218 = vmatprep.subr.bf16.mxu1 %v5217_v30  ;;  %v77_v43 = vld [vmem:[%s9355_s2 + $0xf8] sm:$0xff]  ;;  %4565 = vmatprep.mubr.f32.mxu1 %v6529_v42  ;;  %v5199_v46 = vpack.c.bf16 %v73_v41, %v70_v40  ;;  %v72_v47 = vld [vmem:[%s9355_s2 + $0xd0] sm:$0xff]  ;;  %v75_v48 = vld [vmem:[%s9355_s2 + $0xe8] sm:$0xff] }
   0xc   :  { %v5201_v49 = vpack.c.bf16 %v80_v44, %v77_v43  ;;  %v76_v50 = vld [vmem:[%s9355_s2 + $0xf0] sm:$0xff]  ;;  %v79_v51 = vld [vmem:[%s9355_s2 + $0x108] sm:$0xff]  ;;  %v86_v53 = vld [vmem:[%s9355_s2 + $0x140] sm:$0xff]  ;;  %v5229_v54 = vpack.c.bf16 %v75_v48, %v72_v47 }
   0xd   :  { %5192 = vmatpush1.bf16.msra.mxu0 %v5191_v23  ;;  %v83_v52 = vld [vmem:[%s9355_s2 + $0x128] sm:$0xff]  ;;  %v5203_v55 = vpack.c.bf16 %v79_v51, %v76_v50  ;;  %v78_v56 = vld [vmem:[%s9355_s2 + $0x100] sm:$0xff]  ;;  %v81_v57 = vld [vmem:[%s9355_s2 + $0x118] sm:$0xff] }
   0xe   :  { %5194 = vmatprep.subr.bf16.mxu0 %v5193_v26  ;;  %5220 = vmatpush3.bf16.msra.mxu1 %v5217_v30  ;;  %v5205_v58 = vpack.c.bf16 %v86_v53, %v83_v52  ;;  %v82_v59 = vld [vmem:[%s9355_s2 + $0x120] sm:$0xff]  ;;  %v85_v60 = vld [vmem:[%s9355_s2 + $0x138] sm:$0xff]  ;;  %v92_v62 = vld [vmem:[%s9355_s2 + $0x170] sm:$0xff]  ;;  %v5233_v63 = vpack.c.bf16 %v81_v57, %v78_v56 }
   0xf   :  { %5222 = vmatprep.subr.bf16.mxu1 %v5221_v35  ;;  %v89_v61 = vld [vmem:[%s9355_s2 + $0x158] sm:$0xff]  ;;  %v5207_v0 = vpack.c.bf16 %v85_v60, %v82_v59  ;;  %v84_v1 = vld [vmem:[%s9355_s2 + $0x130] sm:$0xff]  ;;  %v87_v2 = vld [vmem:[%s9355_s2 + $0x148] sm:$0xff] }
  0x10   :  { %v5209_v4 = vpack.c.bf16 %v92_v62, %v89_v61  ;;  %v88_v5 = vld [vmem:[%s9355_s2 + $0x150] sm:$0xff]  ;;  %v91_v6 = vld [vmem:[%s9355_s2 + $0x168] sm:$0xff]  ;;  %v357_v8 = vld [vmem:[%s9357_s3 + $0x20] sm:$0xff]  ;;  %v5237_v9 = vpack.c.bf16 %v87_v2, %v84_v1 }
  0x11   :  { %5196 = vmatpush1.bf16.msra.mxu0 %v5195_v36  ;;  %v354_v7 = vld [vmem:[%s9357_s3 + $0x8] sm:$0xff]  ;;  %v5211_v10 = vpack.c.bf16 %v91_v6, %v88_v5  ;;  %v90_v11 = vld [vmem:[%s9355_s2 + $0x160] sm:$0xff]  ;;  %v93_v12 = vld [vmem:[%s9355_s2 + $0x178] sm:$0xff] }
  0x12   :  { %5198 = vmatprep.subr.bf16.mxu0 %v5197_v39  ;;  %5224 = vmatpush3.bf16.msra.mxu1 %v5221_v35  ;;  %v5245_v13 = vpack.c.bf16 %v357_v8, %v354_v7  ;;  %v353_v14 = vld [vmem:[%s9357_s3] sm:$0xff]  ;;  %v356_v15 = vld [vmem:[%s9357_s3 + $0x18] sm:$0xff]  ;;  %v363_v17 = vld [vmem:[%s9357_s3 + $0x50] sm:$0xff]  ;;  %v5241_v18 = vpack.c.bf16 %v93_v12, %v90_v11 }
  0x13   :  { %5226 = vmatprep.subr.bf16.mxu1 %v5225_v45  ;;  %v360_v16 = vld [vmem:[%s9357_s3 + $0x38] sm:$0xff]  ;;  %v5247_v19 = vpack.c.bf16 %v356_v15, %v353_v14  ;;  %v355_v20 = vld [vmem:[%s9357_s3 + $0x10] sm:$0xff]  ;;  %v358_v21 = vld [vmem:[%s9357_s3 + $0x28] sm:$0xff] }
  0x14   :  { %v5249_v22 = vpack.c.bf16 %v363_v17, %v360_v16  ;;  %v359_v23 = vld [vmem:[%s9357_s3 + $0x30] sm:$0xff]  ;;  %v362_v24 = vld [vmem:[%s9357_s3 + $0x48] sm:$0xff]  ;;  %v369_v26 = vld [vmem:[%s9357_s3 + $0x80] sm:$0xff]  ;;  %v5277_v27 = vpack.c.bf16 %v358_v21, %v355_v20 }
  0x15   :  { %5200 = vmatpush1.bf16.msra.mxu0 %v5199_v46  ;;  %v366_v25 = vld [vmem:[%s9357_s3 + $0x68] sm:$0xff]  ;;  %v5251_v29 = vpack.c.bf16 %v362_v24, %v359_v23  ;;  %v361_v30 = vld [vmem:[%s9357_s3 + $0x40] sm:$0xff]  ;;  %v364_v31 = vld [vmem:[%s9357_s3 + $0x58] sm:$0xff] }
  0x16   :  { %5202 = vmatprep.subr.bf16.mxu0 %v5201_v49  ;;  %5228 = vmatpush3.bf16.msra.mxu1 %v5225_v45  ;;  %v6633_v28 = vld [vmem:[%s9356_s0 + $0x8] sm:$0xff]  ;;  %v5253_v32 = vpack.c.bf16 %v369_v26, %v366_v25  ;;  %v365_v33 = vld [vmem:[%s9357_s3 + $0x60] sm:$0xff]  ;;  %v368_v35 = vld [vmem:[%s9357_s3 + $0x78] sm:$0xff]  ;;  %v5281_v38 = vpack.c.bf16 %v364_v31, %v361_v30 }
  0x17   :  { %5230 = vmatprep.subr.bf16.mxu1 %v5229_v54  ;;  %v372_v36 = vld [vmem:[%s9357_s3 + $0x98] sm:$0xff]  ;;  %v375_v37 = vld [vmem:[%s9357_s3 + $0xb0] sm:$0xff]  ;;  %v5255_v40 = vpack.c.bf16 %v368_v35, %v365_v33  ;;  %v370_v43 = vld [vmem:[%s9357_s3 + $0x88] sm:$0xff] }
  0x18   :  { %v6658_v39 = vld [vmem:[%s9356_s0 + $0x10] sm:$0xff]  ;;  %v5257_v44 = vpack.c.bf16 %v375_v37, %v372_v36  ;;  %v374_v46 = vld [vmem:[%s9357_s3 + $0xa8] sm:$0xff]  ;;  %v381_v48 = vld [vmem:[%s9357_s3 + $0xe0] sm:$0xff] }
  0x19   :  { %5204 = vmatpush1.bf16.msra.mxu0 %v5203_v55  ;;  %v367_v41 = vld [vmem:[%s9357_s3 + $0x70] sm:$0xff]  ;;  %v378_v47 = vld [vmem:[%s9357_s3 + $0xc8] sm:$0xff]  ;;  %v6685_v50 = vld [vmem:[%s9356_s0 + $0x18] sm:$0xff] }
  0x1a   :  { %5206 = vmatprep.subr.bf16.mxu0 %v5205_v58  ;;  %5232 = vmatpush3.bf16.msra.mxu1 %v5229_v54  ;;  %v371_v45 = vld [vmem:[%s9357_s3 + $0x90] sm:$0xff]  ;;  %v5285_v49 = vpack.c.bf16 %v370_v43, %v367_v41  ;;  %v373_v52 = vld [vmem:[%s9357_s3 + $0xa0] sm:$0xff]  ;;  %v376_v53 = vld [vmem:[%s9357_s3 + $0xb8] sm:$0xff]  ;;  %v5261_v55 = vpack.c.bf16 %v381_v48, %v378_v47 }
  0x1b   :  { %5234 = vmatprep.subr.bf16.mxu1 %v5233_v63  ;;  %v5259_v51 = vpack.c.bf16 %v374_v46, %v371_v45  ;;  %v6696_v54 = vld [vmem:[%s9356_s0 + $0x20] sm:$0xff]  ;;  %v380_v57 = vld [vmem:[%s9357_s3 + $0xd8] sm:$0xff]  ;;  %v387_v59 = vld [vmem:[%s9357_s3 + $0x110] sm:$0xff]  ;;  %v5289_v60 = vpack.c.bf16 %v376_v53, %v373_v52 }
  0x1c   :  { %v377_v56 = vld [vmem:[%s9357_s3 + $0xc0] sm:$0xff]  ;;  %v384_v58 = vld [vmem:[%s9357_s3 + $0xf8] sm:$0xff]  ;;  %v6717_v62 = vld [vmem:[%s9356_s0 + $0x28] sm:$0xff] }
  0x1d   :  { %5208 = vmatpush1.bf16.msra.mxu0 %v5207_v0  ;;  %v5263_v61 = vpack.c.bf16 %v380_v57, %v377_v56  ;;  %v382_v0 = vld [vmem:[%s9357_s3 + $0xe8] sm:$0xff]  ;;  %v5265_v1 = vpack.c.bf16 %v387_v59, %v384_v58  ;;  %v383_v2 = vld [vmem:[%s9357_s3 + $0xf0] sm:$0xff]  ;;  %v393_v7 = vld [vmem:[%s9357_s3 + $0x140] sm:$0xff]  ;;  %v9369_v59 = vmov 0.0|0.0  }
  0x1e   :  { %5210 = vmatprep.subr.bf16.mxu0 %v5209_v4  ;;  %5236 = vmatpush3.bf16.msra.mxu1 %v5233_v63  ;;  %v379_v63 = vld [vmem:[%s9357_s3 + $0xd0] sm:$0xff]  ;;  %v386_v4 = vld [vmem:[%s9357_s3 + $0x108] sm:$0xff]  ;;  %v385_v11 = vld [vmem:[%s9357_s3 + $0x100] sm:$0xff] }
  0x1f   :  { %5238 = vmatprep.subr.bf16.mxu1 %v5237_v9  ;;  %v6734_v5 = vld [vmem:[%s9356_s0 + $0x30] sm:$0xff]  ;;  %v390_v6 = vld [vmem:[%s9357_s3 + $0x128] sm:$0xff]  ;;  %v5293_v8 = vpack.c.bf16 %v382_v0, %v379_v63  ;;  %v388_v12 = vld [vmem:[%s9357_s3 + $0x118] sm:$0xff] }
  0x20   :  { %v389_v14 = vld [vmem:[%s9357_s3 + $0x120] sm:$0xff]  ;;  %v392_v15 = vld [vmem:[%s9357_s3 + $0x138] sm:$0xff]  ;;  %v399_v17 = vld [vmem:[%s9357_s3 + $0x170] sm:$0xff] }
  0x21   :  { %5212 = vmatpush1.bf16.msra.mxu0 %v5211_v10  ;;  %v6749_v10 = vld [vmem:[%s9356_s0 + $0x38] sm:$0xff]  ;;  %v391_v20 = vld [vmem:[%s9357_s3 + $0x130] sm:$0xff]  ;;  %v394_v21 = vld [vmem:[%s9357_s3 + $0x148] sm:$0xff] }
  0x22   :  { %5246 = vmatprep.subr.bf16.mxu0 %v5245_v13  ;;  %5240 = vmatpush3.bf16.msra.mxu1 %v5237_v9  ;;  %v5267_v9 = vpack.c.bf16 %v386_v4, %v383_v2  ;;  %v5269_v13 = vpack.c.bf16 %v393_v7, %v390_v6  ;;  %v396_v16 = vld [vmem:[%s9357_s3 + $0x158] sm:$0xff]  ;;  %v395_v23 = vld [vmem:[%s9357_s3 + $0x150] sm:$0xff]  ;;  %v398_v24 = vld [vmem:[%s9357_s3 + $0x168] sm:$0xff] }
  0x23   :  { %5242 = vmatprep.subr.bf16.mxu1 %v5241_v18  ;;  %v663_v25 = vld [vmem:[%s9358_s4 + $0x8] sm:$0xff]  ;;  %v666_v26 = vld [vmem:[%s9358_s4 + $0x20] sm:$0xff]  ;;  %v400_v31 = vld [vmem:[%s9357_s3 + $0x178] sm:$0xff] }
  0x24   :  { %176 = vmatmul.mubr.f32.vlgmr.msra.gmra.mrb[0].mxu0 %v6529_v42  ;;  %v397_v30 = vld [vmem:[%s9357_s3 + $0x160] sm:$0xff]  ;;  %v665_v35 = vld [vmem:[%s9358_s4 + $0x18] sm:$0xff]  ;;  %v672_v37 = vld [vmem:[%s9358_s4 + $0x50] sm:$0xff] }
  0x25   :  { %5248 = vmatpush1.bf16.msra.mxu0 %v5247_v19  ;;  %181 = vmatprep.mubr.f32.mxu0 %v9367_v3  ;;  %v5271_v19 = vpack.c.bf16 %v392_v15, %v389_v14  ;;  %v662_v33 = vld [vmem:[%s9358_s4] sm:$0xff]  ;;  %v669_v36 = vld [vmem:[%s9358_s4 + $0x38] sm:$0xff]  ;;  %v668_v43 = vld [vmem:[%s9358_s4 + $0x30] sm:$0xff] }
  0x26   :  { %5250 = vmatprep.subr.bf16.mxu0 %v5249_v22  ;;  %5244 = vmatpush3.bf16.msra.mxu1 %v5241_v18  ;;  %v5297_v18 = vpack.c.bf16 %v388_v12, %v385_v11  ;;  %v5273_v22 = vpack.c.bf16 %v399_v17, %v396_v16  ;;  %v6818_v41 = vpack.c.bf16 %v672_v37, %v669_v36  ;;  %v675_v45 = vld [vmem:[%s9358_s4 + $0x68] sm:$0xff]  ;;  %v678_v46 = vld [vmem:[%s9358_s4 + $0x80] sm:$0xff]  ;;  %v664_v48 = vld [vmem:[%s9358_s4 + $0x10] sm:$0xff] }
  0x27   :  { %5278 = vmatprep.subr.bf16.mxu1 %v5277_v27  ;;  %v6835_v47 = vld [vmem:[%s9359_s1] sm:$0xff]  ;;  %v681_v56 = vld [vmem:[%s9358_s4 + $0x98] sm:$0xff]  ;;  %v684_v57 = vld [vmem:[%s9358_s4 + $0xb0] sm:$0xff] }
  0x28   :  { %182 = vmatmul.mubr.f32.gmra.mrb[2].mxu0 %v6633_v28  ;;  %vm878_vm0 = vcmp.gt.s32.totalorder %v6835_v47, 0  ;;  %v674_v53 = vld [vmem:[%s9358_s4 + $0x60] sm:$0xff]  ;;  %v6880_v0 = vpack.c.bf16 %v684_v57, %v681_v56  ;;  %v683_v2 = vld [vmem:[%s9358_s4 + $0xa8] sm:$0xff]  ;;  %v689_v12 = vld [vmem:[%s9358_s4 + $0xd8] sm:$0xff]  ;;  %vm1103_vm1 = vcmp.gt.s32.totalorder %v6835_v47, 7  ;;  %vm1765_vm3 = vcmp.gt.s32.totalorder %v6835_v47, 2 }
  0x29   :  { %5252 = vmatpush1.bf16.msra.mxu0 %v5251_v29  ;;  %187 = vmatprep.mubr.f32.mxu0 %v9367_v3  ;;  %v5275_v29 = vpack.c.bf16 %v398_v24, %v395_v23  ;;  %v879_v52 = vsel %vm878_vm0, 1, %v6376_v34  ;;  %v687_v4 = vld [vmem:[%s9358_s4 + $0xc8] sm:$0xff]  ;;  %v690_v6 = vld [vmem:[%s9358_s4 + $0xe0] sm:$0xff]  ;;  %v696_v14 = vld [vmem:[%s9358_s4 + $0x110] sm:$0xff]  ;;  %vm2207_vm4 = vcmp.gt.s32.totalorder %v6835_v47, 3  ;;  %vm1323_vm5 = vcmp.gt.s32.totalorder %v6835_v47, 1 }
  0x2a   :  { %5254 = vmatprep.subr.bf16.mxu0 %v5253_v32  ;;  %4566 = vmatmul.mubr.f32.vlgmr.msra.gmra.mrb[0].mxu1 %v6633_v28  ;;  %v6799_v32 = vpack.c.bf16 %v666_v26, %v663_v25  ;;  %v6912_v11 = vpack.c.bf16 %v690_v6, %v687_v4  ;;  %v682_v16 = vld [vmem:[%s9358_s4 + $0xa0] sm:$0xff]  ;;  %v685_v17 = vld [vmem:[%s9358_s4 + $0xb8] sm:$0xff]  ;;  %v688_v24 = vld [vmem:[%s9358_s4 + $0xd0] sm:$0xff]  ;;  %vm1544_vm6 = vcmp.gt.s32.totalorder %v6835_v47, 6  ;;  %vm1986_vm7 = vcmp.gt.s32.totalorder %v6835_v47, 5 }
  0x2b   :  { %5280 = vmatpush3.bf16.msra.mxu1 %v5277_v27  ;;  %4568 = vmatprep.mubr.f32.mxu1 %v6658_v39  ;;  %v5301_v27 = vpack.c.bf16 %v394_v21, %v391_v20  ;;  %v695_v20 = vld [vmem:[%s9358_s4 + $0x108] sm:$0xff]  ;;  %v6960_v23 = vpack.c.bf16 %v685_v17, %v682_v16  ;;  %v694_v36 = vld [vmem:[%s9358_s4 + $0x100] sm:$0xff]  ;;  %v697_v37 = vld [vmem:[%s9358_s4 + $0x118] sm:$0xff]  ;;  %vm2428_vm8 = vcmp.gt.s32.totalorder %v6835_v47, 4 }
  0x2c   :  { %188 = vmatmul.mubr.f32.gmra.mrb[4].mxu0 %v6658_v39  ;;  %5282 = vmatprep.subr.bf16.mxu1 %v5281_v38  ;;  %v699_v21 = vld [vmem:[%s9358_s4 + $0x128] sm:$0xff]  ;;  %v886_v56 = vld [vmem:[%s9360_s5] sm:$0xff]  ;;  %v889_v57 = vld [vmem:[%s9360_s5 + $0x18] sm:$0xff] }
  0x2d   :  { %5256 = vmatpush1.bf16.msra.mxu0 %v5255_v40  ;;  %193 = vmatprep.mubr.f32.mxu0 %v9367_v3  ;;  %v6815_v40 = vpack.c.bf16 %v665_v35, %v662_v33  ;;  %v691_v25 = vld [vmem:[%s9358_s4 + $0xe8] sm:$0xff]  ;;  %v1104_v35 = vsel %vm1103_vm1, 1, %v6376_v34  ;;  %v706_v4 = vld [vmem:[%s9358_s4 + $0x160] sm:$0xff]  ;;  %v709_v6 = vld [vmem:[%s9358_s4 + $0x178] sm:$0xff] }
  0x2e   :  { %5258 = vmatprep.subr.bf16.mxu0 %v5257_v44  ;;  %4569 = vmatmul.mubr.f32.gmra.mrb[2].mxu1 %v6685_v50  ;;  %v671_v44 = vld [vmem:[%s9358_s4 + $0x48] sm:$0xff]  ;;  %v6993_v33 = vpack.c.bf16 %v691_v25, %v688_v24  ;;  %v888_v16 = vld [vmem:[%s9360_s5 + $0x10] sm:$0xff]  ;;  %v905_v24 = vld [vmem:[%s9360_s5 + $0x98] sm:$0xff] }
  0x2f   :  { %5284 = vmatpush3.bf16.msra.mxu1 %v5281_v38  ;;  %4571 = vmatprep.mubr.f32.mxu1 %v6696_v54  ;;  %v5305_v38 = vpack.c.bf16 %v400_v31, %v397_v30  ;;  %v705_v30 = vld [vmem:[%s9358_s4 + $0x158] sm:$0xff]  ;;  %v708_v31 = vld [vmem:[%s9358_s4 + $0x170] sm:$0xff]  ;;  %v891_v17 = vld [vmem:[%s9360_s5 + $0x28] sm:$0xff] }
  0x30   :  { %194 = vmatmul.mubr.f32.gmra.mrb[6].mxu0 %v6685_v50  ;;  %5286 = vmatprep.subr.bf16.mxu1 %v5285_v49  ;;  %v908_v25 = vld [vmem:[%s9360_s5 + $0xb0] sm:$0xff] }
  0x31   :  { %5260 = vmatpush1.bf16.msra.mxu0 %v5259_v51  ;;  %199 = vmatprep.mubr.f32.mxu0 %v9367_v3  ;;  %v6847_v51 = vpack.c.bf16 %v671_v44, %v668_v43  ;;  %v704_v43 = vld [vmem:[%s9358_s4 + $0x150] sm:$0xff]  ;;  %v707_v44 = vld [vmem:[%s9358_s4 + $0x168] sm:$0xff] }
  0x32   :  { %5262 = vmatprep.subr.bf16.mxu0 %v5261_v55  ;;  %4572 = vmatmul.mubr.f32.gmra.mrb[4].mxu1 %v6717_v62  ;;  %v677_v55 = vld [vmem:[%s9358_s4 + $0x78] sm:$0xff] }
  0x33   :  { %5288 = vmatpush3.bf16.msra.mxu1 %v5285_v49  ;;  %4574 = vmatprep.mubr.f32.mxu1 %v6734_v5  ;;  %v667_v49 = vld [vmem:[%s9358_s4 + $0x28] sm:$0xff]  ;;  %v6877_v63 = vpack.c.bf16 %v677_v55, %v674_v53  ;;  %v7041_v55 = vpack.c.bf16 %v707_v44, %v704_v43  ;;  %v914_v44 = vld [vmem:[%s9360_s5 + $0xe0] sm:$0xff] }
  0x34   :  { %200 = vmatmul.mubr.f32.gmra.mrb[8].mxu0 %v6696_v54  ;;  %5290 = vmatprep.subr.bf16.mxu1 %v5289_v60  ;;  %v6865_v58 = vpack.c.bf16 %v667_v49, %v664_v48  ;;  %v7027_v48 = vpack.c.bf16 %v697_v37, %v694_v36  ;;  %v1766_v49 = vsel %vm1765_vm3, 1, %v6376_v34  ;;  %v703_v53 = vld [vmem:[%s9358_s4 + $0x148] sm:$0xff]  ;;  %v904_v36 = vld [vmem:[%s9360_s5 + $0x90] sm:$0xff] }
  0x35   :  { %5264 = vmatpush1.bf16.msra.mxu0 %v5263_v61  ;;  %205 = vmatprep.mubr.f32.mxu0 %v9367_v3  ;;  %v673_v61 = vld [vmem:[%s9358_s4 + $0x58] sm:$0xff]  ;;  %v907_v37 = vld [vmem:[%s9360_s5 + $0xa8] sm:$0xff] }
  0x36   :  { %5266 = vmatprep.subr.bf16.mxu0 %v5265_v1  ;;  %4575 = vmatmul.mubr.f32.gmra.mrb[6].mxu1 %v6749_v10  ;;  %v680_v1 = vld [vmem:[%s9358_s4 + $0x90] sm:$0xff]  ;;  %v911_v43 = vld [vmem:[%s9360_s5 + $0xc8] sm:$0xff] }
  0x37   :  { %5292 = vmatpush3.bf16.msra.mxu1 %v5289_v60  ;;  %4609 = vmatprep.mubr.f32.mxu1 %v6529_v42  ;;  %v670_v60 = vld [vmem:[%s9358_s4 + $0x40] sm:$0xff] }
  0x38   :  { %206 = vmatmul.mubr.f32.gmra.mrb[10].mxu0 %v6717_v62  ;;  %5294 = vmatprep.subr.bf16.mxu1 %v5293_v8  ;;  %v6896_v7 = vpack.c.bf16 %v673_v61, %v670_v60  ;;  %v893_v60 = vld [vmem:[%s9360_s5 + $0x38] sm:$0xff]  ;;  %v896_v61 = vld [vmem:[%s9360_s5 + $0x50] sm:$0xff] }
  0x39   :  { %5268 = vmatpush1.bf16.msra.mxu0 %v5267_v9  ;;  %211 = vmatprep.mubr.f32.mxu0 %v9367_v3  ;;  %v6909_v9 = vpack.c.bf16 %v683_v2, %v680_v1  ;;  %v2208_v2 = vsel %vm2207_vm4, 1, %v6376_v34 }
  0x3a   :  { %5270 = vmatprep.subr.bf16.mxu0 %v5269_v13  ;;  %881 = vperm.xlu0 %6273, %v879_v52   ;;  %v693_v13 = vld [vmem:[%s9358_s4 + $0xf8] sm:$0xff]  ;;  %v700_v52 = vld [vmem:[%s9358_s4 + $0x130] sm:$0xff] }
  0x3b   :  { %5296 = vmatpush3.bf16.msra.mxu1 %v5293_v8  ;;  %v679_v8 = vld [vmem:[%s9358_s4 + $0x88] sm:$0xff]  ;;  %v7059_v1 = vpack.c.bf16 %v703_v53, %v700_v52  ;;  %v7161_v52 = vpack.c.bf16 %v907_v37, %v904_v36  ;;  %v7164_v53 = vpack.c.bf16 %v914_v44, %v911_v43  ;;  %v925_v36 = vld [vmem:[%s9360_s5 + $0x138] sm:$0xff]  ;;  %v932_v43 = vld [vmem:[%s9360_s5 + $0x170] sm:$0xff] }
  0x3c   :  { %212 = vmatmul.mubr.f32.gmra.mrb[12].mxu0 %v6734_v5  ;;  %5298 = vmatprep.subr.bf16.mxu1 %v5297_v18  ;;  %v929_v37 = vld [vmem:[%s9360_s5 + $0x158] sm:$0xff] }
  0x3d   :  { %5272 = vmatpush1.bf16.msra.mxu0 %v5271_v19  ;;  %217 = vmatprep.mubr.f32.mxu0 %v9367_v3  ;;  %v6944_v19 = vpack.c.bf16 %v696_v14, %v693_v13  ;;  %v902_v13 = vld [vmem:[%s9360_s5 + $0x80] sm:$0xff]  ;;  %v7090_v14 = vpack.c.bf16 %v709_v6, %v706_v4  ;;  %v909_v6 = vld [vmem:[%s9360_s5 + $0xb8] sm:$0xff] }
  0x3e   :  { %5274 = vmatprep.subr.bf16.mxu0 %v5273_v22  ;;  %v702_v22 = vld [vmem:[%s9358_s4 + $0x140] sm:$0xff]  ;;  %1106 = vperm.xlu0 %6273, %v1104_v35   ;;  %v7133_v35 = vpack.c.bf16 %v908_v25, %v905_v24  ;;  %v915_v24 = vld [vmem:[%s9360_s5 + $0xe8] sm:$0xff] }
  0x3f   :  { %5300 = vmatpush3.bf16.msra.mxu1 %v5297_v18  ;;  %v906_v4 = vld [vmem:[%s9360_s5 + $0xa0] sm:$0xff] }
  0x40   :  { %218 = vmatmul.mubr.f32.gmra.mrb[14].mxu0 %v6749_v10  ;;  %5302 = vmatprep.subr.bf16.mxu1 %v5301_v27 }
  0x41   :  { %5276 = vmatpush1.bf16.msra.mxu0 %v5275_v29  ;;  %482 = vmatprep.mubr.f32.mxu0 %v9367_v3  ;;  %v701_v29 = vld [vmem:[%s9358_s4 + $0x138] sm:$0xff] }
  0x42   :  { %5310 = vmatprep.subr.bf16.mxu0 %v6799_v32  ;;  %1768 = vperm.xlu0 %6273, %v1766_v49   ;;  %v903_v49 = vld [vmem:[%s9360_s5 + $0x88] sm:$0xff] }
  0x43   :  { %5304 = vmatpush3.bf16.msra.mxu1 %v5301_v27  ;;  %v698_v27 = vld [vmem:[%s9358_s4 + $0x120] sm:$0xff] }
  0x44   :  { %483 = vmatmul.mubr.f32.vlgmr.msra.gmra.mrb[16].mxu0 %v6529_v42  ;;  %5306 = vmatprep.subr.bf16.mxu1 %v5305_v38  ;;  %v6851_v42 = vpack.c.bf16 %v678_v46, %v675_v45  ;;  %v887_v45 = vld [vmem:[%s9360_s5 + $0x8] sm:$0xff]  ;;  %v890_v46 = vld [vmem:[%s9360_s5 + $0x20] sm:$0xff] }
  0x45   :  { %5312 = vmatpush1.bf16.msra.mxu0 %v6815_v40  ;;  %488 = vmatprep.mubr.f32.mxu0 %v9367_v3 }
  0x46   :  { %5314 = vmatprep.subr.bf16.mxu0 %v6818_v41  ;;  %2210 = vperm.xlu0 %6273, %v2208_v2  }
  0x47   :  { %5308 = vmatpush3.bf16.msra.mxu1 %v5305_v38  ;;  %v7009_v38 = vpack.c.bf16 %v701_v29, %v698_v27  ;;  %v7120_v27 = vpack.c.bf16 %v891_v17, %v888_v16  ;;  %v894_v29 = vld [vmem:[%s9360_s5 + $0x40] sm:$0xff]  ;;  %v923_v16 = vld [vmem:[%s9360_s5 + $0x128] sm:$0xff] }
  0x48   :  { %489 = vmatmul.mubr.f32.gmra.mrb[18].mxu0 %v6633_v28  ;;  %5341 = vmatprep.subr.bf16.mxu1 %v9369_v59  ;;  %v926_v17 = vld [vmem:[%s9360_s5 + $0x140] sm:$0xff] }
  0x49   :  { %5316 = vmatpush1.bf16.msra.mxu0 %v6847_v51  ;;  %494 = vmatprep.mubr.f32.mxu0 %v9367_v3 }
  0x4a   :  { %5318 = vmatprep.subr.bf16.mxu0 %v6851_v42  ;;  %4610 = vmatmul.mubr.f32.vlgmr.msra.gmra.mrb[8].mxu1 %v6633_v28  ;;  %v676_v28 = vld [vmem:[%s9358_s4 + $0x70] sm:$0xff] }
  0x4b   :  { %5343 = vmatpush3.bf16.msra.mxu1 %v6865_v58  ;;  %4612 = vmatprep.mubr.f32.mxu1 %v6658_v39  ;;  %v6928_v15 = vpack.c.bf16 %v679_v8, %v676_v28  ;;  %v7072_v28 = vpack.c.bf16 %v889_v57, %v886_v56  ;;  %v7075_v8 = vpack.c.bf16 %v896_v61, %v893_v60  ;;  %v910_v56 = vld [vmem:[%s9360_s5 + $0xc0] sm:$0xff]  ;;  %v913_v57 = vld [vmem:[%s9360_s5 + $0xd8] sm:$0xff]  ;;  %v920_v61 = vld [vmem:[%s9360_s5 + $0x110] sm:$0xff] }
  0x4c   :  { %495 = vmatmul.mubr.f32.gmra.mrb[20].mxu0 %v6658_v39  ;;  %5344 = vmatprep.subr.bf16.mxu1 %v9369_v59  ;;  %v686_v39 = vld [vmem:[%s9358_s4 + $0xc0] sm:$0xff]  ;;  %v917_v60 = vld [vmem:[%s9360_s5 + $0xf8] sm:$0xff] }
  0x4d   :  { %5320 = vmatpush1.bf16.msra.mxu0 %v6877_v63  ;;  %500 = vmatprep.mubr.f32.mxu0 %v9367_v3  ;;  %v6941_v18 = vpack.c.bf16 %v689_v12, %v686_v39  ;;  %v895_v39 = vld [vmem:[%s9360_s5 + $0x48] sm:$0xff] }
  0x4e   :  { %5322 = vmatprep.subr.bf16.mxu0 %v6880_v0  ;;  %4613 = vmatmul.mubr.f32.gmra.mrb[10].mxu1 %v6685_v50  ;;  %v899_v12 = vld [vmem:[%s9360_s5 + $0x68] sm:$0xff] }
  0x4f   :  { %5346 = vmatpush3.bf16.msra.mxu1 %v6896_v7  ;;  %4615 = vmatprep.mubr.f32.mxu1 %v6696_v54 }
  0x50   :  { %501 = vmatmul.mubr.f32.gmra.mrb[22].mxu0 %v6685_v50  ;;  %5347 = vmatprep.subr.bf16.mxu1 %v9369_v59  ;;  %v692_v50 = vld [vmem:[%s9358_s4 + $0xf0] sm:$0xff] }
  0x51   :  { %5324 = vmatpush1.bf16.msra.mxu0 %v6909_v9  ;;  %506 = vmatprep.mubr.f32.mxu0 %v9367_v3  ;;  %v6974_v26 = vpack.c.bf16 %v695_v20, %v692_v50  ;;  %v7105_v20 = vpack.c.bf16 %v902_v13, %v899_v12  ;;  %v916_v12 = vld [vmem:[%s9360_s5 + $0xf0] sm:$0xff]  ;;  %v919_v13 = vld [vmem:[%s9360_s5 + $0x108] sm:$0xff] }
  0x52   :  { %5326 = vmatprep.subr.bf16.mxu0 %v6912_v11  ;;  %4616 = vmatmul.mubr.f32.gmra.mrb[12].mxu1 %v6717_v62  ;;  %v7217_v25 = vpack.c.bf16 %v919_v13, %v916_v12  ;;  %v927_v12 = vld [vmem:[%s9360_s5 + $0x148] sm:$0xff] }
  0x53   :  { %5349 = vmatpush3.bf16.msra.mxu1 %v6928_v15  ;;  %4618 = vmatprep.mubr.f32.mxu1 %v6734_v5 }
  0x54   :  { %507 = vmatmul.mubr.f32.gmra.mrb[24].mxu0 %v6696_v54  ;;  %5350 = vmatprep.subr.bf16.mxu1 %v9369_v59  ;;  %v6977_v54 = vpack.c.bf16 %v702_v22, %v699_v21  ;;  %v898_v21 = vld [vmem:[%s9360_s5 + $0x60] sm:$0xff]  ;;  %v901_v22 = vld [vmem:[%s9360_s5 + $0x78] sm:$0xff] }
  0x55   :  { %5328 = vmatpush1.bf16.msra.mxu0 %v6941_v18  ;;  %512 = vmatprep.mubr.f32.mxu0 %v9367_v3 }
  0x56   :  { %5330 = vmatprep.subr.bf16.mxu0 %v6944_v19  ;;  %4619 = vmatmul.mubr.f32.gmra.mrb[14].mxu1 %v6749_v10 }
  0x57   :  { %5352 = vmatpush3.bf16.msra.mxu1 %v6960_v23  ;;  %4653 = vmatprep.mubr.msk.f32.mxu1 %vm6378_vm2, %v9367_v3 }
  0x58   :  { %513 = vmatmul.mubr.f32.gmra.mrb[26].mxu0 %v6717_v62  ;;  %5353 = vmatprep.subr.bf16.mxu1 %v9369_v59  ;;  %v7012_v62 = vpack.c.bf16 %v708_v31, %v705_v30  ;;  %v897_v30 = vld [vmem:[%s9360_s5 + $0x58] sm:$0xff]  ;;  %v7130_v31 = vpack.c.bf16 %v901_v22, %v898_v21  ;;  %v7207_v21 = vpack.c.bf16 %v909_v6, %v906_v4  ;;  %v912_v22 = vld [vmem:[%s9360_s5 + $0xd0] sm:$0xff] }
  0x59   :  { %5332 = vmatpush1.bf16.msra.mxu0 %v6974_v26  ;;  %518 = vmatprep.mubr.f32.mxu0 %v9367_v3  ;;  %v7235_v44 = vpack.c.bf16 %v915_v24, %v912_v22  ;;  %v924_v6 = vld [vmem:[%s9360_s5 + $0x130] sm:$0xff]  ;;  %v933_v22 = vld [vmem:[%s9360_s5 + $0x178] sm:$0xff] }
  0x5a   :  { %5334 = vmatprep.subr.bf16.mxu0 %v6977_v54 }
  0x5b   :  { %5355 = vmatpush3.bf16.msra.mxu1 %v6993_v33 }
  0x5c   :  { %519 = vmatmul.mubr.f32.gmra.mrb[28].mxu0 %v6734_v5  ;;  %5356 = vmatprep.subr.bf16.mxu1 %v9369_v59  ;;  %v7044_v5 = vpack.c.bf16 %v890_v46, %v887_v45  ;;  %v7149_v45 = vpack.c.bf16 %v897_v30, %v894_v29  ;;  %v900_v46 = vld [vmem:[%s9360_s5 + $0x70] sm:$0xff]  ;;  %v7220_v29 = vpack.c.bf16 %v926_v17, %v923_v16  ;;  %v922_v30 = vld [vmem:[%s9360_s5 + $0x120] sm:$0xff] }
  0x5d   :  { %5336 = vmatpush1.bf16.msra.mxu0 %v7009_v38  ;;  %524 = vmatprep.mubr.f32.mxu0 %v9367_v3  ;;  %v7179_v2 = vpack.c.bf16 %v903_v49, %v900_v46  ;;  %v918_v46 = vld [vmem:[%s9360_s5 + $0x100] sm:$0xff]  ;;  %v921_v49 = vld [vmem:[%s9360_s5 + $0x118] sm:$0xff]  ;;  %v7271_v16 = vpack.c.bf16 %v927_v12, %v924_v6 }
  0x5e   :  { %5338 = vmatprep.subr.bf16.mxu0 %v7012_v62  ;;  %v7257_v4 = vpack.c.bf16 %v921_v49, %v918_v46  ;;  %v930_v17 = vld [vmem:[%s9360_s5 + $0x160] sm:$0xff] }
  0x5f   :  { %5358 = vmatpush3.bf16.msra.mxu1 %v7027_v48  ;;  %v7283_v24 = vpack.c.bf16 %v933_v22, %v930_v17 }
  0x60   :  { %525 = vmatmul.mubr.f32.gmra.mrb[30].mxu0 %v6749_v10  ;;  %5359 = vmatprep.subr.bf16.mxu1 %v9369_v59  ;;  %v892_v10 = vld [vmem:[%s9360_s5 + $0x30] sm:$0xff] }
  0x61   :  { %5340 = vmatpush1.bf16.msra.mxu0 %v7041_v55  ;;  %774 = vmatprep.mubr.f32.mxu0 %v9367_v3  ;;  %v7101_v50 = vpack.c.bf16 %v895_v39, %v892_v10  ;;  %v7189_v10 = vpack.c.bf16 %v913_v57, %v910_v56  ;;  %v7192_v39 = vpack.c.bf16 %v920_v61, %v917_v60  ;;  %v928_v60 = vld [vmem:[%s9360_s5 + $0x150] sm:$0xff]  ;;  %v931_v61 = vld [vmem:[%s9360_s5 + $0x168] sm:$0xff] }
  0x62   :  { %5366 = vmatprep.subr.bf16.mxu0 %v7044_v5  ;;  %v7245_v56 = vpack.c.bf16 %v925_v36, %v922_v30  ;;  %v7248_v57 = vpack.c.bf16 %v932_v43, %v929_v37  ;;  %v7267_v13 = vpack.c.bf16 %v931_v61, %v928_v60 }
  0x63   :  { %5361 = vmatpush3.bf16.msra.mxu1 %v7059_v1 }
  0x64   :  { %775 = vmatmul.mubr.f32.vlgmr.msra.gmra.mrb[0].mxu0 %v9367_v3  ;;  %5362 = vmatprep.subr.bf16.mxu1 %v9369_v59 }
  0x65   :  { %5368 = vmatpush1.bf16.msra.mxu0 %v7072_v28  ;;  %998 = vmatprep.mubr.f32.mxu0 %v9367_v3 }
  0x66   :  { %5370 = vmatprep.subr.bf16.mxu0 %v7075_v8 }
  0x67   :  { %5364 = vmatpush3.bf16.msra.mxu1 %v7090_v14 }
  0x68   :  { %5397 = vmatprep.subr.bf16.mxu1 %v9369_v59 }
  0x69   :  { %5372 = vmatpush1.bf16.msra.mxu0 %v7101_v50 }
  0x6a   :  { %5374 = vmatprep.subr.bf16.mxu0 %v7105_v20  ;;  %4654 = vmatmul.mubr.f32.vlgmr.msra.gmra.mrb[16].mxu1 %v9367_v3 }
  0x6b   :  { %5399 = vmatpush3.bf16.msra.mxu1 %v7120_v27  ;;  %4688 = vmatprep.mubr.msk.f32.mxu1 %vm6378_vm2, %v9367_v3 }
  0x6c   :  { %5400 = vmatprep.subr.bf16.mxu1 %v9369_v59 }
  0x6d   :  { %5376 = vmatpush1.bf16.msra.mxu0 %v7130_v31 }
  0x6e   :  { %5378 = vmatprep.subr.bf16.mxu0 %v7133_v35 }
  0x6f   :  { %5402 = vmatpush3.bf16.msra.mxu1 %v7149_v45 }
  0x70   :  { %5403 = vmatprep.subr.bf16.mxu1 %v9369_v59 }
  0x71   :  { %5380 = vmatpush1.bf16.msra.mxu0 %v7161_v52 }
  0x72   :  { %5382 = vmatprep.subr.bf16.mxu0 %v7164_v53 }
  0x73   :  { %5405 = vmatpush3.bf16.msra.mxu1 %v7179_v2 }
  0x74   :  { %5406 = vmatprep.subr.bf16.mxu1 %v9369_v59 }
  0x75   :  { %5384 = vmatpush1.bf16.msra.mxu0 %v7189_v10 }
  0x76   :  { %5386 = vmatprep.subr.bf16.mxu0 %v7192_v39 }
  0x77   :  { %5408 = vmatpush3.bf16.msra.mxu1 %v7207_v21 }
  0x78   :  { %5409 = vmatprep.subr.bf16.mxu1 %v9369_v59 }
  0x79   :  { %5388 = vmatpush1.bf16.msra.mxu0 %v7217_v25 }
  0x7a   :  { %5390 = vmatprep.subr.bf16.mxu0 %v7220_v29 }
  0x7b   :  { %5411 = vmatpush3.bf16.msra.mxu1 %v7235_v44 }
  0x7c   :  { %5412 = vmatprep.subr.bf16.mxu1 %v9369_v59 }
  0x7d   :  { %5392 = vmatpush1.bf16.msra.mxu0 %v7245_v56 }
  0x7e   :  { %5394 = vmatprep.subr.bf16.mxu0 %v7248_v57 }
  0x7f   :  { %5414 = vmatpush3.bf16.msra.mxu1 %v7257_v4 }
  0x80   :  { %5415 = vmatprep.subr.bf16.mxu1 %v9369_v59 }
  0x81   :  { %5396 = vmatpush1.bf16.msra.mxu0 %v7267_v13 }
  0x82   :  { %5422 = vmatprep.subr.bf16.mxu0 %v6799_v32  ;;  %v96_v32 = vlaneseq }
  0x83   :  { %5417 = vmatpush3.bf16.msra.mxu1 %v7271_v16 }
  0x84   :  { %999 = vmatmul.mubr.f32.vlgmr.msra.gmra.mrb[30].mxu0 %v9367_v3  ;;  %5418 = vmatprep.subr.bf16.mxu1 %v9369_v59 }
  0x85   :  { %5424 = vmatpush1.bf16.msra.mxu0 %v6815_v40  ;;  %1224 = vmatprep.mubr.f32.mxu0 %v9367_v3  ;;  %v7325_v40 = vshrl.u32 %v96_v32, 7 }
  0x86   :  { %5426 = vmatprep.subr.bf16.mxu0 %v6818_v41 }
  0x87   :  { %5420 = vmatpush3.bf16.msra.mxu1 %v7283_v24  ;;  %v106_v41 = vsub.s32 2, %v7325_v40 }
  0x88   :  { %5453 = vmatprep.subr.bf16.mxu1 %v9369_v59 }
  0x89   :  { %5428 = vmatpush1.bf16.msra.mxu0 %v6847_v51  ;;  %v94_v51 = vld [vmem:[%s9361_s6] sm:$0x7] }
  0x8a   :  { %4689 = vmatmul.mubr.f32.vlgmr.msra.gmra.mrb[18].mxu1 %v9367_v3  ;;  %5430 = vmatprep.subr.bf16.mxu0 %v6851_v42  ;;  %v7331_v42 = vrot.slane %v94_v51, %v106_v41 }
  0x8b   :  { %5455 = vmatpush3.bf16.msra.mxu1 %v6865_v58  ;;  %4723 = vmatprep.mubr.msk.f32.mxu1 %vm6378_vm2, %v9367_v3 }
  0x8c   :  { %5456 = vmatprep.subr.bf16.mxu1 %v9369_v59 }
  0x8d   :  { %5432 = vmatpush1.bf16.msra.mxu0 %v6877_v63 }
  0x8e   :  { %5434 = vmatprep.subr.bf16.mxu0 %v6880_v0 }
  0x8f   :  { %5458 = vmatpush3.bf16.msra.mxu1 %v6896_v7  ;;  %v1324_v7 = vsel %vm1323_vm5, 1, %v6376_v34 }
  0x90   :  { %5459 = vmatprep.subr.bf16.mxu1 %v9369_v59  ;;  %1326 = vperm.xlu1 %6274, %v1324_v7   ;;  %v102_v7 = vsub.s32 1, %v7325_v40 }
  0x91   :  { %5436 = vmatpush1.bf16.msra.mxu0 %v6909_v9 }
  0x92   :  { %5438 = vmatprep.subr.bf16.mxu0 %v6912_v11  ;;  %v1545_v11 = vsel %vm1544_vm6, 1, %v6376_v34 }
  0x93   :  { %5461 = vmatpush3.bf16.msra.mxu1 %v6928_v15 }
  0x94   :  { %5462 = vmatprep.subr.bf16.mxu1 %v9369_v59  ;;  %1547 = vperm.xlu1 %6274, %v1545_v11  }
  0x95   :  { %5440 = vmatpush1.bf16.msra.mxu0 %v6941_v18 }
  0x96   :  { %5442 = vmatprep.subr.bf16.mxu0 %v6944_v19 }
  0x97   :  { %5464 = vmatpush3.bf16.msra.mxu1 %v6960_v23 }
  0x98   :  { %5465 = vmatprep.subr.bf16.mxu1 %v9369_v59 }
  0x99   :  { %5444 = vmatpush1.bf16.msra.mxu0 %v6974_v26  ;;  %v1987_v26 = vsel %vm1986_vm7, 1, %v6376_v34 }
  0x9a   :  { %5446 = vmatprep.subr.bf16.mxu0 %v6977_v54  ;;  %1989 = vperm.xlu1 %6274, %v1987_v26  }
  0x9b   :  { %5467 = vmatpush3.bf16.msra.mxu1 %v6993_v33 }
  0x9c   :  { %5468 = vmatprep.subr.bf16.mxu1 %v9369_v59 }
  0x9d   :  { %5448 = vmatpush1.bf16.msra.mxu0 %v7009_v38 }
  0x9e   :  { %5450 = vmatprep.subr.bf16.mxu0 %v7012_v62 }
  0x9f   :  { %5470 = vmatpush3.bf16.msra.mxu1 %v7027_v48  ;;  %v2429_v48 = vsel %vm2428_vm8, 1, %v6376_v34 }
  0xa0   :  { %5471 = vmatprep.subr.bf16.mxu1 %v9369_v59  ;;  %2431 = vperm.xlu1 %6274, %v2429_v48  }
  0xa1   :  { %5452 = vmatpush1.bf16.msra.mxu0 %v7041_v55 }
  0xa2   :  { %5478 = vmatprep.subr.bf16.mxu0 %v7044_v5 }
  0xa3   :  { %5473 = vmatpush3.bf16.msra.mxu1 %v7059_v1 }
  0xa4   :  { %5474 = vmatprep.subr.bf16.mxu1 %v9369_v59 }
  0xa7   :  { %5476 = vmatpush3.bf16.msra.mxu1 %v7090_v14  ;;  %v401_v14 = vld [vmem:[%s9362_s7] sm:$0x7] }
  0xa8   :  { %5509 = vmatprep.subr.bf16.mxu1 %v9369_v59  ;;  %v7367_v47 = vrot.slane %v401_v14, %v106_v41 }
  0xb9   :  { %v7413_v59 = vpop.permute.xlu0 %881 }
  0xba   :  { %9414 = vst [vmem:[#allocation16_spill] sm:$0xff] %v7413_v59  ;;  %vm883_vm9 = vcmp.eq.s32.totalorder %v7413_v59, 1 }
  0xfd   :  { %v4567_v58 = vpop.f32.mrb[0].mxu1 }
  0xfe   :  { %v7334_v63 = vadd.f32 %v4567_v58, %v7331_v42  ;;  %v7336_v0 = vpop.f32.mrb[1].mxu1  ;;  %v98_v58 = vsub.s32 0, %v7325_v40  ;;  %v7403_v40 = vld [vmem:[%s9363_s8] ss:$0 sm:$0xff] }
 0x101   :  { %v4570_v9 = vpop.f32.mrb[2].mxu1 }
 0x102   :  { %v7343_v15 = vadd.f32 %v4570_v9, %v7331_v42  ;;  %v300_v18 = vpop.f32.mrb[3].mxu1  ;;  %v7394_v9 = vrot.slane %v94_v51, %v98_v58 }
 0x103   :  { %v7347_v19 = vadd.f32 %v300_v18, %v7331_v42  ;;  %v7396_v18 = vrot.slane %v94_v51, %v102_v7 }
 0x104   :  { %9403 = vst [vmem:[#allocation5_spill] sm:$0xff] %v7343_v15 }
 0x105   :  { %v4573_v23 = vpop.f32.mrb[4].mxu1 }
 0x106   :  { %v7351_v54 = vadd.f32 %v4573_v23, %v7331_v42  ;;  %v310_v33 = vpop.f32.mrb[5].mxu1 }
 0x107   :  { %v7355_v38 = vadd.f32 %v310_v33, %v7331_v42 }
 0x108   :  { %9404 = vst [vmem:[#allocation6_spill] sm:$0xff] %v7351_v54  ;;  %v1799_v54 = vld [vmem:[%s9360_s5 + $0xc0] sm:$0xff] }
 0x109   :  { %9405 = vst [vmem:[#allocation7_spill] sm:$0xff] %v7355_v38  ;;  %v4576_v62 = vpop.f32.mrb[6].mxu1 }
 0x10a   :  { %v7359_v55 = vadd.f32 %v4576_v62, %v7331_v42  ;;  %v320_v5 = vpop.f32.mrb[7].mxu1 }
 0x10b   :  { %v7362_v1 = vadd.f32 %v320_v5, %v7331_v42 }
 0x10c   :  { %9406 = vst [vmem:[#allocation8_spill] sm:$0xff] %v7359_v55 }
 0x10d   :  { %9407 = vst [vmem:[#allocation9_spill] sm:$0xff] %v7362_v1 }
 0x11d   :  { %v4611_v30 = vpop.f32.mrb[8].mxu1 }
 0x11e   :  { %v7370_v36 = vadd.f32 %v4611_v30, %v7367_v47  ;;  %v597_v37 = vpop.f32.mrb[9].mxu1 }
 0x11f   :  { %v7373_v34 = vadd.f32 %v597_v37, %v7367_v47 }
 0x120   :  { %9408 = vst [vmem:[#allocation10_spill] sm:$0xff] %v7370_v36 }
 0x121   :  { %9409 = vst [vmem:[#allocation11_spill] sm:$0xff] %v7373_v34  ;;  %v4614_v43 = vpop.f32.mrb[10].mxu1 }
 0x122   :  { %v7376_v46 = vadd.f32 %v4614_v43, %v7367_v47  ;;  %v607_v49 = vpop.f32.mrb[11].mxu1 }
 0x123   :  { %v7379_v60 = vadd.f32 %v607_v49, %v7367_v47 }
 0x124   :  { %9410 = vst [vmem:[#allocation12_spill] sm:$0xff] %v7376_v46 }
 0x125   :  { %9411 = vst [vmem:[#allocation13_spill] sm:$0xff] %v7379_v60  ;;  %v4617_v61 = vpop.f32.mrb[12].mxu1 }
 0x126   :  { %v7382_v6 = vadd.f32 %v4617_v61, %v7367_v47  ;;  %v617_v12 = vpop.f32.mrb[13].mxu1  ;;  %v291_v61 = vadd.f32 %v7336_v0, %v7331_v42 }
 0x127   :  { %v7385_v17 = vadd.f32 %v617_v12, %v7367_v47 }
 0x128   :  { %9412 = vst [vmem:[#allocation14_spill] sm:$0xff] %v7382_v6 }
 0x129   :  { %9413 = vst [vmem:[#allocation15_spill] sm:$0xff] %v7385_v17  ;;  %v7387_v22 = vpop.f32.mrb[14].mxu1  ;;  %v1805_v17 = vld [vmem:[%s9360_s5 + $0xf0] sm:$0xff] }
 0x12a   :  { %v627_v32 = vpop.f32.mrb[15].mxu1 }
 0x12b   :  { %v7390_v41 = vadd.f32 %v627_v32, %v7367_v47 }
 0x137   :  { %v776_v11 = vpop.f32.mrb[0].mxu0 }
 0x138   :  { %v6205_v23 = vadd.f32 %v776_v11, %v7394_v9  ;;  %v778_v26 = vpop.f32.mrb[1].mxu0 }
 0x139   :  { %v6206_v62 = vadd.f32 %v778_v26, %v7396_v18 }
 0x13a   :  { %v855_v33 = vmul.f32 0.5, %v6205_v23 }
 0x13b   :  { %v860_v30 = vmul.f32 0.5, %v6206_v62 }
 0x13c   :  { %6275 = vtanh.f32 %v855_v33  ;;  %v7408_v33 = vrot.slane %v401_v14, %v98_v58 }
 0x13d   :  { %v847_v48 = vpop.f32.mrb[16].mxu1  ;;  %6277 = vtanh.f32 %v860_v30 }
 0x13e   :  { %v4655_v5 = vpop.f32.mrb[17].mxu1  ;;  %v870_v51 = vadd.f32 %v7403_v40, %v847_v48 }
 0x13f   :  { %v7410_v5 = vrot.slane %v401_v14, %v102_v7 }
 0x146   :  { %v6276_v37 = vpop.eup %6275 }
 0x147   :  { %v857_v43 = vadd.f32 1.0, %v6276_v37  ;;  %v6278_v32 = vpop.eup %6277 }
 0x148   :  { %v862_v23 = vadd.f32 1.0, %v6278_v32 }
 0x149   :  { %v858_v49 = vmul.f32 0.5, %v857_v43 }
 0x14a   :  { %v863_v26 = vmul.f32 0.5, %v862_v23  ;;  %v1564_v23 = vld [vmem:[%s9358_s4 + $0x50] sm:$0xff] }
 0x14b   :  { %v871_v12 = vmul.f32 %v870_v51, %v858_v49 }
 0x14c   :  { %v874_v30 = vsub.f32 1.0, %v863_v26  ;;  %v876_v43 = vmul.f32 0.0, %v863_v26 }
 0x14d   :  { %v872_v11 = vadd.f32 %v871_v12, %v291_v61  ;;  %v9415_v61 = vmov 0.0|0.0   ;;  %v9416_v12 = vmov 0.0  }
 0x14f   :  { %6279 = vtanh.f32 %v872_v11 }
 0x157   :  { %v1000_v62 = vpop.f32.mrb[30].mxu0 }
 0x158   :  { %v6235_v37 = vadd.f32 %v1000_v62, %v7408_v33  ;;  %v1002_v3 = vpop.f32.mrb[31].mxu0  ;;  %v1560_v62 = vld [vmem:[%s9358_s4 + $0x30] sm:$0xff] }
 0x159   :  { %v6280_v48 = vpop.eup %6279  ;;  %v6236_v51 = vadd.f32 %v1002_v3, %v7410_v5 }
 0x15a   :  { %v875_v42 = vmul.f32 %v6280_v48, %v874_v30  ;;  %v1080_v0 = vmul.f32 0.5, %v6235_v37  ;;  %v1563_v30 = vld [vmem:[%s9358_s4 + $0x48] sm:$0xff]  ;;  %v1562_v37 = vld [vmem:[%s9358_s4 + $0x40] sm:$0xff] }
 0x15b   :  { %v1085_v3 = vmul.f32 0.5, %v6236_v51  ;;  %v7530_v48 = vpack.c.bf16 %v1563_v30, %v1560_v62  ;;  %v1570_v51 = vld [vmem:[%s9358_s4 + $0x80] sm:$0xff]  ;;  %v1588_v62 = vld [vmem:[%s9358_s4 + $0x110] sm:$0xff] }
 0x15c   :  { %v877_v49 = vadd.f32 %v876_v43, %v875_v42  ;;  %6281 = vtanh.f32 %v1080_v0  ;;  %v1565_v43 = vld [vmem:[%s9358_s4 + $0x58] sm:$0xff]  ;;  %v1567_v0 = vld [vmem:[%s9358_s4 + $0x68] sm:$0xff] }
 0x15d   :  { %v1071_v58 = vpop.f32.mrb[18].mxu1  ;;  %6283 = vtanh.f32 %v1085_v3  ;;  %v7536_v42 = vpack.c.bf16 %v1565_v43, %v1562_v37  ;;  %v1568_v3 = vld [vmem:[%s9358_s4 + $0x70] sm:$0xff]  ;;  %v1587_v43 = vld [vmem:[%s9358_s4 + $0x108] sm:$0xff] }
 0x15e   :  { %v7419_v14 = vsel %vm883_vm9, %v877_v49, 0.0  ;;  %4201 = vmatmul.mubr.msk.f32.vlgmr.msra.gmra.mrb[2].mxu0 %vm883_vm9, %v877_v49  ;;  %4724 = vmatmul.mubr.msk.f32.vlgmr.msra.gmra.mrb[20].mxu1 %vm883_vm9, %v877_v49  ;;  %v4690_v7 = vpop.f32.mrb[19].mxu1  ;;  %v7546_v49 = vpack.c.bf16 %v1570_v51, %v1567_v0  ;;  %v1584_v37 = vld [vmem:[%s9358_s4 + $0xf0] sm:$0xff]  ;;  %v1586_v0 = vld [vmem:[%s9358_s4 + $0x100] sm:$0xff] }
 0x15f   :  { %885 = vst [vmem:[%s9364_s10] sm:$0xff] %v7419_v14  ;;  %5480 = vmatpush1.bf16.msra.mxu0 %v7072_v28  ;;  %5511 = vmatpush3.bf16.msra.mxu1 %v7120_v27  ;;  %v7443_v28 = vld [vmem:[%s9365_s9] ss:$0 sm:$0xff]  ;;  %v1569_v7 = vld [vmem:[%s9358_s4 + $0x78] sm:$0xff]  ;;  %v7642_v51 = vpack.c.bf16 %v1587_v43, %v1584_v37 }
 0x160   :  { %5482 = vmatprep.subr.bf16.mxu0 %v7075_v8  ;;  %5512 = vmatprep.subr.bf16.mxu1 %v9415_v61  ;;  %v1095_v32 = vadd.f32 %v7443_v28, %v1071_v58  ;;  %v1566_v58 = vld [vmem:[%s9358_s4 + $0x60] sm:$0xff]  ;;  %v1601_v37 = vld [vmem:[%s9358_s4 + $0x178] sm:$0xff] }
 0x161   :  { %1445 = vmatprep.mubr.f32.mxu0 %v9416_v12  ;;  %4758 = vmatprep.mubr.msk.f32.mxu1 %vm6378_vm2, %v9416_v12 }
 0x163   :  { %5484 = vmatpush1.bf16.msra.mxu0 %v7101_v50  ;;  %5514 = vmatpush3.bf16.msra.mxu1 %v7149_v45 }
 0x164   :  { %5486 = vmatprep.subr.bf16.mxu0 %v7105_v20  ;;  %5515 = vmatprep.subr.bf16.mxu1 %v9415_v61  ;;  %v633_v20 = vadd.f32 %v7387_v22, %v7367_v47  ;;  %v1561_v22 = vld [vmem:[%s9358_s4 + $0x38] sm:$0xff] }
 0x165   :  { %v7518_v26 = vpack.c.bf16 %v1564_v23, %v1561_v22  ;;  %v1585_v23 = vld [vmem:[%s9358_s4 + $0xf8] sm:$0xff] }
 0x166   :  { %v6282_v8 = vpop.eup %6281  ;;  %v7630_v30 = vpack.c.bf16 %v1588_v62, %v1585_v23  ;;  %v1598_v23 = vld [vmem:[%s9358_s4 + $0x160] sm:$0xff] }
 0x167   :  { %v1082_v27 = vadd.f32 1.0, %v6282_v8  ;;  %5488 = vmatpush1.bf16.msra.mxu0 %v7130_v31  ;;  %5517 = vmatpush3.bf16.msra.mxu1 %v7179_v2  ;;  %v6284_v31 = vpop.eup %6283  ;;  %v7558_v8 = vpack.c.bf16 %v1569_v7, %v1566_v58  ;;  %v1589_v58 = vld [vmem:[%s9358_s4 + $0x118] sm:$0xff]  ;;  %v7704_v43 = vpack.c.bf16 %v1601_v37, %v1598_v23 }
 0x168   :  { %5490 = vmatprep.subr.bf16.mxu0 %v7133_v35  ;;  %5518 = vmatprep.subr.bf16.mxu1 %v9415_v61  ;;  %v1087_v35 = vadd.f32 1.0, %v6284_v31  ;;  %v1572_v31 = vld [vmem:[%s9358_s4 + $0x90] sm:$0xff]  ;;  %v7648_v7 = vpack.c.bf16 %v1589_v58, %v1586_v0  ;;  %v1776_v0 = vld [vmem:[%s9360_s5 + $0x8] sm:$0xff]  ;;  %v1779_v58 = vld [vmem:[%s9360_s5 + $0x20] sm:$0xff] }
 0x169   :  { %v1083_v50 = vmul.f32 0.5, %v1082_v27  ;;  %v1571_v27 = vld [vmem:[%s9358_s4 + $0x88] sm:$0xff] }
 0x16b   :  { %v1096_v45 = vmul.f32 %v1095_v32, %v1083_v50  ;;  %5492 = vmatpush1.bf16.msra.mxu0 %v7161_v52  ;;  %5520 = vmatpush3.bf16.msra.mxu1 %v7207_v21  ;;  %v1088_v52 = vmul.f32 0.5, %v1087_v35  ;;  %v7470_v21 = vpop.permute.xlu0 %1106  ;;  %v7564_v32 = vpack.c.bf16 %v1571_v27, %v1568_v3  ;;  %v1573_v50 = vld [vmem:[%s9358_s4 + $0x98] sm:$0xff]  ;;  %v1574_v35 = vld [vmem:[%s9358_s4 + $0xa0] sm:$0xff]  ;;  %v1591_v3 = vld [vmem:[%s9358_s4 + $0x128] sm:$0xff] }
 0x16c   :  { %5494 = vmatprep.subr.bf16.mxu0 %v7164_v53  ;;  %5521 = vmatprep.subr.bf16.mxu1 %v9415_v61  ;;  %9417 = vst [vmem:[#allocation17_spill] sm:$0xff] %v7470_v21  ;;  %vm1108_vm10 = vcmp.eq.s32.totalorder %v7470_v21, 1  ;;  %v1594_v27 = vld [vmem:[%s9358_s4 + $0x140] sm:$0xff] }
 0x16d   :  { %v1097_v11 = vadd.f32 %v1096_v45, %v633_v20  ;;  %v1099_v53 = vsub.f32 1.0, %v1088_v52  ;;  %v1576_v20 = vld [vmem:[%s9358_s4 + $0xb0] sm:$0xff]  ;;  %v8466_v21 = vld [vmem:[%s9365_s9] ss:$0 sm:$0xff] }
 0x16e   :  { %v7574_v45 = vpack.c.bf16 %v1576_v20, %v1573_v50  ;;  %v7658_v50 = vpack.c.bf16 %v1594_v27, %v1591_v3  ;;  %v1590_v20 = vld [vmem:[%s9358_s4 + $0x120] sm:$0xff]  ;;  %v7714_v3 = vpack.c.bf16 %v1779_v58, %v1776_v0 }
 0x16f   :  { %6285 = vtanh.f32 %v1097_v11  ;;  %5496 = vmatpush1.bf16.msra.mxu0 %v7189_v10  ;;  %5523 = vmatpush3.bf16.msra.mxu1 %v7235_v44  ;;  %v1101_v10 = vmul.f32 0.0, %v1088_v52  ;;  %v1558_v44 = vld [vmem:[%s9358_s4 + $0x20] sm:$0xff]  ;;  %v1575_v11 = vld [vmem:[%s9358_s4 + $0xa8] sm:$0xff] }
 0x170   :  { %5498 = vmatprep.subr.bf16.mxu0 %v7192_v39  ;;  %5524 = vmatprep.subr.bf16.mxu1 %v9415_v61  ;;  %v7586_v52 = vpack.c.bf16 %v1575_v11, %v1572_v31  ;;  %v1593_v31 = vld [vmem:[%s9358_s4 + $0x138] sm:$0xff]  ;;  %v1592_v11 = vld [vmem:[%s9358_s4 + $0x130] sm:$0xff] }
 0x173   :  { %5500 = vmatpush1.bf16.msra.mxu0 %v7217_v25  ;;  %5526 = vmatpush3.bf16.msra.mxu1 %v7257_v4  ;;  %v1557_v4 = vld [vmem:[%s9358_s4 + $0x18] sm:$0xff] }
 0x174   :  { %5502 = vmatprep.subr.bf16.mxu0 %v7220_v29  ;;  %5527 = vmatprep.subr.bf16.mxu1 %v9415_v61  ;;  %v1555_v29 = vld [vmem:[%s9358_s4 + $0x8] sm:$0xff] }
 0x177   :  { %5504 = vmatpush1.bf16.msra.mxu0 %v7245_v56  ;;  %5529 = vmatpush3.bf16.msra.mxu1 %v7271_v16  ;;  %v7491_v56 = vpack.c.bf16 %v1558_v44, %v1555_v29  ;;  %v1578_v44 = vld [vmem:[%s9358_s4 + $0xc0] sm:$0xff] }
 0x178   :  { %5506 = vmatprep.subr.bf16.mxu0 %v7248_v57  ;;  %5530 = vmatprep.subr.bf16.mxu1 %v9415_v61  ;;  %v1554_v57 = vld [vmem:[%s9358_s4] sm:$0xff] }
 0x179   :  { %v6286_v2 = vpop.eup %6285  ;;  %v7502_v16 = vpack.c.bf16 %v1557_v4, %v1554_v57  ;;  %v1581_v57 = vld [vmem:[%s9358_s4 + $0xd8] sm:$0xff]  ;;  %v1580_v4 = vld [vmem:[%s9358_s4 + $0xd0] sm:$0xff] }
 0x17a   :  { %v1100_v39 = vmul.f32 %v6286_v2, %v1099_v53  ;;  %v1577_v53 = vld [vmem:[%s9358_s4 + $0xb8] sm:$0xff] }
 0x17b   :  { %5508 = vmatpush1.bf16.msra.mxu0 %v7267_v13  ;;  %5532 = vmatpush3.bf16.msra.mxu1 %v7283_v24  ;;  %v1556_v13 = vld [vmem:[%s9358_s4 + $0x10] sm:$0xff]  ;;  %v1559_v24 = vld [vmem:[%s9358_s4 + $0x28] sm:$0xff]  ;;  %v7592_v2 = vpack.c.bf16 %v1577_v53, %v1574_v35  ;;  %v7670_v35 = vpack.c.bf16 %v1593_v31, %v1590_v20 }
 0x17c   :  { %v7472_v25 = vadd.f32 %v1101_v10, %v1100_v39  ;;  %5565 = vmatprep.subr.bf16.mxu1 %v9415_v61  ;;  %5534 = vmatprep.subr.bf16.mxu0 %v7491_v56  ;;  %v7508_v47 = vpack.c.bf16 %v1559_v24, %v1556_v13  ;;  %v1579_v10 = vld [vmem:[%s9358_s4 + $0xc8] sm:$0xff]  ;;  %v1582_v39 = vld [vmem:[%s9358_s4 + $0xe0] sm:$0xff]  ;;  %v7614_v13 = vpack.c.bf16 %v1581_v57, %v1578_v44  ;;  %v1600_v44 = vld [vmem:[%s9358_s4 + $0x170] sm:$0xff] }
 0x17d   :  { %v7602_v29 = vpack.c.bf16 %v1582_v39, %v1579_v10  ;;  %v1583_v24 = vld [vmem:[%s9358_s4 + $0xe8] sm:$0xff]  ;;  %v1597_v39 = vld [vmem:[%s9358_s4 + $0x158] sm:$0xff] }
 0x17e   :  { %4204 = vmatmul.mubr.msk.f32.vlgmr.msra.gmra.mrb[28].mxu0 %vm1108_vm10, %v7472_v25  ;;  %4759 = vmatmul.mubr.msk.f32.vlgmr.msra.gmra.mrb[22].mxu1 %vm1108_vm10, %v7472_v25  ;;  %v7620_v22 = vpack.c.bf16 %v1583_v24, %v1580_v4  ;;  %v1595_v53 = vld [vmem:[%s9358_s4 + $0x148] sm:$0xff]  ;;  %v7686_v57 = vpack.c.bf16 %v1600_v44, %v1597_v39  ;;  %v1596_v4 = vld [vmem:[%s9358_s4 + $0x150] sm:$0xff] }
 0x17f   :  { %1666 = vmatprep.mubr.f32.mxu0 %v9416_v12  ;;  %4793 = vmatprep.mubr.msk.f32.mxu1 %vm6378_vm2, %v9416_v12  ;;  %v7676_v10 = vpack.c.bf16 %v1595_v53, %v1592_v11  ;;  %v1599_v24 = vld [vmem:[%s9358_s4 + $0x168] sm:$0xff] }
 0x180   :  { %5536 = vmatpush1.bf16.msra.mxu0 %v7502_v16  ;;  %5567 = vmatpush3.bf16.msra.mxu1 %v7508_v47  ;;  %v7698_v62 = vpack.c.bf16 %v1599_v24, %v1596_v4 }
 0x181   :  { %5568 = vmatprep.subr.bf16.mxu1 %v9415_v61  ;;  %5538 = vmatprep.subr.bf16.mxu0 %v7518_v26 }
 0x184   :  { %5540 = vmatpush1.bf16.msra.mxu0 %v7530_v48  ;;  %5570 = vmatpush3.bf16.msra.mxu1 %v7536_v42 }
 0x185   :  { %5571 = vmatprep.subr.bf16.mxu1 %v9415_v61  ;;  %5542 = vmatprep.subr.bf16.mxu0 %v7546_v49 }
 0x188   :  { %5544 = vmatpush1.bf16.msra.mxu0 %v7558_v8  ;;  %5573 = vmatpush3.bf16.msra.mxu1 %v7564_v32 }
 0x189   :  { %5574 = vmatprep.subr.bf16.mxu1 %v9415_v61  ;;  %5546 = vmatprep.subr.bf16.mxu0 %v7574_v45 }
 0x18c   :  { %5548 = vmatpush1.bf16.msra.mxu0 %v7586_v52  ;;  %5576 = vmatpush3.bf16.msra.mxu1 %v7592_v2 }
 0x18d   :  { %5577 = vmatprep.subr.bf16.mxu1 %v9415_v61  ;;  %5550 = vmatprep.subr.bf16.mxu0 %v7602_v29 }
 0x190   :  { %5552 = vmatpush1.bf16.msra.mxu0 %v7614_v13  ;;  %5579 = vmatpush3.bf16.msra.mxu1 %v7620_v22 }
 0x191   :  { %5580 = vmatprep.subr.bf16.mxu1 %v9415_v61  ;;  %5554 = vmatprep.subr.bf16.mxu0 %v7630_v30 }
 0x194   :  { %5556 = vmatpush1.bf16.msra.mxu0 %v7642_v51  ;;  %5582 = vmatpush3.bf16.msra.mxu1 %v7648_v7 }
 0x195   :  { %5583 = vmatprep.subr.bf16.mxu1 %v9415_v61  ;;  %5558 = vmatprep.subr.bf16.mxu0 %v7658_v50 }
 0x198   :  { %5560 = vmatpush1.bf16.msra.mxu0 %v7670_v35  ;;  %5585 = vmatpush3.bf16.msra.mxu1 %v7676_v10 }
 0x199   :  { %5586 = vmatprep.subr.bf16.mxu1 %v9415_v61  ;;  %5562 = vmatprep.subr.bf16.mxu0 %v7686_v57 }
 0x19c   :  { %5564 = vmatpush1.bf16.msra.mxu0 %v7698_v62  ;;  %5588 = vmatpush3.bf16.msra.mxu1 %v7704_v43 }
 0x19d   :  { %5621 = vmatprep.subr.bf16.mxu1 %v9415_v61  ;;  %5590 = vmatprep.subr.bf16.mxu0 %v7714_v3 }
 0x231   :  { %v1226_v27 = vpop.f32.mrb[2].mxu0  ;;  %v1297_v20 = vpop.f32.mrb[20].mxu1 }
 0x232   :  { %v6207_v31 = vadd.f32 %v1226_v27, %v7394_v9  ;;  %v1228_v11 = vpop.f32.mrb[3].mxu0  ;;  %v4725_v53 = vpop.f32.mrb[21].mxu1  ;;  %v1315_v0 = vadd.f32 %v7403_v40, %v1297_v20 }
 0x233   :  { %v6208_v44 = vadd.f32 %v1228_v11, %v7396_v18 }
 0x234   :  { %v1306_v39 = vmul.f32 0.5, %v6207_v31 }
 0x235   :  { %v1311_v4 = vmul.f32 0.5, %v6208_v44 }
 0x236   :  { %6287 = vtanh.f32 %v1306_v39 }
 0x237   :  { %6289 = vtanh.f32 %v1311_v4  ;;  %v1775_v4 = vld [vmem:[%s9360_s5] sm:$0xff] }
 0x240   :  { %v6288_v24 = vpop.eup %6287 }
 0x241   :  { %v1308_v23 = vadd.f32 1.0, %v6288_v24  ;;  %v6290_v59 = vpop.eup %6289 }
 0x242   :  { %v1313_v55 = vadd.f32 1.0, %v6290_v59  ;;  %v1777_v59 = vld [vmem:[%s9360_s5 + $0x10] sm:$0xff] }
 0x243   :  { %v1309_v37 = vmul.f32 0.5, %v1308_v23 }
 0x244   :  { %v1314_v27 = vmul.f32 0.5, %v1313_v55  ;;  %v1780_v55 = vld [vmem:[%s9360_s5 + $0x28] sm:$0xff] }
 0x245   :  { %v1316_v58 = vmul.f32 %v1315_v0, %v1309_v37  ;;  %v1782_v37 = vld [vmem:[%s9360_s5 + $0x38] sm:$0xff]  ;;  %v1785_v0 = vld [vmem:[%s9360_s5 + $0x50] sm:$0xff] }
 0x246   :  { %v1319_v31 = vsub.f32 1.0, %v1314_v27 }
 0x247   :  { %v1317_v34 = vadd.f32 %v1316_v58, %v7334_v63  ;;  %v1778_v63 = vld [vmem:[%s9360_s5 + $0x18] sm:$0xff] }
 0x248   :  { %v7748_v1 = vpack.c.bf16 %v1778_v63, %v1775_v4  ;;  %v1786_v4 = vld [vmem:[%s9360_s5 + $0x58] sm:$0xff] }
 0x249   :  { %6291 = vtanh.f32 %v1317_v34  ;;  %v7738_v34 = vpop.permute.xlu1 %1326 }
 0x24a   :  { %9418 = vst [vmem:[#allocation18_spill] sm:$0xff] %v7738_v34  ;;  %vm1328_vm11 = vcmp.eq.s32.totalorder %v7738_v34, 1 }
 0x251   :  { %v1447_v36 = vpop.f32.mrb[28].mxu0  ;;  %v7722_v53 = vpop.f32.mrb[22].mxu1 }
 0x252   :  { %v6233_v11 = vadd.f32 %v1447_v36, %v7408_v33  ;;  %v1449_v39 = vpop.f32.mrb[29].mxu0  ;;  %v4760_v44 = vpop.f32.mrb[23].mxu1  ;;  %v1321_v36 = vmul.f32 %v1314_v27, %v7419_v14  ;;  %v7750_v27 = vpack.c.bf16 %v1780_v55, %v1777_v59  ;;  %v1788_v55 = vld [vmem:[%s9360_s5 + $0x68] sm:$0xff]  ;;  %v1536_v38 = vadd.f32 %v7443_v28, %v7722_v53  ;;  %v1806_v53 = vld [vmem:[%s9360_s5 + $0xf8] sm:$0xff] }
 0x253   :  { %v6292_v20 = vpop.eup %6291  ;;  %v6234_v58 = vadd.f32 %v1449_v39, %v7410_v5  ;;  %v1783_v39 = vld [vmem:[%s9360_s5 + $0x40] sm:$0xff] }
 0x254   :  { %v1320_v24 = vmul.f32 %v6292_v20, %v1319_v31  ;;  %v1527_v23 = vmul.f32 0.5, %v6233_v11  ;;  %v1781_v31 = vld [vmem:[%s9360_s5 + $0x30] sm:$0xff]  ;;  %v7755_v11 = vpack.c.bf16 %v1785_v0, %v1782_v37  ;;  %v1784_v20 = vld [vmem:[%s9360_s5 + $0x48] sm:$0xff]  ;;  %v1787_v37 = vld [vmem:[%s9360_s5 + $0x60] sm:$0xff] }
 0x256   :  { %v1322_v44 = vadd.f32 %v1321_v36, %v1320_v24  ;;  %6293 = vtanh.f32 %v1527_v23  ;;  %v1791_v36 = vld [vmem:[%s9360_s5 + $0x80] sm:$0xff]  ;;  %v1532_v24 = vmul.f32 0.5, %v6234_v58  ;;  %v7788_v23 = vpack.c.bf16 %v1786_v4, %v1783_v39  ;;  %v1790_v58 = vld [vmem:[%s9360_s5 + $0x78] sm:$0xff]  ;;  %v1797_v39 = vld [vmem:[%s9360_s5 + $0xb0] sm:$0xff] }
 0x257   :  { %v7795_v0 = vpack.c.bf16 %v1791_v36, %v1788_v55  ;;  %v7817_v4 = vpack.c.bf16 %v1790_v58, %v1787_v37  ;;  %v1793_v55 = vld [vmem:[%s9360_s5 + $0x90] sm:$0xff]  ;;  %v1795_v37 = vld [vmem:[%s9360_s5 + $0xa0] sm:$0xff]  ;;  %v1798_v58 = vld [vmem:[%s9360_s5 + $0xb8] sm:$0xff] }
 0x258   :  { %v1329_v63 = vsel %vm1328_vm11, %v1322_v44, 0.0  ;;  %v7771_v59 = vsel %vm1328_vm11, %v1322_v44, %v7419_v14  ;;  %v7786_v14 = vpack.c.bf16 %v1784_v20, %v1781_v31  ;;  %v1789_v44 = vld [vmem:[%s9360_s5 + $0x70] sm:$0xff]  ;;  %v1792_v31 = vld [vmem:[%s9360_s5 + $0x88] sm:$0xff]  ;;  %v1794_v20 = vld [vmem:[%s9360_s5 + $0x98] sm:$0xff]  ;;  %6295 = vtanh.f32 %v1532_v24 }
 0x259   :  { %4203 = vst [vmem:[%s9364_s10 + $0x8] sm:$0xff] %v1329_v63  ;;  %1667 = vmatmul.mubr.f32.vlgmr.msra.gmra.mrb[4].mxu0 %v7771_v59  ;;  %4794 = vmatmul.mubr.f32.vlgmr.msra.gmra.mrb[24].mxu1 %v7771_v59  ;;  %v7819_v63 = vpack.c.bf16 %v1792_v31, %v1789_v44  ;;  %v7826_v36 = vpack.c.bf16 %v1797_v39, %v1794_v20  ;;  %v1796_v24 = vld [vmem:[%s9360_s5 + $0xa8] sm:$0xff]  ;;  %v1803_v20 = vld [vmem:[%s9360_s5 + $0xe0] sm:$0xff] }
 0x25a   :  { %5592 = vmatpush1.bf16.msra.mxu0 %v7748_v1  ;;  %5623 = vmatpush3.bf16.msra.mxu1 %v7750_v27  ;;  %v1800_v31 = vld [vmem:[%s9360_s5 + $0xc8] sm:$0xff]  ;;  %v7845_v34 = vpack.c.bf16 %v1796_v24, %v1793_v55  ;;  %v7847_v60 = vpack.c.bf16 %v1798_v58, %v1795_v37  ;;  %v1802_v55 = vld [vmem:[%s9360_s5 + $0xd8] sm:$0xff]  ;;  %v1801_v24 = vld [vmem:[%s9360_s5 + $0xd0] sm:$0xff] }
 0x25b   :  { %5594 = vmatprep.subr.bf16.mxu0 %v7755_v11  ;;  %5624 = vmatprep.subr.bf16.mxu1 %v9415_v61  ;;  %v1804_v37 = vld [vmem:[%s9360_s5 + $0xe8] sm:$0xff]  ;;  %v1809_v58 = vld [vmem:[%s9360_s5 + $0x110] sm:$0xff] }
 0x25c   :  { %1887 = vmatprep.mubr.f32.mxu0 %v9416_v12  ;;  %4828 = vmatprep.mubr.msk.f32.mxu1 %vm6378_vm2, %v9416_v12 }
 0x25e   :  { %5596 = vmatpush1.bf16.msra.mxu0 %v7786_v14  ;;  %5626 = vmatpush3.bf16.msra.mxu1 %v7788_v23 }
 0x25f   :  { %5598 = vmatprep.subr.bf16.mxu0 %v7795_v0  ;;  %5627 = vmatprep.subr.bf16.mxu1 %v9415_v61 }
 0x260   :  { %v6294_v44 = vpop.eup %6293 }
 0x261   :  { %v1529_v39 = vadd.f32 1.0, %v6294_v44  ;;  %v7856_v44 = vpack.c.bf16 %v1803_v20, %v1800_v31  ;;  %v7875_v20 = vpack.c.bf16 %v1802_v55, %v1799_v54  ;;  %v1808_v54 = vld [vmem:[%s9360_s5 + $0x108] sm:$0xff]  ;;  %v1810_v55 = vld [vmem:[%s9360_s5 + $0x118] sm:$0xff] }
 0x262   :  { %5600 = vmatpush1.bf16.msra.mxu0 %v7817_v4  ;;  %5629 = vmatpush3.bf16.msra.mxu1 %v7819_v63  ;;  %v6296_v15 = vpop.eup %6295 }
 0x263   :  { %v1530_v46 = vmul.f32 0.5, %v1529_v39  ;;  %5602 = vmatprep.subr.bf16.mxu0 %v7826_v36  ;;  %5630 = vmatprep.subr.bf16.mxu1 %v9415_v61  ;;  %9419 = vst [vmem:[#allocation19_spill] sm:$0xff] %v7856_v44  ;;  %v7877_v39 = vpack.c.bf16 %v1804_v37, %v1801_v24  ;;  %v1815_v24 = vld [vmem:[%s9360_s5 + $0x140] sm:$0xff]  ;;  %v1534_v37 = vadd.f32 1.0, %v6296_v15  ;;  %v1814_v15 = vld [vmem:[%s9360_s5 + $0x138] sm:$0xff] }
 0x265   :  { %v1537_v31 = vmul.f32 %v1536_v38, %v1530_v46  ;;  %9420 = vst [vmem:[#allocation20_spill] sm:$0xff] %v7877_v39  ;;  %v7885_v38 = vpack.c.bf16 %v1809_v58, %v1806_v53  ;;  %v1807_v46 = vld [vmem:[%s9360_s5 + $0x100] sm:$0xff]  ;;  %v7904_v53 = vpack.c.bf16 %v1808_v54, %v1805_v17  ;;  %v1816_v17 = vld [vmem:[%s9360_s5 + $0x148] sm:$0xff]  ;;  %v1818_v54 = vld [vmem:[%s9360_s5 + $0x158] sm:$0xff] }
 0x266   :  { %5604 = vmatpush1.bf16.msra.mxu0 %v7845_v34  ;;  %5632 = vmatpush3.bf16.msra.mxu1 %v7847_v60  ;;  %v7906_v58 = vpack.c.bf16 %v1810_v55, %v1807_v46  ;;  %v1821_v46 = vld [vmem:[%s9360_s5 + $0x170] sm:$0xff]  ;;  %v1535_v55 = vmul.f32 0.5, %v1534_v37  ;;  %v1820_v37 = vld [vmem:[%s9360_s5 + $0x168] sm:$0xff] }
 0x267   :  { %v1538_v6 = vadd.f32 %v1537_v31, %v7390_v41  ;;  %5606 = vmatprep.subr.bf16.mxu0 %v7856_v44  ;;  %5633 = vmatprep.subr.bf16.mxu1 %v9415_v61  ;;  %9421 = vst [vmem:[#allocation21_spill] sm:$0xff] %v7885_v38  ;;  %v1812_v41 = vld [vmem:[%s9360_s5 + $0x128] sm:$0xff]  ;;  %9422 = vst [vmem:[#allocation22_spill] sm:$0xff] %v7904_v53  ;;  %v1811_v31 = vld [vmem:[%s9360_s5 + $0x120] sm:$0xff] }
 0x268   :  { %9423 = vst [vmem:[#allocation23_spill] sm:$0xff] %v7906_v58  ;;  %v7913_v44 = vpack.c.bf16 %v1815_v24, %v1812_v41  ;;  %v7932_v41 = vpack.c.bf16 %v1814_v15, %v1811_v31  ;;  %v1819_v31 = vld [vmem:[%s9360_s5 + $0x160] sm:$0xff]  ;;  %v1822_v15 = vld [vmem:[%s9360_s5 + $0x178] sm:$0xff] }
 0x269   :  { %6297 = vtanh.f32 %v1538_v6  ;;  %v1813_v6 = vld [vmem:[%s9360_s5 + $0x130] sm:$0xff] }
 0x26a   :  { %5608 = vmatpush1.bf16.msra.mxu0 %v7875_v20  ;;  %5635 = vmatpush3.bf16.msra.mxu1 %v7877_v39  ;;  %9424 = vst [vmem:[#allocation24_spill] sm:$0xff] %v7913_v44  ;;  %9425 = vst [vmem:[#allocation25_spill] sm:$0xff] %v7932_v41  ;;  %v7934_v24 = vpack.c.bf16 %v1816_v17, %v1813_v6  ;;  %v7941_v39 = vpack.c.bf16 %v1821_v46, %v1818_v54  ;;  %v1540_v6 = vsub.f32 1.0, %v1535_v55 }
 0x26b   :  { %5610 = vmatprep.subr.bf16.mxu0 %v7885_v38  ;;  %5636 = vmatprep.subr.bf16.mxu1 %v9415_v61  ;;  %v1817_v38 = vld [vmem:[%s9360_s5 + $0x150] sm:$0xff]  ;;  %v7956_v54 = vpack.c.bf16 %v1822_v15, %v1819_v31 }
 0x26c   :  { %v7954_v17 = vpack.c.bf16 %v1820_v37, %v1817_v38 }
 0x26e   :  { %5612 = vmatpush1.bf16.msra.mxu0 %v7904_v53  ;;  %5638 = vmatpush3.bf16.msra.mxu1 %v7906_v58 }
 0x26f   :  { %5614 = vmatprep.subr.bf16.mxu0 %v7913_v44  ;;  %5639 = vmatprep.subr.bf16.mxu1 %v9415_v61  ;;  %v7963_v44 = vsel %vm1108_vm10, %v7472_v25, 0.0 }
 0x270   :  { %9426 = vst [vmem:[#allocation26_spill] sm:$0xff] %v7963_v44  ;;  %v1542_v53 = vmul.f32 %v1535_v55, %v7963_v44  ;;  %v8025_v55 = vpop.permute.xlu0 %1768 }
 0x271   :  { %9429 = vst [vmem:[#allocation29_spill] sm:$0xff] %v8025_v55  ;;  %vm1770_vm13 = vcmp.eq.s32.totalorder %v8025_v55, 1 }
 0x272   :  { %5616 = vmatpush1.bf16.msra.mxu0 %v7932_v41  ;;  %5641 = vmatpush3.bf16.msra.mxu1 %v7934_v24  ;;  %v7966_v41 = vpop.permute.xlu1 %1547 }
 0x273   :  { %v6298_v46 = vpop.eup %6297  ;;  %5618 = vmatprep.subr.bf16.mxu0 %v7941_v39  ;;  %5642 = vmatprep.subr.bf16.mxu1 %v9415_v61  ;;  %9427 = vst [vmem:[#allocation27_spill] sm:$0xff] %v7966_v41  ;;  %vm1549_vm12 = vcmp.eq.s32.totalorder %v7966_v41, 1 }
 0x274   :  { %v1541_v58 = vmul.f32 %v6298_v46, %v1540_v6  ;;  %v9431_v46 = vld [vmem:[#allocation19_spill] sm:$0xff] }
 0x276   :  { %5620 = vmatpush1.bf16.msra.mxu0 %v7954_v17  ;;  %5644 = vmatpush3.bf16.msra.mxu1 %v7956_v54  ;;  %v7970_v38 = vadd.f32 %v1542_v53, %v1541_v58 }
 0x277   :  { %5646 = vmatprep.subr.bf16.mxu0 %v7491_v56  ;;  %5677 = vmatprep.subr.bf16.mxu1 %v9415_v61 }
 0x278   :  { %9428 = vst [vmem:[#allocation28_spill] sm:$0xff] %v7970_v38  ;;  %v7979_v25 = vsel %vm1549_vm12, %v7970_v38, %v7963_v44  ;;  %v2683_v38 = vld [vmem:[%s9360_s5 + $0xf0] sm:$0xff] }
 0x279   :  { %1888 = vmatmul.mubr.f32.vlgmr.msra.gmra.mrb[26].mxu0 %v7979_v25  ;;  %4829 = vmatmul.mubr.f32.vlgmr.msra.gmra.mrb[26].mxu1 %v7979_v25 }
 0x27a   :  { %5648 = vmatpush1.bf16.msra.mxu0 %v7502_v16  ;;  %5679 = vmatpush3.bf16.msra.mxu1 %v7508_v47 }
 0x27b   :  { %5650 = vmatprep.subr.bf16.mxu0 %v7518_v26  ;;  %5680 = vmatprep.subr.bf16.mxu1 %v9415_v61 }
 0x27c   :  { %2108 = vmatprep.mubr.f32.mxu0 %v9416_v12  ;;  %4863 = vmatprep.mubr.msk.f32.mxu1 %vm6378_vm2, %v9416_v12 }
 0x27e   :  { %5652 = vmatpush1.bf16.msra.mxu0 %v7530_v48  ;;  %5682 = vmatpush3.bf16.msra.mxu1 %v7536_v42 }
 0x27f   :  { %5654 = vmatprep.subr.bf16.mxu0 %v7546_v49  ;;  %5683 = vmatprep.subr.bf16.mxu1 %v9415_v61 }
 0x282   :  { %5656 = vmatpush1.bf16.msra.mxu0 %v7558_v8  ;;  %5685 = vmatpush3.bf16.msra.mxu1 %v7564_v32 }
 0x283   :  { %5658 = vmatprep.subr.bf16.mxu0 %v7574_v45  ;;  %5686 = vmatprep.subr.bf16.mxu1 %v9415_v61 }
 0x286   :  { %5660 = vmatpush1.bf16.msra.mxu0 %v7586_v52  ;;  %5688 = vmatpush3.bf16.msra.mxu1 %v7592_v2 }
 0x287   :  { %5662 = vmatprep.subr.bf16.mxu0 %v7602_v29  ;;  %5689 = vmatprep.subr.bf16.mxu1 %v9415_v61 }
 0x28a   :  { %5664 = vmatpush1.bf16.msra.mxu0 %v7614_v13  ;;  %5691 = vmatpush3.bf16.msra.mxu1 %v7620_v22 }
 0x28b   :  { %5666 = vmatprep.subr.bf16.mxu0 %v7630_v30  ;;  %5692 = vmatprep.subr.bf16.mxu1 %v9415_v61 }
 0x28e   :  { %5668 = vmatpush1.bf16.msra.mxu0 %v7642_v51  ;;  %5694 = vmatpush3.bf16.msra.mxu1 %v7648_v7 }
 0x28f   :  { %5670 = vmatprep.subr.bf16.mxu0 %v7658_v50  ;;  %5695 = vmatprep.subr.bf16.mxu1 %v9415_v61 }
 0x292   :  { %5672 = vmatpush1.bf16.msra.mxu0 %v7670_v35  ;;  %5697 = vmatpush3.bf16.msra.mxu1 %v7676_v10 }
 0x293   :  { %5674 = vmatprep.subr.bf16.mxu0 %v7686_v57  ;;  %5698 = vmatprep.subr.bf16.mxu1 %v9415_v61 }
 0x296   :  { %5676 = vmatpush1.bf16.msra.mxu0 %v7698_v62  ;;  %5700 = vmatpush3.bf16.msra.mxu1 %v7704_v43 }
 0x297   :  { %5702 = vmatprep.subr.bf16.mxu0 %v7714_v3  ;;  %5733 = vmatprep.subr.bf16.mxu1 %v9415_v61 }
 0x32c   :  { %v1668_v56 = vpop.f32.mrb[4].mxu0  ;;  %v1739_v16 = vpop.f32.mrb[24].mxu1 }
 0x32d   :  { %v6209_v47 = vadd.f32 %v1668_v56, %v7394_v9  ;;  %v1670_v26 = vpop.f32.mrb[5].mxu0  ;;  %v4795_v48 = vpop.f32.mrb[25].mxu1  ;;  %v1757_v2 = vadd.f32 %v7403_v40, %v1739_v16  ;;  %v9436_v56 = vld [vmem:[#allocation24_spill] sm:$0xff] }
 0x32e   :  { %v6210_v49 = vadd.f32 %v1670_v26, %v7396_v18 }
 0x32f   :  { %v1748_v42 = vmul.f32 0.5, %v6209_v47  ;;  %v9437_v47 = vld [vmem:[#allocation25_spill] sm:$0xff] }
 0x330   :  { %v1753_v8 = vmul.f32 0.5, %v6210_v49 }
 0x331   :  { %6299 = vtanh.f32 %v1748_v42  ;;  %v8074_v42 = vpop.permute.xlu1 %1989 }
 0x332   :  { %6301 = vtanh.f32 %v1753_v8  ;;  %vm1991_vm14 = vcmp.eq.s32.totalorder %v8074_v42, 1  ;;  %v2441_v8 = vld [vmem:[%s9358_s4 + $0x18] sm:$0xff] }
 0x33b   :  { %v6300_v32 = vpop.eup %6299 }
 0x33c   :  { %v1750_v45 = vadd.f32 1.0, %v6300_v32  ;;  %v6302_v13 = vpop.eup %6301  ;;  %v2440_v32 = vld [vmem:[%s9358_s4 + $0x10] sm:$0xff] }
 0x33d   :  { %v1755_v30 = vadd.f32 1.0, %v6302_v13  ;;  %v2448_v13 = vld [vmem:[%s9358_s4 + $0x50] sm:$0xff] }
 0x33e   :  { %v1751_v52 = vmul.f32 0.5, %v1750_v45 }
 0x33f   :  { %v1756_v51 = vmul.f32 0.5, %v1755_v30  ;;  %v2444_v30 = vld [vmem:[%s9358_s4 + $0x30] sm:$0xff] }
 0x340   :  { %v1758_v29 = vmul.f32 %v1757_v2, %v1751_v52  ;;  %v2443_v52 = vld [vmem:[%s9358_s4 + $0x28] sm:$0xff] }
 0x341   :  { %v1761_v35 = vsub.f32 1.0, %v1756_v51  ;;  %v1763_v53 = vmul.f32 %v1756_v51, %v7771_v59  ;;  %v8116_v2 = vpack.c.bf16 %v2443_v52, %v2440_v32  ;;  %v2447_v51 = vld [vmem:[%s9358_s4 + $0x48] sm:$0xff] }
 0x342   :  { %v1759_v22 = vadd.f32 %v1758_v29, %v7347_v19  ;;  %v2445_v29 = vld [vmem:[%s9358_s4 + $0x38] sm:$0xff]  ;;  %v2475_v52 = vld [vmem:[%s9358_s4 + $0x128] sm:$0xff] }
 0x344   :  { %6303 = vtanh.f32 %v1759_v22  ;;  %v8126_v22 = vpack.c.bf16 %v2448_v13, %v2445_v29  ;;  %v2478_v29 = vld [vmem:[%s9358_s4 + $0x140] sm:$0xff] }
 0x345   :  { %v8266_v13 = vpack.c.bf16 %v2478_v29, %v2475_v52  ;;  %v8331_v29 = vld [vmem:[%s9363_s8] ss:$0 sm:$0xff] }
 0x34c   :  { %v1889_v7 = vpop.f32.mrb[26].mxu0  ;;  %v1960_v50 = vpop.f32.mrb[26].mxu1 }
 0x34d   :  { %v6231_v10 = vadd.f32 %v1889_v7, %v7408_v33  ;;  %v1891_v57 = vpop.f32.mrb[27].mxu0  ;;  %v4830_v62 = vpop.f32.mrb[27].mxu1  ;;  %v2446_v7 = vld [vmem:[%s9358_s4 + $0x40] sm:$0xff] }
 0x34e   :  { %v6304_v43 = vpop.eup %6303  ;;  %v6232_v40 = vadd.f32 %v1891_v57, %v7410_v5  ;;  %v2451_v57 = vld [vmem:[%s9358_s4 + $0x68] sm:$0xff]  ;;  %v2454_v62 = vld [vmem:[%s9358_s4 + $0x80] sm:$0xff] }
 0x34f   :  { %v1762_v3 = vmul.f32 %v6304_v43, %v1761_v35  ;;  %v1969_v58 = vmul.f32 0.5, %v6231_v10  ;;  %v2449_v35 = vld [vmem:[%s9358_s4 + $0x58] sm:$0xff]  ;;  %v8154_v43 = vpack.c.bf16 %v2454_v62, %v2451_v57  ;;  %v2479_v57 = vld [vmem:[%s9358_s4 + $0x148] sm:$0xff] }
 0x350   :  { %v1974_v15 = vmul.f32 0.5, %v6232_v40  ;;  %v8144_v10 = vpack.c.bf16 %v2449_v35, %v2446_v7  ;;  %v2476_v7 = vld [vmem:[%s9358_s4 + $0x130] sm:$0xff] }
 0x351   :  { %6305 = vtanh.f32 %v1969_v58  ;;  %v1764_v19 = vadd.f32 %v1763_v53, %v1762_v3  ;;  %v2450_v3 = vld [vmem:[%s9358_s4 + $0x60] sm:$0xff]  ;;  %v2453_v53 = vld [vmem:[%s9358_s4 + $0x78] sm:$0xff]  ;;  %v2452_v58 = vld [vmem:[%s9358_s4 + $0x70] sm:$0xff]  ;;  %v8284_v62 = vpack.c.bf16 %v2479_v57, %v2476_v7 }
 0x352   :  { %6307 = vtanh.f32 %v1974_v15  ;;  %v8166_v40 = vpack.c.bf16 %v2453_v53, %v2450_v3  ;;  %v2457_v15 = vld [vmem:[%s9358_s4 + $0x98] sm:$0xff]  ;;  %v2484_v53 = vld [vmem:[%s9358_s4 + $0x170] sm:$0xff]  ;;  %v9440_v57 = vld [vmem:[#allocation5_spill] sm:$0xff] }
 0x353   :  { %v1771_v37 = vsel %vm1770_vm13, %v1764_v19, 0.0  ;;  %v8033_v31 = vsel %vm1770_vm13, %v1764_v19, %v7771_v59  ;;  %v1978_v59 = vadd.f32 %v7443_v28, %v1960_v50  ;;  %v9432_v28 = vld [vmem:[#allocation20_spill] sm:$0xff]  ;;  %v8138_v50 = vpack.c.bf16 %v2447_v51, %v2444_v30  ;;  %v2455_v19 = vld [vmem:[%s9358_s4 + $0x88] sm:$0xff]  ;;  %v2474_v30 = vld [vmem:[%s9358_s4 + $0x120] sm:$0xff] }
 0x354   :  { %4206 = vst [vmem:[%s9364_s10 + $0x10] sm:$0xff] %v1771_v37  ;;  %2109 = vmatmul.mubr.f32.vlgmr.msra.gmra.mrb[6].mxu0 %v8033_v31  ;;  %4864 = vmatmul.mubr.f32.vlgmr.msra.gmra.mrb[28].mxu1 %v8033_v31  ;;  %v8172_v37 = vpack.c.bf16 %v2455_v19, %v2452_v58  ;;  %v2477_v51 = vld [vmem:[%s9358_s4 + $0x138] sm:$0xff]  ;;  %v2480_v19 = vld [vmem:[%s9358_s4 + $0x150] sm:$0xff] }
 0x355   :  { %5704 = vmatpush1.bf16.msra.mxu0 %v7748_v1  ;;  %5735 = vmatpush3.bf16.msra.mxu1 %v7750_v27  ;;  %v8278_v35 = vpack.c.bf16 %v2477_v51, %v2474_v30  ;;  %v2481_v3 = vld [vmem:[%s9358_s4 + $0x158] sm:$0xff] }
 0x356   :  { %5706 = vmatprep.subr.bf16.mxu0 %v7755_v11  ;;  %5736 = vmatprep.subr.bf16.mxu1 %v9415_v61  ;;  %v8294_v58 = vpack.c.bf16 %v2484_v53, %v2481_v3 }
 0x357   :  { %2329 = vmatprep.mubr.f32.mxu0 %v9416_v12  ;;  %4898 = vmatprep.mubr.msk.f32.mxu1 %vm6378_vm2, %v9416_v12 }
 0x359   :  { %5708 = vmatpush1.bf16.msra.mxu0 %v7786_v14  ;;  %5738 = vmatpush3.bf16.msra.mxu1 %v7788_v23 }
 0x35a   :  { %5710 = vmatprep.subr.bf16.mxu0 %v7795_v0  ;;  %5739 = vmatprep.subr.bf16.mxu1 %v9415_v61  ;;  %v9430_v0 = vld [vmem:[#allocation14_spill] sm:$0xff] }
 0x35b   :  { %v6306_v1 = vpop.eup %6305  ;;  %9438 = vst [vmem:[#allocation14_spill] sm:$0xff] %v8074_v42  ;;  %v9443_v42 = vld [vmem:[#allocation15_spill] sm:$0xff] }
 0x35c   :  { %v1971_v27 = vadd.f32 1.0, %v6306_v1  ;;  %v6308_v23 = vpop.eup %6307  ;;  %v2460_v1 = vld [vmem:[%s9358_s4 + $0xb0] sm:$0xff] }
 0x35d   :  { %5712 = vmatpush1.bf16.msra.mxu0 %v7817_v4  ;;  %5741 = vmatpush3.bf16.msra.mxu1 %v7819_v63  ;;  %v1976_v4 = vadd.f32 1.0, %v6308_v23  ;;  %v9433_v63 = vld [vmem:[#allocation21_spill] sm:$0xff] }
 0x35e   :  { %v1972_v11 = vmul.f32 0.5, %v1971_v27  ;;  %5714 = vmatprep.subr.bf16.mxu0 %v7826_v36  ;;  %5742 = vmatprep.subr.bf16.mxu1 %v9415_v61  ;;  %v9434_v36 = vld [vmem:[#allocation22_spill] sm:$0xff]  ;;  %v8182_v27 = vpack.c.bf16 %v2460_v1, %v2457_v15  ;;  %v2482_v1 = vld [vmem:[%s9358_s4 + $0x160] sm:$0xff] }
 0x35f   :  { %v2483_v15 = vld [vmem:[%s9358_s4 + $0x168] sm:$0xff] }
 0x360   :  { %v1979_v14 = vmul.f32 %v1978_v59, %v1972_v11  ;;  %v2456_v11 = vld [vmem:[%s9358_s4 + $0x90] sm:$0xff]  ;;  %v2459_v59 = vld [vmem:[%s9358_s4 + $0xa8] sm:$0xff] }
 0x361   :  { %5716 = vmatpush1.bf16.msra.mxu0 %v7845_v34  ;;  %5744 = vmatpush3.bf16.msra.mxu1 %v7847_v60  ;;  %v1977_v34 = vmul.f32 0.5, %v1976_v4  ;;  %v9435_v60 = vld [vmem:[#allocation23_spill] sm:$0xff]  ;;  %v8194_v23 = vpack.c.bf16 %v2459_v59, %v2456_v11  ;;  %v2466_v4 = vld [vmem:[%s9358_s4 + $0xe0] sm:$0xff]  ;;  %v8306_v11 = vpack.c.bf16 %v2483_v15, %v2480_v19  ;;  %v2485_v59 = vld [vmem:[%s9358_s4 + $0x178] sm:$0xff] }
 0x362   :  { %v1980_v6 = vadd.f32 %v1979_v14, %v9430_v0  ;;  %5718 = vmatprep.subr.bf16.mxu0 %v9431_v46  ;;  %5745 = vmatprep.subr.bf16.mxu1 %v9415_v61  ;;  %v2458_v14 = vld [vmem:[%s9358_s4 + $0xa0] sm:$0xff]  ;;  %v2461_v0 = vld [vmem:[%s9358_s4 + $0xb8] sm:$0xff]  ;;  %v2463_v46 = vld [vmem:[%s9358_s4 + $0xc8] sm:$0xff] }
 0x363   :  { %v1982_v16 = vsub.f32 1.0, %v1977_v34  ;;  %v1984_v48 = vmul.f32 %v1977_v34, %v7979_v25  ;;  %v2465_v34 = vld [vmem:[%s9358_s4 + $0xd8] sm:$0xff] }
 0x364   :  { %6309 = vtanh.f32 %v1980_v6  ;;  %v8200_v6 = vpack.c.bf16 %v2461_v0, %v2458_v14  ;;  %v8312_v14 = vpack.c.bf16 %v2485_v59, %v2482_v1  ;;  %v2654_v0 = vld [vmem:[%s9360_s5 + $0x8] sm:$0xff] }
 0x365   :  { %5720 = vmatpush1.bf16.msra.mxu0 %v7875_v20  ;;  %5747 = vmatpush3.bf16.msra.mxu1 %v9432_v28  ;;  %v8210_v28 = vpack.c.bf16 %v2466_v4, %v2463_v46  ;;  %v2657_v46 = vld [vmem:[%s9360_s5 + $0x20] sm:$0xff] }
 0x366   :  { %5722 = vmatprep.subr.bf16.mxu0 %v9433_v63  ;;  %5748 = vmatprep.subr.bf16.mxu1 %v9415_v61  ;;  %v2462_v63 = vld [vmem:[%s9358_s4 + $0xc0] sm:$0xff]  ;;  %v8322_v4 = vpack.c.bf16 %v2657_v46, %v2654_v0 }
 0x369   :  { %5724 = vmatpush1.bf16.msra.mxu0 %v9434_v36  ;;  %5750 = vmatpush3.bf16.msra.mxu1 %v9435_v60  ;;  %v2464_v36 = vld [vmem:[%s9358_s4 + $0xd0] sm:$0xff]  ;;  %v8222_v60 = vpack.c.bf16 %v2465_v34, %v2462_v63 }
 0x36a   :  { %5726 = vmatprep.subr.bf16.mxu0 %v9436_v56  ;;  %5751 = vmatprep.subr.bf16.mxu1 %v9415_v61  ;;  %v2467_v56 = vld [vmem:[%s9358_s4 + $0xe8] sm:$0xff] }
 0x36d   :  { %5728 = vmatpush1.bf16.msra.mxu0 %v9437_v47  ;;  %5753 = vmatpush3.bf16.msra.mxu1 %v7934_v24  ;;  %v2439_v24 = vld [vmem:[%s9358_s4 + $0x8] sm:$0xff]  ;;  %v2469_v47 = vld [vmem:[%s9358_s4 + $0xf8] sm:$0xff] }
 0x36e   :  { %v6310_v20 = vpop.eup %6309  ;;  %5730 = vmatprep.subr.bf16.mxu0 %v7941_v39  ;;  %5754 = vmatprep.subr.bf16.mxu1 %v9415_v61 }
 0x36f   :  { %v1983_v26 = vmul.f32 %v6310_v20, %v1982_v16  ;;  %v8228_v16 = vpack.c.bf16 %v2467_v56, %v2464_v36  ;;  %v2472_v20 = vld [vmem:[%s9358_s4 + $0x110] sm:$0xff] }
 0x371   :  { %5732 = vmatpush1.bf16.msra.mxu0 %v7954_v17  ;;  %5756 = vmatpush3.bf16.msra.mxu1 %v7956_v54  ;;  %v8078_v49 = vadd.f32 %v1984_v48, %v1983_v26  ;;  %v2442_v17 = vld [vmem:[%s9358_s4 + $0x20] sm:$0xff]  ;;  %v8238_v26 = vpack.c.bf16 %v2472_v20, %v2469_v47  ;;  %v2468_v48 = vld [vmem:[%s9358_s4 + $0xf0] sm:$0xff] }
 0x372   :  { %5789 = vmatprep.subr.bf16.mxu1 %v9415_v61  ;;  %v8099_v54 = vpack.c.bf16 %v2442_v17, %v2439_v24  ;;  %v2471_v24 = vld [vmem:[%s9358_s4 + $0x108] sm:$0xff]  ;;  %v2470_v17 = vld [vmem:[%s9358_s4 + $0x100] sm:$0xff] }
 0x373   :  { %9439 = vst [vmem:[#allocation19_spill] sm:$0xff] %v8078_v49  ;;  %v8086_v39 = vsel %vm1991_vm14, %v8078_v49, %v7979_v25  ;;  %v2438_v25 = vld [vmem:[%s9358_s4] sm:$0xff] }
 0x374   :  { %2330 = vmatmul.mubr.f32.vlgmr.msra.gmra.mrb[24].mxu0 %v8086_v39  ;;  %4899 = vmatmul.mubr.f32.vlgmr.msra.gmra.mrb[30].mxu1 %v8086_v39  ;;  %v8110_v45 = vpack.c.bf16 %v2441_v8, %v2438_v25  ;;  %v8250_v25 = vpack.c.bf16 %v2471_v24, %v2468_v48  ;;  %v2473_v8 = vld [vmem:[%s9358_s4 + $0x118] sm:$0xff] }
 0x375   :  { %2550 = vmatprep.mubr.f32.mxu0 %v9416_v12  ;;  %4933 = vmatprep.mubr.msk.f32.mxu1 %vm6378_vm2, %v9416_v12  ;;  %v8256_v32 = vpack.c.bf16 %v2473_v8, %v2470_v17 }
 0x376   :  { %5758 = vmatprep.subr.bf16.mxu0 %v8099_v54  ;;  %5791 = vmatpush3.bf16.msra.mxu1 %v8116_v2 }
 0x377   :  { %5760 = vmatpush1.bf16.msra.mxu0 %v8110_v45  ;;  %5792 = vmatprep.subr.bf16.mxu1 %v9415_v61 }
 0x378   :  { %5762 = vmatprep.subr.bf16.mxu0 %v8126_v22 }
 0x37a   :  { %5794 = vmatpush3.bf16.msra.mxu1 %v8144_v10 }
 0x37b   :  { %5764 = vmatpush1.bf16.msra.mxu0 %v8138_v50  ;;  %5795 = vmatprep.subr.bf16.mxu1 %v9415_v61 }
 0x37c   :  { %5766 = vmatprep.subr.bf16.mxu0 %v8154_v43 }
 0x37e   :  { %5797 = vmatpush3.bf16.msra.mxu1 %v8172_v37 }
 0x37f   :  { %5768 = vmatpush1.bf16.msra.mxu0 %v8166_v40  ;;  %5798 = vmatprep.subr.bf16.mxu1 %v9415_v61 }
 0x380   :  { %5770 = vmatprep.subr.bf16.mxu0 %v8182_v27 }
 0x382   :  { %5800 = vmatpush3.bf16.msra.mxu1 %v8200_v6 }
 0x383   :  { %5772 = vmatpush1.bf16.msra.mxu0 %v8194_v23  ;;  %5801 = vmatprep.subr.bf16.mxu1 %v9415_v61 }
 0x384   :  { %5774 = vmatprep.subr.bf16.mxu0 %v8210_v28 }
 0x386   :  { %5803 = vmatpush3.bf16.msra.mxu1 %v8228_v16 }
 0x387   :  { %5776 = vmatpush1.bf16.msra.mxu0 %v8222_v60  ;;  %5804 = vmatprep.subr.bf16.mxu1 %v9415_v61 }
 0x388   :  { %5778 = vmatprep.subr.bf16.mxu0 %v8238_v26 }
 0x38a   :  { %5806 = vmatpush3.bf16.msra.mxu1 %v8256_v32 }
 0x38b   :  { %5780 = vmatpush1.bf16.msra.mxu0 %v8250_v25  ;;  %5807 = vmatprep.subr.bf16.mxu1 %v9415_v61 }
 0x38c   :  { %5782 = vmatprep.subr.bf16.mxu0 %v8266_v13 }
 0x38e   :  { %5809 = vmatpush3.bf16.msra.mxu1 %v8284_v62 }
 0x38f   :  { %5784 = vmatpush1.bf16.msra.mxu0 %v8278_v35  ;;  %5810 = vmatprep.subr.bf16.mxu1 %v9415_v61 }
 0x390   :  { %5786 = vmatprep.subr.bf16.mxu0 %v8294_v58 }
 0x392   :  { %5812 = vmatpush3.bf16.msra.mxu1 %v8312_v14 }
 0x393   :  { %5788 = vmatpush1.bf16.msra.mxu0 %v8306_v11  ;;  %5845 = vmatprep.subr.bf16.mxu1 %v9415_v61 }
 0x394   :  { %5814 = vmatprep.subr.bf16.mxu0 %v8322_v4 }
 0x427   :  { %v2110_v63 = vpop.f32.mrb[6].mxu0  ;;  %v2181_v34 = vpop.f32.mrb[28].mxu1 }
 0x428   :  { %v6211_v36 = vadd.f32 %v2110_v63, %v7394_v9  ;;  %v2112_v56 = vpop.f32.mrb[7].mxu0  ;;  %v4865_v47 = vpop.f32.mrb[29].mxu1  ;;  %v2199_v30 = vadd.f32 %v8331_v29, %v2181_v34 }
 0x429   :  { %v6212_v48 = vadd.f32 %v2112_v56, %v7396_v18  ;;  %v2656_v56 = vld [vmem:[%s9360_s5 + $0x18] sm:$0xff]  ;;  %v2655_v47 = vld [vmem:[%s9360_s5 + $0x10] sm:$0xff] }
 0x42a   :  { %v2190_v20 = vmul.f32 0.5, %v6211_v36  ;;  %v2653_v36 = vld [vmem:[%s9360_s5] sm:$0xff] }
 0x42b   :  { %v2195_v24 = vmul.f32 0.5, %v6212_v48  ;;  %v8350_v48 = vpop.permute.xlu0 %2210 }
 0x42c   :  { %6311 = vtanh.f32 %v2190_v20  ;;  %v2658_v20 = vld [vmem:[%s9360_s5 + $0x28] sm:$0xff]  ;;  %9441 = vst [vmem:[#allocation20_spill] sm:$0xff] %v8350_v48  ;;  %vm2212_vm15 = vcmp.eq.s32.totalorder %v8350_v48, 1 }
 0x42d   :  { %6313 = vtanh.f32 %v2195_v24 }
 0x436   :  { %v6312_v17 = vpop.eup %6311 }
 0x437   :  { %v2192_v8 = vadd.f32 1.0, %v6312_v17  ;;  %v6314_v7 = vpop.eup %6313 }
 0x438   :  { %v2197_v53 = vadd.f32 1.0, %v6314_v7 }
 0x439   :  { %v2193_v52 = vmul.f32 0.5, %v2192_v8 }
 0x43a   :  { %v2198_v19 = vmul.f32 0.5, %v2197_v53  ;;  %v2659_v53 = vld [vmem:[%s9360_s5 + $0x30] sm:$0xff] }
 0x43b   :  { %v2200_v51 = vmul.f32 %v2199_v30, %v2193_v52  ;;  %v2660_v52 = vld [vmem:[%s9360_s5 + $0x38] sm:$0xff]  ;;  %v2663_v30 = vld [vmem:[%s9360_s5 + $0x50] sm:$0xff] }
 0x43c   :  { %v2203_v59 = vsub.f32 1.0, %v2198_v19  ;;  %v2205_v17 = vmul.f32 %v2198_v19, %v8033_v31  ;;  %v8370_v19 = vpack.c.bf16 %v2663_v30, %v2660_v52  ;;  %v2672_v52 = vld [vmem:[%s9360_s5 + $0x98] sm:$0xff]  ;;  %v2675_v30 = vld [vmem:[%s9360_s5 + $0xb0] sm:$0xff] }
 0x43d   :  { %v2201_v3 = vadd.f32 %v2200_v51, %v9440_v57  ;;  %v8362_v57 = vpack.c.bf16 %v2656_v56, %v2653_v36  ;;  %v2669_v36 = vld [vmem:[%s9360_s5 + $0x80] sm:$0xff] }
 0x43f   :  { %6315 = vtanh.f32 %v2201_v3  ;;  %v8364_v3 = vpack.c.bf16 %v2658_v20, %v2655_v47  ;;  %v2665_v47 = vld [vmem:[%s9360_s5 + $0x60] sm:$0xff] }
 0x447   :  { %v2331_v15 = vpop.f32.mrb[24].mxu0  ;;  %v8335_v1 = vpop.f32.mrb[30].mxu1 }
 0x448   :  { %v6229_v0 = vadd.f32 %v2331_v15, %v7408_v33  ;;  %v2333_v46 = vpop.f32.mrb[25].mxu0  ;;  %v4900_v63 = vpop.f32.mrb[31].mxu1  ;;  %v2662_v15 = vld [vmem:[%s9360_s5 + $0x48] sm:$0xff] }
 0x449   :  { %v6316_v34 = vpop.eup %6315  ;;  %v6230_v51 = vadd.f32 %v2333_v46, %v7410_v5  ;;  %v2666_v63 = vld [vmem:[%s9360_s5 + $0x68] sm:$0xff]  ;;  %v8397_v56 = vpack.c.bf16 %v2662_v15, %v2659_v53  ;;  %v2671_v15 = vld [vmem:[%s9360_s5 + $0x90] sm:$0xff] }
 0x44a   :  { %v2204_v24 = vmul.f32 %v6316_v34, %v2203_v59  ;;  %v2411_v8 = vmul.f32 0.5, %v6229_v0  ;;  %v2661_v59 = vld [vmem:[%s9360_s5 + $0x40] sm:$0xff]  ;;  %v2664_v0 = vld [vmem:[%s9360_s5 + $0x58] sm:$0xff]  ;;  %v8406_v20 = vpack.c.bf16 %v2669_v36, %v2666_v63 }
 0x44b   :  { %v2416_v34 = vmul.f32 0.5, %v6230_v51  ;;  %v2673_v63 = vld [vmem:[%s9360_s5 + $0xa0] sm:$0xff]  ;;  %v2676_v36 = vld [vmem:[%s9360_s5 + $0xb8] sm:$0xff] }
 0x44c   :  { %6317 = vtanh.f32 %v2411_v8  ;;  %v8360_v7 = vadd.f32 %v2205_v17, %v2204_v24  ;;  %v2668_v24 = vld [vmem:[%s9360_s5 + $0x78] sm:$0xff]  ;;  %v2667_v17 = vld [vmem:[%s9360_s5 + $0x70] sm:$0xff]  ;;  %v2670_v8 = vld [vmem:[%s9360_s5 + $0x88] sm:$0xff] }
 0x44d   :  { %6319 = vtanh.f32 %v2416_v34  ;;  %v8428_v51 = vpack.c.bf16 %v2668_v24, %v2665_v47  ;;  %v8430_v53 = vpack.c.bf16 %v2670_v8, %v2667_v17  ;;  %v2678_v47 = vld [vmem:[%s9360_s5 + $0xc8] sm:$0xff]  ;;  %v2681_v24 = vld [vmem:[%s9360_s5 + $0xe0] sm:$0xff] }
 0x44e   :  { %9442 = vst [vmem:[#allocation21_spill] sm:$0xff] %v8360_v7  ;;  %v8385_v46 = vsel %vm2212_vm15, %v8360_v7, %v8033_v31  ;;  %v8399_v31 = vpack.c.bf16 %v2664_v0, %v2661_v59  ;;  %v8437_v59 = vpack.c.bf16 %v2675_v30, %v2672_v52  ;;  %v2674_v0 = vld [vmem:[%s9360_s5 + $0xa8] sm:$0xff]  ;;  %v8458_v52 = vpack.c.bf16 %v2676_v36, %v2673_v63  ;;  %v2677_v30 = vld [vmem:[%s9360_s5 + $0xc0] sm:$0xff]  ;;  %v2679_v63 = vld [vmem:[%s9360_s5 + $0xd0] sm:$0xff] }
 0x44f   :  { %2551 = vmatmul.mubr.f32.vlgmr.msra.gmra.mrb[8].mxu0 %v8385_v46  ;;  %4934 = vmatmul.mubr.f32.vlgmr.msra.gmra.mrb[32].mxu1 %v8385_v46  ;;  %v8456_v8 = vpack.c.bf16 %v2674_v0, %v2671_v15  ;;  %v8472_v15 = vpack.c.bf16 %v2681_v24, %v2678_v47  ;;  %v2680_v0 = vld [vmem:[%s9360_s5 + $0xd8] sm:$0xff]  ;;  %v2682_v36 = vld [vmem:[%s9360_s5 + $0xe8] sm:$0xff]  ;;  %v2687_v47 = vld [vmem:[%s9360_s5 + $0x110] sm:$0xff] }
 0x450   :  { %5816 = vmatpush1.bf16.msra.mxu0 %v8362_v57  ;;  %5847 = vmatpush3.bf16.msra.mxu1 %v8364_v3  ;;  %v8493_v41 = vpack.c.bf16 %v2682_v36, %v2679_v63  ;;  %v2693_v63 = vld [vmem:[%s9360_s5 + $0x140] sm:$0xff]  ;;  %v2695_v7 = vld [vmem:[%s9360_s5 + $0x150] sm:$0xff] }
 0x451   :  { %5818 = vmatprep.subr.bf16.mxu0 %v8370_v19  ;;  %5848 = vmatprep.subr.bf16.mxu1 %v9415_v61 }
 0x452   :  { %2765 = vmatprep.mubr.f32.mxu0 %v9416_v12  ;;  %4968 = vmatprep.mubr.msk.f32.mxu1 %vm6378_vm2, %v9416_v12 }
 0x454   :  { %5820 = vmatpush1.bf16.msra.mxu0 %v8397_v56  ;;  %5850 = vmatpush3.bf16.msra.mxu1 %v8399_v31 }
 0x455   :  { %5822 = vmatprep.subr.bf16.mxu0 %v8406_v20  ;;  %5851 = vmatprep.subr.bf16.mxu1 %v9415_v61 }
 0x456   :  { %v6318_v34 = vpop.eup %6317 }
 0x457   :  { %v2413_v17 = vadd.f32 1.0, %v6318_v34  ;;  %v2420_v34 = vadd.f32 %v8466_v21, %v8335_v1  ;;  %v2684_v1 = vld [vmem:[%s9360_s5 + $0xf8] sm:$0xff]  ;;  %v6320_v55 = vpop.eup %6319 }
 0x458   :  { %5824 = vmatpush1.bf16.msra.mxu0 %v8428_v51  ;;  %5853 = vmatpush3.bf16.msra.mxu1 %v8430_v53  ;;  %v2418_v36 = vadd.f32 1.0, %v6320_v55  ;;  %v2692_v55 = vld [vmem:[%s9360_s5 + $0x138] sm:$0xff] }
 0x459   :  { %v2414_v44 = vmul.f32 0.5, %v2413_v17  ;;  %5826 = vmatprep.subr.bf16.mxu0 %v8437_v59  ;;  %5854 = vmatprep.subr.bf16.mxu1 %v9415_v61  ;;  %v8491_v17 = vpack.c.bf16 %v2680_v0, %v2677_v30  ;;  %v2686_v30 = vld [vmem:[%s9360_s5 + $0x108] sm:$0xff]  ;;  %v2688_v0 = vld [vmem:[%s9360_s5 + $0x118] sm:$0xff] }
 0x45b   :  { %v2421_v24 = vmul.f32 %v2420_v34, %v2414_v44  ;;  %v8501_v44 = vpack.c.bf16 %v2687_v47, %v2684_v1  ;;  %v2685_v34 = vld [vmem:[%s9360_s5 + $0x100] sm:$0xff]  ;;  %v8520_v1 = vpack.c.bf16 %v2686_v30, %v2683_v38  ;;  %v2691_v38 = vld [vmem:[%s9360_s5 + $0x130] sm:$0xff]  ;;  %v2696_v30 = vld [vmem:[%s9360_s5 + $0x158] sm:$0xff] }
 0x45c   :  { %5828 = vmatpush1.bf16.msra.mxu0 %v8456_v8  ;;  %5856 = vmatpush3.bf16.msra.mxu1 %v8458_v52  ;;  %v8522_v47 = vpack.c.bf16 %v2688_v0, %v2685_v34  ;;  %v2699_v34 = vld [vmem:[%s9360_s5 + $0x170] sm:$0xff]  ;;  %v2419_v0 = vmul.f32 0.5, %v2418_v36  ;;  %v2698_v36 = vld [vmem:[%s9360_s5 + $0x168] sm:$0xff] }
 0x45d   :  { %v2422_v49 = vadd.f32 %v2421_v24, %v9443_v42  ;;  %5830 = vmatprep.subr.bf16.mxu0 %v8472_v15  ;;  %5857 = vmatprep.subr.bf16.mxu1 %v9415_v61  ;;  %9444 = vst [vmem:[#allocation22_spill] sm:$0xff] %v8501_v44  ;;  %v2690_v42 = vld [vmem:[%s9360_s5 + $0x128] sm:$0xff]  ;;  %9445 = vst [vmem:[#allocation23_spill] sm:$0xff] %v8520_v1  ;;  %v2689_v24 = vld [vmem:[%s9360_s5 + $0x120] sm:$0xff] }
 0x45e   :  { %9446 = vst [vmem:[#allocation24_spill] sm:$0xff] %v8522_v47  ;;  %v8529_v48 = vpack.c.bf16 %v2693_v63, %v2690_v42  ;;  %v8548_v42 = vpack.c.bf16 %v2692_v55, %v2689_v24  ;;  %v2697_v24 = vld [vmem:[%s9360_s5 + $0x160] sm:$0xff]  ;;  %v2700_v55 = vld [vmem:[%s9360_s5 + $0x178] sm:$0xff] }
 0x45f   :  { %6321 = vtanh.f32 %v2422_v49  ;;  %v2694_v49 = vld [vmem:[%s9360_s5 + $0x148] sm:$0xff] }
 0x460   :  { %5832 = vmatpush1.bf16.msra.mxu0 %v8491_v17  ;;  %5859 = vmatpush3.bf16.msra.mxu1 %v8493_v41  ;;  %9447 = vst [vmem:[#allocation25_spill] sm:$0xff] %v8529_v48  ;;  %9448 = vst [vmem:[#allocation5_spill] sm:$0xff] %v8548_v42  ;;  %v8550_v63 = vpack.c.bf16 %v2694_v49, %v2691_v38  ;;  %v2424_v38 = vsub.f32 1.0, %v2419_v0  ;;  %v8570_v49 = vpack.c.bf16 %v2698_v36, %v2695_v7 }
 0x461   :  { %5834 = vmatprep.subr.bf16.mxu0 %v8501_v44  ;;  %5860 = vmatprep.subr.bf16.mxu1 %v9415_v61  ;;  %v8557_v44 = vpack.c.bf16 %v2699_v34, %v2696_v30  ;;  %v8572_v30 = vpack.c.bf16 %v2700_v55, %v2697_v24 }
 0x464   :  { %5836 = vmatpush1.bf16.msra.mxu0 %v8520_v1  ;;  %5862 = vmatpush3.bf16.msra.mxu1 %v8522_v47  ;;  %v2426_v1 = vmul.f32 %v2419_v0, %v8086_v39 }
 0x465   :  { %5838 = vmatprep.subr.bf16.mxu0 %v8529_v48  ;;  %5863 = vmatprep.subr.bf16.mxu1 %v9415_v61  ;;  %v8576_v48 = vpop.permute.xlu1 %2431 }
 0x466   :  { %vm2433_vm0 = vcmp.eq.s32.totalorder %v8576_v48, 1 }
 0x468   :  { %5840 = vmatpush1.bf16.msra.mxu0 %v8548_v42  ;;  %5865 = vmatpush3.bf16.msra.mxu1 %v8550_v63 }
 0x469   :  { %v6322_v34 = vpop.eup %6321  ;;  %5842 = vmatprep.subr.bf16.mxu0 %v8557_v44  ;;  %5866 = vmatprep.subr.bf16.mxu1 %v9415_v61 }
 0x46a   :  { %v2425_v47 = vmul.f32 %v6322_v34, %v2424_v38 }
 0x46c   :  { %5844 = vmatpush1.bf16.msra.mxu0 %v8570_v49  ;;  %5868 = vmatpush3.bf16.msra.mxu1 %v8572_v30  ;;  %v8581_v42 = vadd.f32 %v2426_v1, %v2425_v47 }
 0x46d   :  { %5870 = vmatprep.subr.bf16.mxu0 %v8099_v54  ;;  %5901 = vmatprep.subr.bf16.mxu1 %v9415_v61 }
 0x46e   :  { %v8590_v7 = vsel %vm2433_vm0, %v8581_v42, %v8086_v39  ;;  %v2434_v24 = vsel %vm2433_vm0, %v8581_v42, 0.0  ;;  %v9454_v42 = vld [vmem:[#allocation25_spill] sm:$0xff] }
 0x46f   :  { %2766 = vmatmul.mubr.f32.vlgmr.msra.gmra.mrb[22].mxu0 %v8590_v7  ;;  %4969 = vmatmul.mubr.f32.vlgmr.msra.gmra.mrb[34].mxu1 %v8590_v7 }
 0x470   :  { %5872 = vmatpush1.bf16.msra.mxu0 %v8110_v45  ;;  %5903 = vmatpush3.bf16.msra.mxu1 %v8116_v2 }
 0x471   :  { %5874 = vmatprep.subr.bf16.mxu0 %v8126_v22  ;;  %5904 = vmatprep.subr.bf16.mxu1 %v9415_v61 }
 0x472   :  { %2980 = vmatprep.mubr.f32.mxu0 %v9416_v12  ;;  %5003 = vmatprep.mubr.msk.f32.mxu1 %vm6378_vm2, %v9416_v12 }
 0x474   :  { %5876 = vmatpush1.bf16.msra.mxu0 %v8138_v50  ;;  %5906 = vmatpush3.bf16.msra.mxu1 %v8144_v10 }
 0x475   :  { %5878 = vmatprep.subr.bf16.mxu0 %v8154_v43  ;;  %5907 = vmatprep.subr.bf16.mxu1 %v9415_v61 }
 0x478   :  { %5880 = vmatpush1.bf16.msra.mxu0 %v8166_v40  ;;  %5909 = vmatpush3.bf16.msra.mxu1 %v8172_v37 }
 0x479   :  { %5882 = vmatprep.subr.bf16.mxu0 %v8182_v27  ;;  %5910 = vmatprep.subr.bf16.mxu1 %v9415_v61 }
 0x47c   :  { %5884 = vmatpush1.bf16.msra.mxu0 %v8194_v23  ;;  %5912 = vmatpush3.bf16.msra.mxu1 %v8200_v6 }
 0x47d   :  { %5886 = vmatprep.subr.bf16.mxu0 %v8210_v28  ;;  %5913 = vmatprep.subr.bf16.mxu1 %v9415_v61 }
 0x480   :  { %5888 = vmatpush1.bf16.msra.mxu0 %v8222_v60  ;;  %5915 = vmatpush3.bf16.msra.mxu1 %v8228_v16  ;;  %v9449_v60 = vld [vmem:[#allocation7_spill] sm:$0xff] }
 0x481   :  { %5890 = vmatprep.subr.bf16.mxu0 %v8238_v26  ;;  %5916 = vmatprep.subr.bf16.mxu1 %v9415_v61 }
 0x484   :  { %5892 = vmatpush1.bf16.msra.mxu0 %v8250_v25  ;;  %5918 = vmatpush3.bf16.msra.mxu1 %v8256_v32 }
 0x485   :  { %5894 = vmatprep.subr.bf16.mxu0 %v8266_v13  ;;  %5919 = vmatprep.subr.bf16.mxu1 %v9415_v61 }
 0x488   :  { %5896 = vmatpush1.bf16.msra.mxu0 %v8278_v35  ;;  %5921 = vmatpush3.bf16.msra.mxu1 %v8284_v62 }
 0x489   :  { %5898 = vmatprep.subr.bf16.mxu0 %v8294_v58  ;;  %5922 = vmatprep.subr.bf16.mxu1 %v9415_v61 }
 0x48c   :  { %5900 = vmatpush1.bf16.msra.mxu0 %v8306_v11  ;;  %5924 = vmatpush3.bf16.msra.mxu1 %v8312_v14 }
 0x48d   :  { %5926 = vmatprep.subr.bf16.mxu0 %v8322_v4  ;;  %5957 = vmatprep.subr.bf16.mxu1 %v9415_v61 }
 0x522   :  { %v2552_v39 = vpop.f32.mrb[8].mxu0  ;;  %v2623_v54 = vpop.f32.mrb[32].mxu1 }
 0x523   :  { %v6213_v45 = vadd.f32 %v2552_v39, %v7394_v9  ;;  %v2554_v2 = vpop.f32.mrb[9].mxu0  ;;  %v4935_v22 = vpop.f32.mrb[33].mxu1  ;;  %v2641_v23 = vadd.f32 %v8331_v29, %v2623_v54  ;;  %v9455_v54 = vld [vmem:[#allocation5_spill] sm:$0xff] }
 0x524   :  { %v6214_v10 = vadd.f32 %v2554_v2, %v7396_v18  ;;  %v9456_v22 = vld [vmem:[#allocation21_spill] sm:$0xff] }
 0x525   :  { %v2632_v50 = vmul.f32 0.5, %v6213_v45 }
 0x526   :  { %v2637_v43 = vmul.f32 0.5, %v6214_v10  ;;  %v2213_v10 = vsel %vm2212_vm15, %v9456_v22, 0.0  ;;  %v3331_v22 = vld [vmem:[%s9358_s4 + $0x108] sm:$0xff] }
 0x527   :  { %6323 = vtanh.f32 %v2632_v50  ;;  %v3330_v50 = vld [vmem:[%s9358_s4 + $0x100] sm:$0xff] }
 0x528   :  { %6325 = vtanh.f32 %v2637_v43 }
 0x531   :  { %v6324_v40 = vpop.eup %6323 }
 0x532   :  { %v2634_v37 = vadd.f32 1.0, %v6324_v40  ;;  %v6326_v28 = vpop.eup %6325  ;;  %v3298_v40 = vld [vmem:[%s9358_s4] sm:$0xff] }
 0x533   :  { %v2639_v26 = vadd.f32 1.0, %v6326_v28 }
 0x534   :  { %v2635_v27 = vmul.f32 0.5, %v2634_v37  ;;  %v3301_v37 = vld [vmem:[%s9358_s4 + $0x18] sm:$0xff] }
 0x535   :  { %v2640_v25 = vmul.f32 0.5, %v2639_v26 }
 0x536   :  { %v2642_v6 = vmul.f32 %v2641_v23, %v2635_v27  ;;  %v3300_v27 = vld [vmem:[%s9358_s4 + $0x10] sm:$0xff]  ;;  %v8723_v23 = vpack.c.bf16 %v3301_v37, %v3298_v40  ;;  %v3334_v37 = vld [vmem:[%s9358_s4 + $0x120] sm:$0xff] }
 0x537   :  { %v2645_v35 = vsub.f32 1.0, %v2640_v25  ;;  %v2647_v1 = vmul.f32 %v2640_v25, %v8385_v46  ;;  %v3304_v25 = vld [vmem:[%s9358_s4 + $0x30] sm:$0xff] }
 0x538   :  { %v2643_v16 = vadd.f32 %v2642_v6, %v9449_v60  ;;  %v3303_v6 = vld [vmem:[%s9358_s4 + $0x28] sm:$0xff]  ;;  %v3305_v60 = vld [vmem:[%s9358_s4 + $0x38] sm:$0xff] }
 0x539   :  { %v8729_v28 = vpack.c.bf16 %v3303_v6, %v3300_v27  ;;  %v3337_v27 = vld [vmem:[%s9358_s4 + $0x138] sm:$0xff]  ;;  %v3336_v6 = vld [vmem:[%s9358_s4 + $0x130] sm:$0xff] }
 0x53a   :  { %6327 = vtanh.f32 %v2643_v16  ;;  %v3308_v16 = vld [vmem:[%s9358_s4 + $0x50] sm:$0xff] }
 0x53b   :  { %v8739_v26 = vpack.c.bf16 %v3308_v16, %v3305_v60  ;;  %v8891_v60 = vpack.c.bf16 %v3337_v27, %v3334_v37  ;;  %v3339_v16 = vld [vmem:[%s9358_s4 + $0x148] sm:$0xff] }
 0x542   :  { %v2767_v32 = vpop.f32.mrb[22].mxu0  ;;  %v2838_v13 = vpop.f32.mrb[34].mxu1 }
 0x543   :  { %v6227_v62 = vadd.f32 %v2767_v32, %v7408_v33  ;;  %v2769_v58 = vpop.f32.mrb[23].mxu0  ;;  %v4970_v11 = vpop.f32.mrb[35].mxu1  ;;  %v3307_v32 = vld [vmem:[%s9358_s4 + $0x48] sm:$0xff] }
 0x544   :  { %v6328_v14 = vpop.eup %6327  ;;  %v6228_v0 = vadd.f32 %v2769_v58, %v7410_v5  ;;  %v3311_v11 = vld [vmem:[%s9358_s4 + $0x68] sm:$0xff] }
 0x545   :  { %v2646_v4 = vmul.f32 %v6328_v14, %v2645_v35  ;;  %v2847_v47 = vmul.f32 0.5, %v6227_v62  ;;  %v8751_v35 = vpack.c.bf16 %v3307_v32, %v3304_v25  ;;  %v3309_v62 = vld [vmem:[%s9358_s4 + $0x58] sm:$0xff]  ;;  %v3314_v14 = vld [vmem:[%s9358_s4 + $0x80] sm:$0xff]  ;;  %v8897_v25 = vpack.c.bf16 %v3339_v16, %v3336_v6 }
 0x546   :  { %v2852_v34 = vmul.f32 0.5, %v6228_v0  ;;  %v3312_v0 = vld [vmem:[%s9358_s4 + $0x70] sm:$0xff]  ;;  %v3341_v32 = vld [vmem:[%s9358_s4 + $0x158] sm:$0xff] }
 0x547   :  { %6329 = vtanh.f32 %v2847_v47  ;;  %v2648_v36 = vadd.f32 %v2647_v1, %v2646_v4  ;;  %v8767_v4 = vpack.c.bf16 %v3314_v14, %v3311_v11  ;;  %v3310_v1 = vld [vmem:[%s9358_s4 + $0x60] sm:$0xff]  ;;  %v3313_v47 = vld [vmem:[%s9358_s4 + $0x78] sm:$0xff]  ;;  %v3340_v11 = vld [vmem:[%s9358_s4 + $0x150] sm:$0xff] }
 0x548   :  { %6331 = vtanh.f32 %v2852_v34  ;;  %v3317_v34 = vld [vmem:[%s9358_s4 + $0x98] sm:$0xff]  ;;  %v3343_v14 = vld [vmem:[%s9358_s4 + $0x168] sm:$0xff] }
 0x549   :  { %v2649_v55 = vsel %vm2433_vm0, %v2648_v36, 0.0  ;;  %v8644_v38 = vsel %vm2433_vm0, %v2648_v36, %v8385_v46  ;;  %v8779_v36 = vpack.c.bf16 %v3313_v47, %v3310_v1  ;;  %v3342_v1 = vld [vmem:[%s9358_s4 + $0x160] sm:$0xff]  ;;  %v8919_v47 = vpack.c.bf16 %v3343_v14, %v3340_v11 }
 0x54a   :  { %2981 = vmatmul.mubr.f32.vlgmr.msra.gmra.mrb[10].mxu0 %v8644_v38  ;;  %v4179_v39 = vadd.f32 %v2649_v55, %v2434_v24  ;;  %5004 = vmatmul.mubr.f32.vlgmr.msra.gmra.mrb[36].mxu1 %v8644_v38  ;;  %v3315_v24 = vld [vmem:[%s9358_s4 + $0x88] sm:$0xff]  ;;  %v3513_v14 = vld [vmem:[%s9360_s5] sm:$0xff] }
 0x54b   :  { %5928 = vmatpush1.bf16.msra.mxu0 %v8362_v57  ;;  %5959 = vmatpush3.bf16.msra.mxu1 %v8364_v3  ;;  %v8785_v55 = vpack.c.bf16 %v3315_v24, %v3312_v0  ;;  %v3345_v0 = vld [vmem:[%s9358_s4 + $0x178] sm:$0xff] }
 0x54c   :  { %4187 = vst [vmem:[%s9364_s10 + $0x20] sm:$0xff] %v4179_v39  ;;  %5930 = vmatprep.subr.bf16.mxu0 %v8370_v19  ;;  %5960 = vmatprep.subr.bf16.mxu1 %v9415_v61  ;;  %v2856_v19 = vadd.f32 %v8466_v21, %v2838_v13  ;;  %v3306_v13 = vld [vmem:[%s9358_s4 + $0x40] sm:$0xff]  ;;  %v3320_v39 = vld [vmem:[%s9358_s4 + $0xb0] sm:$0xff]  ;;  %v8925_v24 = vpack.c.bf16 %v3345_v0, %v3342_v1  ;;  %v3516_v1 = vld [vmem:[%s9360_s5 + $0x18] sm:$0xff] }
 0x54d   :  { %3195 = vmatprep.mubr.f32.mxu0 %v9416_v12  ;;  %5038 = vmatprep.mubr.msk.f32.mxu1 %vm6378_vm2, %v9416_v12  ;;  %v8757_v58 = vpack.c.bf16 %v3309_v62, %v3306_v13  ;;  %v3344_v13 = vld [vmem:[%s9358_s4 + $0x170] sm:$0xff] }
 0x54e   :  { %v8907_v62 = vpack.c.bf16 %v3344_v13, %v3341_v32  ;;  %v3515_v0 = vld [vmem:[%s9360_s5 + $0x10] sm:$0xff] }
 0x54f   :  { %5932 = vmatpush1.bf16.msra.mxu0 %v8397_v56  ;;  %5962 = vmatpush3.bf16.msra.mxu1 %v8399_v31  ;;  %v9450_v31 = vld [vmem:[#allocation12_spill] sm:$0xff] }
 0x550   :  { %5934 = vmatprep.subr.bf16.mxu0 %v8406_v20  ;;  %5963 = vmatprep.subr.bf16.mxu1 %v9415_v61 }
 0x551   :  { %v6330_v48 = vpop.eup %6329 }
 0x552   :  { %v2849_v57 = vadd.f32 1.0, %v6330_v48  ;;  %v6332_v56 = vpop.eup %6331  ;;  %v8795_v48 = vpack.c.bf16 %v3320_v39, %v3317_v34  ;;  %v3514_v34 = vld [vmem:[%s9360_s5 + $0x8] sm:$0xff]  ;;  %v3517_v39 = vld [vmem:[%s9360_s5 + $0x20] sm:$0xff] }
 0x553   :  { %5936 = vmatpush1.bf16.msra.mxu0 %v8428_v51  ;;  %5965 = vmatpush3.bf16.msra.mxu1 %v8430_v53  ;;  %v2854_v51 = vadd.f32 1.0, %v6332_v56  ;;  %v9451_v53 = vld [vmem:[#allocation22_spill] sm:$0xff]  ;;  %v3321_v56 = vld [vmem:[%s9358_s4 + $0xb8] sm:$0xff] }
 0x554   :  { %v2850_v3 = vmul.f32 0.5, %v2849_v57  ;;  %5938 = vmatprep.subr.bf16.mxu0 %v8437_v59  ;;  %5966 = vmatprep.subr.bf16.mxu1 %v9415_v61  ;;  %v3316_v57 = vld [vmem:[%s9358_s4 + $0x90] sm:$0xff] }
 0x555   :  { %v2855_v59 = vmul.f32 0.5, %v2854_v51  ;;  %v3326_v51 = vld [vmem:[%s9358_s4 + $0xe0] sm:$0xff] }
 0x556   :  { %v2857_v46 = vmul.f32 %v2856_v19, %v2850_v3  ;;  %v3319_v3 = vld [vmem:[%s9358_s4 + $0xa8] sm:$0xff]  ;;  %v3318_v19 = vld [vmem:[%s9358_s4 + $0xa0] sm:$0xff] }
 0x557   :  { %5940 = vmatpush1.bf16.msra.mxu0 %v8456_v8  ;;  %5968 = vmatpush3.bf16.msra.mxu1 %v8458_v52  ;;  %v9452_v8 = vld [vmem:[#allocation23_spill] sm:$0xff]  ;;  %v9453_v52 = vld [vmem:[#allocation24_spill] sm:$0xff]  ;;  %v2862_v45 = vmul.f32 %v2855_v59, %v8590_v7 }
 0x558   :  { %v2858_v20 = vadd.f32 %v2857_v46, %v9450_v31  ;;  %5942 = vmatprep.subr.bf16.mxu0 %v8472_v15  ;;  %5969 = vmatprep.subr.bf16.mxu1 %v9415_v61  ;;  %v2860_v15 = vsub.f32 1.0, %v2855_v59  ;;  %v8807_v46 = vpack.c.bf16 %v3319_v3, %v3316_v57  ;;  %v8813_v31 = vpack.c.bf16 %v3321_v56, %v3318_v19  ;;  %v3322_v59 = vld [vmem:[%s9358_s4 + $0xc0] sm:$0xff] }
 0x559   :  { %v8935_v57 = vpack.c.bf16 %v3517_v39, %v3514_v34  ;;  %v3518_v34 = vld [vmem:[%s9360_s5 + $0x28] sm:$0xff] }
 0x55a   :  { %6333 = vtanh.f32 %v2858_v20  ;;  %v3323_v20 = vld [vmem:[%s9358_s4 + $0xc8] sm:$0xff] }
 0x55b   :  { %5944 = vmatpush1.bf16.msra.mxu0 %v8491_v17  ;;  %5971 = vmatpush3.bf16.msra.mxu1 %v8493_v41 }
 0x55c   :  { %5946 = vmatprep.subr.bf16.mxu0 %v9451_v53  ;;  %5972 = vmatprep.subr.bf16.mxu1 %v9415_v61  ;;  %v8823_v53 = vpack.c.bf16 %v3326_v51, %v3323_v20 }
 0x55f   :  { %5948 = vmatpush1.bf16.msra.mxu0 %v9452_v8  ;;  %5974 = vmatpush3.bf16.msra.mxu1 %v9453_v52  ;;  %v3325_v8 = vld [vmem:[%s9358_s4 + $0xd8] sm:$0xff]  ;;  %v3324_v52 = vld [vmem:[%s9358_s4 + $0xd0] sm:$0xff] }
 0x560   :  { %5950 = vmatprep.subr.bf16.mxu0 %v9454_v42  ;;  %5975 = vmatprep.subr.bf16.mxu1 %v9415_v61  ;;  %v8835_v42 = vpack.c.bf16 %v3325_v8, %v3322_v59 }
 0x563   :  { %5952 = vmatpush1.bf16.msra.mxu0 %v9455_v54  ;;  %5977 = vmatpush3.bf16.msra.mxu1 %v8550_v63 }
 0x564   :  { %v6334_v17 = vpop.eup %6333  ;;  %5954 = vmatprep.subr.bf16.mxu0 %v8557_v44  ;;  %5978 = vmatprep.subr.bf16.mxu1 %v9415_v61 }
 0x565   :  { %v2861_v41 = vmul.f32 %v6334_v17, %v2860_v15  ;;  %v3327_v15 = vld [vmem:[%s9358_s4 + $0xe8] sm:$0xff]  ;;  %v3329_v17 = vld [vmem:[%s9358_s4 + $0xf8] sm:$0xff] }
 0x566   :  { %v8841_v54 = vpack.c.bf16 %v3327_v15, %v3324_v52 }
 0x567   :  { %5956 = vmatpush1.bf16.msra.mxu0 %v8570_v49  ;;  %5980 = vmatpush3.bf16.msra.mxu1 %v8572_v30  ;;  %v2863_v2 = vadd.f32 %v2862_v45, %v2861_v41  ;;  %v3299_v30 = vld [vmem:[%s9358_s4 + $0x8] sm:$0xff]  ;;  %v3332_v41 = vld [vmem:[%s9358_s4 + $0x110] sm:$0xff] }
 0x568   :  { %6013 = vmatprep.subr.bf16.mxu1 %v9415_v61  ;;  %v8851_v45 = vpack.c.bf16 %v3332_v41, %v3329_v17 }
 0x569   :  { %v2864_v63 = vsel %vm2212_vm15, %v2863_v2, 0.0  ;;  %v8696_v44 = vsel %vm2212_vm15, %v2863_v2, %v8590_v7  ;;  %v3302_v7 = vld [vmem:[%s9358_s4 + $0x20] sm:$0xff]  ;;  %v3328_v2 = vld [vmem:[%s9358_s4 + $0xf0] sm:$0xff] }
 0x56a   :  { %3196 = vmatmul.mubr.f32.vlgmr.msra.gmra.mrb[20].mxu0 %v8696_v44  ;;  %v4178_v49 = vadd.f32 %v2864_v63, %v2213_v10  ;;  %5039 = vmatmul.mubr.f32.vlgmr.msra.gmra.mrb[38].mxu1 %v8696_v44  ;;  %v8712_v43 = vpack.c.bf16 %v3302_v7, %v3299_v30  ;;  %v8863_v10 = vpack.c.bf16 %v3331_v22, %v3328_v2  ;;  %v3333_v63 = vld [vmem:[%s9358_s4 + $0x118] sm:$0xff]  ;;  %v3335_v30 = vld [vmem:[%s9358_s4 + $0x128] sm:$0xff]  ;;  %v3338_v7 = vld [vmem:[%s9358_s4 + $0x140] sm:$0xff] }
 0x56b   :  { %3410 = vmatprep.mubr.f32.mxu0 %v9416_v12  ;;  %5073 = vmatprep.mubr.msk.f32.mxu1 %vm6378_vm2, %v9416_v12  ;;  %v8879_v40 = vpack.c.bf16 %v3338_v7, %v3335_v30 }
 0x56c   :  { %4186 = vst [vmem:[%s9364_s10 + $0x18] sm:$0xff] %v4178_v49  ;;  %5982 = vmatprep.subr.bf16.mxu0 %v8712_v43  ;;  %6015 = vmatpush3.bf16.msra.mxu1 %v8729_v28  ;;  %v8869_v49 = vpack.c.bf16 %v3333_v63, %v3330_v50  ;;  %v9458_v63 = vld [vmem:[#allocation6_spill] sm:$0xff] }
 0x56d   :  { %5984 = vmatpush1.bf16.msra.mxu0 %v8723_v23  ;;  %6016 = vmatprep.subr.bf16.mxu1 %v9415_v61 }
 0x56e   :  { %5986 = vmatprep.subr.bf16.mxu0 %v8739_v26 }
 0x570   :  { %6018 = vmatpush3.bf16.msra.mxu1 %v8757_v58 }
 0x571   :  { %5988 = vmatpush1.bf16.msra.mxu0 %v8751_v35  ;;  %6019 = vmatprep.subr.bf16.mxu1 %v9415_v61 }
 0x572   :  { %5990 = vmatprep.subr.bf16.mxu0 %v8767_v4 }
 0x574   :  { %6021 = vmatpush3.bf16.msra.mxu1 %v8785_v55 }
 0x575   :  { %5992 = vmatpush1.bf16.msra.mxu0 %v8779_v36  ;;  %6022 = vmatprep.subr.bf16.mxu1 %v9415_v61 }
 0x576   :  { %5994 = vmatprep.subr.bf16.mxu0 %v8795_v48 }
 0x578   :  { %6024 = vmatpush3.bf16.msra.mxu1 %v8813_v31 }
 0x579   :  { %5996 = vmatpush1.bf16.msra.mxu0 %v8807_v46  ;;  %6025 = vmatprep.subr.bf16.mxu1 %v9415_v61 }
 0x57a   :  { %5998 = vmatprep.subr.bf16.mxu0 %v8823_v53 }
 0x57c   :  { %6027 = vmatpush3.bf16.msra.mxu1 %v8841_v54 }
 0x57d   :  { %6000 = vmatpush1.bf16.msra.mxu0 %v8835_v42  ;;  %6028 = vmatprep.subr.bf16.mxu1 %v9415_v61 }
 0x57e   :  { %6002 = vmatprep.subr.bf16.mxu0 %v8851_v45 }
 0x580   :  { %6030 = vmatpush3.bf16.msra.mxu1 %v8869_v49 }
 0x581   :  { %6004 = vmatpush1.bf16.msra.mxu0 %v8863_v10  ;;  %6031 = vmatprep.subr.bf16.mxu1 %v9415_v61 }
 0x582   :  { %6006 = vmatprep.subr.bf16.mxu0 %v8879_v40 }
 0x584   :  { %6033 = vmatpush3.bf16.msra.mxu1 %v8897_v25 }
 0x585   :  { %6008 = vmatpush1.bf16.msra.mxu0 %v8891_v60  ;;  %6034 = vmatprep.subr.bf16.mxu1 %v9415_v61 }
 0x586   :  { %6010 = vmatprep.subr.bf16.mxu0 %v8907_v62 }
 0x588   :  { %6036 = vmatpush3.bf16.msra.mxu1 %v8925_v24 }
 0x589   :  { %6012 = vmatpush1.bf16.msra.mxu0 %v8919_v47  ;;  %6069 = vmatprep.subr.bf16.mxu1 %v9415_v61 }
 0x58a   :  { %6038 = vmatprep.subr.bf16.mxu0 %v8935_v57 }
 0x61d   :  { %v2982_v3 = vpop.f32.mrb[10].mxu0  ;;  %v3053_v19 = vpop.f32.mrb[36].mxu1 }
 0x61e   :  { %v6215_v56 = vadd.f32 %v2982_v3, %v7394_v9  ;;  %v2984_v20 = vpop.f32.mrb[11].mxu0  ;;  %v5005_v51 = vpop.f32.mrb[37].mxu1  ;;  %v3071_v2 = vadd.f32 %v8331_v29, %v3053_v19 }
 0x61f   :  { %v6216_v8 = vadd.f32 %v2984_v20, %v7396_v18  ;;  %v3523_v20 = vld [vmem:[%s9360_s5 + $0x50] sm:$0xff] }
 0x620   :  { %v3062_v59 = vmul.f32 0.5, %v6215_v56  ;;  %v3520_v56 = vld [vmem:[%s9360_s5 + $0x38] sm:$0xff] }
 0x621   :  { %v3067_v52 = vmul.f32 0.5, %v6216_v8  ;;  %v8966_v8 = vpack.c.bf16 %v3516_v1, %v3513_v14  ;;  %v3525_v14 = vld [vmem:[%s9360_s5 + $0x60] sm:$0xff]  ;;  %v3528_v1 = vld [vmem:[%s9360_s5 + $0x78] sm:$0xff] }
 0x622   :  { %6335 = vtanh.f32 %v3062_v59 }
 0x623   :  { %6337 = vtanh.f32 %v3067_v52  ;;  %v8968_v52 = vpack.c.bf16 %v3518_v34, %v3515_v0  ;;  %v3527_v0 = vld [vmem:[%s9360_s5 + $0x70] sm:$0xff]  ;;  %v3530_v34 = vld [vmem:[%s9360_s5 + $0x88] sm:$0xff] }
 0x62c   :  { %v6336_v15 = vpop.eup %6335 }
 0x62d   :  { %v3064_v17 = vadd.f32 1.0, %v6336_v15  ;;  %v6338_v50 = vpop.eup %6337  ;;  %v3519_v15 = vld [vmem:[%s9360_s5 + $0x30] sm:$0xff] }
 0x62e   :  { %v3069_v7 = vadd.f32 1.0, %v6338_v50  ;;  %v9459_v50 = vld [vmem:[#allocation19_spill] sm:$0xff] }
 0x62f   :  { %v3065_v41 = vmul.f32 0.5, %v3064_v17  ;;  %v8973_v17 = vpack.c.bf16 %v3523_v20, %v3520_v56  ;;  %v9040_v56 = vpack.c.bf16 %v3530_v34, %v3527_v0  ;;  %v3531_v20 = vld [vmem:[%s9360_s5 + $0x90] sm:$0xff]  ;;  %v3542_v0 = vld [vmem:[%s9360_s5 + $0xe8] sm:$0xff] }
 0x630   :  { %v3070_v37 = vmul.f32 0.5, %v3069_v7 }
 0x631   :  { %v3072_v22 = vmul.f32 %v3071_v2, %v3065_v41  ;;  %v3522_v41 = vld [vmem:[%s9360_s5 + $0x48] sm:$0xff]  ;;  %v3521_v2 = vld [vmem:[%s9360_s5 + $0x40] sm:$0xff] }
 0x632   :  { %v3075_v16 = vsub.f32 1.0, %v3070_v37  ;;  %v3077_v3 = vmul.f32 %v3070_v37, %v8644_v38 }
 0x633   :  { %v3073_v30 = vadd.f32 %v3072_v22, %v9458_v63  ;;  %v3524_v22 = vld [vmem:[%s9360_s5 + $0x58] sm:$0xff] }
 0x635   :  { %6339 = vtanh.f32 %v3073_v30  ;;  %v1992_v30 = vsel %vm1991_vm14, %v9459_v50, 0.0  ;;  %v3541_v50 = vld [vmem:[%s9360_s5 + $0xe0] sm:$0xff] }
 0x63d   :  { %v3197_v27 = vpop.f32.mrb[20].mxu0  ;;  %v8943_v6 = vpop.f32.mrb[38].mxu1 }
 0x63e   :  { %v6225_v32 = vadd.f32 %v3197_v27, %v7408_v33  ;;  %v3199_v13 = vpop.f32.mrb[21].mxu0  ;;  %v5040_v11 = vpop.f32.mrb[39].mxu1  ;;  %v3526_v27 = vld [vmem:[%s9360_s5 + $0x68] sm:$0xff] }
 0x63f   :  { %v6340_v29 = vpop.eup %6339  ;;  %v6226_v51 = vadd.f32 %v3199_v13, %v7410_v5  ;;  %v9006_v11 = vpack.c.bf16 %v3524_v22, %v3521_v2  ;;  %v3538_v22 = vld [vmem:[%s9360_s5 + $0xc8] sm:$0xff] }
 0x640   :  { %v3076_v39 = vmul.f32 %v6340_v29, %v3075_v16  ;;  %v3277_v19 = vmul.f32 0.5, %v6225_v32  ;;  %v3529_v16 = vld [vmem:[%s9360_s5 + $0x80] sm:$0xff] }
 0x641   :  { %v3282_v32 = vmul.f32 0.5, %v6226_v51  ;;  %v9016_v29 = vpack.c.bf16 %v3529_v16, %v3526_v27  ;;  %v3537_v27 = vld [vmem:[%s9360_s5 + $0xc0] sm:$0xff] }
 0x642   :  { %6341 = vtanh.f32 %v3277_v19  ;;  %v3078_v59 = vadd.f32 %v3077_v3, %v3076_v39  ;;  %v3532_v39 = vld [vmem:[%s9360_s5 + $0x98] sm:$0xff]  ;;  %v3535_v3 = vld [vmem:[%s9360_s5 + $0xb0] sm:$0xff]  ;;  %v9038_v19 = vpack.c.bf16 %v3528_v1, %v3525_v14 }
 0x643   :  { %6343 = vtanh.f32 %v3282_v32  ;;  %v9047_v51 = vpack.c.bf16 %v3535_v3, %v3532_v39  ;;  %v3286_v32 = vadd.f32 %v8466_v21, %v8943_v6  ;;  %v3540_v14 = vld [vmem:[%s9360_s5 + $0xd8] sm:$0xff]  ;;  %v3539_v1 = vld [vmem:[%s9360_s5 + $0xd0] sm:$0xff] }
 0x644   :  { %v3079_v7 = vsel %vm1991_vm14, %v3078_v59, 0.0  ;;  %v8992_v37 = vsel %vm1991_vm14, %v3078_v59, %v8644_v38  ;;  %v9004_v38 = vpack.c.bf16 %v3522_v41, %v3519_v15  ;;  %v3534_v59 = vld [vmem:[%s9360_s5 + $0xa8] sm:$0xff]  ;;  %v3533_v15 = vld [vmem:[%s9360_s5 + $0xa0] sm:$0xff]  ;;  %v3536_v41 = vld [vmem:[%s9360_s5 + $0xb8] sm:$0xff]  ;;  %v9096_v39 = vpack.c.bf16 %v3540_v14, %v3537_v27 }
 0x645   :  { %3411 = vmatmul.mubr.f32.vlgmr.msra.gmra.mrb[12].mxu0 %v8992_v37  ;;  %v4180_v13 = vadd.f32 %v3079_v7, %v1992_v30  ;;  %5074 = vmatmul.mubr.f32.vlgmr.msra.gmra.mrb[40].mxu1 %v8992_v37  ;;  %v9066_v30 = vpack.c.bf16 %v3534_v59, %v3531_v20  ;;  %v9068_v7 = vpack.c.bf16 %v3536_v41, %v3533_v15  ;;  %v3544_v21 = vld [vmem:[%s9360_s5 + $0xf8] sm:$0xff]  ;;  %v3547_v6 = vld [vmem:[%s9360_s5 + $0x110] sm:$0xff]  ;;  %v9461_v15 = vld [vmem:[#allocation13_spill] sm:$0xff] }
 0x646   :  { %6040 = vmatpush1.bf16.msra.mxu0 %v8966_v8  ;;  %6071 = vmatpush3.bf16.msra.mxu1 %v8968_v52  ;;  %v9098_v3 = vpack.c.bf16 %v3542_v0, %v3539_v1  ;;  %v3543_v20 = vld [vmem:[%s9360_s5 + $0xf0] sm:$0xff]  ;;  %v3550_v27 = vld [vmem:[%s9360_s5 + $0x128] sm:$0xff]  ;;  %v3549_v0 = vld [vmem:[%s9360_s5 + $0x120] sm:$0xff] }
 0x647   :  { %4188 = vst [vmem:[%s9364_s10 + $0x28] sm:$0xff] %v4180_v13  ;;  %6042 = vmatprep.subr.bf16.mxu0 %v8973_v17  ;;  %6072 = vmatprep.subr.bf16.mxu1 %v9415_v61  ;;  %v9077_v13 = vpack.c.bf16 %v3541_v50, %v3538_v22  ;;  %v3546_v22 = vld [vmem:[%s9360_s5 + $0x108] sm:$0xff]  ;;  %v3545_v50 = vld [vmem:[%s9360_s5 + $0x100] sm:$0xff] }
 0x648   :  { %3625 = vmatprep.mubr.f32.mxu0 %v9416_v12  ;;  %5108 = vmatprep.mubr.msk.f32.mxu1 %vm6378_vm2, %v9416_v12  ;;  %v9125_v14 = vpack.c.bf16 %v3546_v22, %v3543_v20  ;;  %v3554_v20 = vld [vmem:[%s9360_s5 + $0x148] sm:$0xff] }
 0x64a   :  { %6044 = vmatpush1.bf16.msra.mxu0 %v9004_v38  ;;  %6074 = vmatpush3.bf16.msra.mxu1 %v9006_v11 }
 0x64b   :  { %6046 = vmatprep.subr.bf16.mxu0 %v9016_v29  ;;  %6075 = vmatprep.subr.bf16.mxu1 %v9415_v61 }
 0x64c   :  { %v6342_v2 = vpop.eup %6341 }
 0x64d   :  { %v3279_v63 = vadd.f32 1.0, %v6342_v2  ;;  %v6344_v59 = vpop.eup %6343  ;;  %v9106_v2 = vpack.c.bf16 %v3547_v6, %v3544_v21  ;;  %v3552_v6 = vld [vmem:[%s9360_s5 + $0x138] sm:$0xff] }
 0x64e   :  { %6048 = vmatpush1.bf16.msra.mxu0 %v9038_v19  ;;  %6077 = vmatpush3.bf16.msra.mxu1 %v9040_v56  ;;  %v9153_v22 = vpack.c.bf16 %v3552_v6, %v3549_v0  ;;  %v3560_v0 = vld [vmem:[%s9360_s5 + $0x178] sm:$0xff] }
 0x64f   :  { %v3280_v16 = vmul.f32 0.5, %v3279_v63  ;;  %6050 = vmatprep.subr.bf16.mxu0 %v9047_v51  ;;  %6078 = vmatprep.subr.bf16.mxu1 %v9415_v61  ;;  %v3548_v63 = vld [vmem:[%s9360_s5 + $0x118] sm:$0xff] }
 0x650   :  { %v9127_v1 = vpack.c.bf16 %v3548_v63, %v3545_v50  ;;  %v3555_v63 = vld [vmem:[%s9360_s5 + $0x150] sm:$0xff] }
 0x651   :  { %v3287_v34 = vmul.f32 %v3286_v32, %v3280_v16  ;;  %v3553_v16 = vld [vmem:[%s9360_s5 + $0x140] sm:$0xff]  ;;  %v3284_v32 = vadd.f32 1.0, %v6344_v59  ;;  %v3556_v59 = vld [vmem:[%s9360_s5 + $0x158] sm:$0xff] }
 0x652   :  { %6052 = vmatpush1.bf16.msra.mxu0 %v9066_v30  ;;  %6080 = vmatpush3.bf16.msra.mxu1 %v9068_v7  ;;  %9462 = vst [vmem:[#allocation15_spill] sm:$0xff] %v9127_v1  ;;  %v9134_v21 = vpack.c.bf16 %v3553_v16, %v3550_v27  ;;  %v3558_v16 = vld [vmem:[%s9360_s5 + $0x168] sm:$0xff] }
 0x653   :  { %v3288_v41 = vadd.f32 %v3287_v34, %v9461_v15  ;;  %6054 = vmatprep.subr.bf16.mxu0 %v9077_v13  ;;  %6081 = vmatprep.subr.bf16.mxu1 %v9415_v61  ;;  %v3551_v34 = vld [vmem:[%s9360_s5 + $0x130] sm:$0xff] }
 0x654   :  { %9463 = vst [vmem:[#allocation7_spill] sm:$0xff] %v9134_v21  ;;  %v3559_v15 = vld [vmem:[%s9360_s5 + $0x170] sm:$0xff]  ;;  %v9155_v50 = vpack.c.bf16 %v3554_v20, %v3551_v34  ;;  %v9175_v34 = vpack.c.bf16 %v3558_v16, %v3555_v63  ;;  %v9466_v63 = vld [vmem:[#allocation28_spill] sm:$0xff] }
 0x655   :  { %6345 = vtanh.f32 %v3288_v41  ;;  %v3285_v41 = vmul.f32 0.5, %v3284_v32  ;;  %v9162_v27 = vpack.c.bf16 %v3559_v15, %v3556_v59  ;;  %v3557_v32 = vld [vmem:[%s9360_s5 + $0x160] sm:$0xff] }
 0x656   :  { %6056 = vmatpush1.bf16.msra.mxu0 %v9096_v39  ;;  %6083 = vmatpush3.bf16.msra.mxu1 %v9098_v3  ;;  %v9177_v20 = vpack.c.bf16 %v3560_v0, %v3557_v32 }
 0x657   :  { %6058 = vmatprep.subr.bf16.mxu0 %v9106_v2  ;;  %6084 = vmatprep.subr.bf16.mxu1 %v9415_v61  ;;  %v3290_v6 = vsub.f32 1.0, %v3285_v41 }
 0x65a   :  { %6060 = vmatpush1.bf16.msra.mxu0 %v9125_v14  ;;  %6086 = vmatpush3.bf16.msra.mxu1 %v9127_v1 }
 0x65b   :  { %6062 = vmatprep.subr.bf16.mxu0 %v9134_v21  ;;  %6087 = vmatprep.subr.bf16.mxu1 %v9415_v61  ;;  %v3292_v21 = vmul.f32 %v3285_v41, %v8696_v44  ;;  %v4161_v41 = vld [vmem:[%s9364_s10 + $0x10] sm:$0xff] }
 0x65e   :  { %6064 = vmatpush1.bf16.msra.mxu0 %v9153_v22  ;;  %6089 = vmatpush3.bf16.msra.mxu1 %v9155_v50 }
 0x65f   :  { %v6346_v59 = vpop.eup %6345  ;;  %6066 = vmatprep.subr.bf16.mxu0 %v9162_v27  ;;  %6090 = vmatprep.subr.bf16.mxu1 %v9415_v61 }
 0x660   :  { %v3291_v15 = vmul.f32 %v6346_v59, %v3290_v6 }
 0x662   :  { %6068 = vmatpush1.bf16.msra.mxu0 %v9175_v34  ;;  %6092 = vmatpush3.bf16.msra.mxu1 %v9177_v20  ;;  %v3293_v1 = vadd.f32 %v3292_v21, %v3291_v15 }
 0x663   :  { %6094 = vmatprep.subr.bf16.mxu0 %v8712_v43  ;;  %6125 = vmatprep.subr.bf16.mxu1 %v9415_v61 }
 0x664   :  { %v3294_v16 = vsel %vm1770_vm13, %v3293_v1, 0.0  ;;  %v9191_v32 = vsel %vm1770_vm13, %v3293_v1, %v8696_v44 }
 0x665   :  { %3626 = vmatmul.mubr.f32.vlgmr.msra.gmra.mrb[18].mxu0 %v9191_v32  ;;  %v4177_v0 = vadd.f32 %v4161_v41, %v3294_v16  ;;  %5109 = vmatmul.mubr.f32.vlgmr.msra.gmra.mrb[42].mxu1 %v9191_v32  ;;  %v1550_v41 = vsel %vm1549_vm12, %v9466_v63, 0.0 }
 0x666   :  { %6096 = vmatpush1.bf16.msra.mxu0 %v8723_v23  ;;  %6127 = vmatpush3.bf16.msra.mxu1 %v8729_v28 }
 0x667   :  { %4185 = vst [vmem:[%s9364_s10 + $0x10] sm:$0xff] %v4177_v0  ;;  %6098 = vmatprep.subr.bf16.mxu0 %v8739_v26  ;;  %6128 = vmatprep.subr.bf16.mxu1 %v9415_v61 }
 0x668   :  { %3840 = vmatprep.mubr.f32.mxu0 %v9416_v12  ;;  %5143 = vmatprep.mubr.msk.f32.mxu1 %vm6378_vm2, %v9416_v12 }
 0x66a   :  { %6100 = vmatpush1.bf16.msra.mxu0 %v8751_v35  ;;  %6130 = vmatpush3.bf16.msra.mxu1 %v8757_v58 }
 0x66b   :  { %6102 = vmatprep.subr.bf16.mxu0 %v8767_v4  ;;  %6131 = vmatprep.subr.bf16.mxu1 %v9415_v61 }
 0x66e   :  { %6104 = vmatpush1.bf16.msra.mxu0 %v8779_v36  ;;  %6133 = vmatpush3.bf16.msra.mxu1 %v8785_v55 }
 0x66f   :  { %6106 = vmatprep.subr.bf16.mxu0 %v8795_v48  ;;  %6134 = vmatprep.subr.bf16.mxu1 %v9415_v61 }
 0x672   :  { %6108 = vmatpush1.bf16.msra.mxu0 %v8807_v46  ;;  %6136 = vmatpush3.bf16.msra.mxu1 %v8813_v31  ;;  %v9241_v46 = vld [vmem:[%s9363_s8] ss:$0 sm:$0xff] }
 0x673   :  { %6110 = vmatprep.subr.bf16.mxu0 %v8823_v53  ;;  %6137 = vmatprep.subr.bf16.mxu1 %v9415_v61 }
 0x676   :  { %6112 = vmatpush1.bf16.msra.mxu0 %v8835_v42  ;;  %6139 = vmatpush3.bf16.msra.mxu1 %v8841_v54  ;;  %v9465_v54 = vld [vmem:[#allocation9_spill] sm:$0xff] }
 0x677   :  { %6114 = vmatprep.subr.bf16.mxu0 %v8851_v45  ;;  %6140 = vmatprep.subr.bf16.mxu1 %v9415_v61 }
 0x67a   :  { %6116 = vmatpush1.bf16.msra.mxu0 %v8863_v10  ;;  %6142 = vmatpush3.bf16.msra.mxu1 %v8869_v49 }
 0x67b   :  { %6118 = vmatprep.subr.bf16.mxu0 %v8879_v40  ;;  %6143 = vmatprep.subr.bf16.mxu1 %v9415_v61 }
 0x67e   :  { %6120 = vmatpush1.bf16.msra.mxu0 %v8891_v60  ;;  %6145 = vmatpush3.bf16.msra.mxu1 %v8897_v25 }
 0x67f   :  { %6122 = vmatprep.subr.bf16.mxu0 %v8907_v62  ;;  %6146 = vmatprep.subr.bf16.mxu1 %v9415_v61 }
 0x682   :  { %6124 = vmatpush1.bf16.msra.mxu0 %v8919_v47  ;;  %6148 = vmatpush3.bf16.msra.mxu1 %v8925_v24 }
 0x683   :  { %6150 = vmatprep.subr.bf16.mxu0 %v8935_v57  ;;  %6181 = vmatprep.subr.bf16.mxu1 %v9415_v61 }
 0x718   :  { %v3412_v44 = vpop.f32.mrb[12].mxu0  ;;  %v3483_v43 = vpop.f32.mrb[40].mxu1 }
 0x719   :  { %v6217_v23 = vadd.f32 %v3412_v44, %v7394_v9  ;;  %v3414_v28 = vpop.f32.mrb[13].mxu0  ;;  %v5075_v26 = vpop.f32.mrb[41].mxu1  ;;  %v3501_v31 = vadd.f32 %v9241_v46, %v3483_v43 }
 0x71a   :  { %v6218_v58 = vadd.f32 %v3414_v28, %v7396_v18 }
 0x71b   :  { %v3492_v35 = vmul.f32 0.5, %v6217_v23 }
 0x71c   :  { %v3497_v4 = vmul.f32 0.5, %v6218_v58 }
 0x71d   :  { %6347 = vtanh.f32 %v3492_v35 }
 0x71e   :  { %6349 = vtanh.f32 %v3497_v4 }
 0x727   :  { %v6348_v36 = vpop.eup %6347 }
 0x728   :  { %v3494_v55 = vadd.f32 1.0, %v6348_v36  ;;  %v6350_v42 = vpop.eup %6349 }
 0x729   :  { %v3499_v10 = vadd.f32 1.0, %v6350_v42 }
 0x72a   :  { %v3495_v48 = vmul.f32 0.5, %v3494_v55 }
 0x72b   :  { %v3500_v49 = vmul.f32 0.5, %v3499_v10 }
 0x72c   :  { %v3502_v53 = vmul.f32 %v3501_v31, %v3495_v48 }
 0x72d   :  { %v3505_v25 = vsub.f32 1.0, %v3500_v49  ;;  %v3507_v21 = vmul.f32 %v3500_v49, %v8992_v37 }
 0x72e   :  { %v3503_v45 = vadd.f32 %v3502_v53, %v9465_v54 }
 0x730   :  { %6351 = vtanh.f32 %v3503_v45  ;;  %v9472_v45 = vld [vmem:[#allocation8_spill] sm:$0xff] }
 0x738   :  { %v3627_v40 = vpop.f32.mrb[18].mxu0  ;;  %v3698_v60 = vpop.f32.mrb[42].mxu1 }
 0x739   :  { %v6223_v62 = vadd.f32 %v3627_v40, %v7408_v33  ;;  %v3629_v47 = vpop.f32.mrb[19].mxu0  ;;  %v5110_v24 = vpop.f32.mrb[43].mxu1 }
 0x73a   :  { %v6352_v57 = vpop.eup %6351  ;;  %v6224_v59 = vadd.f32 %v3629_v47, %v7410_v5 }
 0x73b   :  { %v3506_v1 = vmul.f32 %v6352_v57, %v3505_v25  ;;  %v3707_v6 = vmul.f32 0.5, %v6223_v62 }
 0x73c   :  { %v3712_v43 = vmul.f32 0.5, %v6224_v59 }
 0x73d   :  { %6353 = vtanh.f32 %v3707_v6  ;;  %v3508_v15 = vadd.f32 %v3507_v21, %v3506_v1 }
 0x73e   :  { %6355 = vtanh.f32 %v3712_v43 }
 0x73f   :  { %v3509_v0 = vsel %vm1549_vm12, %v3508_v15, 0.0  ;;  %v9256_v44 = vsel %vm1549_vm12, %v3508_v15, %v8992_v37 }
 0x740   :  { %3841 = vmatmul.mubr.f32.vlgmr.msra.gmra.mrb[14].mxu0 %v9256_v44  ;;  %v4181_v23 = vadd.f32 %v3509_v0, %v1550_v41  ;;  %5144 = vmatmul.mubr.f32.vlgmr.msra.gmra.mrb[44].mxu1 %v9256_v44 }
 0x741   :  { %6152 = vmatpush1.bf16.msra.mxu0 %v8966_v8  ;;  %6183 = vmatpush3.bf16.msra.mxu1 %v8968_v52 }
 0x742   :  { %4189 = vst [vmem:[%s9364_s10 + $0x30] sm:$0xff] %v4181_v23  ;;  %6154 = vmatprep.subr.bf16.mxu0 %v8973_v17  ;;  %6184 = vmatprep.subr.bf16.mxu1 %v9415_v61 }
 0x743   :  { %4055 = vmatprep.mubr.f32.mxu0 %v9416_v12  ;;  %5178 = vmatprep.mubr.msk.f32.mxu1 %vm6378_vm2, %v9416_v12  ;;  %v9279_v12 = vld [vmem:[%s9365_s9] ss:$0 sm:$0xff] }
 0x744   :  { %v3716_v37 = vadd.f32 %v9279_v12, %v3698_v60 }
 0x745   :  { %6156 = vmatpush1.bf16.msra.mxu0 %v9004_v38  ;;  %6186 = vmatpush3.bf16.msra.mxu1 %v9006_v11 }
 0x746   :  { %6158 = vmatprep.subr.bf16.mxu0 %v9016_v29  ;;  %6187 = vmatprep.subr.bf16.mxu1 %v9415_v61  ;;  %v9468_v29 = vld [vmem:[#allocation10_spill] sm:$0xff] }
 0x747   :  { %v6354_v8 = vpop.eup %6353 }
 0x748   :  { %v3709_v52 = vadd.f32 1.0, %v6354_v8  ;;  %v6356_v11 = vpop.eup %6355 }
 0x749   :  { %6160 = vmatpush1.bf16.msra.mxu0 %v9038_v19  ;;  %6189 = vmatpush3.bf16.msra.mxu1 %v9040_v56  ;;  %v3714_v56 = vadd.f32 1.0, %v6356_v11 }
 0x74a   :  { %v3710_v17 = vmul.f32 0.5, %v3709_v52  ;;  %6162 = vmatprep.subr.bf16.mxu0 %v9047_v51  ;;  %6190 = vmatprep.subr.bf16.mxu1 %v9415_v61 }
 0x74b   :  { %v3715_v51 = vmul.f32 0.5, %v3714_v56 }
 0x74c   :  { %v3717_v38 = vmul.f32 %v3716_v37, %v3710_v17 }
 0x74d   :  { %6164 = vmatpush1.bf16.msra.mxu0 %v9066_v30  ;;  %6192 = vmatpush3.bf16.msra.mxu1 %v9068_v7  ;;  %v9469_v30 = vld [vmem:[#allocation15_spill] sm:$0xff] }
 0x74e   :  { %v3718_v19 = vadd.f32 %v3717_v38, %v9468_v29  ;;  %6166 = vmatprep.subr.bf16.mxu0 %v9077_v13  ;;  %6193 = vmatprep.subr.bf16.mxu1 %v9415_v61  ;;  %v9470_v7 = vld [vmem:[#allocation7_spill] sm:$0xff]  ;;  %v3720_v13 = vsub.f32 1.0, %v3715_v51 }
 0x750   :  { %6357 = vtanh.f32 %v3718_v19 }
 0x751   :  { %6168 = vmatpush1.bf16.msra.mxu0 %v9096_v39  ;;  %6195 = vmatpush3.bf16.msra.mxu1 %v9098_v3 }
 0x752   :  { %6170 = vmatprep.subr.bf16.mxu0 %v9106_v2  ;;  %6196 = vmatprep.subr.bf16.mxu1 %v9415_v61  ;;  %v3722_v2 = vmul.f32 %v3715_v51, %v9191_v32 }
 0x755   :  { %6172 = vmatpush1.bf16.msra.mxu0 %v9125_v14  ;;  %6198 = vmatpush3.bf16.msra.mxu1 %v9469_v30 }
 0x756   :  { %6174 = vmatprep.subr.bf16.mxu0 %v9470_v7  ;;  %6199 = vmatprep.subr.bf16.mxu1 %v9415_v61 }
 0x759   :  { %6176 = vmatpush1.bf16.msra.mxu0 %v9153_v22  ;;  %6201 = vmatpush3.bf16.msra.mxu1 %v9155_v50 }
 0x75a   :  { %v6358_v39 = vpop.eup %6357  ;;  %6178 = vmatprep.subr.bf16.mxu0 %v9162_v27  ;;  %6202 = vmatprep.subr.bf16.mxu1 %v9415_v61  ;;  %v4160_v61 = vld [vmem:[%s9364_s10 + $0x8] sm:$0xff] }
 0x75b   :  { %v3721_v3 = vmul.f32 %v6358_v39, %v3720_v13  ;;  %v4159_v13 = vld [vmem:[%s9364_s10] sm:$0xff] }
 0x75d   :  { %6180 = vmatpush1.bf16.msra.mxu0 %v9175_v34  ;;  %6204 = vmatpush3.bf16.msra.mxu1 %v9177_v20  ;;  %v3723_v14 = vadd.f32 %v3722_v2, %v3721_v3 }
 0x75f   :  { %v3724_v26 = vsel %vm1328_vm11, %v3723_v14, 0.0  ;;  %v9309_v22 = vsel %vm1328_vm11, %v3723_v14, %v9191_v32 }
 0x760   :  { %4056 = vmatmul.mubr.f32.vlgmr.msra.gmra.mrb[16].mxu0 %v9309_v22  ;;  %v4176_v50 = vadd.f32 %v4160_v61, %v3724_v26  ;;  %5179 = vmatmul.mubr.f32.vlgmr.msra.gmra.mrb[46].mxu1 %v9309_v22 }
 0x762   :  { %4184 = vst [vmem:[%s9364_s10 + $0x8] sm:$0xff] %v4176_v50 }
 0x813   :  { %v3842_v27 = vpop.f32.mrb[14].mxu0  ;;  %v3913_v34 = vpop.f32.mrb[44].mxu1 }
 0x814   :  { %v6219_v20 = vadd.f32 %v3842_v27, %v7394_v9  ;;  %v3844_v35 = vpop.f32.mrb[15].mxu0  ;;  %v5145_v32 = vpop.f32.mrb[45].mxu1  ;;  %v3931_v53 = vadd.f32 %v9241_v46, %v3913_v34 }
 0x815   :  { %v6220_v4 = vadd.f32 %v3844_v35, %v7396_v18 }
 0x816   :  { %v3922_v58 = vmul.f32 0.5, %v6219_v20 }
 0x817   :  { %v3927_v36 = vmul.f32 0.5, %v6220_v4 }
 0x818   :  { %6359 = vtanh.f32 %v3922_v58 }
 0x819   :  { %6361 = vtanh.f32 %v3927_v36 }
 0x822   :  { %v6360_v55 = vpop.eup %6359 }
 0x823   :  { %v3924_v48 = vadd.f32 1.0, %v6360_v55  ;;  %v6362_v54 = vpop.eup %6361 }
 0x824   :  { %v3929_v49 = vadd.f32 1.0, %v6362_v54 }
 0x825   :  { %v3925_v31 = vmul.f32 0.5, %v3924_v48 }
 0x826   :  { %v3930_v9 = vmul.f32 0.5, %v3929_v49 }
 0x827   :  { %v3932_v42 = vmul.f32 %v3931_v53, %v3925_v31 }
 0x828   :  { %v3935_v25 = vsub.f32 1.0, %v3930_v9  ;;  %v3937_v1 = vmul.f32 %v3930_v9, %v9256_v44 }
 0x829   :  { %v3933_v10 = vadd.f32 %v3932_v42, %v9472_v45 }
 0x82b   :  { %6363 = vtanh.f32 %v3933_v10 }
 0x833   :  { %v4057_v40 = vpop.f32.mrb[16].mxu0  ;;  %v4128_v60 = vpop.f32.mrb[46].mxu1 }
 0x834   :  { %v6221_v18 = vadd.f32 %v4057_v40, %v7408_v33  ;;  %v4059_v62 = vpop.f32.mrb[17].mxu0  ;;  %v5180_v47 = vpop.f32.mrb[47].mxu1  ;;  %v9474_v33 = vld [vmem:[#allocation26_spill] sm:$0xff]  ;;  %v4145_v23 = vadd.f32 %v9279_v12, %v4128_v60 }
 0x835   :  { %v6364_v24 = vpop.eup %6363  ;;  %v6222_v46 = vadd.f32 %v4059_v62, %v7410_v5 }
 0x836   :  { %v3936_v57 = vmul.f32 %v6364_v24, %v3935_v25  ;;  %v4136_v21 = vmul.f32 0.5, %v6221_v18 }
 0x837   :  { %v4141_v41 = vmul.f32 0.5, %v6222_v46 }
 0x838   :  { %v3938_v6 = vadd.f32 %v3937_v1, %v3936_v57  ;;  %6365 = vtanh.f32 %v4136_v21 }
 0x839   :  { %6367 = vtanh.f32 %v4141_v41 }
 0x83a   :  { %v3939_v15 = vsel %vm1108_vm10, %v3938_v6, 0.0  ;;  %v3942_v63 = vsel %vm1108_vm10, %v3938_v6, %v9256_v44  ;;  %v9475_v44 = vld [vmem:[#allocation11_spill] sm:$0xff] }
 0x83b   :  { %4156 = vst [vmem:[%s9366_s11] sm:$0xff] %v3942_v63  ;;  %v4182_v16 = vadd.f32 %v3939_v15, %v9474_v33 }
 0x83d   :  { %4190 = vst [vmem:[%s9364_s10 + $0x38] sm:$0xff] %v4182_v16 }
 0x842   :  { %v6366_v5 = vpop.eup %6365 }
 0x843   :  { %v4138_v0 = vadd.f32 1.0, %v6366_v5  ;;  %v6368_v52 = vpop.eup %6367 }
 0x844   :  { %v4143_v37 = vadd.f32 1.0, %v6368_v52 }
 0x845   :  { %v4139_v43 = vmul.f32 0.5, %v4138_v0 }
 0x846   :  { %v4144_v38 = vmul.f32 0.5, %v4143_v37 }
 0x847   :  { %v4146_v8 = vmul.f32 %v4145_v23, %v4139_v43 }
 0x848   :  { %v4149_v11 = vsub.f32 1.0, %v4144_v38  ;;  %v4151_v56 = vmul.f32 %v4144_v38, %v9309_v22 }
 0x849   :  { %v4147_v17 = vadd.f32 %v4146_v8, %v9475_v44 }
 0x84b   :  { %6369 = vtanh.f32 %v4147_v17 }
 0x855   :  { %v6370_v29 = vpop.eup %6369 }
 0x856   :  { %v4150_v19 = vmul.f32 %v6370_v29, %v4149_v11 }
 0x858   :  { %v4152_v51 = vadd.f32 %v4151_v56, %v4150_v19 }
 0x85a   :  { %v4153_v7 = vsel %vm883_vm9, %v4152_v51, 0.0  ;;  %v4155_v12 = vsel %vm883_vm9, %v4152_v51, %v9309_v22 }
 0x85b   :  { %4212 = vst [vmem:[%s9366_s11 + $0x8] sm:$0xff] %v4155_v12  ;;  %v4175_v39 = vadd.f32 %v4159_v13, %v4153_v7 }
 0x85d   :  { %4183 = vst [vmem:[%s9364_s10] sm:$0xff] %v4175_v39 }

</bundles_post_ra>
